<compile_context>
chip_gen: v5e
topology: v5e:2x2
jax: 0.10.0
libtpu: 0.0.40
codegen_flags: <defaults>
</compile_context>

<pallas_src>
import functools

import jax
import jax.numpy as jnp
from jax.experimental import pallas as pl
from jax.experimental.pallas import tpu as pltpu


_VMEM = pl.BlockSpec(memory_space=pltpu.MemorySpace.VMEM)


def _mdot(a, b):
    return jnp.dot(a, b, preferred_element_type=jnp.float32)


# --------------------------- fused forward kernel ----------------------------

def _fused_kernel(xaug0_ref,
                  ew0_ref, er0_ref, eb0_ref,
                  ew1_ref, er1_ref, eb1_ref,
                  ew2_ref, er2_ref, eb2_ref,
                  wh_ref, bh_ref, wc_ref, bc_ref,
                  dwi0_ref, dwh0_ref, db0_ref,
                  dwi1_ref, dwh1_ref, db1_ref,
                  dwi2_ref, dwh2_ref, db2_ref,
                  pw1_ref, pb1_ref, gamma_ref, beta_ref, pw2_ref, pb2_ref,
                  feed_ref,
                  out_ref,
                  gx_ref, xaug_ref,
                  *, seq_len, batch, hidden, in_feat, out_feat, out_len):
    S, B, H = seq_len, batch, hidden
    H2 = 2 * H

    # ============================ encoder ====================================
    # One bidirectional layer.  Gate column order (width H each):
    #   [i_f, i_b, f_f, f_b, o_f, o_b, g_f, g_b]
    # so sigmoid is applied to one contiguous 6H slab and tanh to one 2H slab.
    def enc_layer(xaug_in, wih_aug_ref, whh_blk_ref, b_ref, write_next):
        # phase 1: one matmul for both directions and all timesteps.
        gx_ref[...] = (_mdot(xaug_in, wih_aug_ref[...])
                       + jnp.broadcast_to(b_ref[...], (S * B, 8 * H)))
        whh_blk = whh_blk_ref[...]                     # (2H, 8H) block-diagonal

        # phase 2: serial recurrence; fwd(t) and bwd(S-1-t) merged per step.
        def step(s, carry):
            h_cat, c_cat = carry                        # (B, 2H) = [fwd | bwd]
            row = s * B
            gates = gx_ref[pl.ds(row, B), :] + _mdot(h_cat, whh_blk)
            sig = jax.nn.sigmoid(gates[:, 0:6 * H])
            i_cat = sig[:, 0:2 * H]
            f_cat = sig[:, 2 * H:4 * H]
            o_cat = sig[:, 4 * H:6 * H]
            g_cat = jnp.tanh(gates[:, 6 * H:8 * H])
            c_cat = f_cat * c_cat + i_cat * g_cat
            h_cat = o_cat * jnp.tanh(c_cat)
            if write_next:
                # next layer's augmented input: row t = [y(t) | y(S-1-t)]
                rrow = (S - 1 - s) * B
                h_f = h_cat[:, 0:H]
                h_b = h_cat[:, H:2 * H]
                xaug_ref[pl.ds(row, B), 0:H] = h_f
                xaug_ref[pl.ds(row, B), 3 * H:4 * H] = h_b
                xaug_ref[pl.ds(rrow, B), H:2 * H] = h_b
                xaug_ref[pl.ds(rrow, B), 2 * H:3 * H] = h_f
            return (h_cat, c_cat)

        z = jnp.zeros((B, H2), jnp.float32)
        return jax.lax.fori_loop(0, S, step, (z, z), unroll=min(S, 8))

    h0, c0 = enc_layer(xaug0_ref[...], ew0_ref, er0_ref, eb0_ref, True)
    h1, c1 = enc_layer(xaug_ref[...], ew1_ref, er1_ref, eb1_ref, True)
    h2, c2 = enc_layer(xaug_ref[...], ew2_ref, er2_ref, eb2_ref, False)

    # =============== decoder initial states: linear transforms ===============
    wh = wh_ref[...]
    wc = wc_ref[...]
    bh = bh_ref[...]
    bc = bc_ref[...]
    dh0 = _mdot(h0, wh) + bh
    dh1 = _mdot(h1, wh) + bh
    dh2 = _mdot(h2, wh) + bh
    dc0 = _mdot(c0, wc) + bc
    dc1 = _mdot(c1, wc) + bc
    dc2 = _mdot(c2, wc) + bc

    # ===================== autoregressive decoder ============================
    # Hoisted weight loads and bias broadcasts (not CSE'd across unrolled
    # iterations otherwise).
    dwi0 = dwi0_ref[...]; dwh0 = dwh0_ref[...]
    dwi1 = dwi1_ref[...]; dwh1 = dwh1_ref[...]
    dwi2 = dwi2_ref[...]; dwh2 = dwh2_ref[...]
    db0 = jnp.broadcast_to(db0_ref[...], (B, 4 * H2))
    db1 = jnp.broadcast_to(db1_ref[...], (B, 4 * H2))
    db2 = jnp.broadcast_to(db2_ref[...], (B, 4 * H2))
    pw1 = pw1_ref[...]
    pw2 = pw2_ref[...]
    feed = feed_ref[...]                                  # (OUT, F) pad/trunc
    pb1 = jnp.broadcast_to(pb1_ref[...], (B, H))
    gamma = jnp.broadcast_to(gamma_ref[...], (B, H))
    beta = jnp.broadcast_to(beta_ref[...], (B, H))
    pb2 = jnp.broadcast_to(pb2_ref[...], (B, out_feat))

    # Gate column order per decoder layer: [i, f, o, g] (width 2H each).
    def dec_cell(inp, h, c, wi, wr, b):
        gates = _mdot(inp, wi) + _mdot(h, wr) + b
        sig = jax.nn.sigmoid(gates[:, 0:3 * H2])
        i = sig[:, 0:H2]
        f = sig[:, H2:2 * H2]
        o = sig[:, 2 * H2:3 * H2]
        g = jnp.tanh(gates[:, 3 * H2:4 * H2])
        c_new = f * c + i * g
        return o * jnp.tanh(c_new), c_new

    din0 = xaug0_ref[pl.ds((S - 1) * B, B), 0:in_feat]    # x[:, -1, :]

    def dec_step(t, carry):
        a0, b0_, a1, b1_, a2, b2_, din = carry
        a0, b0_ = dec_cell(din, a0, b0_, dwi0, dwh0, db0)
        a1, b1_ = dec_cell(a0, a1, b1_, dwi1, dwh1, db1)
        a2, b2_ = dec_cell(a1, a2, b2_, dwi2, dwh2, db2)

        # head: Linear -> LayerNorm -> ReLU -> Linear (Dropout = identity)
        p = _mdot(a2, pw1) + pb1
        mu = jnp.mean(p, axis=-1, keepdims=True)
        var = jnp.mean((p - mu) * (p - mu), axis=-1, keepdims=True)
        pn = (p - mu) * jax.lax.rsqrt(var + 1e-5) * gamma + beta
        cur = _mdot(jnp.maximum(pn, 0.0), pw2) + pb2      # (B, OUT)
        out_ref[t] = cur

        # feedback: pad with zeros / truncate to input_feature via eye-matmul
        din = _mdot(cur, feed)                            # (B, F)
        return (a0, b0_, a1, b1_, a2, b2_, din)

    jax.lax.fori_loop(0, out_len, dec_step,
                      (dh0, dc0, dh1, dc1, dh2, dc2, din0),
                      unroll=min(out_len, 8))


# ---------------------- host-side weight layout prep --------------------------
# Canonical params: per direction/layer (in_dim, 4*hid) weights, columns in
# PyTorch gate order [i | f | g | o]; combined biases (1, 4*hid).

def _split4(w, n):
    return w[:, 0:n], w[:, n:2 * n], w[:, 2 * n:3 * n], w[:, 3 * n:4 * n]


def _dir_merge(w_f, w_b, H):
    """(in,4H)x2 -> (2*in, 8H); columns [i_f,i_b,f_f,f_b,o_f,o_b,g_f,g_b]."""
    in_dim = w_f.shape[0]
    Z = jnp.zeros((in_dim, H), jnp.float32)
    i_f, f_f, g_f, o_f = _split4(w_f, H)
    i_b, f_b, g_b, o_b = _split4(w_b, H)
    top = jnp.concatenate([i_f, Z, f_f, Z, o_f, Z, g_f, Z], axis=1)
    bot = jnp.concatenate([Z, i_b, Z, f_b, Z, o_b, Z, g_b], axis=1)
    return jnp.concatenate([top, bot], axis=0)


def _bias_merge(b_f, b_b, H):
    i_f, f_f, g_f, o_f = _split4(b_f, H)
    i_b, f_b, g_b, o_b = _split4(b_b, H)
    return jnp.concatenate([i_f, i_b, f_f, f_b, o_f, o_b, g_f, g_b], axis=1)


def _perm_sig_first(w, hid):
    """[i|f|g|o] columns -> [i|f|o|g] so sigmoid gates are contiguous."""
    i, f, g, o = _split4(w, hid)
    return jnp.concatenate([i, f, o, g], axis=-1)


def prepare_kernel_params(params, *, hidden_size, input_feature,
                          output_feature):
    """One-time repacking of canonical params into the fused-kernel layout."""
    H = hidden_size
    H2 = 2 * H
    args = []
    for layer in range(3):
        (wih_f, whh_f, b_f), (wih_b, whh_b, b_b) = params["encoder"][layer]
        args += [_dir_merge(wih_f, wih_b, H),          # (2*in, 8H)
                 _dir_merge(whh_f, whh_b, H),          # (2H, 8H) block-diag
                 _bias_merge(b_f, b_b, H)]             # (1, 8H)
    wh, bh = params["hidden_transform"]
    wc, bc = params["cell_transform"]
    args += [wh, bh, wc, bc]
    for layer in range(3):
        wih, whh, b = params["decoder"][layer]
        args += [_perm_sig_first(wih, H2), _perm_sig_first(whh, H2),
                 _perm_sig_first(b, H2)]
    args += list(params["proj"])
    # (OUT, F) identity-embed: cur @ feed == zero-pad (OUT<F) / trunc (OUT>F).
    args.append(jnp.eye(output_feature, input_feature, dtype=jnp.float32))
    return tuple(args)


# ------------------------------- forward pass --------------------------------

def lstm_predictor_forward(x, kparams, *, hidden_size, out_seq_length,
                           input_feature, output_feature):
    # Eval-mode forward (dropout = identity, no teacher forcing).
    B, S, F = x.shape
    H = hidden_size

    # layer-0 augmented input: row (t, b) = [x(t, b) | x(S-1-t, b)]
    x_tm = jnp.transpose(x, (1, 0, 2))                       # (S, B, F)
    xaug0 = jnp.concatenate([x_tm, x_tm[::-1]], axis=-1).reshape(S * B, 2 * F)

    kernel = functools.partial(
        _fused_kernel, seq_len=S, batch=B, hidden=H,
        in_feat=input_feature, out_feat=output_feature, out_len=out_seq_length)

    out_tm = pl.pallas_call(
        kernel,
        out_shape=jax.ShapeDtypeStruct((out_seq_length, B, output_feature),
                                       jnp.float32),
        in_specs=[_VMEM] * (1 + len(kparams)),
        out_specs=_VMEM,
        scratch_shapes=[pltpu.VMEM((S * B, 8 * H), jnp.float32),   # gate pre-acts
                        pltpu.VMEM((S * B, 4 * H), jnp.float32)],  # next-layer aug in
    )(xaug0, *kparams)
    return jnp.transpose(out_tm, (1, 0, 2))                  # (B, T_out, OUT)


# --------------------------- pure-JAX reference -------------------------------

def reference_forward(x, params, *, hidden_size, out_seq_length,
                      input_feature, output_feature):
    B, S, _ = x.shape
    H = hidden_size
    H2 = 2 * H

    def rdot(a, b):
        return jnp.dot(a, b, precision=jax.lax.Precision.HIGHEST)

    def cell(xt, h, c, wih, whh, b, hid):
        g = rdot(xt, wih) + rdot(h, whh) + b
        i = jax.nn.sigmoid(g[:, 0:hid])
        f = jax.nn.sigmoid(g[:, hid:2 * hid])
        gg = jnp.tanh(g[:, 2 * hid:3 * hid])
        o = jax.nn.sigmoid(g[:, 3 * hid:4 * hid])
        c = f * c + i * gg
        return o * jnp.tanh(c), c

    layer_in = x
    enc_h, enc_c = [], []
    for layer in range(3):
        (wih_f, whh_f, b_f), (wih_b, whh_b, b_b) = params["encoder"][layer]
        hf = jnp.zeros((B, H), jnp.float32)
        cf = jnp.zeros((B, H), jnp.float32)
        hb = jnp.zeros((B, H), jnp.float32)
        cb = jnp.zeros((B, H), jnp.float32)
        ys_f, ys_b = [], [None] * S
        for t in range(S):
            hf, cf = cell(layer_in[:, t, :], hf, cf, wih_f, whh_f, b_f, H)
            ys_f.append(hf)
        for t in range(S - 1, -1, -1):
            hb, cb = cell(layer_in[:, t, :], hb, cb, wih_b, whh_b, b_b, H)
            ys_b[t] = hb
        layer_in = jnp.stack(
            [jnp.concatenate([ys_f[t], ys_b[t]], axis=-1) for t in range(S)],
            axis=1)
        enc_h.append(jnp.concatenate([hf, hb], axis=-1))
        enc_c.append(jnp.concatenate([cf, cb], axis=-1))

    wh, bh = params["hidden_transform"]
    wc, bc = params["cell_transform"]
    dh = [rdot(e, wh) + bh for e in enc_h]
    dc = [rdot(e, wc) + bc for e in enc_c]

    pw1, pb1, gamma, beta, pw2, pb2 = params["proj"]
    din = x[:, -1, :]
    outs = []
    for _ in range(out_seq_length):
        inp = din
        for l in range(3):
            wih, whh, b = params["decoder"][l]
            dh[l], dc[l] = cell(inp, dh[l], dc[l], wih, whh, b, H2)
            inp = dh[l]
        p = rdot(inp, pw1) + pb1
        mu = jnp.mean(p, axis=-1, keepdims=True)
        var = jnp.mean((p - mu) ** 2, axis=-1, keepdims=True)
        pn = (p - mu) * jax.lax.rsqrt(var + 1e-5) * gamma + beta
        cur = rdot(jnp.maximum(pn, 0.0), pw2) + pb2
        outs.append(cur)
        if output_feature < input_feature:
            din = jnp.concatenate(
                [cur, jnp.zeros((B, input_feature - output_feature),
                                cur.dtype)], axis=-1)
        elif output_feature > input_feature:
            din = cur[:, 0:input_feature]
        else:
            din = cur
    return jnp.stack(outs, axis=1)


# ------------------------------- parameters ----------------------------------

def init_params(key, F, H, OUT):
    """Synthetic init mirroring _init_weights (xavier weights, zero biases,
    forget-gate bias = 1 via bias_ih; bias_hh stays 0 -> combined forget
    slice is 1).  Gate column order [i | f | g | o], weights transposed."""
    H2 = 2 * H
    ki = iter(jax.random.split(key, 32))

    def xavier(k, shape):
        lim = (6.0 / (shape[0] + shape[1])) ** 0.5
        return jax.random.uniform(k, shape, jnp.float32, -lim, lim)

    def lstm_bias(hd):
        b = jnp.zeros((1, 4 * hd), jnp.float32)
        return b.at[:, hd:2 * hd].set(1.0)

    enc = []
    for layer in range(3):
        in_sz = F if layer == 0 else H2
        dirs = []
        for _ in range(2):  # forward / reverse
            dirs.append((xavier(next(ki), (in_sz, 4 * H)),
                         xavier(next(ki), (H, 4 * H)),
                         lstm_bias(H)))
        enc.append(tuple(dirs))

    dec = []
    for layer in range(3):
        in_sz = F if layer == 0 else H2
        dec.append((xavier(next(ki), (in_sz, 4 * H2)),
                    xavier(next(ki), (H2, 4 * H2)),
                    lstm_bias(H2)))

    hidden_transform = (xavier(next(ki), (H2, H2)),
                        jnp.zeros((1, H2), jnp.float32))
    cell_transform = (xavier(next(ki), (H2, H2)),
                      jnp.zeros((1, H2), jnp.float32))
    proj = (xavier(next(ki), (H2, H)), jnp.zeros((1, H), jnp.float32),
            jnp.ones((1, H), jnp.float32), jnp.zeros((1, H), jnp.float32),
            xavier(next(ki), (H, OUT)), jnp.zeros((1, OUT), jnp.float32))

    return {"encoder": enc, "decoder": dec,
            "hidden_transform": hidden_transform,
            "cell_transform": cell_transform,
            "proj": proj}


# ---------------------------------- main --------------------------------------

if __name__ == "__main__":
    B, S = 2, 8                      # batch, input sequence length
    F, H = 8, 32                     # input_feature, hidden_size
    OUT, OUT_LEN = 4, 4              # output_feature, output_length

    key = jax.random.PRNGKey(0)
    pkey, xkey = jax.random.split(key)
    params = init_params(pkey, F, H, OUT)
    x = jax.random.normal(xkey, (B, S, F), jnp.float32)

    # one-time repacking into the fused-kernel layout (off the hot path)
    kparams = prepare_kernel_params(params, hidden_size=H, input_feature=F,
                                    output_feature=OUT)

    fwd = jax.jit(functools.partial(
        lstm_predictor_forward,
        hidden_size=H, out_seq_length=OUT_LEN,
        input_feature=F, output_feature=OUT))

    out = fwd(x, kparams)
    jax.block_until_ready(out)

    assert out.shape == (B, OUT_LEN, OUT), out.shape
    assert out.dtype == jnp.float32
    assert bool(jnp.all(jnp.isfinite(out)))

    # cross-check the fused kernel (merged directions / packed gates) against
    # a plain-JAX implementation of the same eval-mode forward.
    ref = jax.jit(functools.partial(
        reference_forward,
        hidden_size=H, out_seq_length=OUT_LEN,
        input_feature=F, output_feature=OUT))(x, params)
    jax.block_until_ready(ref)
    assert bool(jnp.allclose(out, ref, atol=2e-2, rtol=2e-2)), \
        float(jnp.max(jnp.abs(out - ref)))

    print("KERNEL_OK")
</pallas_src>

<mosaic_0001>
module attributes {stable_mosaic.version = 11 : i64} {
  func.func @_fused_kernel(%arg0: memref<16x16xf32, #tpu.memory_space<vmem>>, %arg1: memref<16x256xf32, #tpu.memory_space<vmem>>, %arg2: memref<64x256xf32, #tpu.memory_space<vmem>>, %arg3: memref<1x256xf32, #tpu.memory_space<vmem>>, %arg4: memref<128x256xf32, #tpu.memory_space<vmem>>, %arg5: memref<64x256xf32, #tpu.memory_space<vmem>>, %arg6: memref<1x256xf32, #tpu.memory_space<vmem>>, %arg7: memref<128x256xf32, #tpu.memory_space<vmem>>, %arg8: memref<64x256xf32, #tpu.memory_space<vmem>>, %arg9: memref<1x256xf32, #tpu.memory_space<vmem>>, %arg10: memref<64x64xf32, #tpu.memory_space<vmem>>, %arg11: memref<1x64xf32, #tpu.memory_space<vmem>>, %arg12: memref<64x64xf32, #tpu.memory_space<vmem>>, %arg13: memref<1x64xf32, #tpu.memory_space<vmem>>, %arg14: memref<8x256xf32, #tpu.memory_space<vmem>>, %arg15: memref<64x256xf32, #tpu.memory_space<vmem>>, %arg16: memref<1x256xf32, #tpu.memory_space<vmem>>, %arg17: memref<64x256xf32, #tpu.memory_space<vmem>>, %arg18: memref<64x256xf32, #tpu.memory_space<vmem>>, %arg19: memref<1x256xf32, #tpu.memory_space<vmem>>, %arg20: memref<64x256xf32, #tpu.memory_space<vmem>>, %arg21: memref<64x256xf32, #tpu.memory_space<vmem>>, %arg22: memref<1x256xf32, #tpu.memory_space<vmem>>, %arg23: memref<64x32xf32, #tpu.memory_space<vmem>>, %arg24: memref<1x32xf32, #tpu.memory_space<vmem>>, %arg25: memref<1x32xf32, #tpu.memory_space<vmem>>, %arg26: memref<1x32xf32, #tpu.memory_space<vmem>>, %arg27: memref<32x4xf32, #tpu.memory_space<vmem>>, %arg28: memref<1x4xf32, #tpu.memory_space<vmem>>, %arg29: memref<4x8xf32, #tpu.memory_space<vmem>>, %arg30: memref<4x2x4xf32, #tpu.memory_space<vmem>>, %arg31: memref<16x256xf32, #tpu.memory_space<vmem>>, %arg32: memref<16x128xf32, #tpu.memory_space<vmem>>) attributes {dimension_semantics = [], scalar_prefetch = 0 : i64, scratch_operands = 2 : i64, tpu.core_type = #tpu.core_type<tc>} {
    %c0 = arith.constant 0 : index
    %c0_0 = arith.constant 0 : index
    %0 = vector.load %arg0[%c0, %c0_0] : memref<16x16xf32, #tpu.memory_space<vmem>>, vector<16x16xf32>
    %c0_1 = arith.constant 0 : index
    %c0_2 = arith.constant 0 : index
    %1 = vector.load %arg1[%c0_1, %c0_2] : memref<16x256xf32, #tpu.memory_space<vmem>>, vector<16x256xf32>
    %cst = arith.constant dense<0.000000e+00> : vector<16x256xf32>
    %2 = tpu.matmul %0, %1, %cst {dimension_numbers = #tpu.dot_dimension_numbers<[1], [0], [0], [1], [0, 0, 1, 1], [], []>} : vector<16x16xf32>, vector<16x256xf32>, vector<16x256xf32> -> vector<16x256xf32>
    %c0_3 = arith.constant 0 : index
    %c0_4 = arith.constant 0 : index
    %3 = vector.load %arg3[%c0_3, %c0_4] : memref<1x256xf32, #tpu.memory_space<vmem>>, vector<1x256xf32>
    %4 = vector.shape_cast %3 : vector<1x256xf32> to vector<1x256xf32>
    %5 = vector.broadcast %4 : vector<1x256xf32> to vector<16x256xf32>
    %6 = arith.addf %2, %5 : vector<16x256xf32>
    %c0_5 = arith.constant 0 : index
    %c0_6 = arith.constant 0 : index
    %7 = vector.load %arg31[%c0_5, %c0_6] : memref<16x256xf32, #tpu.memory_space<vmem>>, vector<16x256xf32>
    tpu.vector_store %arg31[%c0_5, %c0_6], %6 {strides = array<i32>} : memref<16x256xf32, #tpu.memory_space<vmem>>, vector<16x256xf32>,
    %c0_7 = arith.constant 0 : index
    %c0_8 = arith.constant 0 : index
    %8 = vector.load %arg2[%c0_7, %c0_8] : memref<64x256xf32, #tpu.memory_space<vmem>>, vector<64x256xf32>
    %cst_9 = arith.constant 0.000000e+00 : f32
    %9 = vector.broadcast %cst_9 : f32 to vector<2x64xf32>
    %c0_i32 = arith.constant 0 : i32
    %c2_i32 = arith.constant 2 : i32
    %10 = arith.muli %c0_i32, %c2_i32 : i32
    %11 = arith.index_cast %10 : i32 to index
    %c0_10 = arith.constant 0 : index
    %12 = vector.load %arg31[%11, %c0_10] : memref<16x256xf32, #tpu.memory_space<vmem>>, vector<2x256xf32>
    %cst_11 = arith.constant dense<0.000000e+00> : vector<2x256xf32>
    %13 = tpu.matmul %9, %8, %cst_11 {dimension_numbers = #tpu.dot_dimension_numbers<[1], [0], [0], [1], [0, 0, 1, 1], [], []>} : vector<2x64xf32>, vector<64x256xf32>, vector<2x256xf32> -> vector<2x256xf32>
    %14 = arith.addf %12, %13 : vector<2x256xf32>
    %15 = vector.extract_strided_slice %14 {offsets = [0, 0], sizes = [2, 192], strides = [1, 1]} : vector<2x256xf32> to vector<2x192xf32>
    %16 = arith.negf %15 : vector<2x192xf32>
    %17 = math.exp %16 : vector<2x192xf32>
    %cst_12 = arith.constant 1.000000e+00 : f32
    %18 = vector.broadcast %cst_12 : f32 to vector<2x192xf32>
    %19 = arith.addf %18, %17 : vector<2x192xf32>
    %20 = arith.divf %18, %19 : vector<2x192xf32>
    %21 = vector.extract_strided_slice %20 {offsets = [0, 0], sizes = [2, 64], strides = [1, 1]} : vector<2x192xf32> to vector<2x64xf32>
    %22 = vector.extract_strided_slice %20 {offsets = [0, 64], sizes = [2, 64], strides = [1, 1]} : vector<2x192xf32> to vector<2x64xf32>
    %23 = vector.extract_strided_slice %20 {offsets = [0, 128], sizes = [2, 64], strides = [1, 1]} : vector<2x192xf32> to vector<2x64xf32>
    %24 = vector.extract_strided_slice %14 {offsets = [0, 192], sizes = [2, 64], strides = [1, 1]} : vector<2x256xf32> to vector<2x64xf32>
    %25 = math.tanh %24 : vector<2x64xf32>
    %26 = arith.mulf %22, %9 : vector<2x64xf32>
    %27 = arith.mulf %21, %25 : vector<2x64xf32>
    %28 = arith.addf %26, %27 : vector<2x64xf32>
    %29 = math.tanh %28 : vector<2x64xf32>
    %30 = arith.mulf %23, %29 : vector<2x64xf32>
    %c7_i32 = arith.constant 7 : i32
    %31 = arith.subi %c7_i32, %c0_i32 : i32
    %c2_i32_13 = arith.constant 2 : i32
    %32 = arith.muli %31, %c2_i32_13 : i32
    %33 = vector.extract_strided_slice %30 {offsets = [0, 0], sizes = [2, 32], strides = [1, 1]} : vector<2x64xf32> to vector<2x32xf32>
    %34 = vector.extract_strided_slice %30 {offsets = [0, 32], sizes = [2, 32], strides = [1, 1]} : vector<2x64xf32> to vector<2x32xf32>
    %35 = arith.index_cast %10 : i32 to index
    %c0_14 = arith.constant 0 : index
    %36 = vector.load %arg32[%35, %c0_14] : memref<16x128xf32, #tpu.memory_space<vmem>>, vector<2x32xf32>
    tpu.vector_store %arg32[%35, %c0_14], %33 {strides = array<i32>} : memref<16x128xf32, #tpu.memory_space<vmem>>, vector<2x32xf32>,
    %37 = arith.index_cast %10 : i32 to index
    %c96 = arith.constant 96 : index
    %38 = vector.load %arg32[%37, %c96] : memref<16x128xf32, #tpu.memory_space<vmem>>, vector<2x32xf32>
    tpu.vector_store %arg32[%37, %c96], %34 {strides = array<i32>} : memref<16x128xf32, #tpu.memory_space<vmem>>, vector<2x32xf32>,
    %39 = arith.index_cast %32 : i32 to index
    %c32 = arith.constant 32 : index
    %40 = vector.load %arg32[%39, %c32] : memref<16x128xf32, #tpu.memory_space<vmem>>, vector<2x32xf32>
    tpu.vector_store %arg32[%39, %c32], %34 {strides = array<i32>} : memref<16x128xf32, #tpu.memory_space<vmem>>, vector<2x32xf32>,
    %41 = arith.index_cast %32 : i32 to index
    %c64 = arith.constant 64 : index
    %42 = vector.load %arg32[%41, %c64] : memref<16x128xf32, #tpu.memory_space<vmem>>, vector<2x32xf32>
    tpu.vector_store %arg32[%41, %c64], %33 {strides = array<i32>} : memref<16x128xf32, #tpu.memory_space<vmem>>, vector<2x32xf32>,
    %c1_i32 = arith.constant 1 : i32
    %c2_i32_15 = arith.constant 2 : i32
    %43 = arith.muli %c1_i32, %c2_i32_15 : i32
    %44 = arith.index_cast %43 : i32 to index
    %c0_16 = arith.constant 0 : index
    %45 = vector.load %arg31[%44, %c0_16] : memref<16x256xf32, #tpu.memory_space<vmem>>, vector<2x256xf32>
    %cst_17 = arith.constant dense<0.000000e+00> : vector<2x256xf32>
    %46 = tpu.matmul %30, %8, %cst_17 {dimension_numbers = #tpu.dot_dimension_numbers<[1], [0], [0], [1], [0, 0, 1, 1], [], []>} : vector<2x64xf32>, vector<64x256xf32>, vector<2x256xf32> -> vector<2x256xf32>
    %47 = arith.addf %45, %46 : vector<2x256xf32>
    %48 = vector.extract_strided_slice %47 {offsets = [0, 0], sizes = [2, 192], strides = [1, 1]} : vector<2x256xf32> to vector<2x192xf32>
    %49 = arith.negf %48 : vector<2x192xf32>
    %50 = math.exp %49 : vector<2x192xf32>
    %cst_18 = arith.constant 1.000000e+00 : f32
    %51 = vector.broadcast %cst_18 : f32 to vector<2x192xf32>
    %52 = arith.addf %51, %50 : vector<2x192xf32>
    %53 = arith.divf %51, %52 : vector<2x192xf32>
    %54 = vector.extract_strided_slice %53 {offsets = [0, 0], sizes = [2, 64], strides = [1, 1]} : vector<2x192xf32> to vector<2x64xf32>
    %55 = vector.extract_strided_slice %53 {offsets = [0, 64], sizes = [2, 64], strides = [1, 1]} : vector<2x192xf32> to vector<2x64xf32>
    %56 = vector.extract_strided_slice %53 {offsets = [0, 128], sizes = [2, 64], strides = [1, 1]} : vector<2x192xf32> to vector<2x64xf32>
    %57 = vector.extract_strided_slice %47 {offsets = [0, 192], sizes = [2, 64], strides = [1, 1]} : vector<2x256xf32> to vector<2x64xf32>
    %58 = math.tanh %57 : vector<2x64xf32>
    %59 = arith.mulf %55, %28 : vector<2x64xf32>
    %60 = arith.mulf %54, %58 : vector<2x64xf32>
    %61 = arith.addf %59, %60 : vector<2x64xf32>
    %62 = math.tanh %61 : vector<2x64xf32>
    %63 = arith.mulf %56, %62 : vector<2x64xf32>
    %c7_i32_19 = arith.constant 7 : i32
    %64 = arith.subi %c7_i32_19, %c1_i32 : i32
    %c2_i32_20 = arith.constant 2 : i32
    %65 = arith.muli %64, %c2_i32_20 : i32
    %66 = vector.extract_strided_slice %63 {offsets = [0, 0], sizes = [2, 32], strides = [1, 1]} : vector<2x64xf32> to vector<2x32xf32>
    %67 = vector.extract_strided_slice %63 {offsets = [0, 32], sizes = [2, 32], strides = [1, 1]} : vector<2x64xf32> to vector<2x32xf32>
    %68 = arith.index_cast %43 : i32 to index
    %c0_21 = arith.constant 0 : index
    %69 = vector.load %arg32[%68, %c0_21] : memref<16x128xf32, #tpu.memory_space<vmem>>, vector<2x32xf32>
    tpu.vector_store %arg32[%68, %c0_21], %66 {strides = array<i32>} : memref<16x128xf32, #tpu.memory_space<vmem>>, vector<2x32xf32>,
    %70 = arith.index_cast %43 : i32 to index
    %c96_22 = arith.constant 96 : index
    %71 = vector.load %arg32[%70, %c96_22] : memref<16x128xf32, #tpu.memory_space<vmem>>, vector<2x32xf32>
    tpu.vector_store %arg32[%70, %c96_22], %67 {strides = array<i32>} : memref<16x128xf32, #tpu.memory_space<vmem>>, vector<2x32xf32>,
    %72 = arith.index_cast %65 : i32 to index
    %c32_23 = arith.constant 32 : index
    %73 = vector.load %arg32[%72, %c32_23] : memref<16x128xf32, #tpu.memory_space<vmem>>, vector<2x32xf32>
    tpu.vector_store %arg32[%72, %c32_23], %67 {strides = array<i32>} : memref<16x128xf32, #tpu.memory_space<vmem>>, vector<2x32xf32>,
    %74 = arith.index_cast %65 : i32 to index
    %c64_24 = arith.constant 64 : index
    %75 = vector.load %arg32[%74, %c64_24] : memref<16x128xf32, #tpu.memory_space<vmem>>, vector<2x32xf32>
    tpu.vector_store %arg32[%74, %c64_24], %66 {strides = array<i32>} : memref<16x128xf32, #tpu.memory_space<vmem>>, vector<2x32xf32>,
    %c2_i32_25 = arith.constant 2 : i32
    %c2_i32_26 = arith.constant 2 : i32
    %76 = arith.muli %c2_i32_25, %c2_i32_26 : i32
    %77 = arith.index_cast %76 : i32 to index
    %c0_27 = arith.constant 0 : index
    %78 = vector.load %arg31[%77, %c0_27] : memref<16x256xf32, #tpu.memory_space<vmem>>, vector<2x256xf32>
    %cst_28 = arith.constant dense<0.000000e+00> : vector<2x256xf32>
    %79 = tpu.matmul %63, %8, %cst_28 {dimension_numbers = #tpu.dot_dimension_numbers<[1], [0], [0], [1], [0, 0, 1, 1], [], []>} : vector<2x64xf32>, vector<64x256xf32>, vector<2x256xf32> -> vector<2x256xf32>
    %80 = arith.addf %78, %79 : vector<2x256xf32>
    %81 = vector.extract_strided_slice %80 {offsets = [0, 0], sizes = [2, 192], strides = [1, 1]} : vector<2x256xf32> to vector<2x192xf32>
    %82 = arith.negf %81 : vector<2x192xf32>
    %83 = math.exp %82 : vector<2x192xf32>
    %cst_29 = arith.constant 1.000000e+00 : f32
    %84 = vector.broadcast %cst_29 : f32 to vector<2x192xf32>
    %85 = arith.addf %84, %83 : vector<2x192xf32>
    %86 = arith.divf %84, %85 : vector<2x192xf32>
    %87 = vector.extract_strided_slice %86 {offsets = [0, 0], sizes = [2, 64], strides = [1, 1]} : vector<2x192xf32> to vector<2x64xf32>
    %88 = vector.extract_strided_slice %86 {offsets = [0, 64], sizes = [2, 64], strides = [1, 1]} : vector<2x192xf32> to vector<2x64xf32>
    %89 = vector.extract_strided_slice %86 {offsets = [0, 128], sizes = [2, 64], strides = [1, 1]} : vector<2x192xf32> to vector<2x64xf32>
    %90 = vector.extract_strided_slice %80 {offsets = [0, 192], sizes = [2, 64], strides = [1, 1]} : vector<2x256xf32> to vector<2x64xf32>
    %91 = math.tanh %90 : vector<2x64xf32>
    %92 = arith.mulf %88, %61 : vector<2x64xf32>
    %93 = arith.mulf %87, %91 : vector<2x64xf32>
    %94 = arith.addf %92, %93 : vector<2x64xf32>
    %95 = math.tanh %94 : vector<2x64xf32>
    %96 = arith.mulf %89, %95 : vector<2x64xf32>
    %c7_i32_30 = arith.constant 7 : i32
    %97 = arith.subi %c7_i32_30, %c2_i32_25 : i32
    %c2_i32_31 = arith.constant 2 : i32
    %98 = arith.muli %97, %c2_i32_31 : i32
    %99 = vector.extract_strided_slice %96 {offsets = [0, 0], sizes = [2, 32], strides = [1, 1]} : vector<2x64xf32> to vector<2x32xf32>
    %100 = vector.extract_strided_slice %96 {offsets = [0, 32], sizes = [2, 32], strides = [1, 1]} : vector<2x64xf32> to vector<2x32xf32>
    %101 = arith.index_cast %76 : i32 to index
    %c0_32 = arith.constant 0 : index
    %102 = vector.load %arg32[%101, %c0_32] : memref<16x128xf32, #tpu.memory_space<vmem>>, vector<2x32xf32>
    tpu.vector_store %arg32[%101, %c0_32], %99 {strides = array<i32>} : memref<16x128xf32, #tpu.memory_space<vmem>>, vector<2x32xf32>,
    %103 = arith.index_cast %76 : i32 to index
    %c96_33 = arith.constant 96 : index
    %104 = vector.load %arg32[%103, %c96_33] : memref<16x128xf32, #tpu.memory_space<vmem>>, vector<2x32xf32>
    tpu.vector_store %arg32[%103, %c96_33], %100 {strides = array<i32>} : memref<16x128xf32, #tpu.memory_space<vmem>>, vector<2x32xf32>,
    %105 = arith.index_cast %98 : i32 to index
    %c32_34 = arith.constant 32 : index
    %106 = vector.load %arg32[%105, %c32_34] : memref<16x128xf32, #tpu.memory_space<vmem>>, vector<2x32xf32>
    tpu.vector_store %arg32[%105, %c32_34], %100 {strides = array<i32>} : memref<16x128xf32, #tpu.memory_space<vmem>>, vector<2x32xf32>,
    %107 = arith.index_cast %98 : i32 to index
    %c64_35 = arith.constant 64 : index
    %108 = vector.load %arg32[%107, %c64_35] : memref<16x128xf32, #tpu.memory_space<vmem>>, vector<2x32xf32>
    tpu.vector_store %arg32[%107, %c64_35], %99 {strides = array<i32>} : memref<16x128xf32, #tpu.memory_space<vmem>>, vector<2x32xf32>,
    %c3_i32 = arith.constant 3 : i32
    %c2_i32_36 = arith.constant 2 : i32
    %109 = arith.muli %c3_i32, %c2_i32_36 : i32
    %110 = arith.index_cast %109 : i32 to index
    %c0_37 = arith.constant 0 : index
    %111 = vector.load %arg31[%110, %c0_37] : memref<16x256xf32, #tpu.memory_space<vmem>>, vector<2x256xf32>
    %cst_38 = arith.constant dense<0.000000e+00> : vector<2x256xf32>
    %112 = tpu.matmul %96, %8, %cst_38 {dimension_numbers = #tpu.dot_dimension_numbers<[1], [0], [0], [1], [0, 0, 1, 1], [], []>} : vector<2x64xf32>, vector<64x256xf32>, vector<2x256xf32> -> vector<2x256xf32>
    %113 = arith.addf %111, %112 : vector<2x256xf32>
    %114 = vector.extract_strided_slice %113 {offsets = [0, 0], sizes = [2, 192], strides = [1, 1]} : vector<2x256xf32> to vector<2x192xf32>
    %115 = arith.negf %114 : vector<2x192xf32>
    %116 = math.exp %115 : vector<2x192xf32>
    %cst_39 = arith.constant 1.000000e+00 : f32
    %117 = vector.broadcast %cst_39 : f32 to vector<2x192xf32>
    %118 = arith.addf %117, %116 : vector<2x192xf32>
    %119 = arith.divf %117, %118 : vector<2x192xf32>
    %120 = vector.extract_strided_slice %119 {offsets = [0, 0], sizes = [2, 64], strides = [1, 1]} : vector<2x192xf32> to vector<2x64xf32>
    %121 = vector.extract_strided_slice %119 {offsets = [0, 64], sizes = [2, 64], strides = [1, 1]} : vector<2x192xf32> to vector<2x64xf32>
    %122 = vector.extract_strided_slice %119 {offsets = [0, 128], sizes = [2, 64], strides = [1, 1]} : vector<2x192xf32> to vector<2x64xf32>
    %123 = vector.extract_strided_slice %113 {offsets = [0, 192], sizes = [2, 64], strides = [1, 1]} : vector<2x256xf32> to vector<2x64xf32>
    %124 = math.tanh %123 : vector<2x64xf32>
    %125 = arith.mulf %121, %94 : vector<2x64xf32>
    %126 = arith.mulf %120, %124 : vector<2x64xf32>
    %127 = arith.addf %125, %126 : vector<2x64xf32>
    %128 = math.tanh %127 : vector<2x64xf32>
    %129 = arith.mulf %122, %128 : vector<2x64xf32>
    %c7_i32_40 = arith.constant 7 : i32
    %130 = arith.subi %c7_i32_40, %c3_i32 : i32
    %c2_i32_41 = arith.constant 2 : i32
    %131 = arith.muli %130, %c2_i32_41 : i32
    %132 = vector.extract_strided_slice %129 {offsets = [0, 0], sizes = [2, 32], strides = [1, 1]} : vector<2x64xf32> to vector<2x32xf32>
    %133 = vector.extract_strided_slice %129 {offsets = [0, 32], sizes = [2, 32], strides = [1, 1]} : vector<2x64xf32> to vector<2x32xf32>
    %134 = arith.index_cast %109 : i32 to index
    %c0_42 = arith.constant 0 : index
    %135 = vector.load %arg32[%134, %c0_42] : memref<16x128xf32, #tpu.memory_space<vmem>>, vector<2x32xf32>
    tpu.vector_store %arg32[%134, %c0_42], %132 {strides = array<i32>} : memref<16x128xf32, #tpu.memory_space<vmem>>, vector<2x32xf32>,
    %136 = arith.index_cast %109 : i32 to index
    %c96_43 = arith.constant 96 : index
    %137 = vector.load %arg32[%136, %c96_43] : memref<16x128xf32, #tpu.memory_space<vmem>>, vector<2x32xf32>
    tpu.vector_store %arg32[%136, %c96_43], %133 {strides = array<i32>} : memref<16x128xf32, #tpu.memory_space<vmem>>, vector<2x32xf32>,
    %138 = arith.index_cast %131 : i32 to index
    %c32_44 = arith.constant 32 : index
    %139 = vector.load %arg32[%138, %c32_44] : memref<16x128xf32, #tpu.memory_space<vmem>>, vector<2x32xf32>
    tpu.vector_store %arg32[%138, %c32_44], %133 {strides = array<i32>} : memref<16x128xf32, #tpu.memory_space<vmem>>, vector<2x32xf32>,
    %140 = arith.index_cast %131 : i32 to index
    %c64_45 = arith.constant 64 : index
    %141 = vector.load %arg32[%140, %c64_45] : memref<16x128xf32, #tpu.memory_space<vmem>>, vector<2x32xf32>
    tpu.vector_store %arg32[%140, %c64_45], %132 {strides = array<i32>} : memref<16x128xf32, #tpu.memory_space<vmem>>, vector<2x32xf32>,
    %c4_i32 = arith.constant 4 : i32
    %c2_i32_46 = arith.constant 2 : i32
    %142 = arith.muli %c4_i32, %c2_i32_46 : i32
    %143 = arith.index_cast %142 : i32 to index
    %c0_47 = arith.constant 0 : index
    %144 = vector.load %arg31[%143, %c0_47] : memref<16x256xf32, #tpu.memory_space<vmem>>, vector<2x256xf32>
    %cst_48 = arith.constant dense<0.000000e+00> : vector<2x256xf32>
    %145 = tpu.matmul %129, %8, %cst_48 {dimension_numbers = #tpu.dot_dimension_numbers<[1], [0], [0], [1], [0, 0, 1, 1], [], []>} : vector<2x64xf32>, vector<64x256xf32>, vector<2x256xf32> -> vector<2x256xf32>
    %146 = arith.addf %144, %145 : vector<2x256xf32>
    %147 = vector.extract_strided_slice %146 {offsets = [0, 0], sizes = [2, 192], strides = [1, 1]} : vector<2x256xf32> to vector<2x192xf32>
    %148 = arith.negf %147 : vector<2x192xf32>
    %149 = math.exp %148 : vector<2x192xf32>
    %cst_49 = arith.constant 1.000000e+00 : f32
    %150 = vector.broadcast %cst_49 : f32 to vector<2x192xf32>
    %151 = arith.addf %150, %149 : vector<2x192xf32>
    %152 = arith.divf %150, %151 : vector<2x192xf32>
    %153 = vector.extract_strided_slice %152 {offsets = [0, 0], sizes = [2, 64], strides = [1, 1]} : vector<2x192xf32> to vector<2x64xf32>
    %154 = vector.extract_strided_slice %152 {offsets = [0, 64], sizes = [2, 64], strides = [1, 1]} : vector<2x192xf32> to vector<2x64xf32>
    %155 = vector.extract_strided_slice %152 {offsets = [0, 128], sizes = [2, 64], strides = [1, 1]} : vector<2x192xf32> to vector<2x64xf32>
    %156 = vector.extract_strided_slice %146 {offsets = [0, 192], sizes = [2, 64], strides = [1, 1]} : vector<2x256xf32> to vector<2x64xf32>
    %157 = math.tanh %156 : vector<2x64xf32>
    %158 = arith.mulf %154, %127 : vector<2x64xf32>
    %159 = arith.mulf %153, %157 : vector<2x64xf32>
    %160 = arith.addf %158, %159 : vector<2x64xf32>
    %161 = math.tanh %160 : vector<2x64xf32>
    %162 = arith.mulf %155, %161 : vector<2x64xf32>
    %c7_i32_50 = arith.constant 7 : i32
    %163 = arith.subi %c7_i32_50, %c4_i32 : i32
    %c2_i32_51 = arith.constant 2 : i32
    %164 = arith.muli %163, %c2_i32_51 : i32
    %165 = vector.extract_strided_slice %162 {offsets = [0, 0], sizes = [2, 32], strides = [1, 1]} : vector<2x64xf32> to vector<2x32xf32>
    %166 = vector.extract_strided_slice %162 {offsets = [0, 32], sizes = [2, 32], strides = [1, 1]} : vector<2x64xf32> to vector<2x32xf32>
    %167 = arith.index_cast %142 : i32 to index
    %c0_52 = arith.constant 0 : index
    %168 = vector.load %arg32[%167, %c0_52] : memref<16x128xf32, #tpu.memory_space<vmem>>, vector<2x32xf32>
    tpu.vector_store %arg32[%167, %c0_52], %165 {strides = array<i32>} : memref<16x128xf32, #tpu.memory_space<vmem>>, vector<2x32xf32>,
    %169 = arith.index_cast %142 : i32 to index
    %c96_53 = arith.constant 96 : index
    %170 = vector.load %arg32[%169, %c96_53] : memref<16x128xf32, #tpu.memory_space<vmem>>, vector<2x32xf32>
    tpu.vector_store %arg32[%169, %c96_53], %166 {strides = array<i32>} : memref<16x128xf32, #tpu.memory_space<vmem>>, vector<2x32xf32>,
    %171 = arith.index_cast %164 : i32 to index
    %c32_54 = arith.constant 32 : index
    %172 = vector.load %arg32[%171, %c32_54] : memref<16x128xf32, #tpu.memory_space<vmem>>, vector<2x32xf32>
    tpu.vector_store %arg32[%171, %c32_54], %166 {strides = array<i32>} : memref<16x128xf32, #tpu.memory_space<vmem>>, vector<2x32xf32>,
    %173 = arith.index_cast %164 : i32 to index
    %c64_55 = arith.constant 64 : index
    %174 = vector.load %arg32[%173, %c64_55] : memref<16x128xf32, #tpu.memory_space<vmem>>, vector<2x32xf32>
    tpu.vector_store %arg32[%173, %c64_55], %165 {strides = array<i32>} : memref<16x128xf32, #tpu.memory_space<vmem>>, vector<2x32xf32>,
    %c5_i32 = arith.constant 5 : i32
    %c2_i32_56 = arith.constant 2 : i32
    %175 = arith.muli %c5_i32, %c2_i32_56 : i32
    %176 = arith.index_cast %175 : i32 to index
    %c0_57 = arith.constant 0 : index
    %177 = vector.load %arg31[%176, %c0_57] : memref<16x256xf32, #tpu.memory_space<vmem>>, vector<2x256xf32>
    %cst_58 = arith.constant dense<0.000000e+00> : vector<2x256xf32>
    %178 = tpu.matmul %162, %8, %cst_58 {dimension_numbers = #tpu.dot_dimension_numbers<[1], [0], [0], [1], [0, 0, 1, 1], [], []>} : vector<2x64xf32>, vector<64x256xf32>, vector<2x256xf32> -> vector<2x256xf32>
    %179 = arith.addf %177, %178 : vector<2x256xf32>
    %180 = vector.extract_strided_slice %179 {offsets = [0, 0], sizes = [2, 192], strides = [1, 1]} : vector<2x256xf32> to vector<2x192xf32>
    %181 = arith.negf %180 : vector<2x192xf32>
    %182 = math.exp %181 : vector<2x192xf32>
    %cst_59 = arith.constant 1.000000e+00 : f32
    %183 = vector.broadcast %cst_59 : f32 to vector<2x192xf32>
    %184 = arith.addf %183, %182 : vector<2x192xf32>
    %185 = arith.divf %183, %184 : vector<2x192xf32>
    %186 = vector.extract_strided_slice %185 {offsets = [0, 0], sizes = [2, 64], strides = [1, 1]} : vector<2x192xf32> to vector<2x64xf32>
    %187 = vector.extract_strided_slice %185 {offsets = [0, 64], sizes = [2, 64], strides = [1, 1]} : vector<2x192xf32> to vector<2x64xf32>
    %188 = vector.extract_strided_slice %185 {offsets = [0, 128], sizes = [2, 64], strides = [1, 1]} : vector<2x192xf32> to vector<2x64xf32>
    %189 = vector.extract_strided_slice %179 {offsets = [0, 192], sizes = [2, 64], strides = [1, 1]} : vector<2x256xf32> to vector<2x64xf32>
    %190 = math.tanh %189 : vector<2x64xf32>
    %191 = arith.mulf %187, %160 : vector<2x64xf32>
    %192 = arith.mulf %186, %190 : vector<2x64xf32>
    %193 = arith.addf %191, %192 : vector<2x64xf32>
    %194 = math.tanh %193 : vector<2x64xf32>
    %195 = arith.mulf %188, %194 : vector<2x64xf32>
    %c7_i32_60 = arith.constant 7 : i32
    %196 = arith.subi %c7_i32_60, %c5_i32 : i32
    %c2_i32_61 = arith.constant 2 : i32
    %197 = arith.muli %196, %c2_i32_61 : i32
    %198 = vector.extract_strided_slice %195 {offsets = [0, 0], sizes = [2, 32], strides = [1, 1]} : vector<2x64xf32> to vector<2x32xf32>
    %199 = vector.extract_strided_slice %195 {offsets = [0, 32], sizes = [2, 32], strides = [1, 1]} : vector<2x64xf32> to vector<2x32xf32>
    %200 = arith.index_cast %175 : i32 to index
    %c0_62 = arith.constant 0 : index
    %201 = vector.load %arg32[%200, %c0_62] : memref<16x128xf32, #tpu.memory_space<vmem>>, vector<2x32xf32>
    tpu.vector_store %arg32[%200, %c0_62], %198 {strides = array<i32>} : memref<16x128xf32, #tpu.memory_space<vmem>>, vector<2x32xf32>,
    %202 = arith.index_cast %175 : i32 to index
    %c96_63 = arith.constant 96 : index
    %203 = vector.load %arg32[%202, %c96_63] : memref<16x128xf32, #tpu.memory_space<vmem>>, vector<2x32xf32>
    tpu.vector_store %arg32[%202, %c96_63], %199 {strides = array<i32>} : memref<16x128xf32, #tpu.memory_space<vmem>>, vector<2x32xf32>,
    %204 = arith.index_cast %197 : i32 to index
    %c32_64 = arith.constant 32 : index
    %205 = vector.load %arg32[%204, %c32_64] : memref<16x128xf32, #tpu.memory_space<vmem>>, vector<2x32xf32>
    tpu.vector_store %arg32[%204, %c32_64], %199 {strides = array<i32>} : memref<16x128xf32, #tpu.memory_space<vmem>>, vector<2x32xf32>,
    %206 = arith.index_cast %197 : i32 to index
    %c64_65 = arith.constant 64 : index
    %207 = vector.load %arg32[%206, %c64_65] : memref<16x128xf32, #tpu.memory_space<vmem>>, vector<2x32xf32>
    tpu.vector_store %arg32[%206, %c64_65], %198 {strides = array<i32>} : memref<16x128xf32, #tpu.memory_space<vmem>>, vector<2x32xf32>,
    %c6_i32 = arith.constant 6 : i32
    %c2_i32_66 = arith.constant 2 : i32
    %208 = arith.muli %c6_i32, %c2_i32_66 : i32
    %209 = arith.index_cast %208 : i32 to index
    %c0_67 = arith.constant 0 : index
    %210 = vector.load %arg31[%209, %c0_67] : memref<16x256xf32, #tpu.memory_space<vmem>>, vector<2x256xf32>
    %cst_68 = arith.constant dense<0.000000e+00> : vector<2x256xf32>
    %211 = tpu.matmul %195, %8, %cst_68 {dimension_numbers = #tpu.dot_dimension_numbers<[1], [0], [0], [1], [0, 0, 1, 1], [], []>} : vector<2x64xf32>, vector<64x256xf32>, vector<2x256xf32> -> vector<2x256xf32>
    %212 = arith.addf %210, %211 : vector<2x256xf32>
    %213 = vector.extract_strided_slice %212 {offsets = [0, 0], sizes = [2, 192], strides = [1, 1]} : vector<2x256xf32> to vector<2x192xf32>
    %214 = arith.negf %213 : vector<2x192xf32>
    %215 = math.exp %214 : vector<2x192xf32>
    %cst_69 = arith.constant 1.000000e+00 : f32
    %216 = vector.broadcast %cst_69 : f32 to vector<2x192xf32>
    %217 = arith.addf %216, %215 : vector<2x192xf32>
    %218 = arith.divf %216, %217 : vector<2x192xf32>
    %219 = vector.extract_strided_slice %218 {offsets = [0, 0], sizes = [2, 64], strides = [1, 1]} : vector<2x192xf32> to vector<2x64xf32>
    %220 = vector.extract_strided_slice %218 {offsets = [0, 64], sizes = [2, 64], strides = [1, 1]} : vector<2x192xf32> to vector<2x64xf32>
    %221 = vector.extract_strided_slice %218 {offsets = [0, 128], sizes = [2, 64], strides = [1, 1]} : vector<2x192xf32> to vector<2x64xf32>
    %222 = vector.extract_strided_slice %212 {offsets = [0, 192], sizes = [2, 64], strides = [1, 1]} : vector<2x256xf32> to vector<2x64xf32>
    %223 = math.tanh %222 : vector<2x64xf32>
    %224 = arith.mulf %220, %193 : vector<2x64xf32>
    %225 = arith.mulf %219, %223 : vector<2x64xf32>
    %226 = arith.addf %224, %225 : vector<2x64xf32>
    %227 = math.tanh %226 : vector<2x64xf32>
    %228 = arith.mulf %221, %227 : vector<2x64xf32>
    %c7_i32_70 = arith.constant 7 : i32
    %229 = arith.subi %c7_i32_70, %c6_i32 : i32
    %c2_i32_71 = arith.constant 2 : i32
    %230 = arith.muli %229, %c2_i32_71 : i32
    %231 = vector.extract_strided_slice %228 {offsets = [0, 0], sizes = [2, 32], strides = [1, 1]} : vector<2x64xf32> to vector<2x32xf32>
    %232 = vector.extract_strided_slice %228 {offsets = [0, 32], sizes = [2, 32], strides = [1, 1]} : vector<2x64xf32> to vector<2x32xf32>
    %233 = arith.index_cast %208 : i32 to index
    %c0_72 = arith.constant 0 : index
    %234 = vector.load %arg32[%233, %c0_72] : memref<16x128xf32, #tpu.memory_space<vmem>>, vector<2x32xf32>
    tpu.vector_store %arg32[%233, %c0_72], %231 {strides = array<i32>} : memref<16x128xf32, #tpu.memory_space<vmem>>, vector<2x32xf32>,
    %235 = arith.index_cast %208 : i32 to index
    %c96_73 = arith.constant 96 : index
    %236 = vector.load %arg32[%235, %c96_73] : memref<16x128xf32, #tpu.memory_space<vmem>>, vector<2x32xf32>
    tpu.vector_store %arg32[%235, %c96_73], %232 {strides = array<i32>} : memref<16x128xf32, #tpu.memory_space<vmem>>, vector<2x32xf32>,
    %237 = arith.index_cast %230 : i32 to index
    %c32_74 = arith.constant 32 : index
    %238 = vector.load %arg32[%237, %c32_74] : memref<16x128xf32, #tpu.memory_space<vmem>>, vector<2x32xf32>
    tpu.vector_store %arg32[%237, %c32_74], %232 {strides = array<i32>} : memref<16x128xf32, #tpu.memory_space<vmem>>, vector<2x32xf32>,
    %239 = arith.index_cast %230 : i32 to index
    %c64_75 = arith.constant 64 : index
    %240 = vector.load %arg32[%239, %c64_75] : memref<16x128xf32, #tpu.memory_space<vmem>>, vector<2x32xf32>
    tpu.vector_store %arg32[%239, %c64_75], %231 {strides = array<i32>} : memref<16x128xf32, #tpu.memory_space<vmem>>, vector<2x32xf32>,
    %c7_i32_76 = arith.constant 7 : i32
    %c2_i32_77 = arith.constant 2 : i32
    %241 = arith.muli %c7_i32_76, %c2_i32_77 : i32
    %242 = arith.index_cast %241 : i32 to index
    %c0_78 = arith.constant 0 : index
    %243 = vector.load %arg31[%242, %c0_78] : memref<16x256xf32, #tpu.memory_space<vmem>>, vector<2x256xf32>
    %cst_79 = arith.constant dense<0.000000e+00> : vector<2x256xf32>
    %244 = tpu.matmul %228, %8, %cst_79 {dimension_numbers = #tpu.dot_dimension_numbers<[1], [0], [0], [1], [0, 0, 1, 1], [], []>} : vector<2x64xf32>, vector<64x256xf32>, vector<2x256xf32> -> vector<2x256xf32>
    %245 = arith.addf %243, %244 : vector<2x256xf32>
    %246 = vector.extract_strided_slice %245 {offsets = [0, 0], sizes = [2, 192], strides = [1, 1]} : vector<2x256xf32> to vector<2x192xf32>
    %247 = arith.negf %246 : vector<2x192xf32>
    %248 = math.exp %247 : vector<2x192xf32>
    %cst_80 = arith.constant 1.000000e+00 : f32
    %249 = vector.broadcast %cst_80 : f32 to vector<2x192xf32>
    %250 = arith.addf %249, %248 : vector<2x192xf32>
    %251 = arith.divf %249, %250 : vector<2x192xf32>
    %252 = vector.extract_strided_slice %251 {offsets = [0, 0], sizes = [2, 64], strides = [1, 1]} : vector<2x192xf32> to vector<2x64xf32>
    %253 = vector.extract_strided_slice %251 {offsets = [0, 64], sizes = [2, 64], strides = [1, 1]} : vector<2x192xf32> to vector<2x64xf32>
    %254 = vector.extract_strided_slice %251 {offsets = [0, 128], sizes = [2, 64], strides = [1, 1]} : vector<2x192xf32> to vector<2x64xf32>
    %255 = vector.extract_strided_slice %245 {offsets = [0, 192], sizes = [2, 64], strides = [1, 1]} : vector<2x256xf32> to vector<2x64xf32>
    %256 = math.tanh %255 : vector<2x64xf32>
    %257 = arith.mulf %253, %226 : vector<2x64xf32>
    %258 = arith.mulf %252, %256 : vector<2x64xf32>
    %259 = arith.addf %257, %258 : vector<2x64xf32>
    %260 = math.tanh %259 : vector<2x64xf32>
    %261 = arith.mulf %254, %260 : vector<2x64xf32>
    %c7_i32_81 = arith.constant 7 : i32
    %262 = arith.subi %c7_i32_81, %c7_i32_76 : i32
    %c2_i32_82 = arith.constant 2 : i32
    %263 = arith.muli %262, %c2_i32_82 : i32
    %264 = vector.extract_strided_slice %261 {offsets = [0, 0], sizes = [2, 32], strides = [1, 1]} : vector<2x64xf32> to vector<2x32xf32>
    %265 = vector.extract_strided_slice %261 {offsets = [0, 32], sizes = [2, 32], strides = [1, 1]} : vector<2x64xf32> to vector<2x32xf32>
    %266 = arith.index_cast %241 : i32 to index
    %c0_83 = arith.constant 0 : index
    %267 = vector.load %arg32[%266, %c0_83] : memref<16x128xf32, #tpu.memory_space<vmem>>, vector<2x32xf32>
    tpu.vector_store %arg32[%266, %c0_83], %264 {strides = array<i32>} : memref<16x128xf32, #tpu.memory_space<vmem>>, vector<2x32xf32>,
    %268 = arith.index_cast %241 : i32 to index
    %c96_84 = arith.constant 96 : index
    %269 = vector.load %arg32[%268, %c96_84] : memref<16x128xf32, #tpu.memory_space<vmem>>, vector<2x32xf32>
    tpu.vector_store %arg32[%268, %c96_84], %265 {strides = array<i32>} : memref<16x128xf32, #tpu.memory_space<vmem>>, vector<2x32xf32>,
    %270 = arith.index_cast %263 : i32 to index
    %c32_85 = arith.constant 32 : index
    %271 = vector.load %arg32[%270, %c32_85] : memref<16x128xf32, #tpu.memory_space<vmem>>, vector<2x32xf32>
    tpu.vector_store %arg32[%270, %c32_85], %265 {strides = array<i32>} : memref<16x128xf32, #tpu.memory_space<vmem>>, vector<2x32xf32>,
    %272 = arith.index_cast %263 : i32 to index
    %c64_86 = arith.constant 64 : index
    %273 = vector.load %arg32[%272, %c64_86] : memref<16x128xf32, #tpu.memory_space<vmem>>, vector<2x32xf32>
    tpu.vector_store %arg32[%272, %c64_86], %264 {strides = array<i32>} : memref<16x128xf32, #tpu.memory_space<vmem>>, vector<2x32xf32>,
    %c8_i32 = arith.constant 8 : i32
    %c0_87 = arith.constant 0 : index
    %c0_88 = arith.constant 0 : index
    %274 = vector.load %arg32[%c0_87, %c0_88] : memref<16x128xf32, #tpu.memory_space<vmem>>, vector<16x128xf32>
    %c0_89 = arith.constant 0 : index
    %c0_90 = arith.constant 0 : index
    %275 = vector.load %arg4[%c0_89, %c0_90] : memref<128x256xf32, #tpu.memory_space<vmem>>, vector<128x256xf32>
    %cst_91 = arith.constant dense<0.000000e+00> : vector<16x256xf32>
    %276 = tpu.matmul %274, %275, %cst_91 {dimension_numbers = #tpu.dot_dimension_numbers<[1], [0], [0], [1], [0, 0, 1, 1], [], []>} : vector<16x128xf32>, vector<128x256xf32>, vector<16x256xf32> -> vector<16x256xf32>
    %c0_92 = arith.constant 0 : index
    %c0_93 = arith.constant 0 : index
    %277 = vector.load %arg6[%c0_92, %c0_93] : memref<1x256xf32, #tpu.memory_space<vmem>>, vector<1x256xf32>
    %278 = vector.shape_cast %277 : vector<1x256xf32> to vector<1x256xf32>
    %279 = vector.broadcast %278 : vector<1x256xf32> to vector<16x256xf32>
    %280 = arith.addf %276, %279 : vector<16x256xf32>
    %c0_94 = arith.constant 0 : index
    %c0_95 = arith.constant 0 : index
    %281 = vector.load %arg31[%c0_94, %c0_95] : memref<16x256xf32, #tpu.memory_space<vmem>>, vector<16x256xf32>
    tpu.vector_store %arg31[%c0_94, %c0_95], %280 {strides = array<i32>} : memref<16x256xf32, #tpu.memory_space<vmem>>, vector<16x256xf32>,
    %c0_96 = arith.constant 0 : index
    %c0_97 = arith.constant 0 : index
    %282 = vector.load %arg5[%c0_96, %c0_97] : memref<64x256xf32, #tpu.memory_space<vmem>>, vector<64x256xf32>
    %cst_98 = arith.constant 0.000000e+00 : f32
    %283 = vector.broadcast %cst_98 : f32 to vector<2x64xf32>
    %c0_i32_99 = arith.constant 0 : i32
    %c2_i32_100 = arith.constant 2 : i32
    %284 = arith.muli %c0_i32_99, %c2_i32_100 : i32
    %285 = arith.index_cast %284 : i32 to index
    %c0_101 = arith.constant 0 : index
    %286 = vector.load %arg31[%285, %c0_101] : memref<16x256xf32, #tpu.memory_space<vmem>>, vector<2x256xf32>
    %cst_102 = arith.constant dense<0.000000e+00> : vector<2x256xf32>
    %287 = tpu.matmul %283, %282, %cst_102 {dimension_numbers = #tpu.dot_dimension_numbers<[1], [0], [0], [1], [0, 0, 1, 1], [], []>} : vector<2x64xf32>, vector<64x256xf32>, vector<2x256xf32> -> vector<2x256xf32>
    %288 = arith.addf %286, %287 : vector<2x256xf32>
    %289 = vector.extract_strided_slice %288 {offsets = [0, 0], sizes = [2, 192], strides = [1, 1]} : vector<2x256xf32> to vector<2x192xf32>
    %290 = arith.negf %289 : vector<2x192xf32>
    %291 = math.exp %290 : vector<2x192xf32>
    %cst_103 = arith.constant 1.000000e+00 : f32
    %292 = vector.broadcast %cst_103 : f32 to vector<2x192xf32>
    %293 = arith.addf %292, %291 : vector<2x192xf32>
    %294 = arith.divf %292, %293 : vector<2x192xf32>
    %295 = vector.extract_strided_slice %294 {offsets = [0, 0], sizes = [2, 64], strides = [1, 1]} : vector<2x192xf32> to vector<2x64xf32>
    %296 = vector.extract_strided_slice %294 {offsets = [0, 64], sizes = [2, 64], strides = [1, 1]} : vector<2x192xf32> to vector<2x64xf32>
    %297 = vector.extract_strided_slice %294 {offsets = [0, 128], sizes = [2, 64], strides = [1, 1]} : vector<2x192xf32> to vector<2x64xf32>
    %298 = vector.extract_strided_slice %288 {offsets = [0, 192], sizes = [2, 64], strides = [1, 1]} : vector<2x256xf32> to vector<2x64xf32>
    %299 = math.tanh %298 : vector<2x64xf32>
    %300 = arith.mulf %296, %283 : vector<2x64xf32>
    %301 = arith.mulf %295, %299 : vector<2x64xf32>
    %302 = arith.addf %300, %301 : vector<2x64xf32>
    %303 = math.tanh %302 : vector<2x64xf32>
    %304 = arith.mulf %297, %303 : vector<2x64xf32>
    %c7_i32_104 = arith.constant 7 : i32
    %305 = arith.subi %c7_i32_104, %c0_i32_99 : i32
    %c2_i32_105 = arith.constant 2 : i32
    %306 = arith.muli %305, %c2_i32_105 : i32
    %307 = vector.extract_strided_slice %304 {offsets = [0, 0], sizes = [2, 32], strides = [1, 1]} : vector<2x64xf32> to vector<2x32xf32>
    %308 = vector.extract_strided_slice %304 {offsets = [0, 32], sizes = [2, 32], strides = [1, 1]} : vector<2x64xf32> to vector<2x32xf32>
    %309 = arith.index_cast %284 : i32 to index
    %c0_106 = arith.constant 0 : index
    %310 = vector.load %arg32[%309, %c0_106] : memref<16x128xf32, #tpu.memory_space<vmem>>, vector<2x32xf32>
    tpu.vector_store %arg32[%309, %c0_106], %307 {strides = array<i32>} : memref<16x128xf32, #tpu.memory_space<vmem>>, vector<2x32xf32>,
    %311 = arith.index_cast %284 : i32 to index
    %c96_107 = arith.constant 96 : index
    %312 = vector.load %arg32[%311, %c96_107] : memref<16x128xf32, #tpu.memory_space<vmem>>, vector<2x32xf32>
    tpu.vector_store %arg32[%311, %c96_107], %308 {strides = array<i32>} : memref<16x128xf32, #tpu.memory_space<vmem>>, vector<2x32xf32>,
    %313 = arith.index_cast %306 : i32 to index
    %c32_108 = arith.constant 32 : index
    %314 = vector.load %arg32[%313, %c32_108] : memref<16x128xf32, #tpu.memory_space<vmem>>, vector<2x32xf32>
    tpu.vector_store %arg32[%313, %c32_108], %308 {strides = array<i32>} : memref<16x128xf32, #tpu.memory_space<vmem>>, vector<2x32xf32>,
    %315 = arith.index_cast %306 : i32 to index
    %c64_109 = arith.constant 64 : index
    %316 = vector.load %arg32[%315, %c64_109] : memref<16x128xf32, #tpu.memory_space<vmem>>, vector<2x32xf32>
    tpu.vector_store %arg32[%315, %c64_109], %307 {strides = array<i32>} : memref<16x128xf32, #tpu.memory_space<vmem>>, vector<2x32xf32>,
    %c1_i32_110 = arith.constant 1 : i32
    %c2_i32_111 = arith.constant 2 : i32
    %317 = arith.muli %c1_i32_110, %c2_i32_111 : i32
    %318 = arith.index_cast %317 : i32 to index
    %c0_112 = arith.constant 0 : index
    %319 = vector.load %arg31[%318, %c0_112] : memref<16x256xf32, #tpu.memory_space<vmem>>, vector<2x256xf32>
    %cst_113 = arith.constant dense<0.000000e+00> : vector<2x256xf32>
    %320 = tpu.matmul %304, %282, %cst_113 {dimension_numbers = #tpu.dot_dimension_numbers<[1], [0], [0], [1], [0, 0, 1, 1], [], []>} : vector<2x64xf32>, vector<64x256xf32>, vector<2x256xf32> -> vector<2x256xf32>
    %321 = arith.addf %319, %320 : vector<2x256xf32>
    %322 = vector.extract_strided_slice %321 {offsets = [0, 0], sizes = [2, 192], strides = [1, 1]} : vector<2x256xf32> to vector<2x192xf32>
    %323 = arith.negf %322 : vector<2x192xf32>
    %324 = math.exp %323 : vector<2x192xf32>
    %cst_114 = arith.constant 1.000000e+00 : f32
    %325 = vector.broadcast %cst_114 : f32 to vector<2x192xf32>
    %326 = arith.addf %325, %324 : vector<2x192xf32>
    %327 = arith.divf %325, %326 : vector<2x192xf32>
    %328 = vector.extract_strided_slice %327 {offsets = [0, 0], sizes = [2, 64], strides = [1, 1]} : vector<2x192xf32> to vector<2x64xf32>
    %329 = vector.extract_strided_slice %327 {offsets = [0, 64], sizes = [2, 64], strides = [1, 1]} : vector<2x192xf32> to vector<2x64xf32>
    %330 = vector.extract_strided_slice %327 {offsets = [0, 128], sizes = [2, 64], strides = [1, 1]} : vector<2x192xf32> to vector<2x64xf32>
    %331 = vector.extract_strided_slice %321 {offsets = [0, 192], sizes = [2, 64], strides = [1, 1]} : vector<2x256xf32> to vector<2x64xf32>
    %332 = math.tanh %331 : vector<2x64xf32>
    %333 = arith.mulf %329, %302 : vector<2x64xf32>
    %334 = arith.mulf %328, %332 : vector<2x64xf32>
    %335 = arith.addf %333, %334 : vector<2x64xf32>
    %336 = math.tanh %335 : vector<2x64xf32>
    %337 = arith.mulf %330, %336 : vector<2x64xf32>
    %c7_i32_115 = arith.constant 7 : i32
    %338 = arith.subi %c7_i32_115, %c1_i32_110 : i32
    %c2_i32_116 = arith.constant 2 : i32
    %339 = arith.muli %338, %c2_i32_116 : i32
    %340 = vector.extract_strided_slice %337 {offsets = [0, 0], sizes = [2, 32], strides = [1, 1]} : vector<2x64xf32> to vector<2x32xf32>
    %341 = vector.extract_strided_slice %337 {offsets = [0, 32], sizes = [2, 32], strides = [1, 1]} : vector<2x64xf32> to vector<2x32xf32>
    %342 = arith.index_cast %317 : i32 to index
    %c0_117 = arith.constant 0 : index
    %343 = vector.load %arg32[%342, %c0_117] : memref<16x128xf32, #tpu.memory_space<vmem>>, vector<2x32xf32>
    tpu.vector_store %arg32[%342, %c0_117], %340 {strides = array<i32>} : memref<16x128xf32, #tpu.memory_space<vmem>>, vector<2x32xf32>,
    %344 = arith.index_cast %317 : i32 to index
    %c96_118 = arith.constant 96 : index
    %345 = vector.load %arg32[%344, %c96_118] : memref<16x128xf32, #tpu.memory_space<vmem>>, vector<2x32xf32>
    tpu.vector_store %arg32[%344, %c96_118], %341 {strides = array<i32>} : memref<16x128xf32, #tpu.memory_space<vmem>>, vector<2x32xf32>,
    %346 = arith.index_cast %339 : i32 to index
    %c32_119 = arith.constant 32 : index
    %347 = vector.load %arg32[%346, %c32_119] : memref<16x128xf32, #tpu.memory_space<vmem>>, vector<2x32xf32>
    tpu.vector_store %arg32[%346, %c32_119], %341 {strides = array<i32>} : memref<16x128xf32, #tpu.memory_space<vmem>>, vector<2x32xf32>,
    %348 = arith.index_cast %339 : i32 to index
    %c64_120 = arith.constant 64 : index
    %349 = vector.load %arg32[%348, %c64_120] : memref<16x128xf32, #tpu.memory_space<vmem>>, vector<2x32xf32>
    tpu.vector_store %arg32[%348, %c64_120], %340 {strides = array<i32>} : memref<16x128xf32, #tpu.memory_space<vmem>>, vector<2x32xf32>,
    %c2_i32_121 = arith.constant 2 : i32
    %c2_i32_122 = arith.constant 2 : i32
    %350 = arith.muli %c2_i32_121, %c2_i32_122 : i32
    %351 = arith.index_cast %350 : i32 to index
    %c0_123 = arith.constant 0 : index
    %352 = vector.load %arg31[%351, %c0_123] : memref<16x256xf32, #tpu.memory_space<vmem>>, vector<2x256xf32>
    %cst_124 = arith.constant dense<0.000000e+00> : vector<2x256xf32>
    %353 = tpu.matmul %337, %282, %cst_124 {dimension_numbers = #tpu.dot_dimension_numbers<[1], [0], [0], [1], [0, 0, 1, 1], [], []>} : vector<2x64xf32>, vector<64x256xf32>, vector<2x256xf32> -> vector<2x256xf32>
    %354 = arith.addf %352, %353 : vector<2x256xf32>
    %355 = vector.extract_strided_slice %354 {offsets = [0, 0], sizes = [2, 192], strides = [1, 1]} : vector<2x256xf32> to vector<2x192xf32>
    %356 = arith.negf %355 : vector<2x192xf32>
    %357 = math.exp %356 : vector<2x192xf32>
    %cst_125 = arith.constant 1.000000e+00 : f32
    %358 = vector.broadcast %cst_125 : f32 to vector<2x192xf32>
    %359 = arith.addf %358, %357 : vector<2x192xf32>
    %360 = arith.divf %358, %359 : vector<2x192xf32>
    %361 = vector.extract_strided_slice %360 {offsets = [0, 0], sizes = [2, 64], strides = [1, 1]} : vector<2x192xf32> to vector<2x64xf32>
    %362 = vector.extract_strided_slice %360 {offsets = [0, 64], sizes = [2, 64], strides = [1, 1]} : vector<2x192xf32> to vector<2x64xf32>
    %363 = vector.extract_strided_slice %360 {offsets = [0, 128], sizes = [2, 64], strides = [1, 1]} : vector<2x192xf32> to vector<2x64xf32>
    %364 = vector.extract_strided_slice %354 {offsets = [0, 192], sizes = [2, 64], strides = [1, 1]} : vector<2x256xf32> to vector<2x64xf32>
    %365 = math.tanh %364 : vector<2x64xf32>
    %366 = arith.mulf %362, %335 : vector<2x64xf32>
    %367 = arith.mulf %361, %365 : vector<2x64xf32>
    %368 = arith.addf %366, %367 : vector<2x64xf32>
    %369 = math.tanh %368 : vector<2x64xf32>
    %370 = arith.mulf %363, %369 : vector<2x64xf32>
    %c7_i32_126 = arith.constant 7 : i32
    %371 = arith.subi %c7_i32_126, %c2_i32_121 : i32
    %c2_i32_127 = arith.constant 2 : i32
    %372 = arith.muli %371, %c2_i32_127 : i32
    %373 = vector.extract_strided_slice %370 {offsets = [0, 0], sizes = [2, 32], strides = [1, 1]} : vector<2x64xf32> to vector<2x32xf32>
    %374 = vector.extract_strided_slice %370 {offsets = [0, 32], sizes = [2, 32], strides = [1, 1]} : vector<2x64xf32> to vector<2x32xf32>
    %375 = arith.index_cast %350 : i32 to index
    %c0_128 = arith.constant 0 : index
    %376 = vector.load %arg32[%375, %c0_128] : memref<16x128xf32, #tpu.memory_space<vmem>>, vector<2x32xf32>
    tpu.vector_store %arg32[%375, %c0_128], %373 {strides = array<i32>} : memref<16x128xf32, #tpu.memory_space<vmem>>, vector<2x32xf32>,
    %377 = arith.index_cast %350 : i32 to index
    %c96_129 = arith.constant 96 : index
    %378 = vector.load %arg32[%377, %c96_129] : memref<16x128xf32, #tpu.memory_space<vmem>>, vector<2x32xf32>
    tpu.vector_store %arg32[%377, %c96_129], %374 {strides = array<i32>} : memref<16x128xf32, #tpu.memory_space<vmem>>, vector<2x32xf32>,
    %379 = arith.index_cast %372 : i32 to index
    %c32_130 = arith.constant 32 : index
    %380 = vector.load %arg32[%379, %c32_130] : memref<16x128xf32, #tpu.memory_space<vmem>>, vector<2x32xf32>
    tpu.vector_store %arg32[%379, %c32_130], %374 {strides = array<i32>} : memref<16x128xf32, #tpu.memory_space<vmem>>, vector<2x32xf32>,
    %381 = arith.index_cast %372 : i32 to index
    %c64_131 = arith.constant 64 : index
    %382 = vector.load %arg32[%381, %c64_131] : memref<16x128xf32, #tpu.memory_space<vmem>>, vector<2x32xf32>
    tpu.vector_store %arg32[%381, %c64_131], %373 {strides = array<i32>} : memref<16x128xf32, #tpu.memory_space<vmem>>, vector<2x32xf32>,
    %c3_i32_132 = arith.constant 3 : i32
    %c2_i32_133 = arith.constant 2 : i32
    %383 = arith.muli %c3_i32_132, %c2_i32_133 : i32
    %384 = arith.index_cast %383 : i32 to index
    %c0_134 = arith.constant 0 : index
    %385 = vector.load %arg31[%384, %c0_134] : memref<16x256xf32, #tpu.memory_space<vmem>>, vector<2x256xf32>
    %cst_135 = arith.constant dense<0.000000e+00> : vector<2x256xf32>
    %386 = tpu.matmul %370, %282, %cst_135 {dimension_numbers = #tpu.dot_dimension_numbers<[1], [0], [0], [1], [0, 0, 1, 1], [], []>} : vector<2x64xf32>, vector<64x256xf32>, vector<2x256xf32> -> vector<2x256xf32>
    %387 = arith.addf %385, %386 : vector<2x256xf32>
    %388 = vector.extract_strided_slice %387 {offsets = [0, 0], sizes = [2, 192], strides = [1, 1]} : vector<2x256xf32> to vector<2x192xf32>
    %389 = arith.negf %388 : vector<2x192xf32>
    %390 = math.exp %389 : vector<2x192xf32>
    %cst_136 = arith.constant 1.000000e+00 : f32
    %391 = vector.broadcast %cst_136 : f32 to vector<2x192xf32>
    %392 = arith.addf %391, %390 : vector<2x192xf32>
    %393 = arith.divf %391, %392 : vector<2x192xf32>
    %394 = vector.extract_strided_slice %393 {offsets = [0, 0], sizes = [2, 64], strides = [1, 1]} : vector<2x192xf32> to vector<2x64xf32>
    %395 = vector.extract_strided_slice %393 {offsets = [0, 64], sizes = [2, 64], strides = [1, 1]} : vector<2x192xf32> to vector<2x64xf32>
    %396 = vector.extract_strided_slice %393 {offsets = [0, 128], sizes = [2, 64], strides = [1, 1]} : vector<2x192xf32> to vector<2x64xf32>
    %397 = vector.extract_strided_slice %387 {offsets = [0, 192], sizes = [2, 64], strides = [1, 1]} : vector<2x256xf32> to vector<2x64xf32>
    %398 = math.tanh %397 : vector<2x64xf32>
    %399 = arith.mulf %395, %368 : vector<2x64xf32>
    %400 = arith.mulf %394, %398 : vector<2x64xf32>
    %401 = arith.addf %399, %400 : vector<2x64xf32>
    %402 = math.tanh %401 : vector<2x64xf32>
    %403 = arith.mulf %396, %402 : vector<2x64xf32>
    %c7_i32_137 = arith.constant 7 : i32
    %404 = arith.subi %c7_i32_137, %c3_i32_132 : i32
    %c2_i32_138 = arith.constant 2 : i32
    %405 = arith.muli %404, %c2_i32_138 : i32
    %406 = vector.extract_strided_slice %403 {offsets = [0, 0], sizes = [2, 32], strides = [1, 1]} : vector<2x64xf32> to vector<2x32xf32>
    %407 = vector.extract_strided_slice %403 {offsets = [0, 32], sizes = [2, 32], strides = [1, 1]} : vector<2x64xf32> to vector<2x32xf32>
    %408 = arith.index_cast %383 : i32 to index
    %c0_139 = arith.constant 0 : index
    %409 = vector.load %arg32[%408, %c0_139] : memref<16x128xf32, #tpu.memory_space<vmem>>, vector<2x32xf32>
    tpu.vector_store %arg32[%408, %c0_139], %406 {strides = array<i32>} : memref<16x128xf32, #tpu.memory_space<vmem>>, vector<2x32xf32>,
    %410 = arith.index_cast %383 : i32 to index
    %c96_140 = arith.constant 96 : index
    %411 = vector.load %arg32[%410, %c96_140] : memref<16x128xf32, #tpu.memory_space<vmem>>, vector<2x32xf32>
    tpu.vector_store %arg32[%410, %c96_140], %407 {strides = array<i32>} : memref<16x128xf32, #tpu.memory_space<vmem>>, vector<2x32xf32>,
    %412 = arith.index_cast %405 : i32 to index
    %c32_141 = arith.constant 32 : index
    %413 = vector.load %arg32[%412, %c32_141] : memref<16x128xf32, #tpu.memory_space<vmem>>, vector<2x32xf32>
    tpu.vector_store %arg32[%412, %c32_141], %407 {strides = array<i32>} : memref<16x128xf32, #tpu.memory_space<vmem>>, vector<2x32xf32>,
    %414 = arith.index_cast %405 : i32 to index
    %c64_142 = arith.constant 64 : index
    %415 = vector.load %arg32[%414, %c64_142] : memref<16x128xf32, #tpu.memory_space<vmem>>, vector<2x32xf32>
    tpu.vector_store %arg32[%414, %c64_142], %406 {strides = array<i32>} : memref<16x128xf32, #tpu.memory_space<vmem>>, vector<2x32xf32>,
    %c4_i32_143 = arith.constant 4 : i32
    %c2_i32_144 = arith.constant 2 : i32
    %416 = arith.muli %c4_i32_143, %c2_i32_144 : i32
    %417 = arith.index_cast %416 : i32 to index
    %c0_145 = arith.constant 0 : index
    %418 = vector.load %arg31[%417, %c0_145] : memref<16x256xf32, #tpu.memory_space<vmem>>, vector<2x256xf32>
    %cst_146 = arith.constant dense<0.000000e+00> : vector<2x256xf32>
    %419 = tpu.matmul %403, %282, %cst_146 {dimension_numbers = #tpu.dot_dimension_numbers<[1], [0], [0], [1], [0, 0, 1, 1], [], []>} : vector<2x64xf32>, vector<64x256xf32>, vector<2x256xf32> -> vector<2x256xf32>
    %420 = arith.addf %418, %419 : vector<2x256xf32>
    %421 = vector.extract_strided_slice %420 {offsets = [0, 0], sizes = [2, 192], strides = [1, 1]} : vector<2x256xf32> to vector<2x192xf32>
    %422 = arith.negf %421 : vector<2x192xf32>
    %423 = math.exp %422 : vector<2x192xf32>
    %cst_147 = arith.constant 1.000000e+00 : f32
    %424 = vector.broadcast %cst_147 : f32 to vector<2x192xf32>
    %425 = arith.addf %424, %423 : vector<2x192xf32>
    %426 = arith.divf %424, %425 : vector<2x192xf32>
    %427 = vector.extract_strided_slice %426 {offsets = [0, 0], sizes = [2, 64], strides = [1, 1]} : vector<2x192xf32> to vector<2x64xf32>
    %428 = vector.extract_strided_slice %426 {offsets = [0, 64], sizes = [2, 64], strides = [1, 1]} : vector<2x192xf32> to vector<2x64xf32>
    %429 = vector.extract_strided_slice %426 {offsets = [0, 128], sizes = [2, 64], strides = [1, 1]} : vector<2x192xf32> to vector<2x64xf32>
    %430 = vector.extract_strided_slice %420 {offsets = [0, 192], sizes = [2, 64], strides = [1, 1]} : vector<2x256xf32> to vector<2x64xf32>
    %431 = math.tanh %430 : vector<2x64xf32>
    %432 = arith.mulf %428, %401 : vector<2x64xf32>
    %433 = arith.mulf %427, %431 : vector<2x64xf32>
    %434 = arith.addf %432, %433 : vector<2x64xf32>
    %435 = math.tanh %434 : vector<2x64xf32>
    %436 = arith.mulf %429, %435 : vector<2x64xf32>
    %c7_i32_148 = arith.constant 7 : i32
    %437 = arith.subi %c7_i32_148, %c4_i32_143 : i32
    %c2_i32_149 = arith.constant 2 : i32
    %438 = arith.muli %437, %c2_i32_149 : i32
    %439 = vector.extract_strided_slice %436 {offsets = [0, 0], sizes = [2, 32], strides = [1, 1]} : vector<2x64xf32> to vector<2x32xf32>
    %440 = vector.extract_strided_slice %436 {offsets = [0, 32], sizes = [2, 32], strides = [1, 1]} : vector<2x64xf32> to vector<2x32xf32>
    %441 = arith.index_cast %416 : i32 to index
    %c0_150 = arith.constant 0 : index
    %442 = vector.load %arg32[%441, %c0_150] : memref<16x128xf32, #tpu.memory_space<vmem>>, vector<2x32xf32>
    tpu.vector_store %arg32[%441, %c0_150], %439 {strides = array<i32>} : memref<16x128xf32, #tpu.memory_space<vmem>>, vector<2x32xf32>,
    %443 = arith.index_cast %416 : i32 to index
    %c96_151 = arith.constant 96 : index
    %444 = vector.load %arg32[%443, %c96_151] : memref<16x128xf32, #tpu.memory_space<vmem>>, vector<2x32xf32>
    tpu.vector_store %arg32[%443, %c96_151], %440 {strides = array<i32>} : memref<16x128xf32, #tpu.memory_space<vmem>>, vector<2x32xf32>,
    %445 = arith.index_cast %438 : i32 to index
    %c32_152 = arith.constant 32 : index
    %446 = vector.load %arg32[%445, %c32_152] : memref<16x128xf32, #tpu.memory_space<vmem>>, vector<2x32xf32>
    tpu.vector_store %arg32[%445, %c32_152], %440 {strides = array<i32>} : memref<16x128xf32, #tpu.memory_space<vmem>>, vector<2x32xf32>,
    %447 = arith.index_cast %438 : i32 to index
    %c64_153 = arith.constant 64 : index
    %448 = vector.load %arg32[%447, %c64_153] : memref<16x128xf32, #tpu.memory_space<vmem>>, vector<2x32xf32>
    tpu.vector_store %arg32[%447, %c64_153], %439 {strides = array<i32>} : memref<16x128xf32, #tpu.memory_space<vmem>>, vector<2x32xf32>,
    %c5_i32_154 = arith.constant 5 : i32
    %c2_i32_155 = arith.constant 2 : i32
    %449 = arith.muli %c5_i32_154, %c2_i32_155 : i32
    %450 = arith.index_cast %449 : i32 to index
    %c0_156 = arith.constant 0 : index
    %451 = vector.load %arg31[%450, %c0_156] : memref<16x256xf32, #tpu.memory_space<vmem>>, vector<2x256xf32>
    %cst_157 = arith.constant dense<0.000000e+00> : vector<2x256xf32>
    %452 = tpu.matmul %436, %282, %cst_157 {dimension_numbers = #tpu.dot_dimension_numbers<[1], [0], [0], [1], [0, 0, 1, 1], [], []>} : vector<2x64xf32>, vector<64x256xf32>, vector<2x256xf32> -> vector<2x256xf32>
    %453 = arith.addf %451, %452 : vector<2x256xf32>
    %454 = vector.extract_strided_slice %453 {offsets = [0, 0], sizes = [2, 192], strides = [1, 1]} : vector<2x256xf32> to vector<2x192xf32>
    %455 = arith.negf %454 : vector<2x192xf32>
    %456 = math.exp %455 : vector<2x192xf32>
    %cst_158 = arith.constant 1.000000e+00 : f32
    %457 = vector.broadcast %cst_158 : f32 to vector<2x192xf32>
    %458 = arith.addf %457, %456 : vector<2x192xf32>
    %459 = arith.divf %457, %458 : vector<2x192xf32>
    %460 = vector.extract_strided_slice %459 {offsets = [0, 0], sizes = [2, 64], strides = [1, 1]} : vector<2x192xf32> to vector<2x64xf32>
    %461 = vector.extract_strided_slice %459 {offsets = [0, 64], sizes = [2, 64], strides = [1, 1]} : vector<2x192xf32> to vector<2x64xf32>
    %462 = vector.extract_strided_slice %459 {offsets = [0, 128], sizes = [2, 64], strides = [1, 1]} : vector<2x192xf32> to vector<2x64xf32>
    %463 = vector.extract_strided_slice %453 {offsets = [0, 192], sizes = [2, 64], strides = [1, 1]} : vector<2x256xf32> to vector<2x64xf32>
    %464 = math.tanh %463 : vector<2x64xf32>
    %465 = arith.mulf %461, %434 : vector<2x64xf32>
    %466 = arith.mulf %460, %464 : vector<2x64xf32>
    %467 = arith.addf %465, %466 : vector<2x64xf32>
    %468 = math.tanh %467 : vector<2x64xf32>
    %469 = arith.mulf %462, %468 : vector<2x64xf32>
    %c7_i32_159 = arith.constant 7 : i32
    %470 = arith.subi %c7_i32_159, %c5_i32_154 : i32
    %c2_i32_160 = arith.constant 2 : i32
    %471 = arith.muli %470, %c2_i32_160 : i32
    %472 = vector.extract_strided_slice %469 {offsets = [0, 0], sizes = [2, 32], strides = [1, 1]} : vector<2x64xf32> to vector<2x32xf32>
    %473 = vector.extract_strided_slice %469 {offsets = [0, 32], sizes = [2, 32], strides = [1, 1]} : vector<2x64xf32> to vector<2x32xf32>
    %474 = arith.index_cast %449 : i32 to index
    %c0_161 = arith.constant 0 : index
    %475 = vector.load %arg32[%474, %c0_161] : memref<16x128xf32, #tpu.memory_space<vmem>>, vector<2x32xf32>
    tpu.vector_store %arg32[%474, %c0_161], %472 {strides = array<i32>} : memref<16x128xf32, #tpu.memory_space<vmem>>, vector<2x32xf32>,
    %476 = arith.index_cast %449 : i32 to index
    %c96_162 = arith.constant 96 : index
    %477 = vector.load %arg32[%476, %c96_162] : memref<16x128xf32, #tpu.memory_space<vmem>>, vector<2x32xf32>
    tpu.vector_store %arg32[%476, %c96_162], %473 {strides = array<i32>} : memref<16x128xf32, #tpu.memory_space<vmem>>, vector<2x32xf32>,
    %478 = arith.index_cast %471 : i32 to index
    %c32_163 = arith.constant 32 : index
    %479 = vector.load %arg32[%478, %c32_163] : memref<16x128xf32, #tpu.memory_space<vmem>>, vector<2x32xf32>
    tpu.vector_store %arg32[%478, %c32_163], %473 {strides = array<i32>} : memref<16x128xf32, #tpu.memory_space<vmem>>, vector<2x32xf32>,
    %480 = arith.index_cast %471 : i32 to index
    %c64_164 = arith.constant 64 : index
    %481 = vector.load %arg32[%480, %c64_164] : memref<16x128xf32, #tpu.memory_space<vmem>>, vector<2x32xf32>
    tpu.vector_store %arg32[%480, %c64_164], %472 {strides = array<i32>} : memref<16x128xf32, #tpu.memory_space<vmem>>, vector<2x32xf32>,
    %c6_i32_165 = arith.constant 6 : i32
    %c2_i32_166 = arith.constant 2 : i32
    %482 = arith.muli %c6_i32_165, %c2_i32_166 : i32
    %483 = arith.index_cast %482 : i32 to index
    %c0_167 = arith.constant 0 : index
    %484 = vector.load %arg31[%483, %c0_167] : memref<16x256xf32, #tpu.memory_space<vmem>>, vector<2x256xf32>
    %cst_168 = arith.constant dense<0.000000e+00> : vector<2x256xf32>
    %485 = tpu.matmul %469, %282, %cst_168 {dimension_numbers = #tpu.dot_dimension_numbers<[1], [0], [0], [1], [0, 0, 1, 1], [], []>} : vector<2x64xf32>, vector<64x256xf32>, vector<2x256xf32> -> vector<2x256xf32>
    %486 = arith.addf %484, %485 : vector<2x256xf32>
    %487 = vector.extract_strided_slice %486 {offsets = [0, 0], sizes = [2, 192], strides = [1, 1]} : vector<2x256xf32> to vector<2x192xf32>
    %488 = arith.negf %487 : vector<2x192xf32>
    %489 = math.exp %488 : vector<2x192xf32>
    %cst_169 = arith.constant 1.000000e+00 : f32
    %490 = vector.broadcast %cst_169 : f32 to vector<2x192xf32>
    %491 = arith.addf %490, %489 : vector<2x192xf32>
    %492 = arith.divf %490, %491 : vector<2x192xf32>
    %493 = vector.extract_strided_slice %492 {offsets = [0, 0], sizes = [2, 64], strides = [1, 1]} : vector<2x192xf32> to vector<2x64xf32>
    %494 = vector.extract_strided_slice %492 {offsets = [0, 64], sizes = [2, 64], strides = [1, 1]} : vector<2x192xf32> to vector<2x64xf32>
    %495 = vector.extract_strided_slice %492 {offsets = [0, 128], sizes = [2, 64], strides = [1, 1]} : vector<2x192xf32> to vector<2x64xf32>
    %496 = vector.extract_strided_slice %486 {offsets = [0, 192], sizes = [2, 64], strides = [1, 1]} : vector<2x256xf32> to vector<2x64xf32>
    %497 = math.tanh %496 : vector<2x64xf32>
    %498 = arith.mulf %494, %467 : vector<2x64xf32>
    %499 = arith.mulf %493, %497 : vector<2x64xf32>
    %500 = arith.addf %498, %499 : vector<2x64xf32>
    %501 = math.tanh %500 : vector<2x64xf32>
    %502 = arith.mulf %495, %501 : vector<2x64xf32>
    %c7_i32_170 = arith.constant 7 : i32
    %503 = arith.subi %c7_i32_170, %c6_i32_165 : i32
    %c2_i32_171 = arith.constant 2 : i32
    %504 = arith.muli %503, %c2_i32_171 : i32
    %505 = vector.extract_strided_slice %502 {offsets = [0, 0], sizes = [2, 32], strides = [1, 1]} : vector<2x64xf32> to vector<2x32xf32>
    %506 = vector.extract_strided_slice %502 {offsets = [0, 32], sizes = [2, 32], strides = [1, 1]} : vector<2x64xf32> to vector<2x32xf32>
    %507 = arith.index_cast %482 : i32 to index
    %c0_172 = arith.constant 0 : index
    %508 = vector.load %arg32[%507, %c0_172] : memref<16x128xf32, #tpu.memory_space<vmem>>, vector<2x32xf32>
    tpu.vector_store %arg32[%507, %c0_172], %505 {strides = array<i32>} : memref<16x128xf32, #tpu.memory_space<vmem>>, vector<2x32xf32>,
    %509 = arith.index_cast %482 : i32 to index
    %c96_173 = arith.constant 96 : index
    %510 = vector.load %arg32[%509, %c96_173] : memref<16x128xf32, #tpu.memory_space<vmem>>, vector<2x32xf32>
    tpu.vector_store %arg32[%509, %c96_173], %506 {strides = array<i32>} : memref<16x128xf32, #tpu.memory_space<vmem>>, vector<2x32xf32>,
    %511 = arith.index_cast %504 : i32 to index
    %c32_174 = arith.constant 32 : index
    %512 = vector.load %arg32[%511, %c32_174] : memref<16x128xf32, #tpu.memory_space<vmem>>, vector<2x32xf32>
    tpu.vector_store %arg32[%511, %c32_174], %506 {strides = array<i32>} : memref<16x128xf32, #tpu.memory_space<vmem>>, vector<2x32xf32>,
    %513 = arith.index_cast %504 : i32 to index
    %c64_175 = arith.constant 64 : index
    %514 = vector.load %arg32[%513, %c64_175] : memref<16x128xf32, #tpu.memory_space<vmem>>, vector<2x32xf32>
    tpu.vector_store %arg32[%513, %c64_175], %505 {strides = array<i32>} : memref<16x128xf32, #tpu.memory_space<vmem>>, vector<2x32xf32>,
    %c7_i32_176 = arith.constant 7 : i32
    %c2_i32_177 = arith.constant 2 : i32
    %515 = arith.muli %c7_i32_176, %c2_i32_177 : i32
    %516 = arith.index_cast %515 : i32 to index
    %c0_178 = arith.constant 0 : index
    %517 = vector.load %arg31[%516, %c0_178] : memref<16x256xf32, #tpu.memory_space<vmem>>, vector<2x256xf32>
    %cst_179 = arith.constant dense<0.000000e+00> : vector<2x256xf32>
    %518 = tpu.matmul %502, %282, %cst_179 {dimension_numbers = #tpu.dot_dimension_numbers<[1], [0], [0], [1], [0, 0, 1, 1], [], []>} : vector<2x64xf32>, vector<64x256xf32>, vector<2x256xf32> -> vector<2x256xf32>
    %519 = arith.addf %517, %518 : vector<2x256xf32>
    %520 = vector.extract_strided_slice %519 {offsets = [0, 0], sizes = [2, 192], strides = [1, 1]} : vector<2x256xf32> to vector<2x192xf32>
    %521 = arith.negf %520 : vector<2x192xf32>
    %522 = math.exp %521 : vector<2x192xf32>
    %cst_180 = arith.constant 1.000000e+00 : f32
    %523 = vector.broadcast %cst_180 : f32 to vector<2x192xf32>
    %524 = arith.addf %523, %522 : vector<2x192xf32>
    %525 = arith.divf %523, %524 : vector<2x192xf32>
    %526 = vector.extract_strided_slice %525 {offsets = [0, 0], sizes = [2, 64], strides = [1, 1]} : vector<2x192xf32> to vector<2x64xf32>
    %527 = vector.extract_strided_slice %525 {offsets = [0, 64], sizes = [2, 64], strides = [1, 1]} : vector<2x192xf32> to vector<2x64xf32>
    %528 = vector.extract_strided_slice %525 {offsets = [0, 128], sizes = [2, 64], strides = [1, 1]} : vector<2x192xf32> to vector<2x64xf32>
    %529 = vector.extract_strided_slice %519 {offsets = [0, 192], sizes = [2, 64], strides = [1, 1]} : vector<2x256xf32> to vector<2x64xf32>
    %530 = math.tanh %529 : vector<2x64xf32>
    %531 = arith.mulf %527, %500 : vector<2x64xf32>
    %532 = arith.mulf %526, %530 : vector<2x64xf32>
    %533 = arith.addf %531, %532 : vector<2x64xf32>
    %534 = math.tanh %533 : vector<2x64xf32>
    %535 = arith.mulf %528, %534 : vector<2x64xf32>
    %c7_i32_181 = arith.constant 7 : i32
    %536 = arith.subi %c7_i32_181, %c7_i32_176 : i32
    %c2_i32_182 = arith.constant 2 : i32
    %537 = arith.muli %536, %c2_i32_182 : i32
    %538 = vector.extract_strided_slice %535 {offsets = [0, 0], sizes = [2, 32], strides = [1, 1]} : vector<2x64xf32> to vector<2x32xf32>
    %539 = vector.extract_strided_slice %535 {offsets = [0, 32], sizes = [2, 32], strides = [1, 1]} : vector<2x64xf32> to vector<2x32xf32>
    %540 = arith.index_cast %515 : i32 to index
    %c0_183 = arith.constant 0 : index
    %541 = vector.load %arg32[%540, %c0_183] : memref<16x128xf32, #tpu.memory_space<vmem>>, vector<2x32xf32>
    tpu.vector_store %arg32[%540, %c0_183], %538 {strides = array<i32>} : memref<16x128xf32, #tpu.memory_space<vmem>>, vector<2x32xf32>,
    %542 = arith.index_cast %515 : i32 to index
    %c96_184 = arith.constant 96 : index
    %543 = vector.load %arg32[%542, %c96_184] : memref<16x128xf32, #tpu.memory_space<vmem>>, vector<2x32xf32>
    tpu.vector_store %arg32[%542, %c96_184], %539 {strides = array<i32>} : memref<16x128xf32, #tpu.memory_space<vmem>>, vector<2x32xf32>,
    %544 = arith.index_cast %537 : i32 to index
    %c32_185 = arith.constant 32 : index
    %545 = vector.load %arg32[%544, %c32_185] : memref<16x128xf32, #tpu.memory_space<vmem>>, vector<2x32xf32>
    tpu.vector_store %arg32[%544, %c32_185], %539 {strides = array<i32>} : memref<16x128xf32, #tpu.memory_space<vmem>>, vector<2x32xf32>,
    %546 = arith.index_cast %537 : i32 to index
    %c64_186 = arith.constant 64 : index
    %547 = vector.load %arg32[%546, %c64_186] : memref<16x128xf32, #tpu.memory_space<vmem>>, vector<2x32xf32>
    tpu.vector_store %arg32[%546, %c64_186], %538 {strides = array<i32>} : memref<16x128xf32, #tpu.memory_space<vmem>>, vector<2x32xf32>,
    %c8_i32_187 = arith.constant 8 : i32
    %c0_188 = arith.constant 0 : index
    %c0_189 = arith.constant 0 : index
    %548 = vector.load %arg32[%c0_188, %c0_189] : memref<16x128xf32, #tpu.memory_space<vmem>>, vector<16x128xf32>
    %c0_190 = arith.constant 0 : index
    %c0_191 = arith.constant 0 : index
    %549 = vector.load %arg7[%c0_190, %c0_191] : memref<128x256xf32, #tpu.memory_space<vmem>>, vector<128x256xf32>
    %cst_192 = arith.constant dense<0.000000e+00> : vector<16x256xf32>
    %550 = tpu.matmul %548, %549, %cst_192 {dimension_numbers = #tpu.dot_dimension_numbers<[1], [0], [0], [1], [0, 0, 1, 1], [], []>} : vector<16x128xf32>, vector<128x256xf32>, vector<16x256xf32> -> vector<16x256xf32>
    %c0_193 = arith.constant 0 : index
    %c0_194 = arith.constant 0 : index
    %551 = vector.load %arg9[%c0_193, %c0_194] : memref<1x256xf32, #tpu.memory_space<vmem>>, vector<1x256xf32>
    %552 = vector.shape_cast %551 : vector<1x256xf32> to vector<1x256xf32>
    %553 = vector.broadcast %552 : vector<1x256xf32> to vector<16x256xf32>
    %554 = arith.addf %550, %553 : vector<16x256xf32>
    %c0_195 = arith.constant 0 : index
    %c0_196 = arith.constant 0 : index
    %555 = vector.load %arg31[%c0_195, %c0_196] : memref<16x256xf32, #tpu.memory_space<vmem>>, vector<16x256xf32>
    tpu.vector_store %arg31[%c0_195, %c0_196], %554 {strides = array<i32>} : memref<16x256xf32, #tpu.memory_space<vmem>>, vector<16x256xf32>,
    %c0_197 = arith.constant 0 : index
    %c0_198 = arith.constant 0 : index
    %556 = vector.load %arg8[%c0_197, %c0_198] : memref<64x256xf32, #tpu.memory_space<vmem>>, vector<64x256xf32>
    %cst_199 = arith.constant 0.000000e+00 : f32
    %557 = vector.broadcast %cst_199 : f32 to vector<2x64xf32>
    %c0_i32_200 = arith.constant 0 : i32
    %c2_i32_201 = arith.constant 2 : i32
    %558 = arith.muli %c0_i32_200, %c2_i32_201 : i32
    %559 = arith.index_cast %558 : i32 to index
    %c0_202 = arith.constant 0 : index
    %560 = vector.load %arg31[%559, %c0_202] : memref<16x256xf32, #tpu.memory_space<vmem>>, vector<2x256xf32>
    %cst_203 = arith.constant dense<0.000000e+00> : vector<2x256xf32>
    %561 = tpu.matmul %557, %556, %cst_203 {dimension_numbers = #tpu.dot_dimension_numbers<[1], [0], [0], [1], [0, 0, 1, 1], [], []>} : vector<2x64xf32>, vector<64x256xf32>, vector<2x256xf32> -> vector<2x256xf32>
    %562 = arith.addf %560, %561 : vector<2x256xf32>
    %563 = vector.extract_strided_slice %562 {offsets = [0, 0], sizes = [2, 192], strides = [1, 1]} : vector<2x256xf32> to vector<2x192xf32>
    %564 = arith.negf %563 : vector<2x192xf32>
    %565 = math.exp %564 : vector<2x192xf32>
    %cst_204 = arith.constant 1.000000e+00 : f32
    %566 = vector.broadcast %cst_204 : f32 to vector<2x192xf32>
    %567 = arith.addf %566, %565 : vector<2x192xf32>
    %568 = arith.divf %566, %567 : vector<2x192xf32>
    %569 = vector.extract_strided_slice %568 {offsets = [0, 0], sizes = [2, 64], strides = [1, 1]} : vector<2x192xf32> to vector<2x64xf32>
    %570 = vector.extract_strided_slice %568 {offsets = [0, 64], sizes = [2, 64], strides = [1, 1]} : vector<2x192xf32> to vector<2x64xf32>
    %571 = vector.extract_strided_slice %568 {offsets = [0, 128], sizes = [2, 64], strides = [1, 1]} : vector<2x192xf32> to vector<2x64xf32>
    %572 = vector.extract_strided_slice %562 {offsets = [0, 192], sizes = [2, 64], strides = [1, 1]} : vector<2x256xf32> to vector<2x64xf32>
    %573 = math.tanh %572 : vector<2x64xf32>
    %574 = arith.mulf %570, %557 : vector<2x64xf32>
    %575 = arith.mulf %569, %573 : vector<2x64xf32>
    %576 = arith.addf %574, %575 : vector<2x64xf32>
    %577 = math.tanh %576 : vector<2x64xf32>
    %578 = arith.mulf %571, %577 : vector<2x64xf32>
    %c1_i32_205 = arith.constant 1 : i32
    %c2_i32_206 = arith.constant 2 : i32
    %579 = arith.muli %c1_i32_205, %c2_i32_206 : i32
    %580 = arith.index_cast %579 : i32 to index
    %c0_207 = arith.constant 0 : index
    %581 = vector.load %arg31[%580, %c0_207] : memref<16x256xf32, #tpu.memory_space<vmem>>, vector<2x256xf32>
    %cst_208 = arith.constant dense<0.000000e+00> : vector<2x256xf32>
    %582 = tpu.matmul %578, %556, %cst_208 {dimension_numbers = #tpu.dot_dimension_numbers<[1], [0], [0], [1], [0, 0, 1, 1], [], []>} : vector<2x64xf32>, vector<64x256xf32>, vector<2x256xf32> -> vector<2x256xf32>
    %583 = arith.addf %581, %582 : vector<2x256xf32>
    %584 = vector.extract_strided_slice %583 {offsets = [0, 0], sizes = [2, 192], strides = [1, 1]} : vector<2x256xf32> to vector<2x192xf32>
    %585 = arith.negf %584 : vector<2x192xf32>
    %586 = math.exp %585 : vector<2x192xf32>
    %cst_209 = arith.constant 1.000000e+00 : f32
    %587 = vector.broadcast %cst_209 : f32 to vector<2x192xf32>
    %588 = arith.addf %587, %586 : vector<2x192xf32>
    %589 = arith.divf %587, %588 : vector<2x192xf32>
    %590 = vector.extract_strided_slice %589 {offsets = [0, 0], sizes = [2, 64], strides = [1, 1]} : vector<2x192xf32> to vector<2x64xf32>
    %591 = vector.extract_strided_slice %589 {offsets = [0, 64], sizes = [2, 64], strides = [1, 1]} : vector<2x192xf32> to vector<2x64xf32>
    %592 = vector.extract_strided_slice %589 {offsets = [0, 128], sizes = [2, 64], strides = [1, 1]} : vector<2x192xf32> to vector<2x64xf32>
    %593 = vector.extract_strided_slice %583 {offsets = [0, 192], sizes = [2, 64], strides = [1, 1]} : vector<2x256xf32> to vector<2x64xf32>
    %594 = math.tanh %593 : vector<2x64xf32>
    %595 = arith.mulf %591, %576 : vector<2x64xf32>
    %596 = arith.mulf %590, %594 : vector<2x64xf32>
    %597 = arith.addf %595, %596 : vector<2x64xf32>
    %598 = math.tanh %597 : vector<2x64xf32>
    %599 = arith.mulf %592, %598 : vector<2x64xf32>
    %c2_i32_210 = arith.constant 2 : i32
    %c2_i32_211 = arith.constant 2 : i32
    %600 = arith.muli %c2_i32_210, %c2_i32_211 : i32
    %601 = arith.index_cast %600 : i32 to index
    %c0_212 = arith.constant 0 : index
    %602 = vector.load %arg31[%601, %c0_212] : memref<16x256xf32, #tpu.memory_space<vmem>>, vector<2x256xf32>
    %cst_213 = arith.constant dense<0.000000e+00> : vector<2x256xf32>
    %603 = tpu.matmul %599, %556, %cst_213 {dimension_numbers = #tpu.dot_dimension_numbers<[1], [0], [0], [1], [0, 0, 1, 1], [], []>} : vector<2x64xf32>, vector<64x256xf32>, vector<2x256xf32> -> vector<2x256xf32>
    %604 = arith.addf %602, %603 : vector<2x256xf32>
    %605 = vector.extract_strided_slice %604 {offsets = [0, 0], sizes = [2, 192], strides = [1, 1]} : vector<2x256xf32> to vector<2x192xf32>
    %606 = arith.negf %605 : vector<2x192xf32>
    %607 = math.exp %606 : vector<2x192xf32>
    %cst_214 = arith.constant 1.000000e+00 : f32
    %608 = vector.broadcast %cst_214 : f32 to vector<2x192xf32>
    %609 = arith.addf %608, %607 : vector<2x192xf32>
    %610 = arith.divf %608, %609 : vector<2x192xf32>
    %611 = vector.extract_strided_slice %610 {offsets = [0, 0], sizes = [2, 64], strides = [1, 1]} : vector<2x192xf32> to vector<2x64xf32>
    %612 = vector.extract_strided_slice %610 {offsets = [0, 64], sizes = [2, 64], strides = [1, 1]} : vector<2x192xf32> to vector<2x64xf32>
    %613 = vector.extract_strided_slice %610 {offsets = [0, 128], sizes = [2, 64], strides = [1, 1]} : vector<2x192xf32> to vector<2x64xf32>
    %614 = vector.extract_strided_slice %604 {offsets = [0, 192], sizes = [2, 64], strides = [1, 1]} : vector<2x256xf32> to vector<2x64xf32>
    %615 = math.tanh %614 : vector<2x64xf32>
    %616 = arith.mulf %612, %597 : vector<2x64xf32>
    %617 = arith.mulf %611, %615 : vector<2x64xf32>
    %618 = arith.addf %616, %617 : vector<2x64xf32>
    %619 = math.tanh %618 : vector<2x64xf32>
    %620 = arith.mulf %613, %619 : vector<2x64xf32>
    %c3_i32_215 = arith.constant 3 : i32
    %c2_i32_216 = arith.constant 2 : i32
    %621 = arith.muli %c3_i32_215, %c2_i32_216 : i32
    %622 = arith.index_cast %621 : i32 to index
    %c0_217 = arith.constant 0 : index
    %623 = vector.load %arg31[%622, %c0_217] : memref<16x256xf32, #tpu.memory_space<vmem>>, vector<2x256xf32>
    %cst_218 = arith.constant dense<0.000000e+00> : vector<2x256xf32>
    %624 = tpu.matmul %620, %556, %cst_218 {dimension_numbers = #tpu.dot_dimension_numbers<[1], [0], [0], [1], [0, 0, 1, 1], [], []>} : vector<2x64xf32>, vector<64x256xf32>, vector<2x256xf32> -> vector<2x256xf32>
    %625 = arith.addf %623, %624 : vector<2x256xf32>
    %626 = vector.extract_strided_slice %625 {offsets = [0, 0], sizes = [2, 192], strides = [1, 1]} : vector<2x256xf32> to vector<2x192xf32>
    %627 = arith.negf %626 : vector<2x192xf32>
    %628 = math.exp %627 : vector<2x192xf32>
    %cst_219 = arith.constant 1.000000e+00 : f32
    %629 = vector.broadcast %cst_219 : f32 to vector<2x192xf32>
    %630 = arith.addf %629, %628 : vector<2x192xf32>
    %631 = arith.divf %629, %630 : vector<2x192xf32>
    %632 = vector.extract_strided_slice %631 {offsets = [0, 0], sizes = [2, 64], strides = [1, 1]} : vector<2x192xf32> to vector<2x64xf32>
    %633 = vector.extract_strided_slice %631 {offsets = [0, 64], sizes = [2, 64], strides = [1, 1]} : vector<2x192xf32> to vector<2x64xf32>
    %634 = vector.extract_strided_slice %631 {offsets = [0, 128], sizes = [2, 64], strides = [1, 1]} : vector<2x192xf32> to vector<2x64xf32>
    %635 = vector.extract_strided_slice %625 {offsets = [0, 192], sizes = [2, 64], strides = [1, 1]} : vector<2x256xf32> to vector<2x64xf32>
    %636 = math.tanh %635 : vector<2x64xf32>
    %637 = arith.mulf %633, %618 : vector<2x64xf32>
    %638 = arith.mulf %632, %636 : vector<2x64xf32>
    %639 = arith.addf %637, %638 : vector<2x64xf32>
    %640 = math.tanh %639 : vector<2x64xf32>
    %641 = arith.mulf %634, %640 : vector<2x64xf32>
    %c4_i32_220 = arith.constant 4 : i32
    %c2_i32_221 = arith.constant 2 : i32
    %642 = arith.muli %c4_i32_220, %c2_i32_221 : i32
    %643 = arith.index_cast %642 : i32 to index
    %c0_222 = arith.constant 0 : index
    %644 = vector.load %arg31[%643, %c0_222] : memref<16x256xf32, #tpu.memory_space<vmem>>, vector<2x256xf32>
    %cst_223 = arith.constant dense<0.000000e+00> : vector<2x256xf32>
    %645 = tpu.matmul %641, %556, %cst_223 {dimension_numbers = #tpu.dot_dimension_numbers<[1], [0], [0], [1], [0, 0, 1, 1], [], []>} : vector<2x64xf32>, vector<64x256xf32>, vector<2x256xf32> -> vector<2x256xf32>
    %646 = arith.addf %644, %645 : vector<2x256xf32>
    %647 = vector.extract_strided_slice %646 {offsets = [0, 0], sizes = [2, 192], strides = [1, 1]} : vector<2x256xf32> to vector<2x192xf32>
    %648 = arith.negf %647 : vector<2x192xf32>
    %649 = math.exp %648 : vector<2x192xf32>
    %cst_224 = arith.constant 1.000000e+00 : f32
    %650 = vector.broadcast %cst_224 : f32 to vector<2x192xf32>
    %651 = arith.addf %650, %649 : vector<2x192xf32>
    %652 = arith.divf %650, %651 : vector<2x192xf32>
    %653 = vector.extract_strided_slice %652 {offsets = [0, 0], sizes = [2, 64], strides = [1, 1]} : vector<2x192xf32> to vector<2x64xf32>
    %654 = vector.extract_strided_slice %652 {offsets = [0, 64], sizes = [2, 64], strides = [1, 1]} : vector<2x192xf32> to vector<2x64xf32>
    %655 = vector.extract_strided_slice %652 {offsets = [0, 128], sizes = [2, 64], strides = [1, 1]} : vector<2x192xf32> to vector<2x64xf32>
    %656 = vector.extract_strided_slice %646 {offsets = [0, 192], sizes = [2, 64], strides = [1, 1]} : vector<2x256xf32> to vector<2x64xf32>
    %657 = math.tanh %656 : vector<2x64xf32>
    %658 = arith.mulf %654, %639 : vector<2x64xf32>
    %659 = arith.mulf %653, %657 : vector<2x64xf32>
    %660 = arith.addf %658, %659 : vector<2x64xf32>
    %661 = math.tanh %660 : vector<2x64xf32>
    %662 = arith.mulf %655, %661 : vector<2x64xf32>
    %c5_i32_225 = arith.constant 5 : i32
    %c2_i32_226 = arith.constant 2 : i32
    %663 = arith.muli %c5_i32_225, %c2_i32_226 : i32
    %664 = arith.index_cast %663 : i32 to index
    %c0_227 = arith.constant 0 : index
    %665 = vector.load %arg31[%664, %c0_227] : memref<16x256xf32, #tpu.memory_space<vmem>>, vector<2x256xf32>
    %cst_228 = arith.constant dense<0.000000e+00> : vector<2x256xf32>
    %666 = tpu.matmul %662, %556, %cst_228 {dimension_numbers = #tpu.dot_dimension_numbers<[1], [0], [0], [1], [0, 0, 1, 1], [], []>} : vector<2x64xf32>, vector<64x256xf32>, vector<2x256xf32> -> vector<2x256xf32>
    %667 = arith.addf %665, %666 : vector<2x256xf32>
    %668 = vector.extract_strided_slice %667 {offsets = [0, 0], sizes = [2, 192], strides = [1, 1]} : vector<2x256xf32> to vector<2x192xf32>
    %669 = arith.negf %668 : vector<2x192xf32>
    %670 = math.exp %669 : vector<2x192xf32>
    %cst_229 = arith.constant 1.000000e+00 : f32
    %671 = vector.broadcast %cst_229 : f32 to vector<2x192xf32>
    %672 = arith.addf %671, %670 : vector<2x192xf32>
    %673 = arith.divf %671, %672 : vector<2x192xf32>
    %674 = vector.extract_strided_slice %673 {offsets = [0, 0], sizes = [2, 64], strides = [1, 1]} : vector<2x192xf32> to vector<2x64xf32>
    %675 = vector.extract_strided_slice %673 {offsets = [0, 64], sizes = [2, 64], strides = [1, 1]} : vector<2x192xf32> to vector<2x64xf32>
    %676 = vector.extract_strided_slice %673 {offsets = [0, 128], sizes = [2, 64], strides = [1, 1]} : vector<2x192xf32> to vector<2x64xf32>
    %677 = vector.extract_strided_slice %667 {offsets = [0, 192], sizes = [2, 64], strides = [1, 1]} : vector<2x256xf32> to vector<2x64xf32>
    %678 = math.tanh %677 : vector<2x64xf32>
    %679 = arith.mulf %675, %660 : vector<2x64xf32>
    %680 = arith.mulf %674, %678 : vector<2x64xf32>
    %681 = arith.addf %679, %680 : vector<2x64xf32>
    %682 = math.tanh %681 : vector<2x64xf32>
    %683 = arith.mulf %676, %682 : vector<2x64xf32>
    %c6_i32_230 = arith.constant 6 : i32
    %c2_i32_231 = arith.constant 2 : i32
    %684 = arith.muli %c6_i32_230, %c2_i32_231 : i32
    %685 = arith.index_cast %684 : i32 to index
    %c0_232 = arith.constant 0 : index
    %686 = vector.load %arg31[%685, %c0_232] : memref<16x256xf32, #tpu.memory_space<vmem>>, vector<2x256xf32>
    %cst_233 = arith.constant dense<0.000000e+00> : vector<2x256xf32>
    %687 = tpu.matmul %683, %556, %cst_233 {dimension_numbers = #tpu.dot_dimension_numbers<[1], [0], [0], [1], [0, 0, 1, 1], [], []>} : vector<2x64xf32>, vector<64x256xf32>, vector<2x256xf32> -> vector<2x256xf32>
    %688 = arith.addf %686, %687 : vector<2x256xf32>
    %689 = vector.extract_strided_slice %688 {offsets = [0, 0], sizes = [2, 192], strides = [1, 1]} : vector<2x256xf32> to vector<2x192xf32>
    %690 = arith.negf %689 : vector<2x192xf32>
    %691 = math.exp %690 : vector<2x192xf32>
    %cst_234 = arith.constant 1.000000e+00 : f32
    %692 = vector.broadcast %cst_234 : f32 to vector<2x192xf32>
    %693 = arith.addf %692, %691 : vector<2x192xf32>
    %694 = arith.divf %692, %693 : vector<2x192xf32>
    %695 = vector.extract_strided_slice %694 {offsets = [0, 0], sizes = [2, 64], strides = [1, 1]} : vector<2x192xf32> to vector<2x64xf32>
    %696 = vector.extract_strided_slice %694 {offsets = [0, 64], sizes = [2, 64], strides = [1, 1]} : vector<2x192xf32> to vector<2x64xf32>
    %697 = vector.extract_strided_slice %694 {offsets = [0, 128], sizes = [2, 64], strides = [1, 1]} : vector<2x192xf32> to vector<2x64xf32>
    %698 = vector.extract_strided_slice %688 {offsets = [0, 192], sizes = [2, 64], strides = [1, 1]} : vector<2x256xf32> to vector<2x64xf32>
    %699 = math.tanh %698 : vector<2x64xf32>
    %700 = arith.mulf %696, %681 : vector<2x64xf32>
    %701 = arith.mulf %695, %699 : vector<2x64xf32>
    %702 = arith.addf %700, %701 : vector<2x64xf32>
    %703 = math.tanh %702 : vector<2x64xf32>
    %704 = arith.mulf %697, %703 : vector<2x64xf32>
    %c7_i32_235 = arith.constant 7 : i32
    %c2_i32_236 = arith.constant 2 : i32
    %705 = arith.muli %c7_i32_235, %c2_i32_236 : i32
    %706 = arith.index_cast %705 : i32 to index
    %c0_237 = arith.constant 0 : index
    %707 = vector.load %arg31[%706, %c0_237] : memref<16x256xf32, #tpu.memory_space<vmem>>, vector<2x256xf32>
    %cst_238 = arith.constant dense<0.000000e+00> : vector<2x256xf32>
    %708 = tpu.matmul %704, %556, %cst_238 {dimension_numbers = #tpu.dot_dimension_numbers<[1], [0], [0], [1], [0, 0, 1, 1], [], []>} : vector<2x64xf32>, vector<64x256xf32>, vector<2x256xf32> -> vector<2x256xf32>
    %709 = arith.addf %707, %708 : vector<2x256xf32>
    %710 = vector.extract_strided_slice %709 {offsets = [0, 0], sizes = [2, 192], strides = [1, 1]} : vector<2x256xf32> to vector<2x192xf32>
    %711 = arith.negf %710 : vector<2x192xf32>
    %712 = math.exp %711 : vector<2x192xf32>
    %cst_239 = arith.constant 1.000000e+00 : f32
    %713 = vector.broadcast %cst_239 : f32 to vector<2x192xf32>
    %714 = arith.addf %713, %712 : vector<2x192xf32>
    %715 = arith.divf %713, %714 : vector<2x192xf32>
    %716 = vector.extract_strided_slice %715 {offsets = [0, 0], sizes = [2, 64], strides = [1, 1]} : vector<2x192xf32> to vector<2x64xf32>
    %717 = vector.extract_strided_slice %715 {offsets = [0, 64], sizes = [2, 64], strides = [1, 1]} : vector<2x192xf32> to vector<2x64xf32>
    %718 = vector.extract_strided_slice %715 {offsets = [0, 128], sizes = [2, 64], strides = [1, 1]} : vector<2x192xf32> to vector<2x64xf32>
    %719 = vector.extract_strided_slice %709 {offsets = [0, 192], sizes = [2, 64], strides = [1, 1]} : vector<2x256xf32> to vector<2x64xf32>
    %720 = math.tanh %719 : vector<2x64xf32>
    %721 = arith.mulf %717, %702 : vector<2x64xf32>
    %722 = arith.mulf %716, %720 : vector<2x64xf32>
    %723 = arith.addf %721, %722 : vector<2x64xf32>
    %724 = math.tanh %723 : vector<2x64xf32>
    %725 = arith.mulf %718, %724 : vector<2x64xf32>
    %c8_i32_240 = arith.constant 8 : i32
    %c0_241 = arith.constant 0 : index
    %c0_242 = arith.constant 0 : index
    %726 = vector.load %arg10[%c0_241, %c0_242] : memref<64x64xf32, #tpu.memory_space<vmem>>, vector<64x64xf32>
    %c0_243 = arith.constant 0 : index
    %c0_244 = arith.constant 0 : index
    %727 = vector.load %arg12[%c0_243, %c0_244] : memref<64x64xf32, #tpu.memory_space<vmem>>, vector<64x64xf32>
    %c0_245 = arith.constant 0 : index
    %c0_246 = arith.constant 0 : index
    %728 = vector.load %arg11[%c0_245, %c0_246] : memref<1x64xf32, #tpu.memory_space<vmem>>, vector<1x64xf32>
    %c0_247 = arith.constant 0 : index
    %c0_248 = arith.constant 0 : index
    %729 = vector.load %arg13[%c0_247, %c0_248] : memref<1x64xf32, #tpu.memory_space<vmem>>, vector<1x64xf32>
    %cst_249 = arith.constant dense<0.000000e+00> : vector<2x64xf32>
    %730 = tpu.matmul %261, %726, %cst_249 {dimension_numbers = #tpu.dot_dimension_numbers<[1], [0], [0], [1], [0, 0, 1, 1], [], []>} : vector<2x64xf32>, vector<64x64xf32>, vector<2x64xf32> -> vector<2x64xf32>
    %731 = vector.broadcast %728 : vector<1x64xf32> to vector<2x64xf32>
    %732 = arith.addf %730, %731 : vector<2x64xf32>
    %cst_250 = arith.constant dense<0.000000e+00> : vector<2x64xf32>
    %733 = tpu.matmul %535, %726, %cst_250 {dimension_numbers = #tpu.dot_dimension_numbers<[1], [0], [0], [1], [0, 0, 1, 1], [], []>} : vector<2x64xf32>, vector<64x64xf32>, vector<2x64xf32> -> vector<2x64xf32>
    %734 = vector.broadcast %728 : vector<1x64xf32> to vector<2x64xf32>
    %735 = arith.addf %733, %734 : vector<2x64xf32>
    %cst_251 = arith.constant dense<0.000000e+00> : vector<2x64xf32>
    %736 = tpu.matmul %725, %726, %cst_251 {dimension_numbers = #tpu.dot_dimension_numbers<[1], [0], [0], [1], [0, 0, 1, 1], [], []>} : vector<2x64xf32>, vector<64x64xf32>, vector<2x64xf32> -> vector<2x64xf32>
    %737 = vector.broadcast %728 : vector<1x64xf32> to vector<2x64xf32>
    %738 = arith.addf %736, %737 : vector<2x64xf32>
    %cst_252 = arith.constant dense<0.000000e+00> : vector<2x64xf32>
    %739 = tpu.matmul %259, %727, %cst_252 {dimension_numbers = #tpu.dot_dimension_numbers<[1], [0], [0], [1], [0, 0, 1, 1], [], []>} : vector<2x64xf32>, vector<64x64xf32>, vector<2x64xf32> -> vector<2x64xf32>
    %740 = vector.broadcast %729 : vector<1x64xf32> to vector<2x64xf32>
    %741 = arith.addf %739, %740 : vector<2x64xf32>
    %cst_253 = arith.constant dense<0.000000e+00> : vector<2x64xf32>
    %742 = tpu.matmul %533, %727, %cst_253 {dimension_numbers = #tpu.dot_dimension_numbers<[1], [0], [0], [1], [0, 0, 1, 1], [], []>} : vector<2x64xf32>, vector<64x64xf32>, vector<2x64xf32> -> vector<2x64xf32>
    %743 = vector.broadcast %729 : vector<1x64xf32> to vector<2x64xf32>
    %744 = arith.addf %742, %743 : vector<2x64xf32>
    %cst_254 = arith.constant dense<0.000000e+00> : vector<2x64xf32>
    %745 = tpu.matmul %723, %727, %cst_254 {dimension_numbers = #tpu.dot_dimension_numbers<[1], [0], [0], [1], [0, 0, 1, 1], [], []>} : vector<2x64xf32>, vector<64x64xf32>, vector<2x64xf32> -> vector<2x64xf32>
    %746 = vector.broadcast %729 : vector<1x64xf32> to vector<2x64xf32>
    %747 = arith.addf %745, %746 : vector<2x64xf32>
    %c0_255 = arith.constant 0 : index
    %c0_256 = arith.constant 0 : index
    %748 = vector.load %arg14[%c0_255, %c0_256] : memref<8x256xf32, #tpu.memory_space<vmem>>, vector<8x256xf32>
    %c0_257 = arith.constant 0 : index
    %c0_258 = arith.constant 0 : index
    %749 = vector.load %arg15[%c0_257, %c0_258] : memref<64x256xf32, #tpu.memory_space<vmem>>, vector<64x256xf32>
    %c0_259 = arith.constant 0 : index
    %c0_260 = arith.constant 0 : index
    %750 = vector.load %arg17[%c0_259, %c0_260] : memref<64x256xf32, #tpu.memory_space<vmem>>, vector<64x256xf32>
    %c0_261 = arith.constant 0 : index
    %c0_262 = arith.constant 0 : index
    %751 = vector.load %arg18[%c0_261, %c0_262] : memref<64x256xf32, #tpu.memory_space<vmem>>, vector<64x256xf32>
    %c0_263 = arith.constant 0 : index
    %c0_264 = arith.constant 0 : index
    %752 = vector.load %arg20[%c0_263, %c0_264] : memref<64x256xf32, #tpu.memory_space<vmem>>, vector<64x256xf32>
    %c0_265 = arith.constant 0 : index
    %c0_266 = arith.constant 0 : index
    %753 = vector.load %arg21[%c0_265, %c0_266] : memref<64x256xf32, #tpu.memory_space<vmem>>, vector<64x256xf32>
    %c0_267 = arith.constant 0 : index
    %c0_268 = arith.constant 0 : index
    %754 = vector.load %arg16[%c0_267, %c0_268] : memref<1x256xf32, #tpu.memory_space<vmem>>, vector<1x256xf32>
    %755 = vector.shape_cast %754 : vector<1x256xf32> to vector<1x256xf32>
    %756 = vector.broadcast %755 : vector<1x256xf32> to vector<2x256xf32>
    %c0_269 = arith.constant 0 : index
    %c0_270 = arith.constant 0 : index
    %757 = vector.load %arg19[%c0_269, %c0_270] : memref<1x256xf32, #tpu.memory_space<vmem>>, vector<1x256xf32>
    %758 = vector.shape_cast %757 : vector<1x256xf32> to vector<1x256xf32>
    %759 = vector.broadcast %758 : vector<1x256xf32> to vector<2x256xf32>
    %c0_271 = arith.constant 0 : index
    %c0_272 = arith.constant 0 : index
    %760 = vector.load %arg22[%c0_271, %c0_272] : memref<1x256xf32, #tpu.memory_space<vmem>>, vector<1x256xf32>
    %761 = vector.shape_cast %760 : vector<1x256xf32> to vector<1x256xf32>
    %762 = vector.broadcast %761 : vector<1x256xf32> to vector<2x256xf32>
    %c0_273 = arith.constant 0 : index
    %c0_274 = arith.constant 0 : index
    %763 = vector.load %arg23[%c0_273, %c0_274] : memref<64x32xf32, #tpu.memory_space<vmem>>, vector<64x32xf32>
    %c0_275 = arith.constant 0 : index
    %c0_276 = arith.constant 0 : index
    %764 = vector.load %arg27[%c0_275, %c0_276] : memref<32x4xf32, #tpu.memory_space<vmem>>, vector<32x4xf32>
    %c0_277 = arith.constant 0 : index
    %c0_278 = arith.constant 0 : index
    %765 = vector.load %arg29[%c0_277, %c0_278] : memref<4x8xf32, #tpu.memory_space<vmem>>, vector<4x8xf32>
    %c0_279 = arith.constant 0 : index
    %c0_280 = arith.constant 0 : index
    %766 = vector.load %arg24[%c0_279, %c0_280] : memref<1x32xf32, #tpu.memory_space<vmem>>, vector<1x32xf32>
    %767 = vector.shape_cast %766 : vector<1x32xf32> to vector<1x32xf32>
    %768 = vector.broadcast %767 : vector<1x32xf32> to vector<2x32xf32>
    %c0_281 = arith.constant 0 : index
    %c0_282 = arith.constant 0 : index
    %769 = vector.load %arg25[%c0_281, %c0_282] : memref<1x32xf32, #tpu.memory_space<vmem>>, vector<1x32xf32>
    %770 = vector.shape_cast %769 : vector<1x32xf32> to vector<1x32xf32>
    %771 = vector.broadcast %770 : vector<1x32xf32> to vector<2x32xf32>
    %c0_283 = arith.constant 0 : index
    %c0_284 = arith.constant 0 : index
    %772 = vector.load %arg26[%c0_283, %c0_284] : memref<1x32xf32, #tpu.memory_space<vmem>>, vector<1x32xf32>
    %773 = vector.shape_cast %772 : vector<1x32xf32> to vector<1x32xf32>
    %774 = vector.broadcast %773 : vector<1x32xf32> to vector<2x32xf32>
    %c0_285 = arith.constant 0 : index
    %c0_286 = arith.constant 0 : index
    %775 = vector.load %arg28[%c0_285, %c0_286] : memref<1x4xf32, #tpu.memory_space<vmem>>, vector<1x4xf32>
    %776 = vector.shape_cast %775 : vector<1x4xf32> to vector<1x4xf32>
    %777 = vector.broadcast %776 : vector<1x4xf32> to vector<2x4xf32>
    %c14 = arith.constant 14 : index
    %c0_287 = arith.constant 0 : index
    %778 = vector.load %arg0[%c14, %c0_287] : memref<16x16xf32, #tpu.memory_space<vmem>>, vector<2x8xf32>
    %c0_i32_288 = arith.constant 0 : i32
    %cst_289 = arith.constant dense<0.000000e+00> : vector<2x256xf32>
    %779 = tpu.matmul %778, %748, %cst_289 {dimension_numbers = #tpu.dot_dimension_numbers<[1], [0], [0], [1], [0, 0, 1, 1], [], []>} : vector<2x8xf32>, vector<8x256xf32>, vector<2x256xf32> -> vector<2x256xf32>
    %cst_290 = arith.constant dense<0.000000e+00> : vector<2x256xf32>
    %780 = tpu.matmul %732, %749, %cst_290 {dimension_numbers = #tpu.dot_dimension_numbers<[1], [0], [0], [1], [0, 0, 1, 1], [], []>} : vector<2x64xf32>, vector<64x256xf32>, vector<2x256xf32> -> vector<2x256xf32>
    %781 = arith.addf %779, %780 : vector<2x256xf32>
    %782 = arith.addf %781, %756 : vector<2x256xf32>
    %783 = vector.extract_strided_slice %782 {offsets = [0, 0], sizes = [2, 192], strides = [1, 1]} : vector<2x256xf32> to vector<2x192xf32>
    %784 = arith.negf %783 : vector<2x192xf32>
    %785 = math.exp %784 : vector<2x192xf32>
    %cst_291 = arith.constant 1.000000e+00 : f32
    %786 = vector.broadcast %cst_291 : f32 to vector<2x192xf32>
    %787 = arith.addf %786, %785 : vector<2x192xf32>
    %788 = arith.divf %786, %787 : vector<2x192xf32>
    %789 = vector.extract_strided_slice %788 {offsets = [0, 0], sizes = [2, 64], strides = [1, 1]} : vector<2x192xf32> to vector<2x64xf32>
    %790 = vector.extract_strided_slice %788 {offsets = [0, 64], sizes = [2, 64], strides = [1, 1]} : vector<2x192xf32> to vector<2x64xf32>
    %791 = vector.extract_strided_slice %788 {offsets = [0, 128], sizes = [2, 64], strides = [1, 1]} : vector<2x192xf32> to vector<2x64xf32>
    %792 = vector.extract_strided_slice %782 {offsets = [0, 192], sizes = [2, 64], strides = [1, 1]} : vector<2x256xf32> to vector<2x64xf32>
    %793 = math.tanh %792 : vector<2x64xf32>
    %794 = arith.mulf %790, %741 : vector<2x64xf32>
    %795 = arith.mulf %789, %793 : vector<2x64xf32>
    %796 = arith.addf %794, %795 : vector<2x64xf32>
    %797 = math.tanh %796 : vector<2x64xf32>
    %798 = arith.mulf %791, %797 : vector<2x64xf32>
    %cst_292 = arith.constant dense<0.000000e+00> : vector<2x256xf32>
    %799 = tpu.matmul %798, %750, %cst_292 {dimension_numbers = #tpu.dot_dimension_numbers<[1], [0], [0], [1], [0, 0, 1, 1], [], []>} : vector<2x64xf32>, vector<64x256xf32>, vector<2x256xf32> -> vector<2x256xf32>
    %cst_293 = arith.constant dense<0.000000e+00> : vector<2x256xf32>
    %800 = tpu.matmul %735, %751, %cst_293 {dimension_numbers = #tpu.dot_dimension_numbers<[1], [0], [0], [1], [0, 0, 1, 1], [], []>} : vector<2x64xf32>, vector<64x256xf32>, vector<2x256xf32> -> vector<2x256xf32>
    %801 = arith.addf %799, %800 : vector<2x256xf32>
    %802 = arith.addf %801, %759 : vector<2x256xf32>
    %803 = vector.extract_strided_slice %802 {offsets = [0, 0], sizes = [2, 192], strides = [1, 1]} : vector<2x256xf32> to vector<2x192xf32>
    %804 = arith.negf %803 : vector<2x192xf32>
    %805 = math.exp %804 : vector<2x192xf32>
    %cst_294 = arith.constant 1.000000e+00 : f32
    %806 = vector.broadcast %cst_294 : f32 to vector<2x192xf32>
    %807 = arith.addf %806, %805 : vector<2x192xf32>
    %808 = arith.divf %806, %807 : vector<2x192xf32>
    %809 = vector.extract_strided_slice %808 {offsets = [0, 0], sizes = [2, 64], strides = [1, 1]} : vector<2x192xf32> to vector<2x64xf32>
    %810 = vector.extract_strided_slice %808 {offsets = [0, 64], sizes = [2, 64], strides = [1, 1]} : vector<2x192xf32> to vector<2x64xf32>
    %811 = vector.extract_strided_slice %808 {offsets = [0, 128], sizes = [2, 64], strides = [1, 1]} : vector<2x192xf32> to vector<2x64xf32>
    %812 = vector.extract_strided_slice %802 {offsets = [0, 192], sizes = [2, 64], strides = [1, 1]} : vector<2x256xf32> to vector<2x64xf32>
    %813 = math.tanh %812 : vector<2x64xf32>
    %814 = arith.mulf %810, %744 : vector<2x64xf32>
    %815 = arith.mulf %809, %813 : vector<2x64xf32>
    %816 = arith.addf %814, %815 : vector<2x64xf32>
    %817 = math.tanh %816 : vector<2x64xf32>
    %818 = arith.mulf %811, %817 : vector<2x64xf32>
    %cst_295 = arith.constant dense<0.000000e+00> : vector<2x256xf32>
    %819 = tpu.matmul %818, %752, %cst_295 {dimension_numbers = #tpu.dot_dimension_numbers<[1], [0], [0], [1], [0, 0, 1, 1], [], []>} : vector<2x64xf32>, vector<64x256xf32>, vector<2x256xf32> -> vector<2x256xf32>
    %cst_296 = arith.constant dense<0.000000e+00> : vector<2x256xf32>
    %820 = tpu.matmul %738, %753, %cst_296 {dimension_numbers = #tpu.dot_dimension_numbers<[1], [0], [0], [1], [0, 0, 1, 1], [], []>} : vector<2x64xf32>, vector<64x256xf32>, vector<2x256xf32> -> vector<2x256xf32>
    %821 = arith.addf %819, %820 : vector<2x256xf32>
    %822 = arith.addf %821, %762 : vector<2x256xf32>
    %823 = vector.extract_strided_slice %822 {offsets = [0, 0], sizes = [2, 192], strides = [1, 1]} : vector<2x256xf32> to vector<2x192xf32>
    %824 = arith.negf %823 : vector<2x192xf32>
    %825 = math.exp %824 : vector<2x192xf32>
    %cst_297 = arith.constant 1.000000e+00 : f32
    %826 = vector.broadcast %cst_297 : f32 to vector<2x192xf32>
    %827 = arith.addf %826, %825 : vector<2x192xf32>
    %828 = arith.divf %826, %827 : vector<2x192xf32>
    %829 = vector.extract_strided_slice %828 {offsets = [0, 0], sizes = [2, 64], strides = [1, 1]} : vector<2x192xf32> to vector<2x64xf32>
    %830 = vector.extract_strided_slice %828 {offsets = [0, 64], sizes = [2, 64], strides = [1, 1]} : vector<2x192xf32> to vector<2x64xf32>
    %831 = vector.extract_strided_slice %828 {offsets = [0, 128], sizes = [2, 64], strides = [1, 1]} : vector<2x192xf32> to vector<2x64xf32>
    %832 = vector.extract_strided_slice %822 {offsets = [0, 192], sizes = [2, 64], strides = [1, 1]} : vector<2x256xf32> to vector<2x64xf32>
    %833 = math.tanh %832 : vector<2x64xf32>
    %834 = arith.mulf %830, %747 : vector<2x64xf32>
    %835 = arith.mulf %829, %833 : vector<2x64xf32>
    %836 = arith.addf %834, %835 : vector<2x64xf32>
    %837 = math.tanh %836 : vector<2x64xf32>
    %838 = arith.mulf %831, %837 : vector<2x64xf32>
    %cst_298 = arith.constant dense<0.000000e+00> : vector<2x32xf32>
    %839 = tpu.matmul %838, %763, %cst_298 {dimension_numbers = #tpu.dot_dimension_numbers<[1], [0], [0], [1], [0, 0, 1, 1], [], []>} : vector<2x64xf32>, vector<64x32xf32>, vector<2x32xf32> -> vector<2x32xf32>
    %840 = arith.addf %839, %768 : vector<2x32xf32>
    %cst_299 = arith.constant dense<0.000000e+00> : vector<2xf32>
    %841 = vector.multi_reduction <add>, %840, %cst_299 [1] : vector<2x32xf32> to vector<2xf32>
    %842 = vector.shape_cast %841 : vector<2xf32> to vector<2x1xf32>
    %cst_300 = arith.constant 3.200000e+01 : f32
    %843 = vector.broadcast %cst_300 : f32 to vector<2x1xf32>
    %844 = arith.divf %842, %843 : vector<2x1xf32>
    %845 = vector.broadcast %844 : vector<2x1xf32> to vector<2x32xf32>
    %846 = arith.subf %840, %845 : vector<2x32xf32>
    %847 = vector.broadcast %844 : vector<2x1xf32> to vector<2x32xf32>
    %848 = arith.subf %840, %847 : vector<2x32xf32>
    %849 = arith.mulf %846, %848 : vector<2x32xf32>
    %cst_301 = arith.constant dense<0.000000e+00> : vector<2xf32>
    %850 = vector.multi_reduction <add>, %849, %cst_301 [1] : vector<2x32xf32> to vector<2xf32>
    %851 = vector.shape_cast %850 : vector<2xf32> to vector<2x1xf32>
    %cst_302 = arith.constant 3.200000e+01 : f32
    %852 = vector.broadcast %cst_302 : f32 to vector<2x1xf32>
    %853 = arith.divf %851, %852 : vector<2x1xf32>
    %854 = vector.broadcast %844 : vector<2x1xf32> to vector<2x32xf32>
    %855 = arith.subf %840, %854 : vector<2x32xf32>
    %cst_303 = arith.constant 9.99999974E-6 : f32
    %856 = vector.broadcast %cst_303 : f32 to vector<2x1xf32>
    %857 = arith.addf %853, %856 : vector<2x1xf32>
    %858 = math.rsqrt %857 : vector<2x1xf32>
    %859 = vector.broadcast %858 : vector<2x1xf32> to vector<2x32xf32>
    %860 = arith.mulf %855, %859 : vector<2x32xf32>
    %861 = arith.mulf %860, %771 : vector<2x32xf32>
    %862 = arith.addf %861, %774 : vector<2x32xf32>
    %cst_304 = arith.constant 0.000000e+00 : f32
    %863 = vector.broadcast %cst_304 : f32 to vector<2x32xf32>
    %864 = arith.maximumf %862, %863 : vector<2x32xf32>
    %cst_305 = arith.constant dense<0.000000e+00> : vector<2x4xf32>
    %865 = tpu.matmul %864, %764, %cst_305 {dimension_numbers = #tpu.dot_dimension_numbers<[1], [0], [0], [1], [0, 0, 1, 1], [], []>} : vector<2x32xf32>, vector<32x4xf32>, vector<2x4xf32> -> vector<2x4xf32>
    %866 = arith.addf %865, %777 : vector<2x4xf32>
    %867 = arith.index_cast %c0_i32_288 : i32 to index
    %c0_306 = arith.constant 0 : index
    %c0_307 = arith.constant 0 : index
    %868 = vector.load %arg30[%867, %c0_306, %c0_307] : memref<4x2x4xf32, #tpu.memory_space<vmem>>, vector<1x2x4xf32>
    %869 = vector.shape_cast %868 : vector<1x2x4xf32> to vector<2x4xf32>
    %870 = vector.shape_cast %866 : vector<2x4xf32> to vector<1x2x4xf32>
    tpu.vector_store %arg30[%867, %c0_306, %c0_307], %870 {strides = array<i32>} : memref<4x2x4xf32, #tpu.memory_space<vmem>>, vector<1x2x4xf32>,
    %cst_308 = arith.constant dense<0.000000e+00> : vector<2x8xf32>
    %871 = tpu.matmul %866, %765, %cst_308 {dimension_numbers = #tpu.dot_dimension_numbers<[1], [0], [0], [1], [0, 0, 1, 1], [], []>} : vector<2x4xf32>, vector<4x8xf32>, vector<2x8xf32> -> vector<2x8xf32>
    %c1_i32_309 = arith.constant 1 : i32
    %cst_310 = arith.constant dense<0.000000e+00> : vector<2x256xf32>
    %872 = tpu.matmul %871, %748, %cst_310 {dimension_numbers = #tpu.dot_dimension_numbers<[1], [0], [0], [1], [0, 0, 1, 1], [], []>} : vector<2x8xf32>, vector<8x256xf32>, vector<2x256xf32> -> vector<2x256xf32>
    %cst_311 = arith.constant dense<0.000000e+00> : vector<2x256xf32>
    %873 = tpu.matmul %798, %749, %cst_311 {dimension_numbers = #tpu.dot_dimension_numbers<[1], [0], [0], [1], [0, 0, 1, 1], [], []>} : vector<2x64xf32>, vector<64x256xf32>, vector<2x256xf32> -> vector<2x256xf32>
    %874 = arith.addf %872, %873 : vector<2x256xf32>
    %875 = arith.addf %874, %756 : vector<2x256xf32>
    %876 = vector.extract_strided_slice %875 {offsets = [0, 0], sizes = [2, 192], strides = [1, 1]} : vector<2x256xf32> to vector<2x192xf32>
    %877 = arith.negf %876 : vector<2x192xf32>
    %878 = math.exp %877 : vector<2x192xf32>
    %cst_312 = arith.constant 1.000000e+00 : f32
    %879 = vector.broadcast %cst_312 : f32 to vector<2x192xf32>
    %880 = arith.addf %879, %878 : vector<2x192xf32>
    %881 = arith.divf %879, %880 : vector<2x192xf32>
    %882 = vector.extract_strided_slice %881 {offsets = [0, 0], sizes = [2, 64], strides = [1, 1]} : vector<2x192xf32> to vector<2x64xf32>
    %883 = vector.extract_strided_slice %881 {offsets = [0, 64], sizes = [2, 64], strides = [1, 1]} : vector<2x192xf32> to vector<2x64xf32>
    %884 = vector.extract_strided_slice %881 {offsets = [0, 128], sizes = [2, 64], strides = [1, 1]} : vector<2x192xf32> to vector<2x64xf32>
    %885 = vector.extract_strided_slice %875 {offsets = [0, 192], sizes = [2, 64], strides = [1, 1]} : vector<2x256xf32> to vector<2x64xf32>
    %886 = math.tanh %885 : vector<2x64xf32>
    %887 = arith.mulf %883, %796 : vector<2x64xf32>
    %888 = arith.mulf %882, %886 : vector<2x64xf32>
    %889 = arith.addf %887, %888 : vector<2x64xf32>
    %890 = math.tanh %889 : vector<2x64xf32>
    %891 = arith.mulf %884, %890 : vector<2x64xf32>
    %cst_313 = arith.constant dense<0.000000e+00> : vector<2x256xf32>
    %892 = tpu.matmul %891, %750, %cst_313 {dimension_numbers = #tpu.dot_dimension_numbers<[1], [0], [0], [1], [0, 0, 1, 1], [], []>} : vector<2x64xf32>, vector<64x256xf32>, vector<2x256xf32> -> vector<2x256xf32>
    %cst_314 = arith.constant dense<0.000000e+00> : vector<2x256xf32>
    %893 = tpu.matmul %818, %751, %cst_314 {dimension_numbers = #tpu.dot_dimension_numbers<[1], [0], [0], [1], [0, 0, 1, 1], [], []>} : vector<2x64xf32>, vector<64x256xf32>, vector<2x256xf32> -> vector<2x256xf32>
    %894 = arith.addf %892, %893 : vector<2x256xf32>
    %895 = arith.addf %894, %759 : vector<2x256xf32>
    %896 = vector.extract_strided_slice %895 {offsets = [0, 0], sizes = [2, 192], strides = [1, 1]} : vector<2x256xf32> to vector<2x192xf32>
    %897 = arith.negf %896 : vector<2x192xf32>
    %898 = math.exp %897 : vector<2x192xf32>
    %cst_315 = arith.constant 1.000000e+00 : f32
    %899 = vector.broadcast %cst_315 : f32 to vector<2x192xf32>
    %900 = arith.addf %899, %898 : vector<2x192xf32>
    %901 = arith.divf %899, %900 : vector<2x192xf32>
    %902 = vector.extract_strided_slice %901 {offsets = [0, 0], sizes = [2, 64], strides = [1, 1]} : vector<2x192xf32> to vector<2x64xf32>
    %903 = vector.extract_strided_slice %901 {offsets = [0, 64], sizes = [2, 64], strides = [1, 1]} : vector<2x192xf32> to vector<2x64xf32>
    %904 = vector.extract_strided_slice %901 {offsets = [0, 128], sizes = [2, 64], strides = [1, 1]} : vector<2x192xf32> to vector<2x64xf32>
    %905 = vector.extract_strided_slice %895 {offsets = [0, 192], sizes = [2, 64], strides = [1, 1]} : vector<2x256xf32> to vector<2x64xf32>
    %906 = math.tanh %905 : vector<2x64xf32>
    %907 = arith.mulf %903, %816 : vector<2x64xf32>
    %908 = arith.mulf %902, %906 : vector<2x64xf32>
    %909 = arith.addf %907, %908 : vector<2x64xf32>
    %910 = math.tanh %909 : vector<2x64xf32>
    %911 = arith.mulf %904, %910 : vector<2x64xf32>
    %cst_316 = arith.constant dense<0.000000e+00> : vector<2x256xf32>
    %912 = tpu.matmul %911, %752, %cst_316 {dimension_numbers = #tpu.dot_dimension_numbers<[1], [0], [0], [1], [0, 0, 1, 1], [], []>} : vector<2x64xf32>, vector<64x256xf32>, vector<2x256xf32> -> vector<2x256xf32>
    %cst_317 = arith.constant dense<0.000000e+00> : vector<2x256xf32>
    %913 = tpu.matmul %838, %753, %cst_317 {dimension_numbers = #tpu.dot_dimension_numbers<[1], [0], [0], [1], [0, 0, 1, 1], [], []>} : vector<2x64xf32>, vector<64x256xf32>, vector<2x256xf32> -> vector<2x256xf32>
    %914 = arith.addf %912, %913 : vector<2x256xf32>
    %915 = arith.addf %914, %762 : vector<2x256xf32>
    %916 = vector.extract_strided_slice %915 {offsets = [0, 0], sizes = [2, 192], strides = [1, 1]} : vector<2x256xf32> to vector<2x192xf32>
    %917 = arith.negf %916 : vector<2x192xf32>
    %918 = math.exp %917 : vector<2x192xf32>
    %cst_318 = arith.constant 1.000000e+00 : f32
    %919 = vector.broadcast %cst_318 : f32 to vector<2x192xf32>
    %920 = arith.addf %919, %918 : vector<2x192xf32>
    %921 = arith.divf %919, %920 : vector<2x192xf32>
    %922 = vector.extract_strided_slice %921 {offsets = [0, 0], sizes = [2, 64], strides = [1, 1]} : vector<2x192xf32> to vector<2x64xf32>
    %923 = vector.extract_strided_slice %921 {offsets = [0, 64], sizes = [2, 64], strides = [1, 1]} : vector<2x192xf32> to vector<2x64xf32>
    %924 = vector.extract_strided_slice %921 {offsets = [0, 128], sizes = [2, 64], strides = [1, 1]} : vector<2x192xf32> to vector<2x64xf32>
    %925 = vector.extract_strided_slice %915 {offsets = [0, 192], sizes = [2, 64], strides = [1, 1]} : vector<2x256xf32> to vector<2x64xf32>
    %926 = math.tanh %925 : vector<2x64xf32>
    %927 = arith.mulf %923, %836 : vector<2x64xf32>
    %928 = arith.mulf %922, %926 : vector<2x64xf32>
    %929 = arith.addf %927, %928 : vector<2x64xf32>
    %930 = math.tanh %929 : vector<2x64xf32>
    %931 = arith.mulf %924, %930 : vector<2x64xf32>
    %cst_319 = arith.constant dense<0.000000e+00> : vector<2x32xf32>
    %932 = tpu.matmul %931, %763, %cst_319 {dimension_numbers = #tpu.dot_dimension_numbers<[1], [0], [0], [1], [0, 0, 1, 1], [], []>} : vector<2x64xf32>, vector<64x32xf32>, vector<2x32xf32> -> vector<2x32xf32>
    %933 = arith.addf %932, %768 : vector<2x32xf32>
    %cst_320 = arith.constant dense<0.000000e+00> : vector<2xf32>
    %934 = vector.multi_reduction <add>, %933, %cst_320 [1] : vector<2x32xf32> to vector<2xf32>
    %935 = vector.shape_cast %934 : vector<2xf32> to vector<2x1xf32>
    %cst_321 = arith.constant 3.200000e+01 : f32
    %936 = vector.broadcast %cst_321 : f32 to vector<2x1xf32>
    %937 = arith.divf %935, %936 : vector<2x1xf32>
    %938 = vector.broadcast %937 : vector<2x1xf32> to vector<2x32xf32>
    %939 = arith.subf %933, %938 : vector<2x32xf32>
    %940 = vector.broadcast %937 : vector<2x1xf32> to vector<2x32xf32>
    %941 = arith.subf %933, %940 : vector<2x32xf32>
    %942 = arith.mulf %939, %941 : vector<2x32xf32>
    %cst_322 = arith.constant dense<0.000000e+00> : vector<2xf32>
    %943 = vector.multi_reduction <add>, %942, %cst_322 [1] : vector<2x32xf32> to vector<2xf32>
    %944 = vector.shape_cast %943 : vector<2xf32> to vector<2x1xf32>
    %cst_323 = arith.constant 3.200000e+01 : f32
    %945 = vector.broadcast %cst_323 : f32 to vector<2x1xf32>
    %946 = arith.divf %944, %945 : vector<2x1xf32>
    %947 = vector.broadcast %937 : vector<2x1xf32> to vector<2x32xf32>
    %948 = arith.subf %933, %947 : vector<2x32xf32>
    %cst_324 = arith.constant 9.99999974E-6 : f32
    %949 = vector.broadcast %cst_324 : f32 to vector<2x1xf32>
    %950 = arith.addf %946, %949 : vector<2x1xf32>
    %951 = math.rsqrt %950 : vector<2x1xf32>
    %952 = vector.broadcast %951 : vector<2x1xf32> to vector<2x32xf32>
    %953 = arith.mulf %948, %952 : vector<2x32xf32>
    %954 = arith.mulf %953, %771 : vector<2x32xf32>
    %955 = arith.addf %954, %774 : vector<2x32xf32>
    %cst_325 = arith.constant 0.000000e+00 : f32
    %956 = vector.broadcast %cst_325 : f32 to vector<2x32xf32>
    %957 = arith.maximumf %955, %956 : vector<2x32xf32>
    %cst_326 = arith.constant dense<0.000000e+00> : vector<2x4xf32>
    %958 = tpu.matmul %957, %764, %cst_326 {dimension_numbers = #tpu.dot_dimension_numbers<[1], [0], [0], [1], [0, 0, 1, 1], [], []>} : vector<2x32xf32>, vector<32x4xf32>, vector<2x4xf32> -> vector<2x4xf32>
    %959 = arith.addf %958, %777 : vector<2x4xf32>
    %960 = arith.index_cast %c1_i32_309 : i32 to index
    %c0_327 = arith.constant 0 : index
    %c0_328 = arith.constant 0 : index
    %961 = vector.load %arg30[%960, %c0_327, %c0_328] : memref<4x2x4xf32, #tpu.memory_space<vmem>>, vector<1x2x4xf32>
    %962 = vector.shape_cast %961 : vector<1x2x4xf32> to vector<2x4xf32>
    %963 = vector.shape_cast %959 : vector<2x4xf32> to vector<1x2x4xf32>
    tpu.vector_store %arg30[%960, %c0_327, %c0_328], %963 {strides = array<i32>} : memref<4x2x4xf32, #tpu.memory_space<vmem>>, vector<1x2x4xf32>,
    %cst_329 = arith.constant dense<0.000000e+00> : vector<2x8xf32>
    %964 = tpu.matmul %959, %765, %cst_329 {dimension_numbers = #tpu.dot_dimension_numbers<[1], [0], [0], [1], [0, 0, 1, 1], [], []>} : vector<2x4xf32>, vector<4x8xf32>, vector<2x8xf32> -> vector<2x8xf32>
    %c2_i32_330 = arith.constant 2 : i32
    %cst_331 = arith.constant dense<0.000000e+00> : vector<2x256xf32>
    %965 = tpu.matmul %964, %748, %cst_331 {dimension_numbers = #tpu.dot_dimension_numbers<[1], [0], [0], [1], [0, 0, 1, 1], [], []>} : vector<2x8xf32>, vector<8x256xf32>, vector<2x256xf32> -> vector<2x256xf32>
    %cst_332 = arith.constant dense<0.000000e+00> : vector<2x256xf32>
    %966 = tpu.matmul %891, %749, %cst_332 {dimension_numbers = #tpu.dot_dimension_numbers<[1], [0], [0], [1], [0, 0, 1, 1], [], []>} : vector<2x64xf32>, vector<64x256xf32>, vector<2x256xf32> -> vector<2x256xf32>
    %967 = arith.addf %965, %966 : vector<2x256xf32>
    %968 = arith.addf %967, %756 : vector<2x256xf32>
    %969 = vector.extract_strided_slice %968 {offsets = [0, 0], sizes = [2, 192], strides = [1, 1]} : vector<2x256xf32> to vector<2x192xf32>
    %970 = arith.negf %969 : vector<2x192xf32>
    %971 = math.exp %970 : vector<2x192xf32>
    %cst_333 = arith.constant 1.000000e+00 : f32
    %972 = vector.broadcast %cst_333 : f32 to vector<2x192xf32>
    %973 = arith.addf %972, %971 : vector<2x192xf32>
    %974 = arith.divf %972, %973 : vector<2x192xf32>
    %975 = vector.extract_strided_slice %974 {offsets = [0, 0], sizes = [2, 64], strides = [1, 1]} : vector<2x192xf32> to vector<2x64xf32>
    %976 = vector.extract_strided_slice %974 {offsets = [0, 64], sizes = [2, 64], strides = [1, 1]} : vector<2x192xf32> to vector<2x64xf32>
    %977 = vector.extract_strided_slice %974 {offsets = [0, 128], sizes = [2, 64], strides = [1, 1]} : vector<2x192xf32> to vector<2x64xf32>
    %978 = vector.extract_strided_slice %968 {offsets = [0, 192], sizes = [2, 64], strides = [1, 1]} : vector<2x256xf32> to vector<2x64xf32>
    %979 = math.tanh %978 : vector<2x64xf32>
    %980 = arith.mulf %976, %889 : vector<2x64xf32>
    %981 = arith.mulf %975, %979 : vector<2x64xf32>
    %982 = arith.addf %980, %981 : vector<2x64xf32>
    %983 = math.tanh %982 : vector<2x64xf32>
    %984 = arith.mulf %977, %983 : vector<2x64xf32>
    %cst_334 = arith.constant dense<0.000000e+00> : vector<2x256xf32>
    %985 = tpu.matmul %984, %750, %cst_334 {dimension_numbers = #tpu.dot_dimension_numbers<[1], [0], [0], [1], [0, 0, 1, 1], [], []>} : vector<2x64xf32>, vector<64x256xf32>, vector<2x256xf32> -> vector<2x256xf32>
    %cst_335 = arith.constant dense<0.000000e+00> : vector<2x256xf32>
    %986 = tpu.matmul %911, %751, %cst_335 {dimension_numbers = #tpu.dot_dimension_numbers<[1], [0], [0], [1], [0, 0, 1, 1], [], []>} : vector<2x64xf32>, vector<64x256xf32>, vector<2x256xf32> -> vector<2x256xf32>
    %987 = arith.addf %985, %986 : vector<2x256xf32>
    %988 = arith.addf %987, %759 : vector<2x256xf32>
    %989 = vector.extract_strided_slice %988 {offsets = [0, 0], sizes = [2, 192], strides = [1, 1]} : vector<2x256xf32> to vector<2x192xf32>
    %990 = arith.negf %989 : vector<2x192xf32>
    %991 = math.exp %990 : vector<2x192xf32>
    %cst_336 = arith.constant 1.000000e+00 : f32
    %992 = vector.broadcast %cst_336 : f32 to vector<2x192xf32>
    %993 = arith.addf %992, %991 : vector<2x192xf32>
    %994 = arith.divf %992, %993 : vector<2x192xf32>
    %995 = vector.extract_strided_slice %994 {offsets = [0, 0], sizes = [2, 64], strides = [1, 1]} : vector<2x192xf32> to vector<2x64xf32>
    %996 = vector.extract_strided_slice %994 {offsets = [0, 64], sizes = [2, 64], strides = [1, 1]} : vector<2x192xf32> to vector<2x64xf32>
    %997 = vector.extract_strided_slice %994 {offsets = [0, 128], sizes = [2, 64], strides = [1, 1]} : vector<2x192xf32> to vector<2x64xf32>
    %998 = vector.extract_strided_slice %988 {offsets = [0, 192], sizes = [2, 64], strides = [1, 1]} : vector<2x256xf32> to vector<2x64xf32>
    %999 = math.tanh %998 : vector<2x64xf32>
    %1000 = arith.mulf %996, %909 : vector<2x64xf32>
    %1001 = arith.mulf %995, %999 : vector<2x64xf32>
    %1002 = arith.addf %1000, %1001 : vector<2x64xf32>
    %1003 = math.tanh %1002 : vector<2x64xf32>
    %1004 = arith.mulf %997, %1003 : vector<2x64xf32>
    %cst_337 = arith.constant dense<0.000000e+00> : vector<2x256xf32>
    %1005 = tpu.matmul %1004, %752, %cst_337 {dimension_numbers = #tpu.dot_dimension_numbers<[1], [0], [0], [1], [0, 0, 1, 1], [], []>} : vector<2x64xf32>, vector<64x256xf32>, vector<2x256xf32> -> vector<2x256xf32>
    %cst_338 = arith.constant dense<0.000000e+00> : vector<2x256xf32>
    %1006 = tpu.matmul %931, %753, %cst_338 {dimension_numbers = #tpu.dot_dimension_numbers<[1], [0], [0], [1], [0, 0, 1, 1], [], []>} : vector<2x64xf32>, vector<64x256xf32>, vector<2x256xf32> -> vector<2x256xf32>
    %1007 = arith.addf %1005, %1006 : vector<2x256xf32>
    %1008 = arith.addf %1007, %762 : vector<2x256xf32>
    %1009 = vector.extract_strided_slice %1008 {offsets = [0, 0], sizes = [2, 192], strides = [1, 1]} : vector<2x256xf32> to vector<2x192xf32>
    %1010 = arith.negf %1009 : vector<2x192xf32>
    %1011 = math.exp %1010 : vector<2x192xf32>
    %cst_339 = arith.constant 1.000000e+00 : f32
    %1012 = vector.broadcast %cst_339 : f32 to vector<2x192xf32>
    %1013 = arith.addf %1012, %1011 : vector<2x192xf32>
    %1014 = arith.divf %1012, %1013 : vector<2x192xf32>
    %1015 = vector.extract_strided_slice %1014 {offsets = [0, 0], sizes = [2, 64], strides = [1, 1]} : vector<2x192xf32> to vector<2x64xf32>
    %1016 = vector.extract_strided_slice %1014 {offsets = [0, 64], sizes = [2, 64], strides = [1, 1]} : vector<2x192xf32> to vector<2x64xf32>
    %1017 = vector.extract_strided_slice %1014 {offsets = [0, 128], sizes = [2, 64], strides = [1, 1]} : vector<2x192xf32> to vector<2x64xf32>
    %1018 = vector.extract_strided_slice %1008 {offsets = [0, 192], sizes = [2, 64], strides = [1, 1]} : vector<2x256xf32> to vector<2x64xf32>
    %1019 = math.tanh %1018 : vector<2x64xf32>
    %1020 = arith.mulf %1016, %929 : vector<2x64xf32>
    %1021 = arith.mulf %1015, %1019 : vector<2x64xf32>
    %1022 = arith.addf %1020, %1021 : vector<2x64xf32>
    %1023 = math.tanh %1022 : vector<2x64xf32>
    %1024 = arith.mulf %1017, %1023 : vector<2x64xf32>
    %cst_340 = arith.constant dense<0.000000e+00> : vector<2x32xf32>
    %1025 = tpu.matmul %1024, %763, %cst_340 {dimension_numbers = #tpu.dot_dimension_numbers<[1], [0], [0], [1], [0, 0, 1, 1], [], []>} : vector<2x64xf32>, vector<64x32xf32>, vector<2x32xf32> -> vector<2x32xf32>
    %1026 = arith.addf %1025, %768 : vector<2x32xf32>
    %cst_341 = arith.constant dense<0.000000e+00> : vector<2xf32>
    %1027 = vector.multi_reduction <add>, %1026, %cst_341 [1] : vector<2x32xf32> to vector<2xf32>
    %1028 = vector.shape_cast %1027 : vector<2xf32> to vector<2x1xf32>
    %cst_342 = arith.constant 3.200000e+01 : f32
    %1029 = vector.broadcast %cst_342 : f32 to vector<2x1xf32>
    %1030 = arith.divf %1028, %1029 : vector<2x1xf32>
    %1031 = vector.broadcast %1030 : vector<2x1xf32> to vector<2x32xf32>
    %1032 = arith.subf %1026, %1031 : vector<2x32xf32>
    %1033 = vector.broadcast %1030 : vector<2x1xf32> to vector<2x32xf32>
    %1034 = arith.subf %1026, %1033 : vector<2x32xf32>
    %1035 = arith.mulf %1032, %1034 : vector<2x32xf32>
    %cst_343 = arith.constant dense<0.000000e+00> : vector<2xf32>
    %1036 = vector.multi_reduction <add>, %1035, %cst_343 [1] : vector<2x32xf32> to vector<2xf32>
    %1037 = vector.shape_cast %1036 : vector<2xf32> to vector<2x1xf32>
    %cst_344 = arith.constant 3.200000e+01 : f32
    %1038 = vector.broadcast %cst_344 : f32 to vector<2x1xf32>
    %1039 = arith.divf %1037, %1038 : vector<2x1xf32>
    %1040 = vector.broadcast %1030 : vector<2x1xf32> to vector<2x32xf32>
    %1041 = arith.subf %1026, %1040 : vector<2x32xf32>
    %cst_345 = arith.constant 9.99999974E-6 : f32
    %1042 = vector.broadcast %cst_345 : f32 to vector<2x1xf32>
    %1043 = arith.addf %1039, %1042 : vector<2x1xf32>
    %1044 = math.rsqrt %1043 : vector<2x1xf32>
    %1045 = vector.broadcast %1044 : vector<2x1xf32> to vector<2x32xf32>
    %1046 = arith.mulf %1041, %1045 : vector<2x32xf32>
    %1047 = arith.mulf %1046, %771 : vector<2x32xf32>
    %1048 = arith.addf %1047, %774 : vector<2x32xf32>
    %cst_346 = arith.constant 0.000000e+00 : f32
    %1049 = vector.broadcast %cst_346 : f32 to vector<2x32xf32>
    %1050 = arith.maximumf %1048, %1049 : vector<2x32xf32>
    %cst_347 = arith.constant dense<0.000000e+00> : vector<2x4xf32>
    %1051 = tpu.matmul %1050, %764, %cst_347 {dimension_numbers = #tpu.dot_dimension_numbers<[1], [0], [0], [1], [0, 0, 1, 1], [], []>} : vector<2x32xf32>, vector<32x4xf32>, vector<2x4xf32> -> vector<2x4xf32>
    %1052 = arith.addf %1051, %777 : vector<2x4xf32>
    %1053 = arith.index_cast %c2_i32_330 : i32 to index
    %c0_348 = arith.constant 0 : index
    %c0_349 = arith.constant 0 : index
    %1054 = vector.load %arg30[%1053, %c0_348, %c0_349] : memref<4x2x4xf32, #tpu.memory_space<vmem>>, vector<1x2x4xf32>
    %1055 = vector.shape_cast %1054 : vector<1x2x4xf32> to vector<2x4xf32>
    %1056 = vector.shape_cast %1052 : vector<2x4xf32> to vector<1x2x4xf32>
    tpu.vector_store %arg30[%1053, %c0_348, %c0_349], %1056 {strides = array<i32>} : memref<4x2x4xf32, #tpu.memory_space<vmem>>, vector<1x2x4xf32>,
    %cst_350 = arith.constant dense<0.000000e+00> : vector<2x8xf32>
    %1057 = tpu.matmul %1052, %765, %cst_350 {dimension_numbers = #tpu.dot_dimension_numbers<[1], [0], [0], [1], [0, 0, 1, 1], [], []>} : vector<2x4xf32>, vector<4x8xf32>, vector<2x8xf32> -> vector<2x8xf32>
    %c3_i32_351 = arith.constant 3 : i32
    %cst_352 = arith.constant dense<0.000000e+00> : vector<2x256xf32>
    %1058 = tpu.matmul %1057, %748, %cst_352 {dimension_numbers = #tpu.dot_dimension_numbers<[1], [0], [0], [1], [0, 0, 1, 1], [], []>} : vector<2x8xf32>, vector<8x256xf32>, vector<2x256xf32> -> vector<2x256xf32>
    %cst_353 = arith.constant dense<0.000000e+00> : vector<2x256xf32>
    %1059 = tpu.matmul %984, %749, %cst_353 {dimension_numbers = #tpu.dot_dimension_numbers<[1], [0], [0], [1], [0, 0, 1, 1], [], []>} : vector<2x64xf32>, vector<64x256xf32>, vector<2x256xf32> -> vector<2x256xf32>
    %1060 = arith.addf %1058, %1059 : vector<2x256xf32>
    %1061 = arith.addf %1060, %756 : vector<2x256xf32>
    %1062 = vector.extract_strided_slice %1061 {offsets = [0, 0], sizes = [2, 192], strides = [1, 1]} : vector<2x256xf32> to vector<2x192xf32>
    %1063 = arith.negf %1062 : vector<2x192xf32>
    %1064 = math.exp %1063 : vector<2x192xf32>
    %cst_354 = arith.constant 1.000000e+00 : f32
    %1065 = vector.broadcast %cst_354 : f32 to vector<2x192xf32>
    %1066 = arith.addf %1065, %1064 : vector<2x192xf32>
    %1067 = arith.divf %1065, %1066 : vector<2x192xf32>
    %1068 = vector.extract_strided_slice %1067 {offsets = [0, 0], sizes = [2, 64], strides = [1, 1]} : vector<2x192xf32> to vector<2x64xf32>
    %1069 = vector.extract_strided_slice %1067 {offsets = [0, 64], sizes = [2, 64], strides = [1, 1]} : vector<2x192xf32> to vector<2x64xf32>
    %1070 = vector.extract_strided_slice %1067 {offsets = [0, 128], sizes = [2, 64], strides = [1, 1]} : vector<2x192xf32> to vector<2x64xf32>
    %1071 = vector.extract_strided_slice %1061 {offsets = [0, 192], sizes = [2, 64], strides = [1, 1]} : vector<2x256xf32> to vector<2x64xf32>
    %1072 = math.tanh %1071 : vector<2x64xf32>
    %1073 = arith.mulf %1069, %982 : vector<2x64xf32>
    %1074 = arith.mulf %1068, %1072 : vector<2x64xf32>
    %1075 = arith.addf %1073, %1074 : vector<2x64xf32>
    %1076 = math.tanh %1075 : vector<2x64xf32>
    %1077 = arith.mulf %1070, %1076 : vector<2x64xf32>
    %cst_355 = arith.constant dense<0.000000e+00> : vector<2x256xf32>
    %1078 = tpu.matmul %1077, %750, %cst_355 {dimension_numbers = #tpu.dot_dimension_numbers<[1], [0], [0], [1], [0, 0, 1, 1], [], []>} : vector<2x64xf32>, vector<64x256xf32>, vector<2x256xf32> -> vector<2x256xf32>
    %cst_356 = arith.constant dense<0.000000e+00> : vector<2x256xf32>
    %1079 = tpu.matmul %1004, %751, %cst_356 {dimension_numbers = #tpu.dot_dimension_numbers<[1], [0], [0], [1], [0, 0, 1, 1], [], []>} : vector<2x64xf32>, vector<64x256xf32>, vector<2x256xf32> -> vector<2x256xf32>
    %1080 = arith.addf %1078, %1079 : vector<2x256xf32>
    %1081 = arith.addf %1080, %759 : vector<2x256xf32>
    %1082 = vector.extract_strided_slice %1081 {offsets = [0, 0], sizes = [2, 192], strides = [1, 1]} : vector<2x256xf32> to vector<2x192xf32>
    %1083 = arith.negf %1082 : vector<2x192xf32>
    %1084 = math.exp %1083 : vector<2x192xf32>
    %cst_357 = arith.constant 1.000000e+00 : f32
    %1085 = vector.broadcast %cst_357 : f32 to vector<2x192xf32>
    %1086 = arith.addf %1085, %1084 : vector<2x192xf32>
    %1087 = arith.divf %1085, %1086 : vector<2x192xf32>
    %1088 = vector.extract_strided_slice %1087 {offsets = [0, 0], sizes = [2, 64], strides = [1, 1]} : vector<2x192xf32> to vector<2x64xf32>
    %1089 = vector.extract_strided_slice %1087 {offsets = [0, 64], sizes = [2, 64], strides = [1, 1]} : vector<2x192xf32> to vector<2x64xf32>
    %1090 = vector.extract_strided_slice %1087 {offsets = [0, 128], sizes = [2, 64], strides = [1, 1]} : vector<2x192xf32> to vector<2x64xf32>
    %1091 = vector.extract_strided_slice %1081 {offsets = [0, 192], sizes = [2, 64], strides = [1, 1]} : vector<2x256xf32> to vector<2x64xf32>
    %1092 = math.tanh %1091 : vector<2x64xf32>
    %1093 = arith.mulf %1089, %1002 : vector<2x64xf32>
    %1094 = arith.mulf %1088, %1092 : vector<2x64xf32>
    %1095 = arith.addf %1093, %1094 : vector<2x64xf32>
    %1096 = math.tanh %1095 : vector<2x64xf32>
    %1097 = arith.mulf %1090, %1096 : vector<2x64xf32>
    %cst_358 = arith.constant dense<0.000000e+00> : vector<2x256xf32>
    %1098 = tpu.matmul %1097, %752, %cst_358 {dimension_numbers = #tpu.dot_dimension_numbers<[1], [0], [0], [1], [0, 0, 1, 1], [], []>} : vector<2x64xf32>, vector<64x256xf32>, vector<2x256xf32> -> vector<2x256xf32>
    %cst_359 = arith.constant dense<0.000000e+00> : vector<2x256xf32>
    %1099 = tpu.matmul %1024, %753, %cst_359 {dimension_numbers = #tpu.dot_dimension_numbers<[1], [0], [0], [1], [0, 0, 1, 1], [], []>} : vector<2x64xf32>, vector<64x256xf32>, vector<2x256xf32> -> vector<2x256xf32>
    %1100 = arith.addf %1098, %1099 : vector<2x256xf32>
    %1101 = arith.addf %1100, %762 : vector<2x256xf32>
    %1102 = vector.extract_strided_slice %1101 {offsets = [0, 0], sizes = [2, 192], strides = [1, 1]} : vector<2x256xf32> to vector<2x192xf32>
    %1103 = arith.negf %1102 : vector<2x192xf32>
    %1104 = math.exp %1103 : vector<2x192xf32>
    %cst_360 = arith.constant 1.000000e+00 : f32
    %1105 = vector.broadcast %cst_360 : f32 to vector<2x192xf32>
    %1106 = arith.addf %1105, %1104 : vector<2x192xf32>
    %1107 = arith.divf %1105, %1106 : vector<2x192xf32>
    %1108 = vector.extract_strided_slice %1107 {offsets = [0, 0], sizes = [2, 64], strides = [1, 1]} : vector<2x192xf32> to vector<2x64xf32>
    %1109 = vector.extract_strided_slice %1107 {offsets = [0, 64], sizes = [2, 64], strides = [1, 1]} : vector<2x192xf32> to vector<2x64xf32>
    %1110 = vector.extract_strided_slice %1107 {offsets = [0, 128], sizes = [2, 64], strides = [1, 1]} : vector<2x192xf32> to vector<2x64xf32>
    %1111 = vector.extract_strided_slice %1101 {offsets = [0, 192], sizes = [2, 64], strides = [1, 1]} : vector<2x256xf32> to vector<2x64xf32>
    %1112 = math.tanh %1111 : vector<2x64xf32>
    %1113 = arith.mulf %1109, %1022 : vector<2x64xf32>
    %1114 = arith.mulf %1108, %1112 : vector<2x64xf32>
    %1115 = arith.addf %1113, %1114 : vector<2x64xf32>
    %1116 = math.tanh %1115 : vector<2x64xf32>
    %1117 = arith.mulf %1110, %1116 : vector<2x64xf32>
    %cst_361 = arith.constant dense<0.000000e+00> : vector<2x32xf32>
    %1118 = tpu.matmul %1117, %763, %cst_361 {dimension_numbers = #tpu.dot_dimension_numbers<[1], [0], [0], [1], [0, 0, 1, 1], [], []>} : vector<2x64xf32>, vector<64x32xf32>, vector<2x32xf32> -> vector<2x32xf32>
    %1119 = arith.addf %1118, %768 : vector<2x32xf32>
    %cst_362 = arith.constant dense<0.000000e+00> : vector<2xf32>
    %1120 = vector.multi_reduction <add>, %1119, %cst_362 [1] : vector<2x32xf32> to vector<2xf32>
    %1121 = vector.shape_cast %1120 : vector<2xf32> to vector<2x1xf32>
    %cst_363 = arith.constant 3.200000e+01 : f32
    %1122 = vector.broadcast %cst_363 : f32 to vector<2x1xf32>
    %1123 = arith.divf %1121, %1122 : vector<2x1xf32>
    %1124 = vector.broadcast %1123 : vector<2x1xf32> to vector<2x32xf32>
    %1125 = arith.subf %1119, %1124 : vector<2x32xf32>
    %1126 = vector.broadcast %1123 : vector<2x1xf32> to vector<2x32xf32>
    %1127 = arith.subf %1119, %1126 : vector<2x32xf32>
    %1128 = arith.mulf %1125, %1127 : vector<2x32xf32>
    %cst_364 = arith.constant dense<0.000000e+00> : vector<2xf32>
    %1129 = vector.multi_reduction <add>, %1128, %cst_364 [1] : vector<2x32xf32> to vector<2xf32>
    %1130 = vector.shape_cast %1129 : vector<2xf32> to vector<2x1xf32>
    %cst_365 = arith.constant 3.200000e+01 : f32
    %1131 = vector.broadcast %cst_365 : f32 to vector<2x1xf32>
    %1132 = arith.divf %1130, %1131 : vector<2x1xf32>
    %1133 = vector.broadcast %1123 : vector<2x1xf32> to vector<2x32xf32>
    %1134 = arith.subf %1119, %1133 : vector<2x32xf32>
    %cst_366 = arith.constant 9.99999974E-6 : f32
    %1135 = vector.broadcast %cst_366 : f32 to vector<2x1xf32>
    %1136 = arith.addf %1132, %1135 : vector<2x1xf32>
    %1137 = math.rsqrt %1136 : vector<2x1xf32>
    %1138 = vector.broadcast %1137 : vector<2x1xf32> to vector<2x32xf32>
    %1139 = arith.mulf %1134, %1138 : vector<2x32xf32>
    %1140 = arith.mulf %1139, %771 : vector<2x32xf32>
    %1141 = arith.addf %1140, %774 : vector<2x32xf32>
    %cst_367 = arith.constant 0.000000e+00 : f32
    %1142 = vector.broadcast %cst_367 : f32 to vector<2x32xf32>
    %1143 = arith.maximumf %1141, %1142 : vector<2x32xf32>
    %cst_368 = arith.constant dense<0.000000e+00> : vector<2x4xf32>
    %1144 = tpu.matmul %1143, %764, %cst_368 {dimension_numbers = #tpu.dot_dimension_numbers<[1], [0], [0], [1], [0, 0, 1, 1], [], []>} : vector<2x32xf32>, vector<32x4xf32>, vector<2x4xf32> -> vector<2x4xf32>
    %1145 = arith.addf %1144, %777 : vector<2x4xf32>
    %1146 = arith.index_cast %c3_i32_351 : i32 to index
    %c0_369 = arith.constant 0 : index
    %c0_370 = arith.constant 0 : index
    %1147 = vector.load %arg30[%1146, %c0_369, %c0_370] : memref<4x2x4xf32, #tpu.memory_space<vmem>>, vector<1x2x4xf32>
    %1148 = vector.shape_cast %1147 : vector<1x2x4xf32> to vector<2x4xf32>
    %1149 = vector.shape_cast %1145 : vector<2x4xf32> to vector<1x2x4xf32>
    tpu.vector_store %arg30[%1146, %c0_369, %c0_370], %1149 {strides = array<i32>} : memref<4x2x4xf32, #tpu.memory_space<vmem>>, vector<1x2x4xf32>,
    %cst_371 = arith.constant dense<0.000000e+00> : vector<2x8xf32>
    %1150 = tpu.matmul %1145, %765, %cst_371 {dimension_numbers = #tpu.dot_dimension_numbers<[1], [0], [0], [1], [0, 0, 1, 1], [], []>} : vector<2x4xf32>, vector<4x8xf32>, vector<2x8xf32> -> vector<2x8xf32>
    %c4_i32_372 = arith.constant 4 : i32
    return
  }
}

</mosaic_0001>

<bundles_post_ra>
// kernel: lstm_predictor_forward.1
= control target key start
LH: loop header
LB: loop body
LE: loop exit
PB: predicated region body
PF: predicated region fallthrough
CT: control target
= control target key end

     0   :  { %s7026_s6 = smov 1   ;;  %s7027_s10 = smov 2   ;;  %s9302_s0 = inlined_call_operand.smem [shape: u32[31], index: -1, kind: input, shape index: {}] }
   0x1   :  { %s7086_s5 = sld [smem:[%s9302_s0]]   ;;  %s7028_s14 = smov 3  }
   0x2   :  { %s7091_s9 = sld [smem:[%s9302_s0 + %s7026_s6]]   ;;  %s7029_s18 = smov 4  }
   0x3   :  { %s7096_s13 = sld [smem:[%s9302_s0 + %s7027_s10]]   ;;  %s7030_s22 = smov 5  }
   0x4   :  { %s7101_s17 = sld [smem:[%s9302_s0 + %s7028_s14]]   ;;  %s7031_s26 = smov 6  }
   0x5   :  { %s7106_s21 = sld [smem:[%s9302_s0 + %s7029_s18]]   ;;  %s7032_s30 = smov 7  }
   0x6   :  { %s7111_s25 = sld [smem:[%s9302_s0 + %s7030_s22]]   ;;  %s7033_s4 = smov 8  }
   0x7   :  { %9387 = sst [smem:[#allocation35_spill]] %s7086_s5  ;;  %s7034_s10 = smov 9  }
   0x8   :  { %s7116_s29 = sld [smem:[%s9302_s0 + %s7031_s26]]   ;;  %s7035_s15 = smov 10  }
   0x9   :  { %9388 = sst [smem:[#allocation36_spill]] %s7096_s13  ;;  %s7036_s20 = smov 11  }
   0xa   :  { %9389 = sst [smem:[#allocation37_spill]] %s7101_s17  ;;  %s7037_s26 = smov 12  }
   0xb   :  { %s7121_s3 = sld [smem:[%s9302_s0 + %s7032_s30]]   ;;  %s7038_s1 = smov 13  }
   0xc   :  { %s7126_s8 = sld [smem:[%s9302_s0 + %s7033_s4]]   ;;  %s7039_s7 = smov 14  }
   0xd   :  { %s7131_s14 = sld [smem:[%s9302_s0 + %s7034_s10]]   ;;  %s7041_s22 = smov 16  }
   0xe   :  { %s7136_s19 = sld [smem:[%s9302_s0 + %s7035_s15]]   ;;  %s7040_s15 = smov 15  }
   0xf   :  { %s7141_s24 = sld [smem:[%s9302_s0 + %s7036_s20]]   ;;  %s7042_s28 = smov 17  }
  0x10   :  { %s7146_s30 = sld [smem:[%s9302_s0 + %s7037_s26]]  }
  0x11   :  { %s7151_s6 = sld [smem:[%s9302_s0 + %s7038_s1]]  }
  0x12   :  { %s7156_s12 = sld [smem:[%s9302_s0 + %s7039_s7]]   ;;  %s7043_s7 = smov 18  }
  0x13   :  { %9390 = sst [smem:[#allocation38_spill]] %s7131_s14 }
  0x14   :  { %9391 = sst [smem:[#allocation39_spill]] %s7136_s19 }
  0x15   :  { %s7161_s20 = sld [smem:[%s9302_s0 + %s7040_s15]]   ;;  %s7044_s15 = smov 19  }
  0x16   :  { %s7166_s27 = sld [smem:[%s9302_s0 + %s7041_s22]]   ;;  %s7045_s22 = smov 20  }
  0x17   :  { %s7171_s4 = sld [smem:[%s9302_s0 + %s7042_s28]]   ;;  %s7046_s28 = smov 21  }
  0x18   :  { %s7176_s19 = sld [smem:[%s9302_s0 + %s7043_s7]]   ;;  %s7047_s7 = smov 22  }
  0x19   :  { %s7181_s14 = sld [smem:[%s9302_s0 + %s7044_s15]]   ;;  %s7048_s15 = smov 23  }
  0x1a   :  { %s7191_s17 = sld [smem:[%s9302_s0 + %s7046_s28]]   ;;  %s7050_s28 = smov 25  }
  0x1b   :  { %s7196_s5 = sld [smem:[%s9302_s0 + %s7047_s7]]   ;;  %s7051_s7 = smov 26  }
  0x1c   :  { %9392 = sst [smem:[#allocation40_spill]] %s7166_s27 }
  0x1d   :  { %s7186_s27 = sld [smem:[%s9302_s0 + %s7045_s22]]   ;;  %s7049_s22 = smov 24  }
  0x1e   :  { %s7206_s13 = sld [smem:[%s9302_s0 + %s7049_s22]]   ;;  %s7053_s22 = smov 28  }
  0x1f   :  { %9393 = sst [smem:[#allocation41_spill]] %s7181_s14 }
  0x20   :  { %9394 = sst [smem:[#allocation42_spill]] %s7191_s17 }
  0x21   :  { %9395 = sst [smem:[#allocation43_spill]] %s7196_s5 }
  0x22   :  { %s7201_s14 = sld [smem:[%s9302_s0 + %s7048_s15]]   ;;  %s7052_s15 = smov 27  }
  0x23   :  { %s7211_s17 = sld [smem:[%s9302_s0 + %s7050_s28]]   ;;  %s7054_s28 = smov 29  }
  0x24   :  { %9397 = sst [smem:[#allocation45_spill]] %s7206_s13 }
  0x25   :  { %s7216_s5 = sld [smem:[%s9302_s0 + %s7051_s7]]   ;;  %s7055_s7 = smov 30  }
  0x26   :  { %s7226_s13 = sld [smem:[%s9302_s0 + %s7053_s22]]  }
  0x28   :  { %9396 = sst [smem:[#allocation44_spill]] %s7201_s14 }
  0x29   :  { %9398 = sst [smem:[#allocation46_spill]] %s7211_s17 }
  0x2a   :  { %s7221_s14 = sld [smem:[%s9302_s0 + %s7052_s15]]  }
  0x2b   :  { %9399 = sst [smem:[#allocation47_spill]] %s7216_s5 }
  0x2c   :  { %s7231_s17 = sld [smem:[%s9302_s0 + %s7054_s28]]  }
  0x2d   :  { %s7236_s5 = sld [smem:[%s9302_s0 + %s7055_s7]]  }
  0x2e   :  { %66 = vsyncpa [#allocation5], 0 }
  0x2f   :  { %67 = vsyncpa [#allocation7], 0 }
  0x30   :  { %68 = vsyncpa [#allocation10], 0 }
  0x31   :  { %69 = vsyncpa [#allocation13], 0 }
  0x32   :  { %70 = vsyncpa [#allocation16], 0 }
  0x33   :  { %71 = vsyncpa [#allocation19], 0 }
  0x34   :  { %72 = vsyncpa [#allocation22], 0 }
  0x35   :  { %73 = vsyncpa [#allocation25], 0  ;;  %s97_s15 = sshll.u32 %s7106_s21, 4  ;;  %s7056_s16 = smov [#allocation6]   ;;  %s98_s15 = int_to_ptr.hbm [resolvable:$true] %s97_s15 }
  0x36   :  { %s99_s18 = sshll.u32 %s7056_s16, 4  ;;  %s124_s22 = sshll.u32 %s7116_s29, 4  ;;  %s100_s18 = int_to_ptr.vmem [resolvable:$true] %s99_s18  ;;  %s125_s22 = int_to_ptr.hbm [resolvable:$true] %s124_s22 }
  0x37   :  { %s6650_s0 = sshra.s32 %s98_s15, 4  ;;  %s6654_s26 = scalar_lea.hbm %s7106_s21, 256  ;;  %s6651_s0 = int_to_ptr.hbm [resolvable:$true] %s6650_s0 }
  0x38   :  { %s6652_s23 = scalar_lea.hbm %s6651_s0, 256  ;;  %p6655_p1 = scmp.lt.s32.totalorder %s6651_s0, %s7106_s21 }
  0x39   :  { %p6653_p0 = scmp.ne.s32.totalorder %s6651_s0, %s6652_s23  ;;  %p6656_p2 = scmp.lt.s32.totalorder %s6654_s26, %s6652_s23 }
  0x3b   :  { %p6657_p3 = por %p6656_p2, %p6655_p1 }
  0x3d   :  { %p6658_p4 = pnand %p6657_p3, %p6653_p0 }
  0x3f   :  { %6661 = shalt.err (!%p6658_p4)
}
  0x40   :  { %s7057_s28 = smov 256   ;;  %s7058_s1 = smov 16  }
  0x41   :  { %105 = dma.hbm_to_vmem [thread:$0]  %s98_s15, 4096, %s100_s18, [#allocation7], %s7057_s28, %s7057_s28, %s7058_s1  }
  0x42   :  { %s7059_s2 = smov [#allocation9]   ;;  %s147_s10 = sshll.u32 %s7126_s8, 4  ;;  %s7246_s10 = int_to_ptr.hbm [resolvable:$true] %s147_s10 }
  0x43   :  { %s126_s7 = sshll.u32 %s7059_s2, 4  ;;  %s6674_s21 = sshra.s32 %s125_s22, 4  ;;  %s127_s7 = int_to_ptr.vmem [resolvable:$true] %s126_s7  ;;  %s6675_s21 = int_to_ptr.hbm [resolvable:$true] %s6674_s21 }
  0x44   :  { %s6676_s11 = scalar_lea.hbm %s6675_s21, 2  ;;  %s6678_s16 = scalar_lea.hbm %s7116_s29, 2 }
  0x45   :  { %p6677_p5 = scmp.ne.s32.totalorder %s6675_s21, %s6676_s11  ;;  %p6679_p6 = scmp.lt.s32.totalorder %s6675_s21, %s7116_s29 }
  0x46   :  { %p6680_p7 = scmp.lt.s32.totalorder %s6678_s16, %s6676_s11 }
  0x48   :  { %p6681_p8 = por %p6680_p7, %p6679_p6 }
  0x4a   :  { %p6682_p9 = pnand %p6681_p8, %p6677_p5 }
  0x4c   :  { %6685 = shalt.err (!%p6682_p9)
}
  0x4d   :  { %129 = dma.hbm_to_vmem [thread:$0]  %s125_s22, 32, %s127_s7, [#allocation10]  }
  0x4e   :  { %s175_s15 = sshll.u32 %s7146_s30, 4  ;;  %s7060_s18 = smov [#allocation12]   ;;  %s7251_s15 = int_to_ptr.hbm [resolvable:$true] %s175_s15 }
  0x4f   :  { %s149_s0 = sshll.u32 %s7060_s18, 4  ;;  %s6698_s23 = sshra.s32 %s7246_s10, 4  ;;  %s150_s0 = int_to_ptr.vmem [resolvable:$true] %s149_s0  ;;  %s6699_s23 = int_to_ptr.hbm [resolvable:$true] %s6698_s23 }
  0x50   :  { %s6700_s26 = scalar_lea.hbm %s6699_s23, 128  ;;  %s6702_s29 = scalar_lea.hbm %s7126_s8, 128 }
  0x51   :  { %p6701_p10 = scmp.ne.s32.totalorder %s6699_s23, %s6700_s26  ;;  %p6703_p11 = scmp.lt.s32.totalorder %s6699_s23, %s7126_s8 }
  0x52   :  { %p6704_p12 = scmp.lt.s32.totalorder %s6702_s29, %s6700_s26 }
  0x54   :  { %p6705_p13 = por %p6704_p12, %p6703_p11 }
  0x56   :  { %p6706_p0 = pnand %p6705_p13, %p6701_p10 }
  0x58   :  { %6709 = shalt.err (!%p6706_p0)
}
  0x59   :  { %155 = dma.hbm_to_vmem [thread:$0]  %s7246_s10, 2048, %s150_s0, [#allocation13], %s7057_s28, %s7057_s28, %s7058_s1  }
  0x5a   :  { %s7061_s22 = smov [#allocation15]   ;;  %s6722_s7 = sshra.s32 %s7251_s15, 4  ;;  %s6723_s7 = int_to_ptr.hbm [resolvable:$true] %s6722_s7 }
  0x5b   :  { %s177_s2 = sshll.u32 %s7061_s22, 4  ;;  %s6724_s21 = scalar_lea.hbm %s6723_s7, 64  ;;  %s178_s2 = int_to_ptr.vmem [resolvable:$true] %s177_s2 }
  0x5c   :  { %p6725_p1 = scmp.ne.s32.totalorder %s6723_s7, %s6724_s21  ;;  %s6726_s8 = scalar_lea.hbm %s7146_s30, 64 }
  0x5d   :  { %p6727_p2 = scmp.lt.s32.totalorder %s6723_s7, %s7146_s30  ;;  %p6728_p3 = scmp.lt.s32.totalorder %s6726_s8, %s6724_s21 }
  0x5f   :  { %p6729_p4 = por %p6728_p3, %p6727_p2 }
  0x61   :  { %p6730_p5 = pnand %p6729_p4, %p6725_p1 }
  0x63   :  { %6733 = shalt.err (!%p6730_p5)
}
  0x64   :  { %s7062_s11 = smov 128   ;;  %s7063_s10 = smov 8  }
  0x65   :  { %183 = dma.hbm_to_vmem [thread:$0]  %s7251_s15, 1024, %s178_s2, [#allocation16], %s7062_s11, %s7062_s11, %s7063_s10  }
  0x66   :  { %s200_s16 = sshll.u32 %s7156_s12, 4  ;;  %s7064_s18 = smov [#allocation18]   ;;  %s201_s16 = int_to_ptr.hbm [resolvable:$true] %s200_s16 }
  0x67   :  { %s202_s0 = sshll.u32 %s7064_s18, 4  ;;  %s225_s23 = sshll.u32 %s7171_s4, 4  ;;  %s203_s0 = int_to_ptr.vmem [resolvable:$true] %s202_s0  ;;  %s226_s23 = int_to_ptr.hbm [resolvable:$true] %s225_s23 }
  0x68   :  { %s6746_s26 = sshra.s32 %s201_s16, 4  ;;  %s6750_s29 = scalar_lea.hbm %s7156_s12, 16  ;;  %s6747_s26 = int_to_ptr.hbm [resolvable:$true] %s6746_s26 }
  0x69   :  { %s6748_s30 = scalar_lea.hbm %s6747_s26, 16  ;;  %p6751_p7 = scmp.lt.s32.totalorder %s6747_s26, %s7156_s12 }
  0x6a   :  { %p6749_p6 = scmp.ne.s32.totalorder %s6747_s26, %s6748_s30  ;;  %p6752_p8 = scmp.lt.s32.totalorder %s6750_s29, %s6748_s30 }
  0x6c   :  { %p6753_p9 = por %p6752_p8, %p6751_p7 }
  0x6e   :  { %p6754_p10 = pnand %p6753_p9, %p6749_p6 }
  0x70   :  { %6757 = shalt.err (!%p6754_p10)
}
  0x71   :  { %205 = dma.hbm_to_vmem [thread:$0]  %s201_s16, 256, %s203_s0, [#allocation19]  }
  0x72   :  { %s7065_s15 = smov [#allocation21]   ;;  %s253_s2 = sshll.u32 %s7186_s27, 4  ;;  %s7269_s2 = int_to_ptr.hbm [resolvable:$true] %s253_s2 }
  0x73   :  { %s227_s22 = sshll.u32 %s7065_s15, 4  ;;  %s6770_s7 = sshra.s32 %s226_s23, 4  ;;  %s228_s22 = int_to_ptr.vmem [resolvable:$true] %s227_s22  ;;  %s6771_s7 = int_to_ptr.hbm [resolvable:$true] %s6770_s7 }
  0x74   :  { %s6772_s21 = scalar_lea.hbm %s6771_s7, 128  ;;  %s6774_s12 = scalar_lea.hbm %s7171_s4, 128 }
  0x75   :  { %p6773_p11 = scmp.ne.s32.totalorder %s6771_s7, %s6772_s21  ;;  %p6775_p12 = scmp.lt.s32.totalorder %s6771_s7, %s7171_s4 }
  0x76   :  { %p6776_p13 = scmp.lt.s32.totalorder %s6774_s12, %s6772_s21 }
  0x78   :  { %p6777_p0 = por %p6776_p13, %p6775_p12 }
  0x7a   :  { %p6778_p1 = pnand %p6777_p0, %p6773_p11 }
  0x7c   :  { %6781 = shalt.err (!%p6778_p1)
}
  0x7d   :  { %233 = dma.hbm_to_vmem [thread:$0]  %s226_s23, 2048, %s228_s22, [#allocation22], %s7057_s28, %s7057_s28, %s7058_s1  }
  0x7e   :  { %s80_s8 = sshll.u32 %s7091_s9, 4  ;;  %s7066_s11 = smov [#allocation24]   ;;  %s7277_s8 = int_to_ptr.hbm [resolvable:$true] %s80_s8 }
  0x7f   :  { %s255_s10 = sshll.u32 %s7066_s11, 4  ;;  %s6794_s16 = sshra.s32 %s7269_s2, 4  ;;  %s256_s10 = int_to_ptr.vmem [resolvable:$true] %s255_s10  ;;  %s6795_s16 = int_to_ptr.hbm [resolvable:$true] %s6794_s16 }
  0x80   :  { %s6796_s4 = scalar_lea.hbm %s6795_s16, 128  ;;  %s6798_s18 = scalar_lea.hbm %s7186_s27, 128 }
  0x81   :  { %p6797_p2 = scmp.ne.s32.totalorder %s6795_s16, %s6796_s4  ;;  %p6799_p3 = scmp.lt.s32.totalorder %s6795_s16, %s7186_s27 }
  0x82   :  { %p6800_p4 = scmp.lt.s32.totalorder %s6798_s18, %s6796_s4 }
  0x84   :  { %p6801_p5 = por %p6800_p4, %p6799_p3 }
  0x86   :  { %p6802_p6 = pnand %p6801_p5, %p6797_p2 }
  0x88   :  { %6805 = shalt.err (!%p6802_p6)
}
  0x89   :  { %261 = dma.hbm_to_vmem [thread:$0]  %s7269_s2, 2048, %s256_s10, [#allocation25], %s7057_s28, %s7057_s28, %s7058_s1  }
  0x8a   :  { %s7067_s0 = smov [#allocation4]   ;;  %s110_s26 = sshll.u32 %s7111_s25, 4  ;;  %s7287_s26 = int_to_ptr.hbm [resolvable:$true] %s110_s26 }
  0x8b   :  { %s82_s23 = sshll.u32 %s7067_s0, 4  ;;  %s6818_s27 = sshra.s32 %s7277_s8, 4  ;;  %s83_s23 = int_to_ptr.vmem [resolvable:$true] %s82_s23  ;;  %s6819_s27 = int_to_ptr.hbm [resolvable:$true] %s6818_s27 }
  0x8c   :  { %s6820_s30 = scalar_lea.hbm %s6819_s27, 32  ;;  %s6822_s29 = scalar_lea.hbm %s7091_s9, 32 }
  0x8d   :  { %p6821_p7 = scmp.ne.s32.totalorder %s6819_s27, %s6820_s30  ;;  %p6823_p8 = scmp.lt.s32.totalorder %s6819_s27, %s7091_s9 }
  0x8e   :  { %p6824_p9 = scmp.lt.s32.totalorder %s6822_s29, %s6820_s30 }
  0x90   :  { %p6825_p10 = por %p6824_p9, %p6823_p8 }
  0x92   :  { %p6826_p11 = pnand %p6825_p10, %p6821_p7 }
  0x94   :  { %6829 = shalt.err (!%p6826_p11)
}
  0x95   :  { %88 = dma.hbm_to_vmem [thread:$0]  %s7277_s8, 512, %s83_s23, [#allocation5], %s7057_s28, %s7057_s28, %s7058_s1  }
  0x96   :  { %s134_s15 = sshll.u32 %s7121_s3, 4  ;;  %s7068_s22 = smov [#allocation8]   ;;  %s7297_s15 = int_to_ptr.hbm [resolvable:$true] %s134_s15 }
  0x97   :  { %s112_s2 = sshll.u32 %s7068_s22, 4  ;;  %s6842_s9 = sshra.s32 %s7287_s26, 4  ;;  %s113_s2 = int_to_ptr.vmem [resolvable:$true] %s112_s2  ;;  %s6843_s9 = int_to_ptr.hbm [resolvable:$true] %s6842_s9 }
  0x98   :  { %s6844_s7 = scalar_lea.hbm %s6843_s9, 128  ;;  %s6846_s21 = scalar_lea.hbm %s7111_s25, 128 }
  0x99   :  { %p6845_p12 = scmp.ne.s32.totalorder %s6843_s9, %s6844_s7  ;;  %p6847_p13 = scmp.lt.s32.totalorder %s6843_s9, %s7111_s25 }
  0x9a   :  { %p6848_p0 = scmp.lt.s32.totalorder %s6846_s21, %s6844_s7 }
  0x9c   :  { %p6849_p1 = por %p6848_p0, %p6847_p13 }
  0x9e   :  { %p6850_p2 = pnand %p6849_p1, %p6845_p12 }
  0xa0   :  { %6853 = shalt.err (!%p6850_p2)
}
  0xa1   :  { %118 = dma.hbm_to_vmem [thread:$0]  %s7287_s26, 2048, %s113_s2, [#allocation7], %s7057_s28, %s7057_s28, %s7058_s1  }
  0xa2   :  { %s7069_s12 = smov [#allocation11]   ;;  %s165_s11 = sshll.u32 %s7141_s24, 4  ;;  %s166_s11 = int_to_ptr.hbm [resolvable:$true] %s165_s11 }
  0xa3   :  { %s136_s8 = sshll.u32 %s7069_s12, 4  ;;  %s6866_s10 = sshra.s32 %s7297_s15, 4  ;;  %s137_s8 = int_to_ptr.vmem [resolvable:$true] %s136_s8  ;;  %s6867_s10 = int_to_ptr.hbm [resolvable:$true] %s6866_s10 }
  0xa4   :  { %s6868_s25 = scalar_lea.hbm %s6867_s10, 256  ;;  %s6870_s16 = scalar_lea.hbm %s7121_s3, 256 }
  0xa5   :  { %p6869_p3 = scmp.ne.s32.totalorder %s6867_s10, %s6868_s25  ;;  %p6871_p4 = scmp.lt.s32.totalorder %s6867_s10, %s7121_s3 }
  0xa6   :  { %p6872_p5 = scmp.lt.s32.totalorder %s6870_s16, %s6868_s25 }
  0xa8   :  { %p6873_p6 = por %p6872_p5, %p6871_p4 }
  0xaa   :  { %p6874_p7 = pnand %p6873_p6, %p6869_p3 }
  0xac   :  { %6877 = shalt.err (!%p6874_p7)
}
  0xad   :  { %142 = dma.hbm_to_vmem [thread:$0]  %s7297_s15, 4096, %s137_s8, [#allocation10], %s7057_s28, %s7057_s28, %s7058_s1  }
  0xae   :  { %s189_s4 = sshll.u32 %s7151_s6, 4  ;;  %s7070_s18 = smov [#allocation14]   ;;  %s190_s4 = int_to_ptr.hbm [resolvable:$true] %s189_s4 }
  0xaf   :  { %s167_s0 = sshll.u32 %s7070_s18, 4  ;;  %s6890_s23 = sshra.s32 %s166_s11, 4  ;;  %s168_s0 = int_to_ptr.vmem [resolvable:$true] %s167_s0  ;;  %s6891_s23 = int_to_ptr.hbm [resolvable:$true] %s6890_s23 }
  0xb0   :  { %s6892_s3 = scalar_lea.hbm %s6891_s23, 1  ;;  %s6894_s26 = scalar_lea.hbm %s7141_s24, 1 }
  0xb1   :  { %p6893_p8 = scmp.ne.s32.totalorder %s6891_s23, %s6892_s3  ;;  %p6895_p9 = scmp.lt.s32.totalorder %s6891_s23, %s7141_s24 }
  0xb2   :  { %p6896_p10 = scmp.lt.s32.totalorder %s6894_s26, %s6892_s3 }
  0xb4   :  { %p6897_p11 = por %p6896_p10, %p6895_p9 }
  0xb6   :  { %p6898_p12 = pnand %p6897_p11, %p6893_p8 }
  0xb8   :  { %6901 = shalt.err (!%p6898_p12)
}
  0xb9   :  { %170 = dma.hbm_to_vmem [thread:$0]  %s166_s11, 16, %s168_s0, [#allocation13]  }
  0xba   :  { %s7071_s27 = smov [#allocation17]   ;;  %s210_s29 = sshll.u32 %s7161_s20, 4  ;;  %s7318_s29 = int_to_ptr.hbm [resolvable:$true] %s210_s29 }
  0xbb   :  { %s191_s30 = sshll.u32 %s7071_s27, 4  ;;  %s6914_s15 = sshra.s32 %s190_s4, 4  ;;  %s192_s30 = int_to_ptr.vmem [resolvable:$true] %s191_s30  ;;  %s6915_s15 = int_to_ptr.hbm [resolvable:$true] %s6914_s15 }
  0xbc   :  { %s6916_s22 = scalar_lea.hbm %s6915_s15, 1  ;;  %s6918_s2 = scalar_lea.hbm %s7151_s6, 1 }
  0xbd   :  { %p6917_p13 = scmp.ne.s32.totalorder %s6915_s15, %s6916_s22  ;;  %p6919_p0 = scmp.lt.s32.totalorder %s6915_s15, %s7151_s6 }
  0xbe   :  { %p6920_p1 = scmp.lt.s32.totalorder %s6918_s2, %s6916_s22 }
  0xc0   :  { %p6921_p2 = por %p6920_p1, %p6919_p0 }
  0xc2   :  { %p6922_p3 = pnand %p6921_p2, %p6917_p13 }
  0xc4   :  { %6925 = shalt.err (!%p6922_p3)
}
  0xc5   :  { %194 = dma.hbm_to_vmem [thread:$0]  %s190_s4, 16, %s192_s30, [#allocation16]  }
  0xc6   :  { %s238_s24 = sshll.u32 %s7176_s19, 4  ;;  %s7072_s9 = smov [#allocation20]   ;;  %s7323_s24 = int_to_ptr.hbm [resolvable:$true] %s238_s24 }
  0xc7   :  { %s212_s7 = sshll.u32 %s7072_s9, 4  ;;  %s6938_s21 = sshra.s32 %s7318_s29, 4  ;;  %s213_s7 = int_to_ptr.vmem [resolvable:$true] %s212_s7  ;;  %s6939_s21 = int_to_ptr.hbm [resolvable:$true] %s6938_s21 }
  0xc8   :  { %s6940_s12 = scalar_lea.hbm %s6939_s21, 128  ;;  %s6942_s6 = scalar_lea.hbm %s7161_s20, 128 }
  0xc9   :  { %p6941_p4 = scmp.ne.s32.totalorder %s6939_s21, %s6940_s12  ;;  %p6943_p5 = scmp.lt.s32.totalorder %s6939_s21, %s7161_s20 }
  0xca   :  { %p6944_p6 = scmp.lt.s32.totalorder %s6942_s6, %s6940_s12 }
  0xcc   :  { %p6945_p7 = por %p6944_p6, %p6943_p5 }
  0xce   :  { %p6946_p8 = pnand %p6945_p7, %p6941_p4 }
  0xd0   :  { %6949 = shalt.err (!%p6946_p8)
}
  0xd1   :  { %s9400_s8 = sld [smem:[#allocation42_spill]]  ;;  %s7073_s11 = smov [#allocation23]  }
  0xd2   :  { %218 = dma.hbm_to_vmem [thread:$0]  %s7318_s29, 2048, %s213_s7, [#allocation19], %s7057_s28, %s7057_s28, %s7058_s1  }
  0xd3   :  { %s240_s10 = sshll.u32 %s7073_s11, 4  ;;  %s6962_s16 = sshra.s32 %s7323_s24, 4  ;;  %s241_s10 = int_to_ptr.vmem [resolvable:$true] %s240_s10  ;;  %s6963_s16 = int_to_ptr.hbm [resolvable:$true] %s6962_s16 }
  0xd4   :  { %s6964_s20 = scalar_lea.hbm %s6963_s16, 128  ;;  %s6966_s4 = scalar_lea.hbm %s7176_s19, 128 }
  0xd5   :  { %p6965_p9 = scmp.ne.s32.totalorder %s6963_s16, %s6964_s20  ;;  %p6967_p10 = scmp.lt.s32.totalorder %s6963_s16, %s7176_s19 }
  0xd6   :  { %p6968_p11 = scmp.lt.s32.totalorder %s6966_s4, %s6964_s20 }
  0xd7   :  { %s266_s25 = sshll.u32 %s9400_s8, 4  ;;  %s267_s25 = int_to_ptr.hbm [resolvable:$true] %s266_s25 }
  0xd8   :  { %p6969_p12 = por %p6968_p11, %p6967_p10 }
  0xda   :  { %p6970_p13 = pnand %p6969_p12, %p6965_p9 }
  0xdc   :  { %6973 = shalt.err (!%p6970_p13)
}
  0xdd   :  { %246 = dma.hbm_to_vmem [thread:$0]  %s7323_s24, 2048, %s241_s10, [#allocation22], %s7057_s28, %s7057_s28, %s7058_s1  }
  0xde   :  { %s7074_s18 = smov [#allocation26]   ;;  %s6986_s23 = sshra.s32 %s267_s25, 4  ;;  %s6987_s23 = int_to_ptr.hbm [resolvable:$true] %s6986_s23 }
  0xdf   :  { %s268_s0 = sshll.u32 %s7074_s18, 4  ;;  %s6988_s3 = scalar_lea.hbm %s6987_s23, 128  ;;  %s269_s0 = int_to_ptr.vmem [resolvable:$true] %s268_s0 }
  0xe0   :  { %p6989_p0 = scmp.ne.s32.totalorder %s6987_s23, %s6988_s3  ;;  %s6990_s19 = scalar_lea.hbm %s9400_s8, 128 }
  0xe1   :  { %p6991_p1 = scmp.lt.s32.totalorder %s6987_s23, %s9400_s8  ;;  %p6992_p2 = scmp.lt.s32.totalorder %s6990_s19, %s6988_s3 }
  0xe3   :  { %p6993_p3 = por %p6992_p2, %p6991_p1 }
  0xe5   :  { %p6994_p4 = pnand %p6993_p3, %p6989_p0 }
  0xe7   :  { %6997 = shalt.err (!%p6994_p4)
}
  0xe8   :  { %274 = dma.hbm_to_vmem [thread:$0]  %s267_s25, 2048, %s269_s0, [#allocation25], %s7057_s28, %s7057_s28, %s7058_s1  }
  0xe9   :  { %7010 = dma.done.wait [#allocation5], 512  }
  0xea   :  { %7011 = vsyncadd [#allocation5], 4294966784 }
  0xeb   :  { %7012 = dma.done.wait [#allocation7], 6144  }
  0xec   :  { %7013 = vsyncadd [#allocation7], 4294961152 }
  0xed   :  { %7014 = dma.done.wait [#allocation10], 4128  }
  0xee   :  { %7015 = vsyncadd [#allocation10], 4294963168 }
  0xef   :  { %7016 = dma.done.wait [#allocation13], 2064  }
  0xf0   :  { %7017 = vsyncadd [#allocation13], 4294965232 }
  0xf1   :  { %7018 = dma.done.wait [#allocation16], 1040  }
  0xf2   :  { %7019 = vsyncadd [#allocation16], 4294966256 }
  0xf3   :  { %7020 = dma.done.wait [#allocation19], 2304  }
  0xf4   :  { %7021 = vsyncadd [#allocation19], 4294964992 }
  0xf5   :  { %7022 = dma.done.wait [#allocation22], 4096  }
  0xf6   :  { %7023 = vsyncadd [#allocation22], 4294963200 }
  0xf7   :  { %7024 = dma.done.wait [#allocation25], 4096  }
  0xf8   :  { %7025 = vsyncadd [#allocation25], 4294963200  ;;  %s9401_s26 = sld [smem:[#allocation36_spill]]  ;;  %v356_v2 = vld [vmem:[#allocation4 + $0x18] sm:$0xff]  ;;  %v354_v4 = vld [vmem:[#allocation4 + $0x8] sm:$0xff]  ;;  %vm363_vm0 = vcmask 130048  }
  0xf9   :  { %s9402_s28 = sld [smem:[#allocation35_spill]]  ;;  %407 = vmatpush.msra.mxu1 %v356_v2  ;;  %v355_v10 = vld [vmem:[#allocation4 + $0x10] sm:$0xff]  ;;  %v353_v11 = vld [vmem:[#allocation4] sm:$0xff]  ;;  %v7075_v21 = vmov 0.0   ;;  %s7076_s27 = smov 64   ;;  %vm438_vm9 = vcmask 523264  }
  0xfa   :  { %384 = vmatpush.msra.mxu0 %v355_v10  ;;  %s9403_s1 = sld [smem:[#allocation37_spill]]  ;;  %vm540_vm10 = vcmask 254976   ;;  %vm9311_vm11 = vcmask 517376  }
  0xfb   :  { %408 = vmatpush.msra.mxu1 %v354_v4  ;;  %s9415_s30 = sld [smem:[#allocation38_spill]] }
  0xfc   :  { %385 = vmatpush.msra.mxu0 %v353_v11  ;;  %s9416_s29 = sld [smem:[#allocation39_spill]] }
  0xfd   :  { %s9430_s15 = sld [smem:[#allocation40_spill]] }
  0xfe   :  { %v7346_v0 = vld [vmem:[%s9401_s26 + $0x78] sm:$0xff]  ;;  %v7349_v1 = vld [vmem:[%s9401_s26 + $0x68] sm:$0xff]  ;;  %v7358_v6 = vld [vmem:[%s9401_s26 + $0x70] sm:$0xff]  ;;  %s9436_s22 = sld [smem:[#allocation41_spill]] }
  0xff   :  { %470 = vmatpush.msra.mxu3 %v7346_v0  ;;  %v7353_v3 = vld [vmem:[%s9401_s26 + $0x58] sm:$0xff]  ;;  %v351_v5 = vld [vmem:[%s9402_s28] sm:$0xff]  ;;  %v7361_v7 = vld [vmem:[%s9401_s26 + $0x48] sm:$0xff]  ;;  %450 = vmatpush.msra.mxu2 %v7358_v6  ;;  %s9441_s2 = sld [smem:[#allocation43_spill]] }
 0x100   :  { %v7365_v8 = vld [vmem:[%s9401_s26 + $0x60] sm:$0xff]  ;;  %5865 = vmatmul.msk.f32.vlgmr.msra.gmra.mxu1 %vm363_vm0, %v351_v5  ;;  %v7370_v9 = vld [vmem:[%s9401_s26 + $0x50] sm:$0xff]  ;;  %v7373_v12 = vld [vmem:[%s9401_s26 + $0x38] sm:$0xff]  ;;  %5863 = vmatmul.msk.f32.vlgmr.msra.gmra.mxu0 %vm363_vm0, %v351_v5  ;;  %s9443_s24 = sld [smem:[#allocation44_spill]] }
 0x101   :  { %471 = vmatpush.msra.mxu3 %v7349_v1  ;;  %451 = vmatpush.msra.mxu2 %v7365_v8  ;;  %v7378_v13 = vld [vmem:[%s9401_s26 + $0x40] sm:$0xff]  ;;  %v7382_v14 = vld [vmem:[%s9401_s26 + $0x28] sm:$0xff]  ;;  %v7387_v15 = vld [vmem:[%s9401_s26 + $0x30] sm:$0xff]  ;;  %s9444_s9 = sld [smem:[#allocation45_spill]] }
 0x102   :  { %584 = vmatpush.msrb.mxu1 %v7346_v0  ;;  %v7391_v16 = vld [vmem:[%s9401_s26 + $0x18] sm:$0xff]  ;;  %564 = vmatpush.msrb.mxu0 %v7358_v6  ;;  %v7397_v17 = vld [vmem:[%s9401_s26 + $0x20] sm:$0xff]  ;;  %v7401_v18 = vld [vmem:[%s9401_s26 + $0x8] sm:$0xff]  ;;  %s9448_s7 = sld [smem:[#allocation46_spill]] }
 0x103   :  { %472 = vmatpush.msra.mxu3 %v7353_v3  ;;  %452 = vmatpush.msra.mxu2 %v7370_v9  ;;  %v7407_v19 = vld [vmem:[%s9401_s26 + $0x10] sm:$0xff]  ;;  %v7414_v20 = vld [vmem:[%s9401_s26] sm:$0xff]  ;;  %v352_v51 = vld [vmem:[%s9402_s28 + $0x8] sm:$0xff]  ;;  %s9450_s21 = sld [smem:[#allocation47_spill]] }
 0x104   :  { %585 = vmatpush.msrb.mxu1 %v7349_v1  ;;  %565 = vmatpush.msrb.mxu0 %v7365_v8  ;;  %v357_v22 = vld [vmem:[%s9403_s1] sm:$0x3] }
 0x105   :  { %473 = vmatpush.msra.mxu3 %v7361_v7  ;;  %453 = vmatpush.msra.mxu2 %v7378_v13  ;;  %v360_v23 = vperm.slane %v357_v22, 1  ;;  %v359_v26 = vperm.slane %v357_v22, 0 }
 0x106   :  { %586 = vmatpush.msrb.mxu1 %v7353_v3  ;;  %566 = vmatpush.msrb.mxu0 %v7370_v9 }
 0x107   :  { %474 = vmatpush.msra.mxu3 %v7373_v12  ;;  %454 = vmatpush.msra.mxu2 %v7387_v15 }
 0x108   :  { %587 = vmatpush.msrb.mxu1 %v7361_v7  ;;  %567 = vmatpush.msrb.mxu0 %v7378_v13 }
 0x109   :  { %475 = vmatpush.msra.mxu3 %v7382_v14  ;;  %455 = vmatpush.msra.mxu2 %v7397_v17 }
 0x10a   :  { %588 = vmatpush.msrb.mxu1 %v7373_v12  ;;  %568 = vmatpush.msrb.mxu0 %v7387_v15 }
 0x10b   :  { %476 = vmatpush.msra.mxu3 %v7391_v16  ;;  %456 = vmatpush.msra.mxu2 %v7407_v19 }
 0x10c   :  { %589 = vmatpush.msrb.mxu1 %v7382_v14  ;;  %569 = vmatpush.msrb.mxu0 %v7397_v17 }
 0x10d   :  { %477 = vmatpush.msra.mxu3 %v7401_v18  ;;  %457 = vmatpush.msra.mxu2 %v7414_v20 }
 0x10e   :  { %478 = vmatmul.f32.vlgmr.msra.gmra.mxu3 %v7075_v21  ;;  %458 = vmatmul.f32.vlgmr.msra.gmra.mxu2 %v7075_v21 }
 0x10f   :  { %708 = vmatpush.msrb.mxu3 %v7346_v0  ;;  %688 = vmatpush.msrb.mxu2 %v7358_v6 }
 0x110   :  { %590 = vmatpush.msrb.mxu1 %v7391_v16  ;;  %570 = vmatpush.msrb.mxu0 %v7407_v19 }
 0x111   :  { %709 = vmatpush.msrb.mxu3 %v7349_v1  ;;  %689 = vmatpush.msrb.mxu2 %v7365_v8 }
 0x112   :  { %591 = vmatpush.msrb.mxu1 %v7401_v18  ;;  %571 = vmatpush.msrb.mxu0 %v7414_v20 }
 0x113   :  { %710 = vmatpush.msrb.mxu3 %v7353_v3  ;;  %690 = vmatpush.msrb.mxu2 %v7370_v9 }
 0x114   :  { %812 = vmatpush.msra.mxu0 %v7358_v6  ;;  %832 = vmatpush.msra.mxu1 %v7346_v0 }
 0x115   :  { %711 = vmatpush.msrb.mxu3 %v7361_v7  ;;  %691 = vmatpush.msrb.mxu2 %v7378_v13 }
 0x116   :  { %813 = vmatpush.msra.mxu0 %v7365_v8  ;;  %833 = vmatpush.msra.mxu1 %v7349_v1 }
 0x117   :  { %712 = vmatpush.msrb.mxu3 %v7373_v12  ;;  %692 = vmatpush.msrb.mxu2 %v7387_v15 }
 0x118   :  { %814 = vmatpush.msra.mxu0 %v7370_v9  ;;  %834 = vmatpush.msra.mxu1 %v7353_v3 }
 0x119   :  { %713 = vmatpush.msrb.mxu3 %v7382_v14  ;;  %693 = vmatpush.msrb.mxu2 %v7397_v17 }
 0x11a   :  { %815 = vmatpush.msra.mxu0 %v7378_v13  ;;  %835 = vmatpush.msra.mxu1 %v7361_v7 }
 0x11b   :  { %714 = vmatpush.msrb.mxu3 %v7391_v16  ;;  %694 = vmatpush.msrb.mxu2 %v7407_v19 }
 0x11c   :  { %816 = vmatpush.msra.mxu0 %v7387_v15  ;;  %836 = vmatpush.msra.mxu1 %v7373_v12 }
 0x11d   :  { %715 = vmatpush.msrb.mxu3 %v7401_v18  ;;  %695 = vmatpush.msrb.mxu2 %v7414_v20 }
 0x11e   :  { %817 = vmatpush.msra.mxu0 %v7397_v17  ;;  %837 = vmatpush.msra.mxu1 %v7382_v14 }
 0x11f   :  { %936 = vmatpush.msra.mxu2 %v7358_v6  ;;  %956 = vmatpush.msra.mxu3 %v7346_v0 }
 0x120   :  { %818 = vmatpush.msra.mxu0 %v7407_v19  ;;  %838 = vmatpush.msra.mxu1 %v7391_v16 }
 0x121   :  { %937 = vmatpush.msra.mxu2 %v7365_v8  ;;  %957 = vmatpush.msra.mxu3 %v7349_v1 }
 0x122   :  { %819 = vmatpush.msra.mxu0 %v7414_v20  ;;  %839 = vmatpush.msra.mxu1 %v7401_v18 }
 0x123   :  { %938 = vmatpush.msra.mxu2 %v7370_v9  ;;  %958 = vmatpush.msra.mxu3 %v7353_v3 }
 0x124   :  { %5864 = vmatmul.msk.f32.gmra.mxu0 %vm363_vm0, %v352_v51  ;;  %5866 = vmatmul.msk.f32.gmra.mxu1 %vm363_vm0, %v352_v51 }
 0x125   :  { %939 = vmatpush.msra.mxu2 %v7378_v13  ;;  %959 = vmatpush.msra.mxu3 %v7361_v7 }
 0x127   :  { %940 = vmatpush.msra.mxu2 %v7387_v15  ;;  %960 = vmatpush.msra.mxu3 %v7373_v12 }
 0x129   :  { %941 = vmatpush.msra.mxu2 %v7397_v17  ;;  %961 = vmatpush.msra.mxu3 %v7382_v14 }
 0x12b   :  { %942 = vmatpush.msra.mxu2 %v7407_v19  ;;  %962 = vmatpush.msra.mxu3 %v7391_v16 }
 0x12d   :  { %943 = vmatpush.msra.mxu2 %v7414_v20  ;;  %963 = vmatpush.msra.mxu3 %v7401_v18 }
 0x17d   :  { %v410_v24 = vpop.f32.mrf.mxu1  ;;  %v387_v27 = vpop.f32.mrf.mxu0 }
 0x17e   :  { %v411_v25 = vadd.f32 %v410_v24, %v360_v23  ;;  %v388_v28 = vadd.f32 %v387_v27, %v359_v26 }
 0x180   :  { %417 = vst [vmem:[#allocation2] sm:$0xff] %v411_v25 }
 0x181   :  { %416 = vst [vmem:[#allocation2 + $0x10] sm:$0xff] %v388_v28 }
 0x187   :  { %v437_v29 = vld [vmem:[#allocation2] sm:$0x3] }
 0x188   :  { %v436_v33 = vld [vmem:[#allocation2 + $0x10] sm:$0x3] }
 0x191   :  { %v479_v30 = vpop.f32.mrf.mxu3  ;;  %v459_v34 = vpop.f32.mrf.mxu2 }
 0x192   :  { %v483_v31 = vadd.f32 %v479_v30, %v437_v29  ;;  %v482_v35 = vadd.f32 %v459_v34, %v436_v33  ;;  %v553_v30 = vld [vmem:[#allocation2] sm:$0xc] }
 0x194   :  { %6110 = vtanh.f32 %v483_v31  ;;  %v5867_v36 = vmul.f32 -1.442695, %v482_v35  ;;  %v5868_v56 = vmul.f32 -1.442695, %v483_v31  ;;  %v552_v35 = vld [vmem:[#allocation2 + $0x10] sm:$0xc] }
 0x196   :  { %6112 = vpow2.f32 %v5867_v36 }
 0x19a   :  { %v6111_v32 = vpop.eup %6110 }
 0x19b   :  { %525 = vrot.lane.b32.xlu0 %v6111_v32, %s7076_s27 }
 0x19c   :  { %v6113_v37 = vpop.eup %6112 }
 0x19d   :  { %v490_v38 = vadd.f32 1.0, %v6113_v37 }
 0x19f   :  { %6114 = vrcp.f32 %v490_v38  ;;  %vm497_vm1 = vweird.f32 %v490_v38  ;;  %v503_v43 = vand.u32 2147483648, %v490_v38  ;;  %v501_v45 = vand.u32 2147483647, %v490_v38 }
 0x1a1   :  { %v504_v46 = vor.u32 1.1754944e-38, %v503_v43  ;;  %vm502_vm4 = vcmp.eq.f32.partialorder %v501_v45, 8.507059e+37  ;;  %v390_v60 = vpop.f32.mrf.mxu0  ;;  %v413_v61 = vpop.f32.mrf.mxu1 }
 0x1a2   :  { %v391_v63 = vadd.f32 %v390_v60, %v359_v26  ;;  %v414_v2 = vadd.f32 %v413_v61, %v360_v23 }
 0x1a4   :  { %418 = vst [vmem:[#allocation2 + $0x18] sm:$0xff] %v391_v63 }
 0x1a5   :  { %v6115_v39 = vpop.eup %6114  ;;  %419 = vst [vmem:[#allocation2 + $0x8] sm:$0xff] %v414_v2 }
 0x1a6   :  { %v493_v40 = vmul.f32 %v6115_v39, %v490_v38  ;;  %vm498_vm2 = vweird.f32 %v6115_v39 }
 0x1a7   :  { %vm499_vm3 = vmor %vm497_vm1, %vm498_vm2 }
 0x1a8   :  { %v494_v41 = vsub.f32 1.0, %v493_v40 }
 0x1aa   :  { %v495_v42 = vmul.f32 %v6115_v39, %v494_v41 }
 0x1ac   :  { %v496_v44 = vadd.f32 %v6115_v39, %v495_v42 }
 0x1ae   :  { %v500_v47 = vsel %vm499_vm3, %v6115_v39, %v496_v44 }
 0x1af   :  { %v505_v49 = vsel %vm502_vm4, %v504_v46, %v500_v47  ;;  %vm663_vm4 = vcmask 257026  }
 0x1b0   :  { %v523_v52 = vmul.f32 0.0, %v505_v49 }
 0x20d   :  { %v526_v48 = vpop.permute.xlu0 %525 }
 0x20e   :  { %v528_v50 = vmul.f32 %v526_v48, %v505_v49 }
 0x210   :  { %530 = vrot.lane.b32.xlu0 %v528_v50, %s7076_s27 }
 0x282   :  { %v531_v53 = vpop.permute.xlu0 %530 }
 0x283   :  { %v7484_v54 = vadd.f32 %v531_v53, %v523_v52 }
 0x285   :  { %6116 = vtanh.f32 %v7484_v54  ;;  %v644_v52 = vrot.slane %v7484_v54, 6 }
 0x286   :  { %6118 = vpow2.f32 %v5868_v56 }
 0x28b   :  { %v6117_v55 = vpop.eup %6116 }
 0x28c   :  { %536 = vrot.lane.b32.xlu1 %v6117_v55, %s7076_s27  ;;  %v6119_v57 = vpop.eup %6118 }
 0x28d   :  { %v491_v58 = vadd.f32 1.0, %v6119_v57 }
 0x28f   :  { %6120 = vrcp.f32 %v491_v58  ;;  %v518_v11 = vand.u32 2147483648, %v491_v58  ;;  %vm512_vm6 = vweird.f32 %v491_v58  ;;  %v516_v22 = vand.u32 2147483647, %v491_v58 }
 0x291   :  { %v519_v25 = vor.u32 1.1754944e-38, %v518_v11  ;;  %vm517_vm8 = vcmp.eq.f32.partialorder %v516_v22, 8.507059e+37 }
 0x295   :  { %v6121_v59 = vpop.eup %6120 }
 0x296   :  { %v508_v62 = vmul.f32 %v6121_v59, %v491_v58  ;;  %vm513_vm5 = vweird.f32 %v6121_v59 }
 0x297   :  { %vm514_vm7 = vmor %vm512_vm6, %vm513_vm5  ;;  %vm9317_vm5 = vcmask 519426  }
 0x298   :  { %v509_v4 = vsub.f32 1.0, %v508_v62 }
 0x29a   :  { %v510_v5 = vmul.f32 %v6121_v59, %v509_v4 }
 0x29c   :  { %v511_v10 = vadd.f32 %v6121_v59, %v510_v5 }
 0x29e   :  { %v515_v24 = vsel %vm514_vm7, %v6121_v59, %v511_v10 }
 0x29f   :  { %v520_v27 = vsel %vm517_vm8, %v519_v25, %v515_v24 }
 0x2fe   :  { %v537_v28 = vpop.permute.xlu1 %536 }
 0x2ff   :  { %v7488_v29 = vmul.f32 %v537_v28, %v520_v27 }
 0x301   :  { %5869 = vmatmul.msk.f32.vlgmr.msrb.gmra.mxu0 %vm438_vm9, %v7488_v29  ;;  %5870 = vmatmul.msk.f32.vlgmr.msrb.gmra.mxu1 %vm438_vm9, %v7488_v29  ;;  %541 = vst.msk [vmem:[#allocation3] sm:$0x3] %vm540_vm10, %v7488_v29 }
 0x302   :  { %1049 = vmatpush.msrb.mxu0 %v7358_v6  ;;  %1069 = vmatpush.msrb.mxu1 %v7346_v0  ;;  %549 = vst.msk [vmem:[#allocation3 + $0xe] sm:$0x3] %vm9311_vm11, %v7488_v29 }
 0x304   :  { %1050 = vmatpush.msrb.mxu0 %v7365_v8  ;;  %1070 = vmatpush.msrb.mxu1 %v7349_v1 }
 0x306   :  { %1051 = vmatpush.msrb.mxu0 %v7370_v9  ;;  %1071 = vmatpush.msrb.mxu1 %v7353_v3 }
 0x308   :  { %1052 = vmatpush.msrb.mxu0 %v7378_v13  ;;  %1072 = vmatpush.msrb.mxu1 %v7361_v7 }
 0x30a   :  { %1053 = vmatpush.msrb.mxu0 %v7387_v15  ;;  %1073 = vmatpush.msrb.mxu1 %v7373_v12 }
 0x30c   :  { %1054 = vmatpush.msrb.mxu0 %v7397_v17  ;;  %1074 = vmatpush.msrb.mxu1 %v7382_v14 }
 0x30e   :  { %1055 = vmatpush.msrb.mxu0 %v7407_v19  ;;  %1075 = vmatpush.msrb.mxu1 %v7391_v16 }
 0x310   :  { %1056 = vmatpush.msrb.mxu0 %v7414_v20  ;;  %1076 = vmatpush.msrb.mxu1 %v7401_v18 }
 0x37e   :  { %v593_v23 = vpop.f32.mrf.mxu1  ;;  %v573_v33 = vpop.f32.mrf.mxu0 }
 0x37f   :  { %v599_v26 = vrot.slane %v593_v23, 6  ;;  %v598_v34 = vrot.slane %v573_v33, 6 }
 0x381   :  { %v603_v31 = vadd.f32 %v599_v26, %v553_v30  ;;  %v602_v36 = vadd.f32 %v598_v34, %v552_v35  ;;  %v676_v26 = vld [vmem:[#allocation2] sm:$0x30]  ;;  %v675_v34 = vld [vmem:[#allocation2 + $0x10] sm:$0x30] }
 0x383   :  { %6122 = vtanh.f32 %v603_v31  ;;  %v5871_v37 = vmul.f32 -1.442695, %v602_v36  ;;  %v5872_v58 = vmul.f32 -1.442695, %v603_v31 }
 0x385   :  { %6124 = vpow2.f32 %v5871_v37 }
 0x389   :  { %v6123_v32 = vpop.eup %6122 }
 0x38a   :  { %648 = vrot.lane.b32.xlu1 %v6123_v32, %s7076_s27 }
 0x38b   :  { %v6125_v38 = vpop.eup %6124 }
 0x38c   :  { %v610_v39 = vadd.f32 1.0, %v6125_v38 }
 0x38e   :  { %6126 = vrcp.f32 %v610_v39  ;;  %v623_v45 = vand.u32 2147483648, %v610_v39  ;;  %vm617_vm13 = vweird.f32 %v610_v39  ;;  %v621_v46 = vand.u32 2147483647, %v610_v39 }
 0x390   :  { %v624_v48 = vor.u32 1.1754944e-38, %v623_v45  ;;  %vm622_vm15 = vcmp.eq.f32.partialorder %v621_v46, 8.507059e+37 }
 0x394   :  { %v6127_v40 = vpop.eup %6126 }
 0x395   :  { %v613_v41 = vmul.f32 %v6127_v40, %v610_v39  ;;  %vm618_vm12 = vweird.f32 %v6127_v40 }
 0x396   :  { %vm619_vm14 = vmor %vm617_vm13, %vm618_vm12 }
 0x397   :  { %v614_v42 = vsub.f32 1.0, %v613_v41 }
 0x399   :  { %v615_v43 = vmul.f32 %v6127_v40, %v614_v42 }
 0x39b   :  { %v616_v44 = vadd.f32 %v6127_v40, %v615_v43 }
 0x39d   :  { %v620_v47 = vsel %vm619_vm14, %v6127_v40, %v616_v44 }
 0x39e   :  { %v625_v50 = vsel %vm622_vm15, %v624_v48, %v620_v47 }
 0x39f   :  { %v646_v53 = vmul.f32 %v644_v52, %v625_v50 }
 0x3fc   :  { %v649_v49 = vpop.permute.xlu1 %648 }
 0x3fd   :  { %v651_v51 = vmul.f32 %v649_v49, %v625_v50 }
 0x3ff   :  { %653 = vrot.lane.b32.xlu2 %v651_v51, %s7076_s27 }
 0x459   :  { %v654_v55 = vpop.permute.xlu2 %653 }
 0x45a   :  { %v7517_v56 = vadd.f32 %v654_v55, %v646_v53 }
 0x45c   :  { %6128 = vtanh.f32 %v7517_v56  ;;  %v768_v51 = vrot.slane %v7517_v56, 6 }
 0x45d   :  { %6130 = vpow2.f32 %v5872_v58 }
 0x462   :  { %v6129_v57 = vpop.eup %6128 }
 0x463   :  { %659 = vrot.lane.b32.xlu2 %v6129_v57, %s7076_s27  ;;  %v6131_v59 = vpop.eup %6130 }
 0x464   :  { %v611_v60 = vadd.f32 1.0, %v6131_v59 }
 0x466   :  { %6132 = vrcp.f32 %v611_v60  ;;  %v638_v54 = vand.u32 2147483648, %v611_v60  ;;  %vm632_vm1 = vweird.f32 %v611_v60  ;;  %v636_v5 = vand.u32 2147483647, %v611_v60 }
 0x468   :  { %v639_v11 = vor.u32 1.1754944e-38, %v638_v54  ;;  %vm637_vm3 = vcmp.eq.f32.partialorder %v636_v5, 8.507059e+37 }
 0x46c   :  { %v6133_v61 = vpop.eup %6132 }
 0x46d   :  { %v628_v62 = vmul.f32 %v6133_v61, %v611_v60  ;;  %vm633_vm0 = vweird.f32 %v6133_v61 }
 0x46e   :  { %vm634_vm2 = vmor %vm632_vm1, %vm633_vm0  ;;  %vm9315_vm1 = vcmask 259076  }
 0x46f   :  { %v629_v63 = vsub.f32 1.0, %v628_v62 }
 0x471   :  { %v630_v2 = vmul.f32 %v6133_v61, %v629_v63 }
 0x473   :  { %v631_v4 = vadd.f32 %v6133_v61, %v630_v2 }
 0x475   :  { %v635_v10 = vsel %vm634_vm2, %v6133_v61, %v631_v4  ;;  %vm9314_vm2 = vcmask 521476  }
 0x476   :  { %v640_v22 = vsel %vm637_vm3, %v639_v11, %v635_v10 }
 0x4bd   :  { %v660_v24 = vpop.permute.xlu2 %659 }
 0x4be   :  { %v7521_v25 = vmul.f32 %v660_v24, %v640_v22 }
 0x4c0   :  { %v677_v27 = vrot.slane %v7521_v25, 2  ;;  %664 = vst.msk [vmem:[#allocation3] sm:$0xc] %vm663_vm4, %v7521_v25 }
 0x4c1   :  { %672 = vst.msk [vmem:[#allocation3 + $0xa] sm:$0xc] %vm9317_vm5, %v7521_v25 }
 0x4c2   :  { %5873 = vmatmul.msk.f32.vlgmr.msrb.gmra.mxu2 %vm438_vm9, %v677_v27  ;;  %5874 = vmatmul.msk.f32.vlgmr.msrb.gmra.mxu3 %vm438_vm9, %v677_v27 }
 0x4c3   :  { %1169 = vmatpush.msrb.mxu2 %v7358_v6  ;;  %1189 = vmatpush.msrb.mxu3 %v7346_v0 }
 0x4c5   :  { %1170 = vmatpush.msrb.mxu2 %v7365_v8  ;;  %1190 = vmatpush.msrb.mxu3 %v7349_v1 }
 0x4c7   :  { %1171 = vmatpush.msrb.mxu2 %v7370_v9  ;;  %1191 = vmatpush.msrb.mxu3 %v7353_v3 }
 0x4c9   :  { %1172 = vmatpush.msrb.mxu2 %v7378_v13  ;;  %1192 = vmatpush.msrb.mxu3 %v7361_v7 }
 0x4cb   :  { %1173 = vmatpush.msrb.mxu2 %v7387_v15  ;;  %1193 = vmatpush.msrb.mxu3 %v7373_v12 }
 0x4cd   :  { %1174 = vmatpush.msrb.mxu2 %v7397_v17  ;;  %1194 = vmatpush.msrb.mxu3 %v7382_v14 }
 0x4cf   :  { %1175 = vmatpush.msrb.mxu2 %v7407_v19  ;;  %1195 = vmatpush.msrb.mxu3 %v7391_v16 }
 0x4d1   :  { %1176 = vmatpush.msrb.mxu2 %v7414_v20  ;;  %1196 = vmatpush.msrb.mxu3 %v7401_v18 }
 0x545   :  { %v717_v28 = vpop.f32.mrf.mxu3  ;;  %v697_v32 = vpop.f32.mrf.mxu2 }
 0x546   :  { %v723_v23 = vrot.slane %v717_v28, 4  ;;  %v722_v33 = vrot.slane %v697_v32, 4 }
 0x548   :  { %v727_v30 = vadd.f32 %v723_v23, %v676_v26  ;;  %v726_v35 = vadd.f32 %v722_v33, %v675_v34 }
 0x54a   :  { %6134 = vtanh.f32 %v727_v30  ;;  %v5875_v36 = vmul.f32 -1.442695, %v726_v35  ;;  %v5876_v58 = vmul.f32 -1.442695, %v727_v30 }
 0x54c   :  { %6136 = vpow2.f32 %v5875_v36 }
 0x550   :  { %v6135_v31 = vpop.eup %6134 }
 0x551   :  { %772 = vrot.lane.b32.xlu0 %v6135_v31, %s7076_s27 }
 0x552   :  { %v6137_v37 = vpop.eup %6136 }
 0x553   :  { %v734_v38 = vadd.f32 1.0, %v6137_v37 }
 0x555   :  { %6138 = vrcp.f32 %v734_v38  ;;  %v747_v44 = vand.u32 2147483648, %v734_v38  ;;  %vm741_vm7 = vweird.f32 %v734_v38  ;;  %v745_v45 = vand.u32 2147483647, %v734_v38 }
 0x557   :  { %v748_v47 = vor.u32 1.1754944e-38, %v747_v44  ;;  %vm746_vm12 = vcmp.eq.f32.partialorder %v745_v45, 8.507059e+37 }
 0x55b   :  { %v6139_v39 = vpop.eup %6138 }
 0x55c   :  { %v737_v40 = vmul.f32 %v6139_v39, %v734_v38  ;;  %vm742_vm6 = vweird.f32 %v6139_v39 }
 0x55d   :  { %vm743_vm8 = vmor %vm741_vm7, %vm742_vm6 }
 0x55e   :  { %v738_v41 = vsub.f32 1.0, %v737_v40 }
 0x560   :  { %v739_v42 = vmul.f32 %v6139_v39, %v738_v41 }
 0x562   :  { %v740_v43 = vadd.f32 %v6139_v39, %v739_v42 }
 0x564   :  { %v744_v46 = vsel %vm743_vm8, %v6139_v39, %v740_v43 }
 0x565   :  { %v749_v49 = vsel %vm746_vm12, %v748_v47, %v744_v46 }
 0x566   :  { %v770_v52 = vmul.f32 %v768_v51, %v749_v49 }
 0x5c3   :  { %v773_v48 = vpop.permute.xlu0 %772 }
 0x5c4   :  { %v775_v50 = vmul.f32 %v773_v48, %v749_v49 }
 0x5c6   :  { %777 = vrot.lane.b32.xlu1 %v775_v50, %s7076_s27 }
 0x638   :  { %v778_v53 = vpop.permute.xlu1 %777 }
 0x639   :  { %v7549_v55 = vadd.f32 %v778_v53, %v770_v52 }
 0x63b   :  { %6140 = vtanh.f32 %v7549_v55  ;;  %v892_v35 = vrot.slane %v7549_v55, 6 }
 0x63c   :  { %6142 = vpow2.f32 %v5876_v58  ;;  %v924_v58 = vld [vmem:[#allocation2 + $0x8] sm:$0x3] }
 0x641   :  { %v6141_v57 = vpop.eup %6140 }
 0x642   :  { %783 = vrot.lane.b32.xlu2 %v6141_v57, %s7076_s27  ;;  %v6143_v59 = vpop.eup %6142 }
 0x643   :  { %v735_v60 = vadd.f32 1.0, %v6143_v59 }
 0x645   :  { %6144 = vrcp.f32 %v735_v60  ;;  %v762_v56 = vand.u32 2147483648, %v735_v60  ;;  %vm756_vm14 = vweird.f32 %v735_v60  ;;  %v760_v54 = vand.u32 2147483647, %v735_v60 }
 0x647   :  { %v763_v10 = vor.u32 1.1754944e-38, %v762_v56  ;;  %vm761_vm0 = vcmp.eq.f32.partialorder %v760_v54, 8.507059e+37 }
 0x64b   :  { %v6145_v61 = vpop.eup %6144 }
 0x64c   :  { %v752_v62 = vmul.f32 %v6145_v61, %v735_v60  ;;  %vm757_vm13 = vweird.f32 %v6145_v61 }
 0x64d   :  { %vm758_vm15 = vmor %vm756_vm14, %vm757_vm13 }
 0x64e   :  { %v753_v63 = vsub.f32 1.0, %v752_v62 }
 0x650   :  { %v754_v2 = vmul.f32 %v6145_v61, %v753_v63  ;;  %v923_v63 = vld [vmem:[#allocation2 + $0x18] sm:$0x3] }
 0x652   :  { %v755_v4 = vadd.f32 %v6145_v61, %v754_v2 }
 0x654   :  { %v759_v5 = vsel %vm758_vm15, %v6145_v61, %v755_v4 }
 0x655   :  { %v764_v11 = vsel %vm761_vm0, %v763_v10, %v759_v5  ;;  %vm911_vm0 = vcmask 261126  }
 0x69c   :  { %v784_v22 = vpop.permute.xlu2 %783 }
 0x69d   :  { %v7553_v24 = vmul.f32 %v784_v22, %v764_v11 }
 0x69f   :  { %v801_v27 = vrot.slane %v7553_v24, 4  ;;  %788 = vst.msk [vmem:[#allocation3] sm:$0x30] %vm9315_vm1, %v7553_v24 }
 0x6a0   :  { %796 = vst.msk [vmem:[#allocation3 + $0x6] sm:$0x30] %vm9314_vm2, %v7553_v24 }
 0x6a1   :  { %5877 = vmatmul.msk.f32.vlgmr.msra.gmra.mxu0 %vm438_vm9, %v801_v27  ;;  %5878 = vmatmul.msk.f32.vlgmr.msra.gmra.mxu1 %vm438_vm9, %v801_v27 }
 0x6a2   :  { %1289 = vmatpush.msra.mxu0 %v7358_v6  ;;  %1309 = vmatpush.msra.mxu1 %v7346_v0 }
 0x6a4   :  { %1290 = vmatpush.msra.mxu0 %v7365_v8  ;;  %1310 = vmatpush.msra.mxu1 %v7349_v1 }
 0x6a6   :  { %1291 = vmatpush.msra.mxu0 %v7370_v9  ;;  %1311 = vmatpush.msra.mxu1 %v7353_v3  ;;  %v800_v3 = vld [vmem:[#allocation2] sm:$0xc0] }
 0x6a8   :  { %1292 = vmatpush.msra.mxu0 %v7378_v13  ;;  %1312 = vmatpush.msra.mxu1 %v7361_v7 }
 0x6aa   :  { %1293 = vmatpush.msra.mxu0 %v7387_v15  ;;  %1313 = vmatpush.msra.mxu1 %v7373_v12  ;;  %v799_v12 = vld [vmem:[#allocation2 + $0x10] sm:$0xc0] }
 0x6ac   :  { %1294 = vmatpush.msra.mxu0 %v7397_v17  ;;  %1314 = vmatpush.msra.mxu1 %v7382_v14 }
 0x6ae   :  { %1295 = vmatpush.msra.mxu0 %v7407_v19  ;;  %1315 = vmatpush.msra.mxu1 %v7391_v16 }
 0x6b0   :  { %1296 = vmatpush.msra.mxu0 %v7414_v20  ;;  %1316 = vmatpush.msra.mxu1 %v7401_v18 }
 0x71e   :  { %v841_v0 = vpop.f32.mrf.mxu1  ;;  %v821_v8 = vpop.f32.mrf.mxu0 }
 0x71f   :  { %v847_v1 = vrot.slane %v841_v0, 2  ;;  %v846_v9 = vrot.slane %v821_v8, 2 }
 0x721   :  { %v851_v6 = vadd.f32 %v847_v1, %v800_v3  ;;  %v850_v13 = vadd.f32 %v846_v9, %v799_v12 }
 0x723   :  { %6146 = vtanh.f32 %v851_v6  ;;  %v5879_v14 = vmul.f32 -1.442695, %v850_v13  ;;  %v5880_v40 = vmul.f32 -1.442695, %v851_v6 }
 0x725   :  { %6148 = vpow2.f32 %v5879_v14 }
 0x729   :  { %v6147_v7 = vpop.eup %6146 }
 0x72a   :  { %896 = vrot.lane.b32.xlu0 %v6147_v7, %s7076_s27 }
 0x72b   :  { %v6149_v15 = vpop.eup %6148 }
 0x72c   :  { %v858_v16 = vadd.f32 1.0, %v6149_v15 }
 0x72e   :  { %6150 = vrcp.f32 %v858_v16  ;;  %v871_v23 = vand.u32 2147483648, %v858_v16  ;;  %vm865_vm6 = vweird.f32 %v858_v16  ;;  %v869_v26 = vand.u32 2147483647, %v858_v16 }
 0x730   :  { %v872_v31 = vor.u32 1.1754944e-38, %v871_v23  ;;  %vm870_vm8 = vcmp.eq.f32.partialorder %v869_v26, 8.507059e+37 }
 0x734   :  { %v6151_v17 = vpop.eup %6150 }
 0x735   :  { %v861_v19 = vmul.f32 %v6151_v17, %v858_v16  ;;  %vm866_vm3 = vweird.f32 %v6151_v17 }
 0x736   :  { %vm867_vm7 = vmor %vm865_vm6, %vm866_vm3  ;;  %vm919_vm3 = vcmask 523526  }
 0x737   :  { %v862_v18 = vsub.f32 1.0, %v861_v19 }
 0x739   :  { %v863_v20 = vmul.f32 %v6151_v17, %v862_v18 }
 0x73b   :  { %v864_v28 = vadd.f32 %v6151_v17, %v863_v20 }
 0x73d   :  { %v868_v30 = vsel %vm867_vm7, %v6151_v17, %v864_v28 }
 0x73e   :  { %v873_v33 = vsel %vm870_vm8, %v872_v31, %v868_v30 }
 0x73f   :  { %v894_v36 = vmul.f32 %v892_v35, %v873_v33 }
 0x79c   :  { %v897_v32 = vpop.permute.xlu0 %896 }
 0x79d   :  { %v899_v34 = vmul.f32 %v897_v32, %v873_v33 }
 0x79f   :  { %901 = vrot.lane.b32.xlu1 %v899_v34, %s7076_s27 }
 0x811   :  { %v902_v37 = vpop.permute.xlu1 %901 }
 0x812   :  { %v7581_v38 = vadd.f32 %v902_v37, %v894_v36 }
 0x814   :  { %6152 = vtanh.f32 %v7581_v38  ;;  %v1010_v12 = vrot.slane %v7581_v38, 6 }
 0x815   :  { %6154 = vpow2.f32 %v5880_v40  ;;  %v1038_v40 = vld [vmem:[#allocation2 + $0x8] sm:$0xc] }
 0x81a   :  { %v6153_v39 = vpop.eup %6152 }
 0x81b   :  { %907 = vrot.lane.b32.xlu2 %v6153_v39, %s7076_s27  ;;  %v6155_v41 = vpop.eup %6154 }
 0x81c   :  { %v859_v42 = vadd.f32 1.0, %v6155_v41 }
 0x81e   :  { %6156 = vrcp.f32 %v859_v42  ;;  %v886_v48 = vand.u32 2147483648, %v859_v42  ;;  %vm880_vm13 = vweird.f32 %v859_v42  ;;  %v884_v49 = vand.u32 2147483647, %v859_v42 }
 0x820   :  { %v887_v51 = vor.u32 1.1754944e-38, %v886_v48  ;;  %vm885_vm15 = vcmp.eq.f32.partialorder %v884_v49, 8.507059e+37 }
 0x824   :  { %v6157_v43 = vpop.eup %6156 }
 0x825   :  { %v876_v44 = vmul.f32 %v6157_v43, %v859_v42  ;;  %vm881_vm12 = vweird.f32 %v6157_v43 }
 0x826   :  { %vm882_vm14 = vmor %vm880_vm13, %vm881_vm12 }
 0x827   :  { %v877_v45 = vsub.f32 1.0, %v876_v44 }
 0x829   :  { %v878_v46 = vmul.f32 %v6157_v43, %v877_v45  ;;  %v1037_v45 = vld [vmem:[#allocation2 + $0x18] sm:$0xc] }
 0x82b   :  { %v879_v47 = vadd.f32 %v6157_v43, %v878_v46 }
 0x82d   :  { %v883_v50 = vsel %vm882_vm14, %v6157_v43, %v879_v47 }
 0x82e   :  { %v888_v52 = vsel %vm885_vm15, %v887_v51, %v883_v50 }
 0x875   :  { %v908_v53 = vpop.permute.xlu2 %907 }
 0x876   :  { %v7585_v55 = vmul.f32 %v908_v53, %v888_v52 }
 0x878   :  { %v925_v57 = vrot.slane %v7585_v55, 6  ;;  %912 = vst.msk [vmem:[#allocation3] sm:$0xc0] %vm911_vm0, %v7585_v55 }
 0x879   :  { %920 = vst.msk [vmem:[#allocation3 + $0x2] sm:$0xc0] %vm919_vm3, %v7585_v55 }
 0x87a   :  { %5881 = vmatmul.msk.f32.vlgmr.msra.gmra.mxu2 %vm438_vm9, %v925_v57  ;;  %5882 = vmatmul.msk.f32.vlgmr.msra.gmra.mxu3 %vm438_vm9, %v925_v57 }
 0x8fd   :  { %v965_v59 = vpop.f32.mrf.mxu3  ;;  %v945_v62 = vpop.f32.mrf.mxu2 }
 0x8fe   :  { %v969_v60 = vadd.f32 %v965_v59, %v924_v58  ;;  %v968_v2 = vadd.f32 %v945_v62, %v923_v63 }
 0x900   :  { %6158 = vtanh.f32 %v969_v60  ;;  %v5883_v4 = vmul.f32 -1.442695, %v968_v2  ;;  %v5884_v17 = vmul.f32 -1.442695, %v969_v60 }
 0x902   :  { %6160 = vpow2.f32 %v5883_v4 }
 0x906   :  { %v6159_v61 = vpop.eup %6158 }
 0x907   :  { %1014 = vrot.lane.b32.xlu0 %v6159_v61, %s7076_s27 }
 0x908   :  { %v6161_v56 = vpop.eup %6160 }
 0x909   :  { %v976_v54 = vadd.f32 1.0, %v6161_v56 }
 0x90b   :  { %6162 = vrcp.f32 %v976_v54  ;;  %v989_v0 = vand.u32 2147483648, %v976_v54  ;;  %vm983_vm7 = vweird.f32 %v976_v54  ;;  %v987_v1 = vand.u32 2147483647, %v976_v54 }
 0x90d   :  { %v990_v6 = vor.u32 1.1754944e-38, %v989_v0  ;;  %vm988_vm12 = vcmp.eq.f32.partialorder %v987_v1, 8.507059e+37 }
 0x911   :  { %v6163_v5 = vpop.eup %6162 }
 0x912   :  { %v979_v10 = vmul.f32 %v6163_v5, %v976_v54  ;;  %vm984_vm6 = vweird.f32 %v6163_v5 }
 0x913   :  { %vm985_vm8 = vmor %vm983_vm7, %vm984_vm6 }
 0x914   :  { %v980_v11 = vsub.f32 1.0, %v979_v10 }
 0x916   :  { %v981_v22 = vmul.f32 %v6163_v5, %v980_v11 }
 0x918   :  { %v982_v27 = vadd.f32 %v6163_v5, %v981_v22 }
 0x91a   :  { %v986_v3 = vsel %vm985_vm8, %v6163_v5, %v982_v27 }
 0x91b   :  { %v991_v8 = vsel %vm988_vm12, %v990_v6, %v986_v3 }
 0x91c   :  { %v1012_v13 = vmul.f32 %v1010_v12, %v991_v8 }
 0x979   :  { %v1015_v7 = vpop.permute.xlu0 %1014 }
 0x97a   :  { %v1017_v9 = vmul.f32 %v1015_v7, %v991_v8 }
 0x97c   :  { %1019 = vrot.lane.b32.xlu1 %v1017_v9, %s7076_s27 }
 0x9ee   :  { %v1020_v14 = vpop.permute.xlu1 %1019 }
 0x9ef   :  { %v1022_v15 = vadd.f32 %v1020_v14, %v1012_v13 }
 0x9f1   :  { %6164 = vtanh.f32 %v1022_v15  ;;  %v1129_v4 = vrot.slane %v1022_v15, 6 }
 0x9f2   :  { %6166 = vpow2.f32 %v5884_v17 }
 0x9f7   :  { %v6165_v16 = vpop.eup %6164 }
 0x9f8   :  { %1025 = vrot.lane.b32.xlu2 %v6165_v16, %s7076_s27  ;;  %v6167_v19 = vpop.eup %6166 }
 0x9f9   :  { %v977_v18 = vadd.f32 1.0, %v6167_v19 }
 0x9fb   :  { %6168 = vrcp.f32 %v977_v18  ;;  %v1004_v31 = vand.u32 2147483648, %v977_v18  ;;  %vm998_vm14 = vweird.f32 %v977_v18  ;;  %v1002_v32 = vand.u32 2147483647, %v977_v18 }
 0x9fd   :  { %v1005_v34 = vor.u32 1.1754944e-38, %v1004_v31  ;;  %vm1003_vm6 = vcmp.eq.f32.partialorder %v1002_v32, 8.507059e+37  ;;  %v1156_v31 = vld [vmem:[#allocation2 + $0x18] sm:$0x30] }
 0xa01   :  { %v6169_v20 = vpop.eup %6168 }
 0xa02   :  { %v994_v28 = vmul.f32 %v6169_v20, %v977_v18  ;;  %vm999_vm13 = vweird.f32 %v6169_v20 }
 0xa03   :  { %vm1000_vm15 = vmor %vm998_vm14, %vm999_vm13 }
 0xa04   :  { %v995_v23 = vsub.f32 1.0, %v994_v28 }
 0xa06   :  { %v996_v26 = vmul.f32 %v6169_v20, %v995_v23 }
 0xa08   :  { %v997_v30 = vadd.f32 %v6169_v20, %v996_v26 }
 0xa0a   :  { %v1001_v33 = vsel %vm1000_vm15, %v6169_v20, %v997_v30  ;;  %v1157_v20 = vld [vmem:[#allocation2 + $0x8] sm:$0x30] }
 0xa0b   :  { %v1006_v35 = vsel %vm1003_vm6, %v1005_v34, %v1001_v33 }
 0xa52   :  { %v1026_v36 = vpop.permute.xlu2 %1025 }
 0xa53   :  { %v7598_v37 = vmul.f32 %v1026_v36, %v1006_v35 }
 0xa55   :  { %5885 = vmatmul.msk.f32.vlgmr.msrb.gmra.mxu0 %vm438_vm9, %v7598_v37  ;;  %5886 = vmatmul.msk.f32.vlgmr.msrb.gmra.mxu1 %vm438_vm9, %v7598_v37 }
 0xad2   :  { %v1078_v38 = vpop.f32.mrf.mxu1  ;;  %v1058_v43 = vpop.f32.mrf.mxu0 }
 0xad3   :  { %v1084_v39 = vrot.slane %v1078_v38, 6  ;;  %v1083_v44 = vrot.slane %v1058_v43, 6 }
 0xad5   :  { %v1088_v41 = vadd.f32 %v1084_v39, %v1038_v40  ;;  %v1087_v46 = vadd.f32 %v1083_v44, %v1037_v45 }
 0xad7   :  { %6170 = vtanh.f32 %v1088_v41  ;;  %v5887_v47 = vmul.f32 -1.442695, %v1087_v46  ;;  %v5888_v11 = vmul.f32 -1.442695, %v1088_v41 }
 0xad9   :  { %6172 = vpow2.f32 %v5887_v47 }
 0xadd   :  { %v6171_v42 = vpop.eup %6170 }
 0xade   :  { %1133 = vrot.lane.b32.xlu0 %v6171_v42, %s7076_s27 }
 0xadf   :  { %v6173_v48 = vpop.eup %6172 }
 0xae0   :  { %v1095_v49 = vadd.f32 1.0, %v6173_v48 }
 0xae2   :  { %6174 = vrcp.f32 %v1095_v49  ;;  %v1108_v58 = vand.u32 2147483648, %v1095_v49  ;;  %vm1102_vm8 = vweird.f32 %v1095_v49  ;;  %v1106_v59 = vand.u32 2147483647, %v1095_v49 }
 0xae4   :  { %v1109_v61 = vor.u32 1.1754944e-38, %v1108_v58  ;;  %vm1107_vm13 = vcmp.eq.f32.partialorder %v1106_v59, 8.507059e+37 }
 0xae8   :  { %v6175_v50 = vpop.eup %6174 }
 0xae9   :  { %v1098_v51 = vmul.f32 %v6175_v50, %v1095_v49  ;;  %vm1103_vm7 = vweird.f32 %v6175_v50 }
 0xaea   :  { %vm1104_vm12 = vmor %vm1102_vm8, %vm1103_vm7 }
 0xaeb   :  { %v1099_v52 = vsub.f32 1.0, %v1098_v51 }
 0xaed   :  { %v1100_v53 = vmul.f32 %v6175_v50, %v1099_v52 }
 0xaef   :  { %v1101_v57 = vadd.f32 %v6175_v50, %v1100_v53 }
 0xaf1   :  { %v1105_v60 = vsel %vm1104_vm12, %v6175_v50, %v1101_v57 }
 0xaf2   :  { %v1110_v63 = vsel %vm1107_vm13, %v1109_v61, %v1105_v60 }
 0xaf3   :  { %v1131_v56 = vmul.f32 %v1129_v4, %v1110_v63 }
 0xb50   :  { %v1134_v62 = vpop.permute.xlu0 %1133 }
 0xb51   :  { %v1136_v2 = vmul.f32 %v1134_v62, %v1110_v63 }
 0xb53   :  { %1138 = vrot.lane.b32.xlu1 %v1136_v2, %s7076_s27 }
 0xbc5   :  { %v1139_v54 = vpop.permute.xlu1 %1138 }
 0xbc6   :  { %v7606_v5 = vadd.f32 %v1139_v54, %v1131_v56 }
 0xbc8   :  { %6176 = vtanh.f32 %v7606_v5  ;;  %v1249_v49 = vrot.slane %v7606_v5, 6 }
 0xbc9   :  { %6178 = vpow2.f32 %v5888_v11 }
 0xbce   :  { %v6177_v10 = vpop.eup %6176 }
 0xbcf   :  { %1144 = vrot.lane.b32.xlu2 %v6177_v10, %s7076_s27  ;;  %v6179_v22 = vpop.eup %6178 }
 0xbd0   :  { %v1096_v27 = vadd.f32 1.0, %v6179_v22 }
 0xbd2   :  { %6180 = vrcp.f32 %v1096_v27  ;;  %v1123_v8 = vand.u32 2147483648, %v1096_v27  ;;  %vm1117_vm15 = vweird.f32 %v1096_v27  ;;  %v1121_v9 = vand.u32 2147483647, %v1096_v27 }
 0xbd4   :  { %v1124_v13 = vor.u32 1.1754944e-38, %v1123_v8  ;;  %vm1122_vm7 = vcmp.eq.f32.partialorder %v1121_v9, 8.507059e+37 }
 0xbd8   :  { %v6181_v0 = vpop.eup %6180 }
 0xbd9   :  { %v1113_v1 = vmul.f32 %v6181_v0, %v1096_v27  ;;  %vm1118_vm14 = vweird.f32 %v6181_v0 }
 0xbda   :  { %vm1119_vm6 = vmor %vm1117_vm15, %vm1118_vm14 }
 0xbdb   :  { %v1114_v3 = vsub.f32 1.0, %v1113_v1 }
 0xbdd   :  { %v1115_v6 = vmul.f32 %v6181_v0, %v1114_v3  ;;  %v1277_v3 = vld [vmem:[#allocation2 + $0x8] sm:$0xc0] }
 0xbdf   :  { %v1116_v7 = vadd.f32 %v6181_v0, %v1115_v6 }
 0xbe1   :  { %v1120_v12 = vsel %vm1119_vm6, %v6181_v0, %v1116_v7 }
 0xbe2   :  { %v1125_v14 = vsel %vm1122_vm7, %v1124_v13, %v1120_v12  ;;  %v1276_v12 = vld [vmem:[#allocation2 + $0x18] sm:$0xc0] }
 0xc29   :  { %v1145_v15 = vpop.permute.xlu2 %1144 }
 0xc2a   :  { %v7610_v16 = vmul.f32 %v1145_v15, %v1125_v14 }
 0xc2c   :  { %v1158_v17 = vrot.slane %v7610_v16, 2 }
 0xc2e   :  { %5889 = vmatmul.msk.f32.vlgmr.msrb.gmra.mxu2 %vm438_vm9, %v1158_v17  ;;  %5890 = vmatmul.msk.f32.vlgmr.msrb.gmra.mxu3 %vm438_vm9, %v1158_v17 }
 0xcb1   :  { %v1198_v19 = vpop.f32.mrf.mxu3  ;;  %v1178_v26 = vpop.f32.mrf.mxu2 }
 0xcb2   :  { %v1204_v18 = vrot.slane %v1198_v19, 4  ;;  %v1203_v30 = vrot.slane %v1178_v26, 4 }
 0xcb4   :  { %v1208_v28 = vadd.f32 %v1204_v18, %v1157_v20  ;;  %v1207_v32 = vadd.f32 %v1203_v30, %v1156_v31 }
 0xcb6   :  { %6182 = vtanh.f32 %v1208_v28  ;;  %v5891_v33 = vmul.f32 -1.442695, %v1207_v32  ;;  %v5892_v57 = vmul.f32 -1.442695, %v1208_v28 }
 0xcb8   :  { %6184 = vpow2.f32 %v5891_v33 }
 0xcbc   :  { %v6183_v23 = vpop.eup %6182 }
 0xcbd   :  { %1253 = vrot.lane.b32.xlu0 %v6183_v23, %s7076_s27 }
 0xcbe   :  { %v6185_v34 = vpop.eup %6184 }
 0xcbf   :  { %v1215_v35 = vadd.f32 1.0, %v6185_v34 }
 0xcc1   :  { %6186 = vrcp.f32 %v1215_v35  ;;  %v1228_v42 = vand.u32 2147483648, %v1215_v35  ;;  %vm1222_vm12 = vweird.f32 %v1215_v35  ;;  %v1226_v43 = vand.u32 2147483647, %v1215_v35 }
 0xcc3   :  { %v1229_v45 = vor.u32 1.1754944e-38, %v1228_v42  ;;  %vm1227_vm14 = vcmp.eq.f32.partialorder %v1226_v43, 8.507059e+37 }
 0xcc7   :  { %v6187_v36 = vpop.eup %6186 }
 0xcc8   :  { %v1218_v38 = vmul.f32 %v6187_v36, %v1215_v35  ;;  %vm1223_vm8 = vweird.f32 %v6187_v36 }
 0xcc9   :  { %vm1224_vm13 = vmor %vm1222_vm12, %vm1223_vm8 }
 0xcca   :  { %v1219_v39 = vsub.f32 1.0, %v1218_v38 }
 0xccc   :  { %v1220_v40 = vmul.f32 %v6187_v36, %v1219_v39 }
 0xcce   :  { %v1221_v41 = vadd.f32 %v6187_v36, %v1220_v40 }
 0xcd0   :  { %v1225_v44 = vsel %vm1224_vm13, %v6187_v36, %v1221_v41 }
 0xcd1   :  { %v1230_v47 = vsel %vm1227_vm14, %v1229_v45, %v1225_v44 }
 0xcd2   :  { %v1251_v50 = vmul.f32 %v1249_v49, %v1230_v47  ;;  %v1428_v49 = vld [vmem:[#allocation6 + $0xf0] sm:$0xff] }
 0xcd3   :  { %1436 = vmatpush.msra.mxu2 %v1428_v49  ;;  %v1430_v49 = vld [vmem:[#allocation9] sm:$0x3] }
 0xd2f   :  { %v1254_v46 = vpop.permute.xlu0 %1253 }
 0xd30   :  { %v1256_v48 = vmul.f32 %v1254_v46, %v1230_v47 }
 0xd32   :  { %1258 = vrot.lane.b32.xlu1 %v1256_v48, %s7076_s27 }
 0xda4   :  { %v1259_v51 = vpop.permute.xlu1 %1258 }
 0xda5   :  { %v7618_v52 = vadd.f32 %v1259_v51, %v1251_v50  ;;  %v1429_v50 = vld [vmem:[#allocation6 + $0xf8] sm:$0xff]  ;;  %v1426_v51 = vld [vmem:[#allocation6 + $0xe0] sm:$0xff] }
 0xda6   :  { %1459 = vmatpush.msra.mxu3 %v1429_v50  ;;  %1437 = vmatpush.msra.mxu2 %v1426_v51  ;;  %v1432_v50 = vperm.slane %v1430_v49, 0  ;;  %v1433_v51 = vperm.slane %v1430_v49, 1 }
 0xda7   :  { %6188 = vtanh.f32 %v7618_v52  ;;  %v1369_v36 = vrot.slane %v7618_v52, 6  ;;  %v1427_v52 = vld [vmem:[#allocation6 + $0xe8] sm:$0xff] }
 0xda8   :  { %6190 = vpow2.f32 %v5892_v57  ;;  %1460 = vmatpush.msra.mxu3 %v1427_v52 }
 0xdad   :  { %v6189_v53 = vpop.eup %6188 }
 0xdae   :  { %1264 = vrot.lane.b32.xlu2 %v6189_v53, %s7076_s27  ;;  %v6191_v58 = vpop.eup %6190  ;;  %v1424_v53 = vld [vmem:[#allocation6 + $0xd0] sm:$0xff] }
 0xdaf   :  { %v1216_v59 = vadd.f32 1.0, %v6191_v58  ;;  %v1422_v58 = vld [vmem:[#allocation6 + $0xc0] sm:$0xff]  ;;  %1438 = vmatpush.msra.mxu2 %v1424_v53 }
 0xdb1   :  { %6192 = vrcp.f32 %v1216_v59  ;;  %v1243_v4 = vand.u32 2147483648, %v1216_v59  ;;  %vm1237_vm6 = vweird.f32 %v1216_v59  ;;  %v1241_v56 = vand.u32 2147483647, %v1216_v59  ;;  %1439 = vmatpush.msra.mxu2 %v1422_v58 }
 0xdb3   :  { %v1244_v5 = vor.u32 1.1754944e-38, %v1243_v4  ;;  %vm1242_vm8 = vcmp.eq.f32.partialorder %v1241_v56, 8.507059e+37  ;;  %v1419_v4 = vld [vmem:[#allocation6 + $0xa8] sm:$0xff] }
 0xdb7   :  { %v6193_v60 = vpop.eup %6192 }
 0xdb8   :  { %v1233_v61 = vmul.f32 %v6193_v60, %v1216_v59  ;;  %vm1238_vm15 = vweird.f32 %v6193_v60  ;;  %v1423_v59 = vld [vmem:[#allocation6 + $0xc8] sm:$0xff] }
 0xdb9   :  { %vm1239_vm7 = vmor %vm1237_vm6, %vm1238_vm15  ;;  %vm9313_vm6 = vcmask 1042176  }
 0xdba   :  { %v1234_v62 = vsub.f32 1.0, %v1233_v61  ;;  %v1421_v61 = vld [vmem:[#allocation6 + $0xb8] sm:$0xff] }
 0xdbc   :  { %v1235_v63 = vmul.f32 %v6193_v60, %v1234_v62 }
 0xdbe   :  { %v1236_v2 = vadd.f32 %v6193_v60, %v1235_v63 }
 0xdc0   :  { %v1240_v54 = vsel %vm1239_vm7, %v6193_v60, %v1236_v2  ;;  %vm9312_vm7 = vcmask 779776   ;;  %v1420_v60 = vld [vmem:[#allocation6 + $0xb0] sm:$0xff]  ;;  %v1418_v2 = vld [vmem:[#allocation6 + $0xa0] sm:$0xff] }
 0xdc1   :  { %v1245_v10 = vsel %vm1242_vm8, %v1244_v5, %v1240_v54  ;;  %vm917_vm8 = vcmask 1048326   ;;  %1440 = vmatpush.msra.mxu2 %v1420_v60  ;;  %v1416_v54 = vld [vmem:[#allocation6 + $0x90] sm:$0xff]  ;;  %v1417_v5 = vld [vmem:[#allocation6 + $0x98] sm:$0xff] }
 0xdc3   :  { %1441 = vmatpush.msra.mxu2 %v1418_v2 }
 0xdc5   :  { %1442 = vmatpush.msra.mxu2 %v1416_v54 }
 0xe08   :  { %v1265_v11 = vpop.permute.xlu2 %1264 }
 0xe09   :  { %v7622_v22 = vmul.f32 %v1265_v11, %v1245_v10 }
 0xe0b   :  { %v1278_v27 = vrot.slane %v7622_v22, 4 }
 0xe0d   :  { %5893 = vmatmul.msk.f32.vlgmr.msra.gmra.mxu0 %vm438_vm9, %v1278_v27  ;;  %5894 = vmatmul.msk.f32.vlgmr.msra.gmra.mxu1 %vm438_vm9, %v1278_v27  ;;  %v1415_v27 = vld [vmem:[#allocation6 + $0x88] sm:$0xff] }
 0xe8a   :  { %v1318_v0 = vpop.f32.mrf.mxu1  ;;  %v1298_v8 = vpop.f32.mrf.mxu0 }
 0xe8b   :  { %v1324_v1 = vrot.slane %v1318_v0, 2  ;;  %v1323_v9 = vrot.slane %v1298_v8, 2  ;;  %v1410_v8 = vld [vmem:[#allocation6 + $0x60] sm:$0xff] }
 0xe8d   :  { %v7627_v6 = vadd.f32 %v1324_v1, %v1277_v3  ;;  %v1327_v13 = vadd.f32 %v1323_v9, %v1276_v12  ;;  %v1412_v3 = vld [vmem:[#allocation6 + $0x70] sm:$0xff]  ;;  %v1411_v9 = vld [vmem:[#allocation6 + $0x68] sm:$0xff] }
 0xe8e   :  { %v1408_v12 = vld [vmem:[#allocation6 + $0x50] sm:$0xff] }
 0xe8f   :  { %6194 = vtanh.f32 %v7627_v6  ;;  %v5895_v14 = vmul.f32 -1.442695, %v1327_v13  ;;  %v5896_v43 = vmul.f32 -1.442695, %v7627_v6  ;;  %v1409_v13 = vld [vmem:[#allocation6 + $0x58] sm:$0xff] }
 0xe91   :  { %6196 = vpow2.f32 %v5895_v14  ;;  %v1406_v14 = vld [vmem:[#allocation6 + $0x40] sm:$0xff] }
 0xe95   :  { %v6195_v7 = vpop.eup %6194 }
 0xe96   :  { %1373 = vrot.lane.b32.xlu0 %v6195_v7, %s7076_s27  ;;  %v1413_v7 = vld [vmem:[#allocation6 + $0x78] sm:$0xff] }
 0xe97   :  { %v6197_v15 = vpop.eup %6196 }
 0xe98   :  { %v1335_v17 = vadd.f32 1.0, %v6197_v15  ;;  %v1407_v15 = vld [vmem:[#allocation6 + $0x48] sm:$0xff] }
 0xe9a   :  { %6198 = vrcp.f32 %v1335_v17  ;;  %v1348_v23 = vand.u32 2147483648, %v1335_v17  ;;  %vm1342_vm13 = vweird.f32 %v1335_v17 }
 0xe9c   :  { %v1349_v30 = vor.u32 1.1754944e-38, %v1348_v23  ;;  %v1400_v23 = vld [vmem:[#allocation6 + $0x10] sm:$0xff] }
 0xe9e   :  { %543 = vrot.lane.b32.xlu0 %v7488_v29, %s7076_s27 }
 0xea0   :  { %v6199_v19 = vpop.eup %6198 }
 0xea1   :  { %v1338_v18 = vmul.f32 %v6199_v19, %v1335_v17  ;;  %vm1343_vm12 = vweird.f32 %v6199_v19 }
 0xea2   :  { %vm1344_vm14 = vmor %vm1342_vm13, %vm1343_vm12  ;;  %vm921_vm12 = vcmask 785926   ;;  %vm669_vm13 = vcmask 1044226  }
 0xea3   :  { %v1339_v20 = vsub.f32 1.0, %v1338_v18  ;;  %v1404_v18 = vld [vmem:[#allocation6 + $0x30] sm:$0xff] }
 0xea5   :  { %v1340_v28 = vmul.f32 %v6199_v19, %v1339_v20  ;;  %v1405_v20 = vld [vmem:[#allocation6 + $0x38] sm:$0xff] }
 0xea6   :  { %914 = vrot.lane.b32.xlu0 %v7585_v55, %s7076_s27  ;;  %v1346_v55 = vand.u32 2147483647, %v1335_v17 }
 0xea7   :  { %v1341_v29 = vadd.f32 %v6199_v19, %v1340_v28  ;;  %v1402_v28 = vld [vmem:[#allocation6 + $0x20] sm:$0xff] }
 0xea8   :  { %vm1347_vm15 = vcmp.eq.f32.partialorder %v1346_v55, 8.507059e+37  ;;  %v1401_v55 = vld [vmem:[#allocation6 + $0x18] sm:$0xff] }
 0xea9   :  { %v1345_v26 = vsel %vm1344_vm14, %v6199_v19, %v1341_v29  ;;  %vm673_vm14 = vcmask 781826   ;;  %v1403_v29 = vld [vmem:[#allocation6 + $0x28] sm:$0xff] }
 0xeaa   :  { %v1350_v32 = vsel %vm1347_vm15, %v1349_v30, %v1345_v26  ;;  %vm793_vm15 = vcmask 1046276   ;;  %v1398_v26 = vld [vmem:[#allocation6] sm:$0xff]  ;;  %v1399_v30 = vld [vmem:[#allocation6 + $0x8] sm:$0xff] }
 0xeab   :  { %v1371_v38 = vmul.f32 %v1369_v36, %v1350_v32  ;;  %v7704_v36 = vld [vmem:[#allocation8 + $0x40] sm:$0xff] }
 0xeae   :  { %1270 = vrot.lane.b32.xlu0 %v7622_v22, %s7076_s27 }
 0xf08   :  { %v1374_v31 = vpop.permute.xlu0 %1373 }
 0xf09   :  { %v1376_v33 = vmul.f32 %v1374_v31, %v1350_v32  ;;  %v7688_v31 = vld [vmem:[#allocation8 + $0x78] sm:$0xff]  ;;  %v7690_v32 = vld [vmem:[#allocation8 + $0x60] sm:$0xff] }
 0xf0a   :  { %1532 = vmatpush.msrb.mxu1 %v7688_v31 }
 0xf0b   :  { %1378 = vrot.lane.b32.xlu1 %v1376_v33, %s7076_s27  ;;  %v7692_v33 = vld [vmem:[#allocation8 + $0x68] sm:$0xff] }
 0xf0c   :  { %1533 = vmatpush.msrb.mxu1 %v7692_v33 }
 0xf10   :  { %v544_v34 = vpop.permute.xlu0 %543 }
 0xf11   :  { %547 = vst.msk [vmem:[#allocation3] sm:$0x3] %vm9313_vm6, %v544_v34 }
 0xf12   :  { %551 = vst.msk [vmem:[#allocation3 + $0xe] sm:$0x3] %vm9312_vm7, %v544_v34  ;;  %v7696_v34 = vld [vmem:[#allocation8 + $0x50] sm:$0xff] }
 0xf13   :  { %666 = vrot.lane.b32.xlu1 %v7521_v25, %s7076_s27 }
 0xf18   :  { %v915_v35 = vpop.permute.xlu0 %914 }
 0xf19   :  { %918 = vst.msk [vmem:[#allocation3] sm:$0xc0] %vm917_vm8, %v915_v35 }
 0xf1a   :  { %922 = vst.msk [vmem:[#allocation3 + $0x2] sm:$0xc0] %vm921_vm12, %v915_v35  ;;  %v7698_v35 = vld [vmem:[#allocation8 + $0x58] sm:$0xff] }
 0xf1b   :  { %1029 = vst.msk [vmem:[#allocation3 + $0x8] sm:$0x3] %vm540_vm10, %v7598_v37  ;;  %1031 = vrot.lane.b32.xlu1 %v7598_v37, %s7076_s27  ;;  %1534 = vmatpush.msrb.mxu1 %v7698_v35 }
 0xf1c   :  { %1035 = vst.msk [vmem:[#allocation3 + $0x6] sm:$0x3] %vm9311_vm11, %v7598_v37  ;;  %vm9316_vm11 = vcmask 783876  }
 0xf20   :  { %v1271_v37 = vpop.permute.xlu0 %1270 }
 0xf7d   :  { %v1379_v25 = vpop.permute.xlu1 %1378 }
 0xf7e   :  { %v7651_v39 = vadd.f32 %v1379_v25, %v1371_v38  ;;  %v7706_v38 = vld [vmem:[#allocation8 + $0x48] sm:$0xff]  ;;  %v7716_v25 = vld [vmem:[#allocation8 + $0x30] sm:$0xff] }
 0xf7f   :  { %1535 = vmatpush.msrb.mxu1 %v7706_v38 }
 0xf80   :  { %6200 = vtanh.f32 %v7651_v39 }
 0xf81   :  { %6202 = vpow2.f32 %v5896_v43  ;;  %v7730_v43 = vld [vmem:[#allocation8 + $0x18] sm:$0xff] }
 0xf85   :  { %v667_v40 = vpop.permute.xlu1 %666 }
 0xf86   :  { %v6201_v41 = vpop.eup %6200  ;;  %670 = vst.msk [vmem:[#allocation3] sm:$0xc] %vm669_vm13, %v667_v40 }
 0xf87   :  { %674 = vst.msk [vmem:[#allocation3 + $0xa] sm:$0xc] %vm673_vm14, %v667_v40  ;;  %1384 = vrot.lane.b32.xlu2 %v6201_v41, %s7076_s27  ;;  %v6203_v44 = vpop.eup %6202  ;;  %v7718_v40 = vld [vmem:[#allocation8 + $0x38] sm:$0xff]  ;;  %v7720_v41 = vld [vmem:[#allocation8 + $0x20] sm:$0xff] }
 0xf88   :  { %1268 = vst.msk [vmem:[#allocation3 + $0x8] sm:$0x30] %vm9315_vm1, %v7622_v22  ;;  %v1336_v45 = vadd.f32 1.0, %v6203_v44  ;;  %1536 = vmatpush.msrb.mxu1 %v7718_v40  ;;  %v7736_v44 = vld [vmem:[#allocation8] sm:$0xff] }
 0xf89   :  { %1274 = vst.msk [vmem:[#allocation3 - $0x2] sm:$0x30] %vm9314_vm2, %v7622_v22  ;;  %v1414_v22 = vld [vmem:[#allocation6 + $0x80] sm:$0xff] }
 0xf8a   :  { %1273 = vst.msk [vmem:[#allocation3 + $0x8] sm:$0x30] %vm793_vm15, %v1271_v37  ;;  %6204 = vrcp.f32 %v1336_v45  ;;  %v1363_v63 = vand.u32 2147483648, %v1336_v45  ;;  %v1361_v56 = vand.u32 2147483647, %v1336_v45  ;;  %1443 = vmatpush.msra.mxu2 %v1414_v22 }
 0xf8b   :  { %1275 = vst.msk [vmem:[#allocation3 - $0x2] sm:$0x30] %vm9316_vm11, %v1271_v37  ;;  %v7722_v37 = vld [vmem:[#allocation8 + $0x28] sm:$0xff] }
 0xf8c   :  { %v1364_v11 = vor.u32 1.1754944e-38, %v1363_v63  ;;  %vm1362_vm1 = vcmp.eq.f32.partialorder %v1361_v56, 8.507059e+37  ;;  %1444 = vmatpush.msra.mxu2 %v1412_v3  ;;  %1537 = vmatpush.msrb.mxu1 %v7722_v37 }
 0xf8d   :  { %v1032_v42 = vpop.permute.xlu1 %1031 }
 0xf8e   :  { %1034 = vst.msk [vmem:[#allocation3 + $0x8] sm:$0x3] %vm9313_vm6, %v1032_v42  ;;  %vm1357_vm6 = vweird.f32 %v1336_v45  ;;  %1445 = vmatpush.msra.mxu2 %v1410_v8  ;;  %1538 = vmatpush.msrb.mxu1 %v7730_v43 }
 0xf8f   :  { %1036 = vst.msk [vmem:[#allocation3 + $0x6] sm:$0x3] %vm9312_vm7, %v1032_v42  ;;  %790 = vrot.lane.b32.xlu2 %v7553_v24, %s7076_s27  ;;  %v1425_v24 = vld [vmem:[#allocation6 + $0xd8] sm:$0xff]  ;;  %v7728_v42 = vld [vmem:[#allocation8 + $0x10] sm:$0xff] }
 0xf90   :  { %v6205_v46 = vpop.eup %6204  ;;  %1461 = vmatpush.msra.mxu3 %v1425_v24  ;;  %1446 = vmatpush.msra.mxu2 %v1408_v12 }
 0xf91   :  { %v1353_v47 = vmul.f32 %v6205_v46, %v1336_v45  ;;  %vm1358_vm7 = vweird.f32 %v6205_v46  ;;  %v7738_v45 = vld [vmem:[#allocation8 + $0x8] sm:$0xff] }
 0xf92   :  { %1462 = vmatpush.msra.mxu3 %v1423_v59  ;;  %vm1359_vm2 = vmor %vm1357_vm6, %vm1358_vm7  ;;  %1447 = vmatpush.msra.mxu2 %v1406_v14 }
 0xf93   :  { %v1354_v48 = vsub.f32 1.0, %v1353_v47  ;;  %1539 = vmatpush.msrb.mxu1 %v7738_v45 }
 0xf94   :  { %1463 = vmatpush.msra.mxu3 %v1421_v61  ;;  %1448 = vmatpush.msra.mxu2 %v1404_v18 }
 0xf95   :  { %v1355_v57 = vmul.f32 %v6205_v46, %v1354_v48  ;;  %1540 = vmatmul.f32.vlgmr.msrb.gmra.mxu1 %v7075_v21 }
 0xf96   :  { %1464 = vmatpush.msra.mxu3 %v1419_v4  ;;  %1449 = vmatpush.msra.mxu2 %v1402_v28 }
 0xf97   :  { %1150 = vrot.lane.b32.xlu2 %v7610_v16, %s7076_s27  ;;  %v1356_v62 = vadd.f32 %v6205_v46, %v1355_v57  ;;  %1642 = vmatpush.msra.mxu1 %v7688_v31 }
 0xf98   :  { %1465 = vmatpush.msra.mxu3 %v1417_v5  ;;  %1450 = vmatpush.msra.mxu2 %v1400_v23 }
 0xf99   :  { %v1360_v10 = vsel %vm1359_vm2, %v6205_v46, %v1356_v62  ;;  %1643 = vmatpush.msra.mxu1 %v7692_v33 }
 0xf9a   :  { %v1365_v0 = vsel %vm1362_vm1, %v1364_v11, %v1360_v10  ;;  %1466 = vmatpush.msra.mxu3 %v1415_v27  ;;  %1451 = vmatpush.msra.mxu2 %v1398_v26 }
 0xf9b   :  { %1644 = vmatpush.msra.mxu1 %v7698_v35 }
 0xf9c   :  { %1467 = vmatpush.msra.mxu3 %v1413_v7 }
 0xf9d   :  { %1645 = vmatpush.msra.mxu1 %v7706_v38 }
 0xf9e   :  { %1468 = vmatpush.msra.mxu3 %v1411_v9 }
 0xf9f   :  { %1646 = vmatpush.msra.mxu1 %v7718_v40 }
 0xfa0   :  { %1469 = vmatpush.msra.mxu3 %v1409_v13 }
 0xfa1   :  { %1647 = vmatpush.msra.mxu1 %v7722_v37 }
 0xfa2   :  { %1470 = vmatpush.msra.mxu3 %v1407_v15 }
 0xfa3   :  { %1648 = vmatpush.msra.mxu1 %v7730_v43 }
 0xfa4   :  { %1471 = vmatpush.msra.mxu3 %v1405_v20 }
 0xfa5   :  { %1649 = vmatpush.msra.mxu1 %v7738_v45 }
 0xfa6   :  { %1472 = vmatpush.msra.mxu3 %v1403_v29 }
 0xfa7   :  { %1882 = vmatpush.msrb.mxu1 %v7688_v31 }
 0xfa8   :  { %1473 = vmatpush.msra.mxu3 %v1401_v55 }
 0xfa9   :  { %1883 = vmatpush.msrb.mxu1 %v7692_v33 }
 0xfaa   :  { %1474 = vmatpush.msra.mxu3 %v1399_v30 }
 0xfab   :  { %1884 = vmatpush.msrb.mxu1 %v7698_v35 }
 0xfac   :  { %1762 = vmatpush.msrb.mxu3 %v7688_v31 }
 0xfad   :  { %1885 = vmatpush.msrb.mxu1 %v7706_v38 }
 0xfae   :  { %1763 = vmatpush.msrb.mxu3 %v7692_v33 }
 0xfaf   :  { %1886 = vmatpush.msrb.mxu1 %v7718_v40 }
 0xfb0   :  { %1764 = vmatpush.msrb.mxu3 %v7698_v35 }
 0xfb1   :  { %1887 = vmatpush.msrb.mxu1 %v7722_v37 }
 0xfb2   :  { %1765 = vmatpush.msrb.mxu3 %v7706_v38 }
 0xfb3   :  { %1888 = vmatpush.msrb.mxu1 %v7730_v43 }
 0xfb4   :  { %1766 = vmatpush.msrb.mxu3 %v7718_v40 }
 0xfb5   :  { %1889 = vmatpush.msrb.mxu1 %v7738_v45 }
 0xfb6   :  { %1767 = vmatpush.msrb.mxu3 %v7722_v37 }
 0xfb8   :  { %1768 = vmatpush.msrb.mxu3 %v7730_v43 }
 0xfba   :  { %1769 = vmatpush.msrb.mxu3 %v7738_v45 }
 0xfe1   :  { %v1385_v1 = vpop.permute.xlu2 %1384 }
 0xfe2   :  { %v7670_v6 = vmul.f32 %v1385_v1, %v1365_v0 }
 0xfe4   :  { %1388 = vst.msk [vmem:[#allocation3 + $0x8] sm:$0xc0] %vm911_vm0, %v7670_v6  ;;  %1390 = vrot.lane.b32.xlu1 %v7670_v6, %s7076_s27 }
 0xfe5   :  { %1394 = vst.msk [vmem:[#allocation3 - $0x6] sm:$0xc0] %vm919_vm3, %v7670_v6 }
 0xfe9   :  { %v791_v17 = vpop.permute.xlu2 %790 }
 0xfea   :  { %794 = vst.msk [vmem:[#allocation3] sm:$0x30] %vm793_vm15, %v791_v17 }
 0xfeb   :  { %798 = vst.msk [vmem:[#allocation3 + $0x6] sm:$0x30] %vm9316_vm11, %v791_v17  ;;  %vm9404_vm11 = vcmask 517376  }
 0xfec   :  { %1148 = vst.msk [vmem:[#allocation3 + $0x8] sm:$0xc] %vm663_vm4, %v7610_v16 }
 0xfed   :  { %1154 = vst.msk [vmem:[#allocation3 + $0x2] sm:$0xc] %vm9317_vm5, %v7610_v16  ;;  %v7686_v16 = vld [vmem:[#allocation8 + $0x70] sm:$0xff] }
 0xfee   :  { %1512 = vmatpush.msrb.mxu0 %v7686_v16  ;;  %1742 = vmatpush.msrb.mxu2 %v7686_v16 }
 0xff0   :  { %1513 = vmatpush.msrb.mxu0 %v7690_v32  ;;  %1743 = vmatpush.msrb.mxu2 %v7690_v32 }
 0xff1   :  { %v1151_v19 = vpop.permute.xlu2 %1150 }
 0xff2   :  { %1153 = vst.msk [vmem:[#allocation3 + $0x8] sm:$0xc] %vm669_vm13, %v1151_v19  ;;  %1514 = vmatpush.msrb.mxu0 %v7696_v34  ;;  %1744 = vmatpush.msrb.mxu2 %v7696_v34 }
 0xff3   :  { %1155 = vst.msk [vmem:[#allocation3 + $0x2] sm:$0xc] %vm673_vm14, %v1151_v19 }
 0xff4   :  { %1515 = vmatpush.msrb.mxu0 %v7704_v36  ;;  %1745 = vmatpush.msrb.mxu2 %v7704_v36 }
 0xff6   :  { %1516 = vmatpush.msrb.mxu0 %v7716_v25  ;;  %1746 = vmatpush.msrb.mxu2 %v7716_v25 }
 0xff8   :  { %1517 = vmatpush.msrb.mxu0 %v7720_v41  ;;  %1747 = vmatpush.msrb.mxu2 %v7720_v41 }
 0xffa   :  { %1518 = vmatpush.msrb.mxu0 %v7728_v42  ;;  %1748 = vmatpush.msrb.mxu2 %v7728_v42 }
 0xffc   :  { %1519 = vmatpush.msrb.mxu0 %v7736_v44  ;;  %1749 = vmatpush.msrb.mxu2 %v7736_v44 }
 0xffd   :  { %1520 = vmatmul.f32.vlgmr.msrb.gmra.mxu0 %v7075_v21 }
 0xffe   :  { %1622 = vmatpush.msra.mxu0 %v7686_v16 }
0x1000   :  { %1623 = vmatpush.msra.mxu0 %v7690_v32 }
0x1002   :  { %1624 = vmatpush.msra.mxu0 %v7696_v34 }
0x1004   :  { %1625 = vmatpush.msra.mxu0 %v7704_v36 }
0x1006   :  { %1626 = vmatpush.msra.mxu0 %v7716_v25 }
0x1008   :  { %1627 = vmatpush.msra.mxu0 %v7720_v41 }
0x100a   :  { %1628 = vmatpush.msra.mxu0 %v7728_v42 }
0x100c   :  { %1629 = vmatpush.msra.mxu0 %v7736_v44 }
0x100e   :  { %1862 = vmatpush.msrb.mxu0 %v7686_v16 }
0x1010   :  { %1863 = vmatpush.msrb.mxu0 %v7690_v32 }
0x1012   :  { %1864 = vmatpush.msrb.mxu0 %v7696_v34  ;;  %v1541_v62 = vpop.f32.mrf.mxu1 }
0x1014   :  { %1865 = vmatpush.msrb.mxu0 %v7704_v36 }
0x1016   :  { %1866 = vmatpush.msrb.mxu0 %v7716_v25 }
0x1018   :  { %1867 = vmatpush.msrb.mxu0 %v7720_v41 }
0x101a   :  { %1868 = vmatpush.msrb.mxu0 %v7728_v42 }
0x101c   :  { %1869 = vmatpush.msrb.mxu0 %v7736_v44 }
0x1056   :  { %v1391_v46 = vpop.permute.xlu1 %1390 }
0x1057   :  { %1393 = vst.msk [vmem:[#allocation3 + $0x8] sm:$0xc0] %vm917_vm8, %v1391_v46 }
0x1058   :  { %1395 = vst.msk [vmem:[#allocation3 - $0x6] sm:$0xc0] %vm921_vm12, %v1391_v46 }
0x105e   :  { %v1397_v48 = vld [vmem:[#allocation3 + $0x8] sm:$0xff] }
0x105f   :  { %v1396_v47 = vld [vmem:[#allocation3] sm:$0xff] }
0x1060   :  { %1452 = vmatmul.f32.vlgmr.msra.gmra.mxu2 %v1396_v47  ;;  %1475 = vmatmul.f32.vlgmr.msra.gmra.mxu3 %v1396_v47 }
0x1061   :  { %1982 = vmatpush.msra.mxu2 %v7686_v16  ;;  %2002 = vmatpush.msra.mxu3 %v7688_v31 }
0x1063   :  { %1983 = vmatpush.msra.mxu2 %v7690_v32  ;;  %2003 = vmatpush.msra.mxu3 %v7692_v33 }
0x1065   :  { %1984 = vmatpush.msra.mxu2 %v7696_v34  ;;  %2004 = vmatpush.msra.mxu3 %v7698_v35 }
0x1067   :  { %1985 = vmatpush.msra.mxu2 %v7704_v36  ;;  %2005 = vmatpush.msra.mxu3 %v7706_v38 }
0x1068   :  { %1455 = vmatmul.f32.gmra.mxu2 %v1397_v48  ;;  %1478 = vmatmul.f32.gmra.mxu3 %v1397_v48 }
0x1069   :  { %1986 = vmatpush.msra.mxu2 %v7716_v25  ;;  %2006 = vmatpush.msra.mxu3 %v7718_v40 }
0x106b   :  { %1987 = vmatpush.msra.mxu2 %v7720_v41  ;;  %2007 = vmatpush.msra.mxu3 %v7722_v37 }
0x106d   :  { %1988 = vmatpush.msra.mxu2 %v7728_v42  ;;  %2008 = vmatpush.msra.mxu3 %v7730_v43 }
0x106f   :  { %1989 = vmatpush.msra.mxu2 %v7736_v44  ;;  %2009 = vmatpush.msra.mxu3 %v7738_v45 }
0x107a   :  { %v1521_v54 = vpop.f32.mrf.mxu0 }
0x10e3   :  { %v1453_v52 = vpop.f32.mrf.mxu2  ;;  %v1476_v53 = vpop.f32.mrf.mxu3 }
0x10e4   :  { %v1454_v24 = vadd.f32 %v1453_v52, %v1432_v50  ;;  %v1477_v57 = vadd.f32 %v1476_v53, %v1433_v51 }
0x10e6   :  { %1482 = vst [vmem:[#allocation2 + $0x10] sm:$0xff] %v1454_v24 }
0x10e7   :  { %1483 = vst [vmem:[#allocation2] sm:$0xff] %v1477_v57 }
0x10eb   :  { %v1456_v58 = vpop.f32.mrf.mxu2  ;;  %v1479_v59 = vpop.f32.mrf.mxu3 }
0x10ec   :  { %v1457_v60 = vadd.f32 %v1456_v58, %v1432_v50  ;;  %v1480_v61 = vadd.f32 %v1479_v59, %v1433_v51 }
0x10ed   :  { %v1502_v56 = vld [vmem:[#allocation2 + $0x10] sm:$0x3] }
0x10ee   :  { %1484 = vst [vmem:[#allocation2 + $0x18] sm:$0xff] %v1457_v60  ;;  %v1503_v63 = vld [vmem:[#allocation2] sm:$0x3]  ;;  %v1544_v5 = vadd.f32 %v1521_v54, %v1502_v56  ;;  %v1611_v60 = vld [vmem:[#allocation2] sm:$0xc] }
0x10ef   :  { %1485 = vst [vmem:[#allocation2 + $0x8] sm:$0xff] %v1480_v61  ;;  %v1545_v2 = vadd.f32 %v1541_v62, %v1503_v63 }
0x10f0   :  { %v5897_v10 = vmul.f32 -1.442695, %v1544_v5 }
0x10f1   :  { %6206 = vtanh.f32 %v1545_v2  ;;  %v5898_v29 = vmul.f32 -1.442695, %v1545_v2 }
0x10f2   :  { %6208 = vpow2.f32 %v5897_v10 }
0x10f7   :  { %v6207_v4 = vpop.eup %6206 }
0x10f8   :  { %1587 = vrot.lane.b32.xlu2 %v6207_v4, %s7076_s27  ;;  %v6209_v11 = vpop.eup %6208  ;;  %v1610_v4 = vld [vmem:[#allocation2 + $0x10] sm:$0xc] }
0x10f9   :  { %v1552_v22 = vadd.f32 1.0, %v6209_v11 }
0x10fb   :  { %6210 = vrcp.f32 %v1552_v22  ;;  %v1565_v8 = vand.u32 2147483648, %v1552_v22  ;;  %vm1559_vm2 = vweird.f32 %v1552_v22  ;;  %v1563_v9 = vand.u32 2147483647, %v1552_v22 }
0x10fd   :  { %v1566_v13 = vor.u32 1.1754944e-38, %v1565_v8  ;;  %vm1564_vm7 = vcmp.eq.f32.partialorder %v1563_v9, 8.507059e+37 }
0x1101   :  { %v6211_v27 = vpop.eup %6210 }
0x1102   :  { %v1555_v0 = vmul.f32 %v6211_v27, %v1552_v22  ;;  %vm1560_vm1 = vweird.f32 %v6211_v27 }
0x1103   :  { %vm1561_vm6 = vmor %vm1559_vm2, %vm1560_vm1 }
0x1104   :  { %v1556_v1 = vsub.f32 1.0, %v1555_v0 }
0x1106   :  { %v1557_v3 = vmul.f32 %v6211_v27, %v1556_v1 }
0x1108   :  { %v1558_v7 = vadd.f32 %v6211_v27, %v1557_v3 }
0x110a   :  { %v1562_v12 = vsel %vm1561_vm6, %v6211_v27, %v1558_v7 }
0x110b   :  { %v1567_v15 = vsel %vm1564_vm7, %v1566_v13, %v1562_v12 }
0x110c   :  { %v1585_v19 = vmul.f32 0.0, %v1567_v15 }
0x1152   :  { %v1588_v14 = vpop.permute.xlu2 %1587 }
0x1153   :  { %v1590_v17 = vmul.f32 %v1588_v14, %v1567_v15 }
0x1155   :  { %1592 = vrot.lane.b32.xlu0 %v1590_v17, %s7076_s27 }
0x11c7   :  { %v1593_v18 = vpop.permute.xlu0 %1592 }
0x11c8   :  { %v7804_v20 = vadd.f32 %v1593_v18, %v1585_v19 }
0x11ca   :  { %6212 = vtanh.f32 %v7804_v20  ;;  %v1702_v15 = vrot.slane %v7804_v20, 6 }
0x11cb   :  { %6214 = vpow2.f32 %v5898_v29 }
0x11d0   :  { %v6213_v28 = vpop.eup %6212 }
0x11d1   :  { %1598 = vrot.lane.b32.xlu1 %v6213_v28, %s7076_s27  ;;  %v6215_v23 = vpop.eup %6214 }
0x11d2   :  { %v1553_v55 = vadd.f32 1.0, %v6215_v23 }
0x11d4   :  { %6216 = vrcp.f32 %v1553_v55  ;;  %v1580_v49 = vand.u32 2147483648, %v1553_v55  ;;  %vm1574_vm2 = vweird.f32 %v1553_v55  ;;  %v1578_v50 = vand.u32 2147483647, %v1553_v55 }
0x11d6   :  { %v1581_v52 = vor.u32 1.1754944e-38, %v1580_v49  ;;  %vm1579_vm7 = vcmp.eq.f32.partialorder %v1578_v50, 8.507059e+37 }
0x11da   :  { %v6217_v26 = vpop.eup %6216 }
0x11db   :  { %v1570_v30 = vmul.f32 %v6217_v26, %v1553_v55  ;;  %vm1575_vm1 = vweird.f32 %v6217_v26 }
0x11dc   :  { %vm1576_vm6 = vmor %vm1574_vm2, %vm1575_vm1 }
0x11dd   :  { %v1571_v46 = vsub.f32 1.0, %v1570_v30 }
0x11df   :  { %v1572_v47 = vmul.f32 %v6217_v26, %v1571_v46 }
0x11e1   :  { %v1573_v48 = vadd.f32 %v6217_v26, %v1572_v47 }
0x11e3   :  { %v1577_v51 = vsel %vm1576_vm6, %v6217_v26, %v1573_v48 }
0x11e4   :  { %v1582_v53 = vsel %vm1579_vm7, %v1581_v52, %v1577_v51 }
0x1243   :  { %v1599_v24 = vpop.permute.xlu1 %1598 }
0x1244   :  { %v7808_v57 = vmul.f32 %v1599_v24, %v1582_v53 }
0x1246   :  { %1602 = vst.msk [vmem:[#allocation3] sm:$0x3] %vm540_vm10, %v7808_v57  ;;  %5899 = vmatmul.msk.f32.vlgmr.msra.gmra.mxu0 %vm438_vm9, %v7808_v57  ;;  %5900 = vmatmul.msk.f32.vlgmr.msra.gmra.mxu1 %vm438_vm9, %v7808_v57 }
0x1247   :  { %1608 = vst.msk [vmem:[#allocation3 + $0xe] sm:$0x3] %vm9404_vm11, %v7808_v57  ;;  %2095 = vmatpush.msra.mxu0 %v7686_v16  ;;  %2115 = vmatpush.msra.mxu1 %v7688_v31 }
0x1249   :  { %2096 = vmatpush.msra.mxu0 %v7690_v32  ;;  %2116 = vmatpush.msra.mxu1 %v7692_v33 }
0x124b   :  { %2097 = vmatpush.msra.mxu0 %v7696_v34  ;;  %2117 = vmatpush.msra.mxu1 %v7698_v35 }
0x124d   :  { %2098 = vmatpush.msra.mxu0 %v7704_v36  ;;  %2118 = vmatpush.msra.mxu1 %v7706_v38 }
0x124f   :  { %2099 = vmatpush.msra.mxu0 %v7716_v25  ;;  %2119 = vmatpush.msra.mxu1 %v7718_v40 }
0x1251   :  { %2100 = vmatpush.msra.mxu0 %v7720_v41  ;;  %2120 = vmatpush.msra.mxu1 %v7722_v37 }
0x1253   :  { %2101 = vmatpush.msra.mxu0 %v7728_v42  ;;  %2121 = vmatpush.msra.mxu1 %v7730_v43 }
0x1255   :  { %2102 = vmatpush.msra.mxu0 %v7736_v44  ;;  %2122 = vmatpush.msra.mxu1 %v7738_v45 }
0x12c3   :  { %v1651_v58 = vpop.f32.mrf.mxu1  ;;  %v1631_v63 = vpop.f32.mrf.mxu0 }
0x12c4   :  { %v1657_v59 = vrot.slane %v1651_v58, 6  ;;  %v1656_v2 = vrot.slane %v1631_v63, 6 }
0x12c6   :  { %v1661_v61 = vadd.f32 %v1657_v59, %v1611_v60  ;;  %v1660_v56 = vadd.f32 %v1656_v2, %v1610_v4 }
0x12c8   :  { %6218 = vtanh.f32 %v1661_v61  ;;  %v5901_v54 = vmul.f32 -1.442695, %v1660_v56  ;;  %v5902_v29 = vmul.f32 -1.442695, %v1661_v61  ;;  %v1730_v61 = vld [vmem:[#allocation2] sm:$0x30] }
0x12c9   :  { %v1729_v56 = vld [vmem:[#allocation2 + $0x10] sm:$0x30] }
0x12ca   :  { %6220 = vpow2.f32 %v5901_v54 }
0x12ce   :  { %v6219_v62 = vpop.eup %6218 }
0x12cf   :  { %1706 = vrot.lane.b32.xlu2 %v6219_v62, %s7076_s27 }
0x12d0   :  { %v6221_v5 = vpop.eup %6220 }
0x12d1   :  { %v1668_v10 = vadd.f32 1.0, %v6221_v5 }
0x12d3   :  { %6222 = vrcp.f32 %v1668_v10  ;;  %v1681_v3 = vand.u32 2147483648, %v1668_v10  ;;  %vm1675_vm1 = vweird.f32 %v1668_v10  ;;  %v1679_v7 = vand.u32 2147483647, %v1668_v10 }
0x12d5   :  { %v1682_v9 = vor.u32 1.1754944e-38, %v1681_v3  ;;  %vm1680_vm6 = vcmp.eq.f32.partialorder %v1679_v7, 8.507059e+37 }
0x12d9   :  { %v6223_v11 = vpop.eup %6222 }
0x12da   :  { %v1671_v22 = vmul.f32 %v6223_v11, %v1668_v10  ;;  %vm1676_vm11 = vweird.f32 %v6223_v11 }
0x12db   :  { %vm1677_vm2 = vmor %vm1675_vm1, %vm1676_vm11 }
0x12dc   :  { %v1672_v27 = vsub.f32 1.0, %v1671_v22 }
0x12de   :  { %v1673_v0 = vmul.f32 %v6223_v11, %v1672_v27 }
0x12e0   :  { %v1674_v1 = vadd.f32 %v6223_v11, %v1673_v0 }
0x12e2   :  { %v1678_v8 = vsel %vm1677_vm2, %v6223_v11, %v1674_v1 }
0x12e3   :  { %v1683_v13 = vsel %vm1680_vm6, %v1682_v9, %v1678_v8 }
0x12e4   :  { %v1704_v17 = vmul.f32 %v1702_v15, %v1683_v13 }
0x1329   :  { %v1707_v12 = vpop.permute.xlu2 %1706 }
0x132a   :  { %v1709_v14 = vmul.f32 %v1707_v12, %v1683_v13 }
0x132c   :  { %1711 = vrot.lane.b32.xlu0 %v1709_v14, %s7076_s27 }
0x139e   :  { %v1712_v19 = vpop.permute.xlu0 %1711 }
0x139f   :  { %v7837_v18 = vadd.f32 %v1712_v19, %v1704_v17 }
0x13a1   :  { %6224 = vtanh.f32 %v7837_v18  ;;  %v1822_v17 = vrot.slane %v7837_v18, 6 }
0x13a2   :  { %6226 = vpow2.f32 %v5902_v29 }
0x13a7   :  { %v6225_v28 = vpop.eup %6224 }
0x13a8   :  { %1717 = vrot.lane.b32.xlu1 %v6225_v28, %s7076_s27  ;;  %v6227_v23 = vpop.eup %6226 }
0x13a9   :  { %v1669_v55 = vadd.f32 1.0, %v6227_v23 }
0x13ab   :  { %6228 = vrcp.f32 %v1669_v55  ;;  %v1696_v20 = vand.u32 2147483648, %v1669_v55  ;;  %vm1690_vm11 = vweird.f32 %v1669_v55  ;;  %v1694_v49 = vand.u32 2147483647, %v1669_v55 }
0x13ad   :  { %v1697_v51 = vor.u32 1.1754944e-38, %v1696_v20  ;;  %vm1695_vm2 = vcmp.eq.f32.partialorder %v1694_v49, 8.507059e+37 }
0x13b1   :  { %v6229_v26 = vpop.eup %6228 }
0x13b2   :  { %v1686_v30 = vmul.f32 %v6229_v26, %v1669_v55  ;;  %vm1691_vm7 = vweird.f32 %v6229_v26 }
0x13b3   :  { %vm1692_vm1 = vmor %vm1690_vm11, %vm1691_vm7 }
0x13b4   :  { %v1687_v46 = vsub.f32 1.0, %v1686_v30 }
0x13b6   :  { %v1688_v47 = vmul.f32 %v6229_v26, %v1687_v46 }
0x13b8   :  { %v1689_v48 = vadd.f32 %v6229_v26, %v1688_v47 }
0x13ba   :  { %v1693_v50 = vsel %vm1692_vm1, %v6229_v26, %v1689_v48 }
0x13bb   :  { %v1698_v52 = vsel %vm1695_vm2, %v1697_v51, %v1693_v50 }
0x141a   :  { %v1718_v53 = vpop.permute.xlu1 %1717 }
0x141b   :  { %v7841_v24 = vmul.f32 %v1718_v53, %v1698_v52 }
0x141d   :  { %v1731_v58 = vrot.slane %v7841_v24, 2  ;;  %1721 = vst.msk [vmem:[#allocation3] sm:$0xc] %vm663_vm4, %v7841_v24 }
0x141e   :  { %1727 = vst.msk [vmem:[#allocation3 + $0xa] sm:$0xc] %vm9317_vm5, %v7841_v24  ;;  %vm9406_vm5 = vcmask 521476  }
0x141f   :  { %5903 = vmatmul.msk.f32.vlgmr.msrb.gmra.mxu2 %vm438_vm9, %v1731_v58  ;;  %5904 = vmatmul.msk.f32.vlgmr.msrb.gmra.mxu3 %vm438_vm9, %v1731_v58 }
0x1420   :  { %2215 = vmatpush.msrb.mxu2 %v7686_v16  ;;  %2235 = vmatpush.msrb.mxu3 %v7688_v31 }
0x1422   :  { %2216 = vmatpush.msrb.mxu2 %v7690_v32  ;;  %2236 = vmatpush.msrb.mxu3 %v7692_v33 }
0x1424   :  { %2217 = vmatpush.msrb.mxu2 %v7696_v34  ;;  %2237 = vmatpush.msrb.mxu3 %v7698_v35 }
0x1426   :  { %2218 = vmatpush.msrb.mxu2 %v7704_v36  ;;  %2238 = vmatpush.msrb.mxu3 %v7706_v38 }
0x1428   :  { %2219 = vmatpush.msrb.mxu2 %v7716_v25  ;;  %2239 = vmatpush.msrb.mxu3 %v7718_v40 }
0x142a   :  { %2220 = vmatpush.msrb.mxu2 %v7720_v41  ;;  %2240 = vmatpush.msrb.mxu3 %v7722_v37 }
0x142c   :  { %2221 = vmatpush.msrb.mxu2 %v7728_v42  ;;  %2241 = vmatpush.msrb.mxu3 %v7730_v43 }
0x142e   :  { %2222 = vmatpush.msrb.mxu2 %v7736_v44  ;;  %2242 = vmatpush.msrb.mxu3 %v7738_v45 }
0x14a2   :  { %v1771_v59 = vpop.f32.mrf.mxu3  ;;  %v1751_v2 = vpop.f32.mrf.mxu2 }
0x14a3   :  { %v1777_v60 = vrot.slane %v1771_v59, 4  ;;  %v1776_v4 = vrot.slane %v1751_v2, 4 }
0x14a5   :  { %v1781_v62 = vadd.f32 %v1777_v60, %v1730_v61  ;;  %v1780_v54 = vadd.f32 %v1776_v4, %v1729_v56 }
0x14a7   :  { %6230 = vtanh.f32 %v1781_v62  ;;  %v5905_v5 = vmul.f32 -1.442695, %v1780_v54  ;;  %v5906_v55 = vmul.f32 -1.442695, %v1781_v62 }
0x14a9   :  { %6232 = vpow2.f32 %v5905_v5 }
0x14ad   :  { %v6231_v63 = vpop.eup %6230 }
0x14ae   :  { %1826 = vrot.lane.b32.xlu2 %v6231_v63, %s7076_s27 }
0x14af   :  { %v6233_v10 = vpop.eup %6232 }
0x14b0   :  { %v1788_v11 = vadd.f32 1.0, %v6233_v10 }
0x14b2   :  { %6234 = vrcp.f32 %v1788_v11  ;;  %v1801_v7 = vand.u32 2147483648, %v1788_v11  ;;  %vm1795_vm7 = vweird.f32 %v1788_v11  ;;  %v1799_v8 = vand.u32 2147483647, %v1788_v11 }
0x14b4   :  { %v1802_v12 = vor.u32 1.1754944e-38, %v1801_v7  ;;  %vm1800_vm1 = vcmp.eq.f32.partialorder %v1799_v8, 8.507059e+37 }
0x14b8   :  { %v6235_v22 = vpop.eup %6234 }
0x14b9   :  { %v1791_v27 = vmul.f32 %v6235_v22, %v1788_v11  ;;  %vm1796_vm6 = vweird.f32 %v6235_v22 }
0x14ba   :  { %vm1797_vm11 = vmor %vm1795_vm7, %vm1796_vm6 }
0x14bb   :  { %v1792_v0 = vsub.f32 1.0, %v1791_v27 }
0x14bd   :  { %v1793_v1 = vmul.f32 %v6235_v22, %v1792_v0 }
0x14bf   :  { %v1794_v3 = vadd.f32 %v6235_v22, %v1793_v1 }
0x14c1   :  { %v1798_v9 = vsel %vm1797_vm11, %v6235_v22, %v1794_v3 }
0x14c2   :  { %v1803_v14 = vsel %vm1800_vm1, %v1802_v12, %v1798_v9  ;;  %vm9405_vm1 = vcmask 259076  }
0x14c3   :  { %v1824_v19 = vmul.f32 %v1822_v17, %v1803_v14 }
0x1508   :  { %v1827_v13 = vpop.permute.xlu2 %1826 }
0x1509   :  { %v1829_v15 = vmul.f32 %v1827_v13, %v1803_v14 }
0x150b   :  { %1831 = vrot.lane.b32.xlu0 %v1829_v15, %s7076_s27 }
0x157d   :  { %v1832_v28 = vpop.permute.xlu0 %1831 }
0x157e   :  { %v7869_v29 = vadd.f32 %v1832_v28, %v1824_v19 }
0x1580   :  { %6236 = vtanh.f32 %v7869_v29  ;;  %v1942_v10 = vrot.slane %v7869_v29, 6 }
0x1581   :  { %6238 = vpow2.f32 %v5906_v55 }
0x1586   :  { %v6237_v23 = vpop.eup %6236 }
0x1587   :  { %1837 = vrot.lane.b32.xlu1 %v6237_v23, %s7076_s27  ;;  %v6239_v26 = vpop.eup %6238 }
0x1588   :  { %v1789_v30 = vadd.f32 1.0, %v6239_v26 }
0x158a   :  { %6240 = vrcp.f32 %v1789_v30  ;;  %v1816_v18 = vand.u32 2147483648, %v1789_v30  ;;  %vm1810_vm6 = vweird.f32 %v1789_v30  ;;  %v1814_v50 = vand.u32 2147483647, %v1789_v30 }
0x158c   :  { %v1817_v52 = vor.u32 1.1754944e-38, %v1816_v18  ;;  %vm1815_vm11 = vcmp.eq.f32.partialorder %v1814_v50, 8.507059e+37 }
0x1590   :  { %v6241_v46 = vpop.eup %6240 }
0x1591   :  { %v1806_v47 = vmul.f32 %v6241_v46, %v1789_v30  ;;  %vm1811_vm2 = vweird.f32 %v6241_v46  ;;  %v1970_v30 = vld [vmem:[#allocation2 + $0x8] sm:$0x3] }
0x1592   :  { %vm1812_vm7 = vmor %vm1810_vm6, %vm1811_vm2 }
0x1593   :  { %v1807_v48 = vsub.f32 1.0, %v1806_v47 }
0x1595   :  { %v1808_v20 = vmul.f32 %v6241_v46, %v1807_v48 }
0x1597   :  { %v1809_v49 = vadd.f32 %v6241_v46, %v1808_v20 }
0x1599   :  { %v1813_v51 = vsel %vm1812_vm7, %v6241_v46, %v1809_v49  ;;  %v1969_v49 = vld [vmem:[#allocation2 + $0x18] sm:$0x3] }
0x159a   :  { %v1818_v53 = vsel %vm1815_vm11, %v1817_v52, %v1813_v51 }
0x15f9   :  { %v1838_v58 = vpop.permute.xlu1 %1837 }
0x15fa   :  { %v7873_v59 = vmul.f32 %v1838_v58, %v1818_v53 }
0x15fc   :  { %v1851_v60 = vrot.slane %v7873_v59, 4  ;;  %1841 = vst.msk [vmem:[#allocation3] sm:$0x30] %vm9405_vm1, %v7873_v59 }
0x15fd   :  { %1847 = vst.msk [vmem:[#allocation3 + $0x6] sm:$0x30] %vm9406_vm5, %v7873_v59 }
0x15fe   :  { %5907 = vmatmul.msk.f32.vlgmr.msrb.gmra.mxu0 %vm438_vm9, %v1851_v60  ;;  %5908 = vmatmul.msk.f32.vlgmr.msrb.gmra.mxu1 %vm438_vm9, %v1851_v60 }
0x15ff   :  { %2335 = vmatpush.msrb.mxu0 %v7686_v16  ;;  %2355 = vmatpush.msrb.mxu1 %v7688_v31 }
0x1601   :  { %2336 = vmatpush.msrb.mxu0 %v7690_v32  ;;  %2356 = vmatpush.msrb.mxu1 %v7692_v33  ;;  %v1850_v32 = vld [vmem:[#allocation2] sm:$0xc0] }
0x1603   :  { %2337 = vmatpush.msrb.mxu0 %v7696_v34  ;;  %2357 = vmatpush.msrb.mxu1 %v7698_v35 }
0x1605   :  { %2338 = vmatpush.msrb.mxu0 %v7704_v36  ;;  %2358 = vmatpush.msrb.mxu1 %v7706_v38  ;;  %v1849_v38 = vld [vmem:[#allocation2 + $0x10] sm:$0xc0] }
0x1607   :  { %2339 = vmatpush.msrb.mxu0 %v7716_v25  ;;  %2359 = vmatpush.msrb.mxu1 %v7718_v40 }
0x1609   :  { %2340 = vmatpush.msrb.mxu0 %v7720_v41  ;;  %2360 = vmatpush.msrb.mxu1 %v7722_v37 }
0x160b   :  { %2341 = vmatpush.msrb.mxu0 %v7728_v42  ;;  %2361 = vmatpush.msrb.mxu1 %v7730_v43 }
0x160d   :  { %2342 = vmatpush.msrb.mxu0 %v7736_v44  ;;  %2362 = vmatpush.msrb.mxu1 %v7738_v45 }
0x167b   :  { %v1891_v16 = vpop.f32.mrf.mxu1  ;;  %v1871_v35 = vpop.f32.mrf.mxu0 }
0x167c   :  { %v1897_v31 = vrot.slane %v1891_v16, 2  ;;  %v1896_v36 = vrot.slane %v1871_v35, 2 }
0x167e   :  { %v1901_v33 = vadd.f32 %v1897_v31, %v1850_v32  ;;  %v1900_v25 = vadd.f32 %v1896_v36, %v1849_v38 }
0x1680   :  { %6242 = vtanh.f32 %v1901_v33  ;;  %v5909_v40 = vmul.f32 -1.442695, %v1900_v25  ;;  %v5910_v1 = vmul.f32 -1.442695, %v1901_v33 }
0x1682   :  { %6244 = vpow2.f32 %v5909_v40 }
0x1686   :  { %v6243_v34 = vpop.eup %6242 }
0x1687   :  { %1946 = vrot.lane.b32.xlu2 %v6243_v34, %s7076_s27 }
0x1688   :  { %v6245_v41 = vpop.eup %6244 }
0x1689   :  { %v1908_v37 = vadd.f32 1.0, %v6245_v41 }
0x168b   :  { %6246 = vrcp.f32 %v1908_v37  ;;  %v1921_v62 = vand.u32 2147483648, %v1908_v37  ;;  %vm1915_vm2 = vweird.f32 %v1908_v37  ;;  %v1919_v63 = vand.u32 2147483647, %v1908_v37 }
0x168d   :  { %v1922_v4 = vor.u32 1.1754944e-38, %v1921_v62  ;;  %vm1920_vm7 = vcmp.eq.f32.partialorder %v1919_v63, 8.507059e+37 }
0x1691   :  { %v6247_v42 = vpop.eup %6246 }
0x1692   :  { %v1911_v43 = vmul.f32 %v6247_v42, %v1908_v37  ;;  %vm1916_vm5 = vweird.f32 %v6247_v42 }
0x1693   :  { %vm1917_vm6 = vmor %vm1915_vm2, %vm1916_vm5 }
0x1694   :  { %v1912_v44 = vsub.f32 1.0, %v1911_v43 }
0x1696   :  { %v1913_v45 = vmul.f32 %v6247_v42, %v1912_v44 }
0x1698   :  { %v1914_v61 = vadd.f32 %v6247_v42, %v1913_v45 }
0x169a   :  { %v1918_v2 = vsel %vm1917_vm6, %v6247_v42, %v1914_v61 }
0x169b   :  { %v1923_v54 = vsel %vm1920_vm7, %v1922_v4, %v1918_v2 }
0x169c   :  { %v1944_v11 = vmul.f32 %v1942_v10, %v1923_v54 }
0x16e1   :  { %v1947_v56 = vpop.permute.xlu2 %1946 }
0x16e2   :  { %v1949_v5 = vmul.f32 %v1947_v56, %v1923_v54 }
0x16e4   :  { %1951 = vrot.lane.b32.xlu0 %v1949_v5, %s7076_s27 }
0x1756   :  { %v1952_v22 = vpop.permute.xlu0 %1951 }
0x1757   :  { %v7901_v27 = vadd.f32 %v1952_v22, %v1944_v11 }
0x1759   :  { %6248 = vtanh.f32 %v7901_v27  ;;  %v2056_v40 = vrot.slane %v7901_v27, 6 }
0x175a   :  { %6250 = vpow2.f32 %v5910_v1 }
0x175f   :  { %v6249_v0 = vpop.eup %6248 }
0x1760   :  { %1957 = vrot.lane.b32.xlu1 %v6249_v0, %s7076_s27  ;;  %v6251_v3 = vpop.eup %6250 }
0x1761   :  { %v1909_v7 = vadd.f32 1.0, %v6251_v3 }
0x1763   :  { %6252 = vrcp.f32 %v1909_v7  ;;  %v1936_v15 = vand.u32 2147483648, %v1909_v7  ;;  %vm1930_vm1 = vweird.f32 %v1909_v7  ;;  %v1934_v17 = vand.u32 2147483647, %v1909_v7 }
0x1765   :  { %v1937_v28 = vor.u32 1.1754944e-38, %v1936_v15  ;;  %vm1935_vm2 = vcmp.eq.f32.partialorder %v1934_v17, 8.507059e+37 }
0x1769   :  { %v6253_v8 = vpop.eup %6252 }
0x176a   :  { %v1926_v9 = vmul.f32 %v6253_v8, %v1909_v7  ;;  %vm1931_vm11 = vweird.f32 %v6253_v8  ;;  %v2084_v7 = vld [vmem:[#allocation2 + $0x8] sm:$0xc] }
0x176b   :  { %vm1932_vm5 = vmor %vm1930_vm1, %vm1931_vm11 }
0x176c   :  { %v1927_v12 = vsub.f32 1.0, %v1926_v9 }
0x176e   :  { %v1928_v13 = vmul.f32 %v6253_v8, %v1927_v12 }
0x1770   :  { %v1929_v14 = vadd.f32 %v6253_v8, %v1928_v13 }
0x1772   :  { %v1933_v19 = vsel %vm1932_vm5, %v6253_v8, %v1929_v14  ;;  %v2083_v14 = vld [vmem:[#allocation2 + $0x18] sm:$0xc] }
0x1773   :  { %v1938_v29 = vsel %vm1935_vm2, %v1937_v28, %v1933_v19 }
0x17d2   :  { %v1958_v23 = vpop.permute.xlu1 %1957 }
0x17d3   :  { %v7905_v55 = vmul.f32 %v1958_v23, %v1938_v29 }
0x17d5   :  { %v1971_v26 = vrot.slane %v7905_v55, 6  ;;  %1961 = vst.msk [vmem:[#allocation3] sm:$0xc0] %vm911_vm0, %v7905_v55 }
0x17d6   :  { %1967 = vst.msk [vmem:[#allocation3 + $0x2] sm:$0xc0] %vm919_vm3, %v7905_v55 }
0x17d7   :  { %5911 = vmatmul.msk.f32.vlgmr.msra.gmra.mxu2 %vm438_vm9, %v1971_v26  ;;  %5912 = vmatmul.msk.f32.vlgmr.msra.gmra.mxu3 %vm438_vm9, %v1971_v26 }
0x185a   :  { %v2011_v46 = vpop.f32.mrf.mxu3  ;;  %v1991_v20 = vpop.f32.mrf.mxu2 }
0x185b   :  { %v2015_v47 = vadd.f32 %v2011_v46, %v1970_v30  ;;  %v2014_v18 = vadd.f32 %v1991_v20, %v1969_v49 }
0x185d   :  { %6254 = vtanh.f32 %v2015_v47  ;;  %v5913_v50 = vmul.f32 -1.442695, %v2014_v18  ;;  %v5914_v44 = vmul.f32 -1.442695, %v2015_v47 }
0x185f   :  { %6256 = vpow2.f32 %v5913_v50 }
0x1863   :  { %v6255_v48 = vpop.eup %6254 }
0x1864   :  { %2060 = vrot.lane.b32.xlu2 %v6255_v48, %s7076_s27 }
0x1865   :  { %v6257_v51 = vpop.eup %6256 }
0x1866   :  { %v2022_v52 = vadd.f32 1.0, %v6257_v51 }
0x1868   :  { %6258 = vrcp.f32 %v2022_v52  ;;  %v2035_v32 = vand.u32 2147483648, %v2022_v52  ;;  %vm2029_vm7 = vweird.f32 %v2022_v52  ;;  %v2033_v33 = vand.u32 2147483647, %v2022_v52 }
0x186a   :  { %v2036_v35 = vor.u32 1.1754944e-38, %v2035_v32  ;;  %vm2034_vm1 = vcmp.eq.f32.partialorder %v2033_v33, 8.507059e+37 }
0x186e   :  { %v6259_v53 = vpop.eup %6258 }
0x186f   :  { %v2025_v58 = vmul.f32 %v6259_v53, %v2022_v52  ;;  %vm2030_vm6 = vweird.f32 %v6259_v53 }
0x1870   :  { %vm2031_vm11 = vmor %vm2029_vm7, %vm2030_vm6 }
0x1871   :  { %v2026_v60 = vsub.f32 1.0, %v2025_v58 }
0x1873   :  { %v2027_v16 = vmul.f32 %v6259_v53, %v2026_v60 }
0x1875   :  { %v2028_v31 = vadd.f32 %v6259_v53, %v2027_v16 }
0x1877   :  { %v2032_v34 = vsel %vm2031_vm11, %v6259_v53, %v2028_v31 }
0x1878   :  { %v2037_v38 = vsel %vm2034_vm1, %v2036_v35, %v2032_v34 }
0x1879   :  { %v2058_v41 = vmul.f32 %v2056_v40, %v2037_v38 }
0x18be   :  { %v2061_v36 = vpop.permute.xlu2 %2060 }
0x18bf   :  { %v2063_v25 = vmul.f32 %v2061_v36, %v2037_v38 }
0x18c1   :  { %2065 = vrot.lane.b32.xlu0 %v2063_v25, %s7076_s27 }
0x1933   :  { %v2066_v37 = vpop.permute.xlu0 %2065 }
0x1934   :  { %v2068_v42 = vadd.f32 %v2066_v37, %v2058_v41 }
0x1936   :  { %6260 = vtanh.f32 %v2068_v42  ;;  %v2175_v52 = vrot.slane %v2068_v42, 6 }
0x1937   :  { %6262 = vpow2.f32 %v5914_v44 }
0x193c   :  { %v6261_v43 = vpop.eup %6260 }
0x193d   :  { %2071 = vrot.lane.b32.xlu1 %v6261_v43, %s7076_s27  ;;  %v6263_v45 = vpop.eup %6262 }
0x193e   :  { %v2023_v61 = vadd.f32 1.0, %v6263_v45 }
0x1940   :  { %6264 = vrcp.f32 %v2023_v61  ;;  %v2050_v54 = vand.u32 2147483648, %v2023_v61  ;;  %vm2044_vm2 = vweird.f32 %v2023_v61  ;;  %v2048_v5 = vand.u32 2147483647, %v2023_v61 }
0x1942   :  { %v2051_v11 = vor.u32 1.1754944e-38, %v2050_v54  ;;  %vm2049_vm7 = vcmp.eq.f32.partialorder %v2048_v5, 8.507059e+37 }
0x1946   :  { %v6265_v62 = vpop.eup %6264 }
0x1947   :  { %v2040_v63 = vmul.f32 %v6265_v62, %v2023_v61  ;;  %vm2045_vm5 = vweird.f32 %v6265_v62 }
0x1948   :  { %vm2046_vm6 = vmor %vm2044_vm2, %vm2045_vm5 }
0x1949   :  { %v2041_v2 = vsub.f32 1.0, %v2040_v63 }
0x194b   :  { %v2042_v4 = vmul.f32 %v6265_v62, %v2041_v2  ;;  %v2203_v2 = vld [vmem:[#allocation2 + $0x8] sm:$0x30] }
0x194d   :  { %v2043_v56 = vadd.f32 %v6265_v62, %v2042_v4 }
0x194f   :  { %v2047_v10 = vsel %vm2046_vm6, %v6265_v62, %v2043_v56 }
0x1950   :  { %v2052_v22 = vsel %vm2049_vm7, %v2051_v11, %v2047_v10  ;;  %v2202_v10 = vld [vmem:[#allocation2 + $0x18] sm:$0x30] }
0x19af   :  { %v2072_v27 = vpop.permute.xlu1 %2071 }
0x19b0   :  { %v7918_v0 = vmul.f32 %v2072_v27, %v2052_v22 }
0x19b2   :  { %5915 = vmatmul.msk.f32.vlgmr.msra.gmra.mxu0 %vm438_vm9, %v7918_v0  ;;  %5916 = vmatmul.msk.f32.vlgmr.msra.gmra.mxu1 %vm438_vm9, %v7918_v0 }
0x1a2f   :  { %v2124_v1 = vpop.f32.mrf.mxu1  ;;  %v2104_v12 = vpop.f32.mrf.mxu0 }
0x1a30   :  { %v2130_v3 = vrot.slane %v2124_v1, 6  ;;  %v2129_v13 = vrot.slane %v2104_v12, 6 }
0x1a32   :  { %v2134_v8 = vadd.f32 %v2130_v3, %v2084_v7  ;;  %v2133_v15 = vadd.f32 %v2129_v13, %v2083_v14 }
0x1a34   :  { %6266 = vtanh.f32 %v2134_v8  ;;  %v5917_v17 = vmul.f32 -1.442695, %v2133_v15  ;;  %v5918_v31 = vmul.f32 -1.442695, %v2134_v8 }
0x1a36   :  { %6268 = vpow2.f32 %v5917_v17 }
0x1a3a   :  { %v6267_v9 = vpop.eup %6266 }
0x1a3b   :  { %2179 = vrot.lane.b32.xlu2 %v6267_v9, %s7076_s27 }
0x1a3c   :  { %v6269_v19 = vpop.eup %6268 }
0x1a3d   :  { %v2141_v28 = vadd.f32 1.0, %v6269_v19 }
0x1a3f   :  { %6270 = vrcp.f32 %v2141_v28  ;;  %v2154_v47 = vand.u32 2147483648, %v2141_v28  ;;  %vm2148_vm1 = vweird.f32 %v2141_v28  ;;  %v2152_v48 = vand.u32 2147483647, %v2141_v28 }
0x1a41   :  { %v2155_v49 = vor.u32 1.1754944e-38, %v2154_v47  ;;  %vm2153_vm2 = vcmp.eq.f32.partialorder %v2152_v48, 8.507059e+37 }
0x1a45   :  { %v6271_v29 = vpop.eup %6270 }
0x1a46   :  { %v2144_v23 = vmul.f32 %v6271_v29, %v2141_v28  ;;  %vm2149_vm11 = vweird.f32 %v6271_v29 }
0x1a47   :  { %vm2150_vm5 = vmor %vm2148_vm1, %vm2149_vm11 }
0x1a48   :  { %v2145_v26 = vsub.f32 1.0, %v2144_v23 }
0x1a4a   :  { %v2146_v30 = vmul.f32 %v6271_v29, %v2145_v26 }
0x1a4c   :  { %v2147_v46 = vadd.f32 %v6271_v29, %v2146_v30 }
0x1a4e   :  { %v2151_v20 = vsel %vm2150_vm5, %v6271_v29, %v2147_v46 }
0x1a4f   :  { %v2156_v50 = vsel %vm2153_vm2, %v2155_v49, %v2151_v20 }
0x1a50   :  { %v2177_v53 = vmul.f32 %v2175_v52, %v2156_v50 }
0x1a95   :  { %v2180_v18 = vpop.permute.xlu2 %2179 }
0x1a96   :  { %v2182_v51 = vmul.f32 %v2180_v18, %v2156_v50 }
0x1a98   :  { %2184 = vrot.lane.b32.xlu0 %v2182_v51, %s7076_s27 }
0x1b0a   :  { %v2185_v58 = vpop.permute.xlu0 %2184 }
0x1b0b   :  { %v7926_v60 = vadd.f32 %v2185_v58, %v2177_v53 }
0x1b0d   :  { %6272 = vtanh.f32 %v7926_v60  ;;  %v2295_v23 = vrot.slane %v7926_v60, 6 }
0x1b0e   :  { %6274 = vpow2.f32 %v5918_v31 }
0x1b13   :  { %v6273_v16 = vpop.eup %6272 }
0x1b14   :  { %2190 = vrot.lane.b32.xlu1 %v6273_v16, %s7076_s27  ;;  %v6275_v32 = vpop.eup %6274 }
0x1b15   :  { %v2142_v33 = vadd.f32 1.0, %v6275_v32 }
0x1b17   :  { %6276 = vrcp.f32 %v2142_v33  ;;  %v2169_v40 = vand.u32 2147483648, %v2142_v33  ;;  %vm2163_vm7 = vweird.f32 %v2142_v33  ;;  %v2167_v41 = vand.u32 2147483647, %v2142_v33 }
0x1b19   :  { %v2170_v42 = vor.u32 1.1754944e-38, %v2169_v40  ;;  %vm2168_vm1 = vcmp.eq.f32.partialorder %v2167_v41, 8.507059e+37 }
0x1b1d   :  { %v6277_v34 = vpop.eup %6276 }
0x1b1e   :  { %v2159_v35 = vmul.f32 %v6277_v34, %v2142_v33  ;;  %vm2164_vm6 = vweird.f32 %v6277_v34 }
0x1b1f   :  { %vm2165_vm11 = vmor %vm2163_vm7, %vm2164_vm6 }
0x1b20   :  { %v2160_v36 = vsub.f32 1.0, %v2159_v35 }
0x1b22   :  { %v2161_v38 = vmul.f32 %v6277_v34, %v2160_v36 }
0x1b24   :  { %v2162_v25 = vadd.f32 %v6277_v34, %v2161_v38 }
0x1b26   :  { %v2166_v37 = vsel %vm2165_vm11, %v6277_v34, %v2162_v25  ;;  %v2323_v25 = vld [vmem:[#allocation2 + $0x8] sm:$0xc0] }
0x1b27   :  { %v2171_v43 = vsel %vm2168_vm1, %v2170_v42, %v2166_v37 }
0x1b86   :  { %v2191_v44 = vpop.permute.xlu1 %2190 }
0x1b87   :  { %v7930_v45 = vmul.f32 %v2191_v44, %v2171_v43  ;;  %v2322_v43 = vld [vmem:[#allocation2 + $0x18] sm:$0xc0] }
0x1b89   :  { %v2204_v61 = vrot.slane %v7930_v45, 2 }
0x1b8b   :  { %5919 = vmatmul.msk.f32.vlgmr.msrb.gmra.mxu2 %vm438_vm9, %v2204_v61  ;;  %5920 = vmatmul.msk.f32.vlgmr.msrb.gmra.mxu3 %vm438_vm9, %v2204_v61 }
0x1c0e   :  { %v2244_v62 = vpop.f32.mrf.mxu3  ;;  %v2224_v54 = vpop.f32.mrf.mxu2 }
0x1c0f   :  { %v2250_v63 = vrot.slane %v2244_v62, 4  ;;  %v2249_v5 = vrot.slane %v2224_v54, 4 }
0x1c11   :  { %v2254_v4 = vadd.f32 %v2250_v63, %v2203_v2  ;;  %v2253_v11 = vadd.f32 %v2249_v5, %v2202_v10 }
0x1c13   :  { %6278 = vtanh.f32 %v2254_v4  ;;  %v5921_v22 = vmul.f32 -1.442695, %v2253_v11  ;;  %v5922_v48 = vmul.f32 -1.442695, %v2254_v4 }
0x1c15   :  { %6280 = vpow2.f32 %v5921_v22 }
0x1c19   :  { %v6279_v56 = vpop.eup %6278 }
0x1c1a   :  { %2299 = vrot.lane.b32.xlu2 %v6279_v56, %s7076_s27 }
0x1c1b   :  { %v6281_v27 = vpop.eup %6280 }
0x1c1c   :  { %v2261_v1 = vadd.f32 1.0, %v6281_v27 }
0x1c1e   :  { %6282 = vrcp.f32 %v2261_v1  ;;  %v2274_v13 = vand.u32 2147483648, %v2261_v1  ;;  %vm2268_vm2 = vweird.f32 %v2261_v1  ;;  %v2272_v14 = vand.u32 2147483647, %v2261_v1 }
0x1c20   :  { %v2275_v17 = vor.u32 1.1754944e-38, %v2274_v13  ;;  %vm2273_vm7 = vcmp.eq.f32.partialorder %v2272_v14, 8.507059e+37 }
0x1c24   :  { %v6283_v3 = vpop.eup %6282 }
0x1c25   :  { %v2264_v7 = vmul.f32 %v6283_v3, %v2261_v1  ;;  %vm2269_vm5 = vweird.f32 %v6283_v3 }
0x1c26   :  { %vm2270_vm6 = vmor %vm2268_vm2, %vm2269_vm5 }
0x1c27   :  { %v2265_v8 = vsub.f32 1.0, %v2264_v7 }
0x1c29   :  { %v2266_v9 = vmul.f32 %v6283_v3, %v2265_v8 }
0x1c2b   :  { %v2267_v12 = vadd.f32 %v6283_v3, %v2266_v9 }
0x1c2d   :  { %v2271_v15 = vsel %vm2270_vm6, %v6283_v3, %v2267_v12 }
0x1c2e   :  { %v2276_v28 = vsel %vm2273_vm7, %v2275_v17, %v2271_v15 }
0x1c2f   :  { %v2297_v26 = vmul.f32 %v2295_v23, %v2276_v28 }
0x1c74   :  { %v2300_v19 = vpop.permute.xlu2 %2299 }
0x1c75   :  { %v2302_v29 = vmul.f32 %v2300_v19, %v2276_v28 }
0x1c77   :  { %2304 = vrot.lane.b32.xlu0 %v2302_v29, %s7076_s27 }
0x1ce9   :  { %v2305_v30 = vpop.permute.xlu0 %2304 }
0x1cea   :  { %v7938_v46 = vadd.f32 %v2305_v30, %v2297_v26  ;;  %v2474_v30 = vld [vmem:[#allocation11 + $0xf0] sm:$0xff] }
0x1ceb   :  { %2482 = vmatpush.msra.mxu2 %v2474_v30 }
0x1cec   :  { %6284 = vtanh.f32 %v7938_v46  ;;  %v2415_v8 = vrot.slane %v7938_v46, 6  ;;  %v2475_v46 = vld [vmem:[#allocation11 + $0xf8] sm:$0xff] }
0x1ced   :  { %6286 = vpow2.f32 %v5922_v48  ;;  %2505 = vmatpush.msra.mxu3 %v2475_v46  ;;  %v2473_v48 = vld [vmem:[#allocation11 + $0xe8] sm:$0xff] }
0x1cee   :  { %v2476_v46 = vld [vmem:[%s9415_s30] sm:$0x3] }
0x1cef   :  { %2506 = vmatpush.msra.mxu3 %v2473_v48  ;;  %v2479_v48 = vperm.slane %v2476_v46, 1 }
0x1cf2   :  { %v6285_v47 = vpop.eup %6284 }
0x1cf3   :  { %2310 = vrot.lane.b32.xlu1 %v6285_v47, %s7076_s27  ;;  %v6287_v20 = vpop.eup %6286  ;;  %v2472_v47 = vld [vmem:[#allocation11 + $0xe0] sm:$0xff] }
0x1cf4   :  { %v2262_v49 = vadd.f32 1.0, %v6287_v20  ;;  %v2470_v20 = vld [vmem:[#allocation11 + $0xd0] sm:$0xff]  ;;  %2483 = vmatpush.msra.mxu2 %v2472_v47  ;;  %v2478_v47 = vperm.slane %v2476_v46, 0 }
0x1cf6   :  { %6288 = vrcp.f32 %v2262_v49  ;;  %v2289_v58 = vand.u32 2147483648, %v2262_v49  ;;  %vm2283_vm1 = vweird.f32 %v2262_v49  ;;  %v2287_v60 = vand.u32 2147483647, %v2262_v49  ;;  %2484 = vmatpush.msra.mxu2 %v2470_v20 }
0x1cf8   :  { %v2290_v31 = vor.u32 1.1754944e-38, %v2289_v58  ;;  %vm2288_vm2 = vcmp.eq.f32.partialorder %v2287_v60, 8.507059e+37  ;;  %v2464_v60 = vld [vmem:[#allocation11 + $0xa0] sm:$0xff] }
0x1cfc   :  { %v6289_v18 = vpop.eup %6288 }
0x1cfd   :  { %v2279_v50 = vmul.f32 %v6289_v18, %v2262_v49  ;;  %vm2284_vm11 = vweird.f32 %v6289_v18  ;;  %v2471_v49 = vld [vmem:[#allocation11 + $0xd8] sm:$0xff] }
0x1cfe   :  { %vm2285_vm5 = vmor %vm2283_vm1, %vm2284_vm11  ;;  %2507 = vmatpush.msra.mxu3 %v2471_v49 }
0x1cff   :  { %v2280_v51 = vsub.f32 1.0, %v2279_v50  ;;  %v2469_v50 = vld [vmem:[#allocation11 + $0xc8] sm:$0xff] }
0x1d00   :  { %2508 = vmatpush.msra.mxu3 %v2469_v50 }
0x1d01   :  { %v2281_v52 = vmul.f32 %v6289_v18, %v2280_v51  ;;  %v2466_v51 = vld [vmem:[#allocation11 + $0xb0] sm:$0xff] }
0x1d03   :  { %v2282_v53 = vadd.f32 %v6289_v18, %v2281_v52  ;;  %v2467_v52 = vld [vmem:[#allocation11 + $0xb8] sm:$0xff] }
0x1d04   :  { %2509 = vmatpush.msra.mxu3 %v2467_v52 }
0x1d05   :  { %v2286_v16 = vsel %vm2285_vm5, %v6289_v18, %v2282_v53  ;;  %vm9407_vm5 = vcmask 1042176   ;;  %v2468_v18 = vld [vmem:[#allocation11 + $0xc0] sm:$0xff] }
0x1d06   :  { %v2291_v32 = vsel %vm2288_vm2, %v2290_v31, %v2286_v16  ;;  %vm9408_vm2 = vcmask 779776   ;;  %2485 = vmatpush.msra.mxu2 %v2468_v18  ;;  %v2465_v16 = vld [vmem:[#allocation11 + $0xa8] sm:$0xff] }
0x1d07   :  { %2510 = vmatpush.msra.mxu3 %v2465_v16 }
0x1d08   :  { %2486 = vmatpush.msra.mxu2 %v2466_v51 }
0x1d0a   :  { %2487 = vmatpush.msra.mxu2 %v2464_v60 }
0x1d65   :  { %v2311_v33 = vpop.permute.xlu1 %2310 }
0x1d66   :  { %v7942_v34 = vmul.f32 %v2311_v33, %v2291_v32  ;;  %v2462_v32 = vld [vmem:[#allocation11 + $0x90] sm:$0xff]  ;;  %v2463_v33 = vld [vmem:[#allocation11 + $0x98] sm:$0xff] }
0x1d67   :  { %2488 = vmatpush.msra.mxu2 %v2462_v32  ;;  %2511 = vmatpush.msra.mxu3 %v2463_v33 }
0x1d68   :  { %v2324_v35 = vrot.slane %v7942_v34, 4 }
0x1d6a   :  { %5923 = vmatmul.msk.f32.vlgmr.msrb.gmra.mxu0 %vm438_vm9, %v2324_v35  ;;  %5924 = vmatmul.msk.f32.vlgmr.msrb.gmra.mxu1 %vm438_vm9, %v2324_v35 }
0x1de7   :  { %v2364_v36 = vpop.f32.mrf.mxu1  ;;  %v2344_v37 = vpop.f32.mrf.mxu0 }
0x1de8   :  { %v2370_v38 = vrot.slane %v2364_v36, 2  ;;  %v2369_v42 = vrot.slane %v2344_v37, 2  ;;  %v2460_v36 = vld [vmem:[#allocation11 + $0x80] sm:$0xff] }
0x1de9   :  { %2489 = vmatpush.msra.mxu2 %v2460_v36 }
0x1dea   :  { %v2374_v40 = vadd.f32 %v2370_v38, %v2323_v25  ;;  %v2373_v44 = vadd.f32 %v2369_v42, %v2322_v43  ;;  %v2461_v38 = vld [vmem:[#allocation11 + $0x88] sm:$0xff]  ;;  %v2459_v42 = vld [vmem:[#allocation11 + $0x78] sm:$0xff]  ;;  %v2456_v43 = vld [vmem:[#allocation11 + $0x60] sm:$0xff] }
0x1deb   :  { %2512 = vmatpush.msra.mxu3 %v2461_v38 }
0x1dec   :  { %6290 = vtanh.f32 %v2374_v40  ;;  %v5925_v61 = vmul.f32 -1.442695, %v2373_v44  ;;  %v5926_v17 = vmul.f32 -1.442695, %v2374_v40  ;;  %v2457_v44 = vld [vmem:[#allocation11 + $0x68] sm:$0xff] }
0x1ded   :  { %2513 = vmatpush.msra.mxu3 %v2459_v42 }
0x1dee   :  { %6292 = vpow2.f32 %v5925_v61  ;;  %v2454_v61 = vld [vmem:[#allocation11 + $0x50] sm:$0xff] }
0x1def   :  { %2514 = vmatpush.msra.mxu3 %v2457_v44 }
0x1df2   :  { %v6291_v41 = vpop.eup %6290 }
0x1df3   :  { %2419 = vrot.lane.b32.xlu2 %v6291_v41, %s7076_s27  ;;  %v2458_v41 = vld [vmem:[#allocation11 + $0x70] sm:$0xff] }
0x1df4   :  { %v6293_v62 = vpop.eup %6292  ;;  %2490 = vmatpush.msra.mxu2 %v2458_v41 }
0x1df5   :  { %v2381_v63 = vadd.f32 1.0, %v6293_v62  ;;  %v2455_v62 = vld [vmem:[#allocation11 + $0x58] sm:$0xff] }
0x1df6   :  { %2491 = vmatpush.msra.mxu2 %v2456_v43  ;;  %2515 = vmatpush.msra.mxu3 %v2455_v62 }
0x1df7   :  { %6294 = vrcp.f32 %v2381_v63  ;;  %v2394_v5 = vand.u32 2147483648, %v2381_v63  ;;  %vm2388_vm7 = vweird.f32 %v2381_v63 }
0x1df8   :  { %2492 = vmatpush.msra.mxu2 %v2454_v61 }
0x1df9   :  { %v2395_v11 = vor.u32 1.1754944e-38, %v2394_v5  ;;  %v2448_v5 = vld [vmem:[#allocation11 + $0x20] sm:$0xff] }
0x1dfb   :  { %1604 = vrot.lane.b32.xlu2 %v7808_v57, %s7076_s27 }
0x1dfd   :  { %v6295_v2 = vpop.eup %6294 }
0x1dfe   :  { %v2384_v4 = vmul.f32 %v6295_v2, %v2381_v63  ;;  %vm2389_vm6 = vweird.f32 %v6295_v2 }
0x1dff   :  { %vm2390_vm11 = vmor %vm2388_vm7, %vm2389_vm6  ;;  %vm9409_vm6 = vcmask 517376   ;;  %vm9410_vm7 = vcmask 259076  }
0x1e00   :  { %v2385_v56 = vsub.f32 1.0, %v2384_v4 }
0x1e02   :  { %v2386_v54 = vmul.f32 %v6295_v2, %v2385_v56 }
0x1e03   :  { %1963 = vrot.lane.b32.xlu2 %v7905_v55, %s7076_s27  ;;  %v2392_v55 = vand.u32 2147483647, %v2381_v63  ;;  %v2452_v63 = vld [vmem:[#allocation11 + $0x40] sm:$0xff] }
0x1e04   :  { %v2387_v57 = vadd.f32 %v6295_v2, %v2386_v54  ;;  %2493 = vmatpush.msra.mxu2 %v2452_v63  ;;  %v2450_v54 = vld [vmem:[#allocation11 + $0x30] sm:$0xff] }
0x1e05   :  { %vm2393_vm1 = vcmp.eq.f32.partialorder %v2392_v55, 8.507059e+37  ;;  %v2449_v55 = vld [vmem:[#allocation11 + $0x28] sm:$0xff] }
0x1e06   :  { %v2391_v10 = vsel %vm2390_vm11, %v6295_v2, %v2387_v57  ;;  %vm9411_vm11 = vcmask 521476   ;;  %v2453_v2 = vld [vmem:[#allocation11 + $0x48] sm:$0xff]  ;;  %v2451_v57 = vld [vmem:[#allocation11 + $0x38] sm:$0xff]  ;;  %2494 = vmatpush.msra.mxu2 %v2450_v54 }
0x1e07   :  { %v2396_v27 = vsel %vm2393_vm1, %v2395_v11, %v2391_v10  ;;  %vm9412_vm1 = vcmask 783876   ;;  %2516 = vmatpush.msra.mxu3 %v2453_v2  ;;  %v2446_v10 = vld [vmem:[#allocation11 + $0x10] sm:$0xff]  ;;  %v2447_v11 = vld [vmem:[#allocation11 + $0x18] sm:$0xff] }
0x1e08   :  { %v2417_v9 = vmul.f32 %v2415_v8, %v2396_v27  ;;  %2495 = vmatpush.msra.mxu2 %v2448_v5  ;;  %v8012_v8 = vld [vmem:[#allocation12 + $0x50] sm:$0xff] }
0x1e09   :  { %2517 = vmatpush.msra.mxu3 %v2451_v57 }
0x1e0a   :  { %2496 = vmatpush.msra.mxu2 %v2446_v10 }
0x1e0b   :  { %2316 = vrot.lane.b32.xlu2 %v7942_v34, %s7076_s27  ;;  %2518 = vmatpush.msra.mxu3 %v2449_v55 }
0x1e0d   :  { %2519 = vmatpush.msra.mxu3 %v2447_v11 }
0x1e4d   :  { %v2420_v22 = vpop.permute.xlu2 %2419 }
0x1e4e   :  { %v2422_v1 = vmul.f32 %v2420_v22, %v2396_v27  ;;  %v2444_v22 = vld [vmem:[#allocation11] sm:$0xff]  ;;  %v2445_v27 = vld [vmem:[#allocation11 + $0x8] sm:$0xff] }
0x1e4f   :  { %2497 = vmatpush.msra.mxu2 %v2444_v22  ;;  %2520 = vmatpush.msra.mxu3 %v2445_v27 }
0x1e50   :  { %2424 = vrot.lane.b32.xlu0 %v2422_v1, %s7076_s27  ;;  %v8004_v1 = vld [vmem:[#allocation12 + $0x78] sm:$0xff] }
0x1e51   :  { %2578 = vmatpush.msra.mxu1 %v8004_v1  ;;  %2794 = vmatpush.msrb.mxu3 %v8004_v1 }
0x1e55   :  { %v1605_v3 = vpop.permute.xlu2 %1604 }
0x1e56   :  { %1607 = vst.msk [vmem:[#allocation3] sm:$0x3] %vm9407_vm5, %v1605_v3 }
0x1e57   :  { %1609 = vst.msk [vmem:[#allocation3 + $0xe] sm:$0x3] %vm9408_vm2, %v1605_v3  ;;  %v8006_v3 = vld [vmem:[#allocation12 + $0x60] sm:$0xff] }
0x1e58   :  { %1723 = vrot.lane.b32.xlu0 %v7841_v24, %s7076_s27 }
0x1e5d   :  { %v1964_v7 = vpop.permute.xlu2 %1963 }
0x1e5e   :  { %1966 = vst.msk [vmem:[#allocation3] sm:$0xc0] %vm917_vm8, %v1964_v7 }
0x1e5f   :  { %1968 = vst.msk [vmem:[#allocation3 + $0x2] sm:$0xc0] %vm921_vm12, %v1964_v7  ;;  %v8010_v7 = vld [vmem:[#allocation12 + $0x68] sm:$0xff] }
0x1e60   :  { %2075 = vst.msk [vmem:[#allocation3 + $0x8] sm:$0x3] %vm540_vm10, %v7918_v0  ;;  %2077 = vrot.lane.b32.xlu0 %v7918_v0, %s7076_s27  ;;  %2579 = vmatpush.msra.mxu1 %v8010_v7 }
0x1e61   :  { %2081 = vst.msk [vmem:[#allocation3 + $0x6] sm:$0x3] %vm9409_vm6, %v7918_v0  ;;  %2795 = vmatpush.msrb.mxu3 %v8010_v7 }
0x1e65   :  { %v2317_v15 = vpop.permute.xlu2 %2316 }
0x1ec2   :  { %v2425_v12 = vpop.permute.xlu0 %2424 }
0x1ec3   :  { %v7968_v13 = vadd.f32 %v2425_v12, %v2417_v9  ;;  %v8014_v9 = vld [vmem:[#allocation12 + $0x58] sm:$0xff]  ;;  %v8020_v12 = vld [vmem:[#allocation12 + $0x40] sm:$0xff] }
0x1ec4   :  { %2580 = vmatpush.msra.mxu1 %v8014_v9  ;;  %2796 = vmatpush.msrb.mxu3 %v8014_v9 }
0x1ec5   :  { %6296 = vtanh.f32 %v7968_v13 }
0x1ec6   :  { %6298 = vpow2.f32 %v5926_v17  ;;  %v8042_v17 = vld [vmem:[#allocation12 + $0x28] sm:$0xff] }
0x1eca   :  { %v1724_v24 = vpop.permute.xlu0 %1723 }
0x1ecb   :  { %v6297_v14 = vpop.eup %6296  ;;  %1726 = vst.msk [vmem:[#allocation3] sm:$0xc] %vm669_vm13, %v1724_v24 }
0x1ecc   :  { %1728 = vst.msk [vmem:[#allocation3 + $0xa] sm:$0xc] %vm673_vm14, %v1724_v24  ;;  %2430 = vrot.lane.b32.xlu1 %v6297_v14, %s7076_s27  ;;  %v6299_v19 = vpop.eup %6298  ;;  %v8022_v24 = vld [vmem:[#allocation12 + $0x48] sm:$0xff]  ;;  %v8032_v14 = vld [vmem:[#allocation12 + $0x30] sm:$0xff] }
0x1ecd   :  { %2314 = vst.msk [vmem:[#allocation3 + $0x8] sm:$0x30] %vm9410_vm7, %v7942_v34  ;;  %v2382_v28 = vadd.f32 1.0, %v6299_v19  ;;  %2581 = vmatpush.msra.mxu1 %v8022_v24  ;;  %2797 = vmatpush.msrb.mxu3 %v8022_v24  ;;  %v8044_v19 = vld [vmem:[#allocation12 + $0x10] sm:$0xff] }
0x1ece   :  { %2319 = vst.msk [vmem:[#allocation3 + $0x8] sm:$0x30] %vm793_vm15, %v2317_v15 }
0x1ecf   :  { %2320 = vst.msk [vmem:[#allocation3 - $0x2] sm:$0x30] %vm9411_vm11, %v7942_v34  ;;  %6300 = vrcp.f32 %v2382_v28  ;;  %v2409_v58 = vand.u32 2147483648, %v2382_v28  ;;  %vm2403_vm7 = vweird.f32 %v2382_v28  ;;  %v2407_v31 = vand.u32 2147483647, %v2382_v28 }
0x1ed0   :  { %2321 = vst.msk [vmem:[#allocation3 - $0x2] sm:$0x30] %vm9412_vm1, %v2317_v15  ;;  %v8034_v15 = vld [vmem:[#allocation12 + $0x38] sm:$0xff] }
0x1ed1   :  { %v2410_v35 = vor.u32 1.1754944e-38, %v2409_v58  ;;  %vm2408_vm1 = vcmp.eq.f32.partialorder %v2407_v31, 8.507059e+37  ;;  %2582 = vmatpush.msra.mxu1 %v8034_v15  ;;  %2798 = vmatpush.msrb.mxu3 %v8034_v15 }
0x1ed2   :  { %v2078_v0 = vpop.permute.xlu0 %2077 }
0x1ed3   :  { %2080 = vst.msk [vmem:[#allocation3 + $0x8] sm:$0x3] %vm9407_vm5, %v2078_v0  ;;  %2583 = vmatpush.msra.mxu1 %v8042_v17  ;;  %2799 = vmatpush.msrb.mxu3 %v8042_v17 }
0x1ed4   :  { %2082 = vst.msk [vmem:[#allocation3 + $0x6] sm:$0x3] %vm9408_vm2, %v2078_v0  ;;  %1843 = vrot.lane.b32.xlu1 %v7873_v59, %s7076_s27  ;;  %v8036_v0 = vld [vmem:[#allocation12 + $0x20] sm:$0xff] }
0x1ed5   :  { %v6301_v29 = vpop.eup %6300 }
0x1ed6   :  { %v2399_v23 = vmul.f32 %v6301_v29, %v2382_v28  ;;  %vm2404_vm6 = vweird.f32 %v6301_v29  ;;  %v8046_v28 = vld [vmem:[#allocation12 + $0x18] sm:$0xff] }
0x1ed7   :  { %vm2405_vm11 = vmor %vm2403_vm7, %vm2404_vm6  ;;  %2584 = vmatpush.msra.mxu1 %v8046_v28  ;;  %2800 = vmatpush.msrb.mxu3 %v8046_v28 }
0x1ed8   :  { %v2400_v26 = vsub.f32 1.0, %v2399_v23  ;;  %v8054_v23 = vld [vmem:[#allocation12 + $0x8] sm:$0xff] }
0x1ed9   :  { %2585 = vmatpush.msra.mxu1 %v8054_v23  ;;  %2801 = vmatpush.msrb.mxu3 %v8054_v23 }
0x1eda   :  { %v2401_v59 = vmul.f32 %v6301_v29, %v2400_v26  ;;  %2586 = vmatmul.f32.vlgmr.msra.gmra.mxu1 %v7075_v21 }
0x1edb   :  { %2681 = vmatpush.msrb.mxu1 %v8004_v1 }
0x1edc   :  { %2196 = vrot.lane.b32.xlu1 %v7930_v45, %s7076_s27  ;;  %v2402_v53 = vadd.f32 %v6301_v29, %v2401_v59 }
0x1edd   :  { %2682 = vmatpush.msrb.mxu1 %v8010_v7 }
0x1ede   :  { %v2406_v34 = vsel %vm2405_vm11, %v6301_v29, %v2402_v53  ;;  %v8052_v29 = vld [vmem:[#allocation12] sm:$0xff] }
0x1edf   :  { %v2411_v25 = vsel %vm2408_vm1, %v2410_v35, %v2406_v34  ;;  %2683 = vmatpush.msrb.mxu1 %v8014_v9 }
0x1ee1   :  { %2684 = vmatpush.msrb.mxu1 %v8022_v24 }
0x1ee3   :  { %2685 = vmatpush.msrb.mxu1 %v8034_v15 }
0x1ee5   :  { %2686 = vmatpush.msrb.mxu1 %v8042_v17 }
0x1ee7   :  { %2687 = vmatpush.msrb.mxu1 %v8046_v28 }
0x1ee9   :  { %2688 = vmatpush.msrb.mxu1 %v8054_v23 }
0x1eeb   :  { %2907 = vmatpush.msra.mxu1 %v8004_v1 }
0x1eed   :  { %2908 = vmatpush.msra.mxu1 %v8010_v7 }
0x1eef   :  { %2909 = vmatpush.msra.mxu1 %v8014_v9 }
0x1ef1   :  { %2910 = vmatpush.msra.mxu1 %v8022_v24 }
0x1ef3   :  { %2911 = vmatpush.msra.mxu1 %v8034_v15 }
0x1ef5   :  { %2912 = vmatpush.msra.mxu1 %v8042_v17 }
0x1ef7   :  { %2913 = vmatpush.msra.mxu1 %v8046_v28 }
0x1ef9   :  { %2914 = vmatpush.msra.mxu1 %v8054_v23 }
0x1f3e   :  { %v2431_v40 = vpop.permute.xlu1 %2430 }
0x1f3f   :  { %v7986_v37 = vmul.f32 %v2431_v40, %v2411_v25 }
0x1f41   :  { %2434 = vst.msk [vmem:[#allocation3 + $0x8] sm:$0xc0] %vm911_vm0, %v7986_v37  ;;  %2436 = vrot.lane.b32.xlu0 %v7986_v37, %s7076_s27  ;;  %vm9413_vm0 = vcmask 783876  }
0x1f42   :  { %2440 = vst.msk [vmem:[#allocation3 - $0x6] sm:$0xc0] %vm919_vm3, %v7986_v37  ;;  %vm9414_vm3 = vcmask 519426  }
0x1f46   :  { %v1844_v4 = vpop.permute.xlu1 %1843 }
0x1f47   :  { %1846 = vst.msk [vmem:[#allocation3] sm:$0x30] %vm793_vm15, %v1844_v4 }
0x1f48   :  { %1848 = vst.msk [vmem:[#allocation3 + $0x6] sm:$0x30] %vm9413_vm0, %v1844_v4 }
0x1f49   :  { %2194 = vst.msk [vmem:[#allocation3 + $0x8] sm:$0xc] %vm663_vm4, %v7930_v45 }
0x1f4a   :  { %2200 = vst.msk [vmem:[#allocation3 + $0x2] sm:$0xc] %vm9414_vm3, %v7930_v45  ;;  %v8002_v45 = vld [vmem:[#allocation12 + $0x70] sm:$0xff] }
0x1f4b   :  { %2558 = vmatpush.msra.mxu0 %v8002_v45  ;;  %2774 = vmatpush.msrb.mxu2 %v8002_v45 }
0x1f4d   :  { %2559 = vmatpush.msra.mxu0 %v8006_v3  ;;  %2775 = vmatpush.msrb.mxu2 %v8006_v3 }
0x1f4e   :  { %v2197_v56 = vpop.permute.xlu1 %2196 }
0x1f4f   :  { %2199 = vst.msk [vmem:[#allocation3 + $0x8] sm:$0xc] %vm669_vm13, %v2197_v56  ;;  %2560 = vmatpush.msra.mxu0 %v8012_v8  ;;  %2776 = vmatpush.msrb.mxu2 %v8012_v8 }
0x1f50   :  { %2201 = vst.msk [vmem:[#allocation3 + $0x2] sm:$0xc] %vm673_vm14, %v2197_v56 }
0x1f51   :  { %2561 = vmatpush.msra.mxu0 %v8020_v12  ;;  %2777 = vmatpush.msrb.mxu2 %v8020_v12 }
0x1f53   :  { %2562 = vmatpush.msra.mxu0 %v8032_v14  ;;  %2778 = vmatpush.msrb.mxu2 %v8032_v14 }
0x1f55   :  { %2563 = vmatpush.msra.mxu0 %v8036_v0  ;;  %2779 = vmatpush.msrb.mxu2 %v8036_v0 }
0x1f57   :  { %2564 = vmatpush.msra.mxu0 %v8044_v19  ;;  %2780 = vmatpush.msrb.mxu2 %v8044_v19  ;;  %v2587_v58 = vpop.f32.mrf.mxu1 }
0x1f59   :  { %2565 = vmatpush.msra.mxu0 %v8052_v29  ;;  %2781 = vmatpush.msrb.mxu2 %v8052_v29 }
0x1f5a   :  { %2566 = vmatmul.f32.vlgmr.msra.gmra.mxu0 %v7075_v21 }
0x1f5b   :  { %2661 = vmatpush.msrb.mxu0 %v8002_v45 }
0x1f5d   :  { %2662 = vmatpush.msrb.mxu0 %v8006_v3 }
0x1f5f   :  { %2663 = vmatpush.msrb.mxu0 %v8012_v8 }
0x1f61   :  { %2664 = vmatpush.msrb.mxu0 %v8020_v12 }
0x1f63   :  { %2665 = vmatpush.msrb.mxu0 %v8032_v14 }
0x1f65   :  { %2666 = vmatpush.msrb.mxu0 %v8036_v0 }
0x1f67   :  { %2667 = vmatpush.msrb.mxu0 %v8044_v19 }
0x1f69   :  { %2668 = vmatpush.msrb.mxu0 %v8052_v29 }
0x1f6b   :  { %2887 = vmatpush.msra.mxu0 %v8002_v45 }
0x1f6d   :  { %2888 = vmatpush.msra.mxu0 %v8006_v3 }
0x1f6f   :  { %2889 = vmatpush.msra.mxu0 %v8012_v8 }
0x1f71   :  { %2890 = vmatpush.msra.mxu0 %v8020_v12 }
0x1f73   :  { %2891 = vmatpush.msra.mxu0 %v8032_v14 }
0x1f75   :  { %2892 = vmatpush.msra.mxu0 %v8036_v0 }
0x1f77   :  { %2893 = vmatpush.msra.mxu0 %v8044_v19 }
0x1f79   :  { %2894 = vmatpush.msra.mxu0 %v8052_v29 }
0x1fb3   :  { %v2437_v26 = vpop.permute.xlu0 %2436 }
0x1fb4   :  { %2439 = vst.msk [vmem:[#allocation3 + $0x8] sm:$0xc0] %vm917_vm8, %v2437_v26 }
0x1fb5   :  { %2441 = vst.msk [vmem:[#allocation3 - $0x6] sm:$0xc0] %vm921_vm12, %v2437_v26 }
0x1fbb   :  { %v2443_v30 = vld [vmem:[#allocation3 + $0x8] sm:$0xff] }
0x1fbc   :  { %v2442_v21 = vld [vmem:[#allocation3] sm:$0xff] }
0x1fbd   :  { %2498 = vmatmul.f32.vlgmr.msra.gmra.mxu2 %v2442_v21  ;;  %2521 = vmatmul.f32.vlgmr.msra.gmra.mxu3 %v2442_v21 }
0x1fbe   :  { %3000 = vmatpush.msra.mxu2 %v8002_v45  ;;  %3020 = vmatpush.msra.mxu3 %v8004_v1 }
0x1fc0   :  { %3001 = vmatpush.msra.mxu2 %v8006_v3  ;;  %3021 = vmatpush.msra.mxu3 %v8010_v7 }
0x1fc2   :  { %3002 = vmatpush.msra.mxu2 %v8012_v8  ;;  %3022 = vmatpush.msra.mxu3 %v8014_v9 }
0x1fc4   :  { %3003 = vmatpush.msra.mxu2 %v8020_v12  ;;  %3023 = vmatpush.msra.mxu3 %v8022_v24 }
0x1fc5   :  { %2501 = vmatmul.f32.gmra.mxu2 %v2443_v30  ;;  %2524 = vmatmul.f32.gmra.mxu3 %v2443_v30 }
0x1fc6   :  { %3004 = vmatpush.msra.mxu2 %v8032_v14  ;;  %3024 = vmatpush.msra.mxu3 %v8034_v15 }
0x1fc8   :  { %3005 = vmatpush.msra.mxu2 %v8036_v0  ;;  %3025 = vmatpush.msra.mxu3 %v8042_v17 }
0x1fca   :  { %3006 = vmatpush.msra.mxu2 %v8044_v19  ;;  %3026 = vmatpush.msra.mxu3 %v8046_v28 }
0x1fcc   :  { %3007 = vmatpush.msra.mxu2 %v8052_v29  ;;  %3027 = vmatpush.msra.mxu3 %v8054_v23 }
0x1fd7   :  { %v2567_v33 = vpop.f32.mrf.mxu0 }
0x2040   :  { %v2499_v20 = vpop.f32.mrf.mxu2  ;;  %v2522_v49 = vpop.f32.mrf.mxu3 }
0x2041   :  { %v2500_v59 = vadd.f32 %v2499_v20, %v2478_v47  ;;  %v2523_v18 = vadd.f32 %v2522_v49, %v2479_v48 }
0x2043   :  { %2528 = vst [vmem:[#allocation2 + $0x10] sm:$0xff] %v2500_v59 }
0x2044   :  { %2529 = vst [vmem:[#allocation2] sm:$0xff] %v2523_v18 }
0x2048   :  { %v2502_v50 = vpop.f32.mrf.mxu2  ;;  %v2525_v51 = vpop.f32.mrf.mxu3 }
0x2049   :  { %v2503_v52 = vadd.f32 %v2502_v50, %v2478_v47  ;;  %v2526_v53 = vadd.f32 %v2525_v51, %v2479_v48 }
0x204a   :  { %v2548_v32 = vld [vmem:[#allocation2 + $0x10] sm:$0x3] }
0x204b   :  { %2530 = vst [vmem:[#allocation2 + $0x18] sm:$0xff] %v2503_v52  ;;  %v2549_v60 = vld [vmem:[#allocation2] sm:$0x3]  ;;  %v2590_v34 = vadd.f32 %v2567_v33, %v2548_v32  ;;  %v2648_v32 = vld [vmem:[#allocation2 + $0x10] sm:$0xc] }
0x204c   :  { %2531 = vst [vmem:[#allocation2 + $0x8] sm:$0xff] %v2526_v53  ;;  %v2591_v16 = vadd.f32 %v2587_v58, %v2549_v60  ;;  %v2649_v53 = vld [vmem:[#allocation2] sm:$0xc] }
0x204d   :  { %v5927_v35 = vmul.f32 -1.442695, %v2590_v34 }
0x204e   :  { %6302 = vtanh.f32 %v2591_v16  ;;  %v5928_v10 = vmul.f32 -1.442695, %v2591_v16 }
0x204f   :  { %6304 = vpow2.f32 %v5927_v35 }
0x2054   :  { %v6303_v31 = vpop.eup %6302 }
0x2055   :  { %2633 = vrot.lane.b32.xlu1 %v6303_v31, %s7076_s27  ;;  %v6305_v36 = vpop.eup %6304 }
0x2056   :  { %v2598_v38 = vadd.f32 1.0, %v6305_v36 }
0x2058   :  { %6306 = vrcp.f32 %v2598_v38  ;;  %v2611_v44 = vand.u32 2147483648, %v2598_v38  ;;  %vm2605_vm8 = vweird.f32 %v2598_v38  ;;  %v2609_v61 = vand.u32 2147483647, %v2598_v38 }
0x205a   :  { %v2612_v63 = vor.u32 1.1754944e-38, %v2611_v44  ;;  %vm2610_vm13 = vcmp.eq.f32.partialorder %v2609_v61, 8.507059e+37 }
0x205e   :  { %v6307_v25 = vpop.eup %6306 }
0x205f   :  { %v2601_v40 = vmul.f32 %v6307_v25, %v2598_v38  ;;  %vm2606_vm4 = vweird.f32 %v6307_v25 }
0x2060   :  { %vm2607_vm12 = vmor %vm2605_vm8, %vm2606_vm4 }
0x2061   :  { %v2602_v41 = vsub.f32 1.0, %v2601_v40 }
0x2063   :  { %v2603_v42 = vmul.f32 %v6307_v25, %v2602_v41 }
0x2065   :  { %v2604_v43 = vadd.f32 %v6307_v25, %v2603_v42 }
0x2067   :  { %v2608_v62 = vsel %vm2607_vm12, %v6307_v25, %v2604_v43 }
0x2068   :  { %v2613_v4 = vsel %vm2610_vm13, %v2612_v63, %v2608_v62 }
0x2069   :  { %v2631_v54 = vmul.f32 0.0, %v2613_v4 }
0x20c7   :  { %v2634_v2 = vpop.permute.xlu1 %2633 }
0x20c8   :  { %v2636_v56 = vmul.f32 %v2634_v2, %v2613_v4 }
0x20ca   :  { %2638 = vrot.lane.b32.xlu2 %v2636_v56, %s7076_s27 }
0x2124   :  { %v2639_v57 = vpop.permute.xlu2 %2638 }
0x2125   :  { %v8121_v5 = vadd.f32 %v2639_v57, %v2631_v54 }
0x2127   :  { %6308 = vtanh.f32 %v8121_v5  ;;  %v2741_v56 = vrot.slane %v8121_v5, 6 }
0x2128   :  { %6310 = vpow2.f32 %v5928_v10 }
0x212d   :  { %v6309_v55 = vpop.eup %6308 }
0x212e   :  { %2644 = vrot.lane.b32.xlu0 %v6309_v55, %s7076_s27  ;;  %v6311_v11 = vpop.eup %6310 }
0x212f   :  { %v2599_v22 = vadd.f32 1.0, %v6311_v11 }
0x2131   :  { %6312 = vrcp.f32 %v2599_v22  ;;  %v2626_v47 = vand.u32 2147483648, %v2599_v22  ;;  %vm2620_vm15 = vweird.f32 %v2599_v22  ;;  %v2624_v48 = vand.u32 2147483647, %v2599_v22 }
0x2133   :  { %v2627_v49 = vor.u32 1.1754944e-38, %v2626_v47  ;;  %vm2625_vm2 = vcmp.eq.f32.partialorder %v2624_v48, 8.507059e+37 }
0x2137   :  { %v6313_v27 = vpop.eup %6312 }
0x2138   :  { %v2616_v26 = vmul.f32 %v6313_v27, %v2599_v22  ;;  %vm2621_vm14 = vweird.f32 %v6313_v27 }
0x2139   :  { %vm2622_vm5 = vmor %vm2620_vm15, %vm2621_vm14 }
0x213a   :  { %v2617_v21 = vsub.f32 1.0, %v2616_v26 }
0x213c   :  { %v2618_v30 = vmul.f32 %v6313_v27, %v2617_v21 }
0x213e   :  { %v2619_v46 = vadd.f32 %v6313_v27, %v2618_v30 }
0x2140   :  { %v2623_v20 = vsel %vm2622_vm5, %v6313_v27, %v2619_v46 }
0x2141   :  { %v2628_v59 = vsel %vm2625_vm2, %v2627_v49, %v2623_v20 }
0x21a0   :  { %v2645_v18 = vpop.permute.xlu0 %2644 }
0x21a1   :  { %v2647_v50 = vmul.f32 %v2645_v18, %v2628_v59 }
0x21a3   :  { %5929 = vmatmul.msk.f32.vlgmr.msrb.gmra.mxu0 %vm438_vm9, %v2647_v50  ;;  %5930 = vmatmul.msk.f32.vlgmr.msrb.gmra.mxu1 %vm438_vm9, %v2647_v50 }
0x21a4   :  { %3106 = vmatpush.msrb.mxu0 %v8002_v45  ;;  %3126 = vmatpush.msrb.mxu1 %v8004_v1 }
0x21a6   :  { %3107 = vmatpush.msrb.mxu0 %v8006_v3  ;;  %3127 = vmatpush.msrb.mxu1 %v8010_v7 }
0x21a8   :  { %3108 = vmatpush.msrb.mxu0 %v8012_v8  ;;  %3128 = vmatpush.msrb.mxu1 %v8014_v9 }
0x21aa   :  { %3109 = vmatpush.msrb.mxu0 %v8020_v12  ;;  %3129 = vmatpush.msrb.mxu1 %v8022_v24 }
0x21ac   :  { %3110 = vmatpush.msrb.mxu0 %v8032_v14  ;;  %3130 = vmatpush.msrb.mxu1 %v8034_v15 }
0x21ae   :  { %3111 = vmatpush.msrb.mxu0 %v8036_v0  ;;  %3131 = vmatpush.msrb.mxu1 %v8042_v17 }
0x21b0   :  { %3112 = vmatpush.msrb.mxu0 %v8044_v19  ;;  %3132 = vmatpush.msrb.mxu1 %v8046_v28 }
0x21b2   :  { %3113 = vmatpush.msrb.mxu0 %v8052_v29  ;;  %3133 = vmatpush.msrb.mxu1 %v8054_v23 }
0x2220   :  { %v2690_v51 = vpop.f32.mrf.mxu1  ;;  %v2670_v16 = vpop.f32.mrf.mxu0 }
0x2221   :  { %v2696_v52 = vrot.slane %v2690_v51, 6  ;;  %v2695_v31 = vrot.slane %v2670_v16, 6 }
0x2223   :  { %v2700_v58 = vadd.f32 %v2696_v52, %v2649_v53  ;;  %v2699_v33 = vadd.f32 %v2695_v31, %v2648_v32 }
0x2225   :  { %6314 = vtanh.f32 %v2700_v58  ;;  %v5931_v34 = vmul.f32 -1.442695, %v2699_v33  ;;  %v5932_v11 = vmul.f32 -1.442695, %v2700_v58  ;;  %v2761_v58 = vld [vmem:[#allocation2] sm:$0x30] }
0x2226   :  { %v2760_v33 = vld [vmem:[#allocation2 + $0x10] sm:$0x30] }
0x2227   :  { %6316 = vpow2.f32 %v5931_v34 }
0x222b   :  { %v6315_v60 = vpop.eup %6314 }
0x222c   :  { %2745 = vrot.lane.b32.xlu1 %v6315_v60, %s7076_s27 }
0x222d   :  { %v6317_v35 = vpop.eup %6316 }
0x222e   :  { %v2707_v36 = vadd.f32 1.0, %v6317_v35 }
0x2230   :  { %6318 = vrcp.f32 %v2707_v36  ;;  %v2720_v43 = vand.u32 2147483648, %v2707_v36  ;;  %vm2714_vm7 = vweird.f32 %v2707_v36  ;;  %v2718_v44 = vand.u32 2147483647, %v2707_v36 }
0x2232   :  { %v2721_v62 = vor.u32 1.1754944e-38, %v2720_v43  ;;  %vm2719_vm1 = vcmp.eq.f32.partialorder %v2718_v44, 8.507059e+37 }
0x2236   :  { %v6319_v38 = vpop.eup %6318 }
0x2237   :  { %v2710_v25 = vmul.f32 %v6319_v38, %v2707_v36  ;;  %vm2715_vm6 = vweird.f32 %v6319_v38 }
0x2238   :  { %vm2716_vm11 = vmor %vm2714_vm7, %vm2715_vm6 }
0x2239   :  { %v2711_v40 = vsub.f32 1.0, %v2710_v25 }
0x223b   :  { %v2712_v41 = vmul.f32 %v6319_v38, %v2711_v40 }
0x223d   :  { %v2713_v42 = vadd.f32 %v6319_v38, %v2712_v41 }
0x223f   :  { %v2717_v61 = vsel %vm2716_vm11, %v6319_v38, %v2713_v42 }
0x2240   :  { %v2722_v2 = vsel %vm2719_vm1, %v2721_v62, %v2717_v61 }
0x2241   :  { %v2743_v54 = vmul.f32 %v2741_v56, %v2722_v2 }
0x229e   :  { %v2746_v63 = vpop.permute.xlu1 %2745 }
0x229f   :  { %v2748_v4 = vmul.f32 %v2746_v63, %v2722_v2 }
0x22a1   :  { %2750 = vrot.lane.b32.xlu2 %v2748_v4, %s7076_s27 }
0x22fb   :  { %v2751_v57 = vpop.permute.xlu2 %2750 }
0x22fc   :  { %v8146_v55 = vadd.f32 %v2751_v57, %v2743_v54 }
0x22fe   :  { %6320 = vtanh.f32 %v8146_v55  ;;  %v2854_v54 = vrot.slane %v8146_v55, 6 }
0x22ff   :  { %6322 = vpow2.f32 %v5932_v11 }
0x2304   :  { %v6321_v10 = vpop.eup %6320 }
0x2305   :  { %2756 = vrot.lane.b32.xlu0 %v6321_v10, %s7076_s27  ;;  %v6323_v22 = vpop.eup %6322 }
0x2306   :  { %v2708_v27 = vadd.f32 1.0, %v6323_v22 }
0x2308   :  { %6324 = vrcp.f32 %v2708_v27  ;;  %v2735_v5 = vand.u32 2147483648, %v2708_v27  ;;  %vm2729_vm3 = vweird.f32 %v2708_v27  ;;  %v2733_v48 = vand.u32 2147483647, %v2708_v27 }
0x230a   :  { %v2736_v49 = vor.u32 1.1754944e-38, %v2735_v5  ;;  %vm2734_vm8 = vcmp.eq.f32.partialorder %v2733_v48, 8.507059e+37 }
0x230e   :  { %v6325_v26 = vpop.eup %6324 }
0x230f   :  { %v2725_v21 = vmul.f32 %v6325_v26, %v2708_v27  ;;  %vm2730_vm0 = vweird.f32 %v6325_v26 }
0x2310   :  { %vm2731_vm4 = vmor %vm2729_vm3, %vm2730_vm0 }
0x2311   :  { %v2726_v30 = vsub.f32 1.0, %v2725_v21 }
0x2313   :  { %v2727_v46 = vmul.f32 %v6325_v26, %v2726_v30 }
0x2315   :  { %v2728_v47 = vadd.f32 %v6325_v26, %v2727_v46 }
0x2317   :  { %v2732_v20 = vsel %vm2731_vm4, %v6325_v26, %v2728_v47 }
0x2318   :  { %v2737_v59 = vsel %vm2734_vm8, %v2736_v49, %v2732_v20 }
0x2377   :  { %v2757_v18 = vpop.permute.xlu0 %2756 }
0x2378   :  { %v2759_v50 = vmul.f32 %v2757_v18, %v2737_v59 }
0x237a   :  { %v2763_v51 = vrot.slane %v2759_v50, 2 }
0x237c   :  { %5933 = vmatmul.msk.f32.vlgmr.msrb.gmra.mxu2 %vm438_vm9, %v2763_v51  ;;  %5934 = vmatmul.msk.f32.vlgmr.msrb.gmra.mxu3 %vm438_vm9, %v2763_v51 }
0x237d   :  { %3219 = vmatpush.msrb.mxu2 %v8002_v45  ;;  %3239 = vmatpush.msrb.mxu3 %v8004_v1 }
0x237f   :  { %3220 = vmatpush.msrb.mxu2 %v8006_v3  ;;  %3240 = vmatpush.msrb.mxu3 %v8010_v7 }
0x2381   :  { %3221 = vmatpush.msrb.mxu2 %v8012_v8  ;;  %3241 = vmatpush.msrb.mxu3 %v8014_v9 }
0x2383   :  { %3222 = vmatpush.msrb.mxu2 %v8020_v12  ;;  %3242 = vmatpush.msrb.mxu3 %v8022_v24 }
0x2385   :  { %3223 = vmatpush.msrb.mxu2 %v8032_v14  ;;  %3243 = vmatpush.msrb.mxu3 %v8034_v15 }
0x2387   :  { %3224 = vmatpush.msrb.mxu2 %v8036_v0  ;;  %3244 = vmatpush.msrb.mxu3 %v8042_v17 }
0x2389   :  { %3225 = vmatpush.msrb.mxu2 %v8044_v19  ;;  %3245 = vmatpush.msrb.mxu3 %v8046_v28 }
0x238b   :  { %3226 = vmatpush.msrb.mxu2 %v8052_v29  ;;  %3246 = vmatpush.msrb.mxu3 %v8054_v23 }
0x23ff   :  { %v2803_v52 = vpop.f32.mrf.mxu3  ;;  %v2783_v31 = vpop.f32.mrf.mxu2 }
0x2400   :  { %v2809_v53 = vrot.slane %v2803_v52, 4  ;;  %v2808_v32 = vrot.slane %v2783_v31, 4 }
0x2402   :  { %v2813_v60 = vadd.f32 %v2809_v53, %v2761_v58  ;;  %v2812_v34 = vadd.f32 %v2808_v32, %v2760_v33 }
0x2404   :  { %6326 = vtanh.f32 %v2813_v60  ;;  %v5935_v35 = vmul.f32 -1.442695, %v2812_v34  ;;  %v5936_v27 = vmul.f32 -1.442695, %v2813_v60 }
0x2406   :  { %6328 = vpow2.f32 %v5935_v35 }
0x240a   :  { %v6327_v16 = vpop.eup %6326 }
0x240b   :  { %2858 = vrot.lane.b32.xlu1 %v6327_v16, %s7076_s27 }
0x240c   :  { %v6329_v36 = vpop.eup %6328 }
0x240d   :  { %v2820_v38 = vadd.f32 1.0, %v6329_v36 }
0x240f   :  { %6330 = vrcp.f32 %v2820_v38  ;;  %v2833_v44 = vand.u32 2147483648, %v2820_v38  ;;  %vm2827_vm13 = vweird.f32 %v2820_v38  ;;  %v2831_v61 = vand.u32 2147483647, %v2820_v38 }
0x2411   :  { %v2834_v63 = vor.u32 1.1754944e-38, %v2833_v44  ;;  %vm2832_vm15 = vcmp.eq.f32.partialorder %v2831_v61, 8.507059e+37 }
0x2415   :  { %v6331_v25 = vpop.eup %6330 }
0x2416   :  { %v2823_v40 = vmul.f32 %v6331_v25, %v2820_v38  ;;  %vm2828_vm12 = vweird.f32 %v6331_v25 }
0x2417   :  { %vm2829_vm14 = vmor %vm2827_vm13, %vm2828_vm12 }
0x2418   :  { %v2824_v41 = vsub.f32 1.0, %v2823_v40 }
0x241a   :  { %v2825_v42 = vmul.f32 %v6331_v25, %v2824_v41 }
0x241c   :  { %v2826_v43 = vadd.f32 %v6331_v25, %v2825_v42 }
0x241e   :  { %v2830_v62 = vsel %vm2829_vm14, %v6331_v25, %v2826_v43 }
0x241f   :  { %v2835_v4 = vsel %vm2832_vm15, %v2834_v63, %v2830_v62 }
0x2420   :  { %v2856_v57 = vmul.f32 %v2854_v54, %v2835_v4 }
0x247d   :  { %v2859_v2 = vpop.permute.xlu1 %2858 }
0x247e   :  { %v2861_v56 = vmul.f32 %v2859_v2, %v2835_v4 }
0x2480   :  { %2863 = vrot.lane.b32.xlu2 %v2861_v56, %s7076_s27 }
0x24da   :  { %v2864_v10 = vpop.permute.xlu2 %2863 }
0x24db   :  { %v8171_v11 = vadd.f32 %v2864_v10, %v2856_v57 }
0x24dd   :  { %6332 = vtanh.f32 %v8171_v11  ;;  %v2967_v35 = vrot.slane %v8171_v11, 6 }
0x24de   :  { %6334 = vpow2.f32 %v5936_v27 }
0x24e3   :  { %v6333_v22 = vpop.eup %6332 }
0x24e4   :  { %2869 = vrot.lane.b32.xlu0 %v6333_v22, %s7076_s27  ;;  %v6335_v26 = vpop.eup %6334 }
0x24e5   :  { %v2821_v21 = vadd.f32 1.0, %v6335_v26  ;;  %v2987_v26 = vld [vmem:[#allocation2 + $0x8] sm:$0x3] }
0x24e7   :  { %6336 = vrcp.f32 %v2821_v21  ;;  %v2848_v55 = vand.u32 2147483648, %v2821_v21  ;;  %vm2842_vm2 = vweird.f32 %v2821_v21  ;;  %v2846_v20 = vand.u32 2147483647, %v2821_v21 }
0x24e9   :  { %v2849_v59 = vor.u32 1.1754944e-38, %v2848_v55  ;;  %vm2847_vm7 = vcmp.eq.f32.partialorder %v2846_v20, 8.507059e+37 }
0x24ed   :  { %v6337_v30 = vpop.eup %6336 }
0x24ee   :  { %v2838_v46 = vmul.f32 %v6337_v30, %v2821_v21  ;;  %vm2843_vm5 = vweird.f32 %v6337_v30 }
0x24ef   :  { %vm2844_vm6 = vmor %vm2842_vm2, %vm2843_vm5 }
0x24f0   :  { %v2839_v47 = vsub.f32 1.0, %v2838_v46 }
0x24f2   :  { %v2840_v5 = vmul.f32 %v6337_v30, %v2839_v47 }
0x24f4   :  { %v2841_v48 = vadd.f32 %v6337_v30, %v2840_v5  ;;  %v2986_v5 = vld [vmem:[#allocation2 + $0x18] sm:$0x3] }
0x24f6   :  { %v2845_v49 = vsel %vm2844_vm6, %v6337_v30, %v2841_v48 }
0x24f7   :  { %v2850_v18 = vsel %vm2847_vm7, %v2849_v59, %v2845_v49 }
0x2556   :  { %v2870_v50 = vpop.permute.xlu0 %2869 }
0x2557   :  { %v2872_v51 = vmul.f32 %v2870_v50, %v2850_v18 }
0x2559   :  { %v2876_v52 = vrot.slane %v2872_v51, 4 }
0x255b   :  { %5937 = vmatmul.msk.f32.vlgmr.msra.gmra.mxu0 %vm438_vm9, %v2876_v52  ;;  %5938 = vmatmul.msk.f32.vlgmr.msra.gmra.mxu1 %vm438_vm9, %v2876_v52 }
0x255c   :  { %3332 = vmatpush.msra.mxu0 %v8002_v45  ;;  %3352 = vmatpush.msra.mxu1 %v8004_v1 }
0x255e   :  { %3333 = vmatpush.msra.mxu0 %v8006_v3  ;;  %3353 = vmatpush.msra.mxu1 %v8010_v7  ;;  %v2874_v3 = vld [vmem:[#allocation2] sm:$0xc0] }
0x2560   :  { %3334 = vmatpush.msra.mxu0 %v8012_v8  ;;  %3354 = vmatpush.msra.mxu1 %v8014_v9 }
0x2562   :  { %3335 = vmatpush.msra.mxu0 %v8020_v12  ;;  %3355 = vmatpush.msra.mxu1 %v8022_v24  ;;  %v2873_v24 = vld [vmem:[#allocation2 + $0x10] sm:$0xc0] }
0x2564   :  { %3336 = vmatpush.msra.mxu0 %v8032_v14  ;;  %3356 = vmatpush.msra.mxu1 %v8034_v15 }
0x2566   :  { %3337 = vmatpush.msra.mxu0 %v8036_v0  ;;  %3357 = vmatpush.msra.mxu1 %v8042_v17 }
0x2568   :  { %3338 = vmatpush.msra.mxu0 %v8044_v19  ;;  %3358 = vmatpush.msra.mxu1 %v8046_v28 }
0x256a   :  { %3339 = vmatpush.msra.mxu0 %v8052_v29  ;;  %3359 = vmatpush.msra.mxu1 %v8054_v23 }
0x25d8   :  { %v2916_v45 = vpop.f32.mrf.mxu1  ;;  %v2896_v9 = vpop.f32.mrf.mxu0 }
0x25d9   :  { %v2922_v1 = vrot.slane %v2916_v45, 2  ;;  %v2921_v12 = vrot.slane %v2896_v9, 2 }
0x25db   :  { %v2926_v7 = vadd.f32 %v2922_v1, %v2874_v3  ;;  %v2925_v14 = vadd.f32 %v2921_v12, %v2873_v24 }
0x25dd   :  { %6338 = vtanh.f32 %v2926_v7  ;;  %v5939_v15 = vmul.f32 -1.442695, %v2925_v14  ;;  %v5940_v41 = vmul.f32 -1.442695, %v2926_v7 }
0x25df   :  { %6340 = vpow2.f32 %v5939_v15 }
0x25e3   :  { %v6339_v8 = vpop.eup %6338 }
0x25e4   :  { %2971 = vrot.lane.b32.xlu1 %v6339_v8, %s7076_s27 }
0x25e5   :  { %v6341_v0 = vpop.eup %6340 }
0x25e6   :  { %v2933_v17 = vadd.f32 1.0, %v6341_v0 }
0x25e8   :  { %6342 = vrcp.f32 %v2933_v17  ;;  %v2946_v58 = vand.u32 2147483648, %v2933_v17  ;;  %vm2940_vm1 = vweird.f32 %v2933_v17  ;;  %v2944_v60 = vand.u32 2147483647, %v2933_v17 }
0x25ea   :  { %v2947_v31 = vor.u32 1.1754944e-38, %v2946_v58  ;;  %vm2945_vm3 = vcmp.eq.f32.partialorder %v2944_v60, 8.507059e+37 }
0x25ee   :  { %v6343_v19 = vpop.eup %6342 }
0x25ef   :  { %v2936_v28 = vmul.f32 %v6343_v19, %v2933_v17  ;;  %vm2941_vm11 = vweird.f32 %v6343_v19 }
0x25f0   :  { %vm2942_vm0 = vmor %vm2940_vm1, %vm2941_vm11 }
0x25f1   :  { %v2937_v29 = vsub.f32 1.0, %v2936_v28 }
0x25f3   :  { %v2938_v23 = vmul.f32 %v6343_v19, %v2937_v29 }
0x25f5   :  { %v2939_v53 = vadd.f32 %v6343_v19, %v2938_v23 }
0x25f7   :  { %v2943_v16 = vsel %vm2942_vm0, %v6343_v19, %v2939_v53 }
0x25f8   :  { %v2948_v33 = vsel %vm2945_vm3, %v2947_v31, %v2943_v16 }
0x25f9   :  { %v2969_v36 = vmul.f32 %v2967_v35, %v2948_v33 }
0x2656   :  { %v2972_v32 = vpop.permute.xlu1 %2971 }
0x2657   :  { %v2974_v34 = vmul.f32 %v2972_v32, %v2948_v33 }
0x2659   :  { %2976 = vrot.lane.b32.xlu2 %v2974_v34, %s7076_s27 }
0x26b3   :  { %v2977_v38 = vpop.permute.xlu2 %2976 }
0x26b4   :  { %v2979_v25 = vadd.f32 %v2977_v38, %v2969_v36 }
0x26b6   :  { %6344 = vtanh.f32 %v2979_v25  ;;  %v3074_v24 = vrot.slane %v2979_v25, 6 }
0x26b7   :  { %6346 = vpow2.f32 %v5940_v41  ;;  %v3094_v41 = vld [vmem:[#allocation2 + $0x8] sm:$0xc] }
0x26bc   :  { %v6345_v40 = vpop.eup %6344 }
0x26bd   :  { %2982 = vrot.lane.b32.xlu0 %v6345_v40, %s7076_s27  ;;  %v6347_v42 = vpop.eup %6346 }
0x26be   :  { %v2934_v43 = vadd.f32 1.0, %v6347_v42 }
0x26c0   :  { %6348 = vrcp.f32 %v2934_v43  ;;  %v2961_v4 = vand.u32 2147483648, %v2934_v43  ;;  %vm2955_vm8 = vweird.f32 %v2934_v43  ;;  %v2959_v56 = vand.u32 2147483647, %v2934_v43 }
0x26c2   :  { %v2962_v57 = vor.u32 1.1754944e-38, %v2961_v4  ;;  %vm2960_vm13 = vcmp.eq.f32.partialorder %v2959_v56, 8.507059e+37 }
0x26c6   :  { %v6349_v44 = vpop.eup %6348 }
0x26c7   :  { %v2951_v61 = vmul.f32 %v6349_v44, %v2934_v43  ;;  %vm2956_vm4 = vweird.f32 %v6349_v44 }
0x26c8   :  { %vm2957_vm12 = vmor %vm2955_vm8, %vm2956_vm4 }
0x26c9   :  { %v2952_v62 = vsub.f32 1.0, %v2951_v61 }
0x26cb   :  { %v2953_v63 = vmul.f32 %v6349_v44, %v2952_v62  ;;  %v3093_v62 = vld [vmem:[#allocation2 + $0x18] sm:$0xc] }
0x26cd   :  { %v2954_v2 = vadd.f32 %v6349_v44, %v2953_v63 }
0x26cf   :  { %v2958_v54 = vsel %vm2957_vm12, %v6349_v44, %v2954_v2 }
0x26d0   :  { %v2963_v10 = vsel %vm2960_vm13, %v2962_v57, %v2958_v54 }
0x272f   :  { %v2983_v11 = vpop.permute.xlu0 %2982 }
0x2730   :  { %v2985_v22 = vmul.f32 %v2983_v11, %v2963_v10 }
0x2732   :  { %v2989_v27 = vrot.slane %v2985_v22, 6 }
0x2734   :  { %5941 = vmatmul.msk.f32.vlgmr.msra.gmra.mxu2 %vm438_vm9, %v2989_v27  ;;  %5942 = vmatmul.msk.f32.vlgmr.msra.gmra.mxu3 %vm438_vm9, %v2989_v27 }
0x27b7   :  { %v3029_v21 = vpop.f32.mrf.mxu3  ;;  %v3009_v47 = vpop.f32.mrf.mxu2 }
0x27b8   :  { %v3033_v30 = vadd.f32 %v3029_v21, %v2987_v26  ;;  %v3032_v48 = vadd.f32 %v3009_v47, %v2986_v5 }
0x27ba   :  { %6350 = vtanh.f32 %v3033_v30  ;;  %v5943_v55 = vmul.f32 -1.442695, %v3032_v48  ;;  %v5944_v19 = vmul.f32 -1.442695, %v3033_v30  ;;  %v3438_v48 = vld [vmem:[%s9416_s29 + $0x38] sm:$0xff] }
0x27bb   :  { %3463 = vmatpush.msra.mxu2 %v3438_v48  ;;  %3486 = vmatpush.msra.mxu3 %v3438_v48 }
0x27bc   :  { %6352 = vpow2.f32 %v5943_v55  ;;  %v3437_v55 = vld [vmem:[%s9416_s29 + $0x30] sm:$0xff] }
0x27bd   :  { %3464 = vmatpush.msra.mxu2 %v3437_v55  ;;  %3487 = vmatpush.msra.mxu3 %v3437_v55 }
0x27c0   :  { %v6351_v46 = vpop.eup %6350 }
0x27c1   :  { %3078 = vrot.lane.b32.xlu1 %v6351_v46, %s7076_s27 }
0x27c2   :  { %v6353_v20 = vpop.eup %6352 }
0x27c3   :  { %v3040_v49 = vadd.f32 1.0, %v6353_v20 }
0x27c5   :  { %6354 = vrcp.f32 %v3040_v49  ;;  %v3053_v45 = vand.u32 2147483648, %v3040_v49  ;;  %vm3047_vm15 = vweird.f32 %v3040_v49  ;;  %v3051_v1 = vand.u32 2147483647, %v3040_v49 }
0x27c7   :  { %v3054_v7 = vor.u32 1.1754944e-38, %v3053_v45  ;;  %vm3052_vm2 = vcmp.eq.f32.partialorder %v3051_v1, 8.507059e+37  ;;  %v3436_v1 = vld [vmem:[%s9416_s29 + $0x28] sm:$0xff] }
0x27c8   :  { %3465 = vmatpush.msra.mxu2 %v3436_v1  ;;  %3488 = vmatpush.msra.mxu3 %v3436_v1 }
0x27cb   :  { %v6355_v59 = vpop.eup %6354 }
0x27cc   :  { %v3043_v18 = vmul.f32 %v6355_v59, %v3040_v49  ;;  %vm3048_vm14 = vweird.f32 %v6355_v59 }
0x27cd   :  { %vm3049_vm5 = vmor %vm3047_vm15, %vm3048_vm14 }
0x27ce   :  { %v3044_v50 = vsub.f32 1.0, %v3043_v18 }
0x27d0   :  { %v3045_v51 = vmul.f32 %v6355_v59, %v3044_v50 }
0x27d2   :  { %v3046_v52 = vadd.f32 %v6355_v59, %v3045_v51 }
0x27d4   :  { %v3050_v3 = vsel %vm3049_vm5, %v6355_v59, %v3046_v52 }
0x27d5   :  { %v3055_v9 = vsel %vm3052_vm2, %v3054_v7, %v3050_v3  ;;  %v3435_v3 = vld [vmem:[%s9416_s29 + $0x20] sm:$0xff]  ;;  %v3434_v7 = vld [vmem:[%s9416_s29 + $0x18] sm:$0xff] }
0x27d6   :  { %v3076_v14 = vmul.f32 %v3074_v24, %v3055_v9  ;;  %3466 = vmatpush.msra.mxu2 %v3435_v3  ;;  %3489 = vmatpush.msra.mxu3 %v3435_v3  ;;  %v3431_v24 = vld [vmem:[%s9416_s29] sm:$0xff] }
0x27d8   :  { %3467 = vmatpush.msra.mxu2 %v3434_v7  ;;  %3490 = vmatpush.msra.mxu3 %v3434_v7 }
0x2833   :  { %v3079_v8 = vpop.permute.xlu1 %3078 }
0x2834   :  { %v3081_v12 = vmul.f32 %v3079_v8, %v3055_v9  ;;  %v3433_v8 = vld [vmem:[%s9416_s29 + $0x10] sm:$0xff]  ;;  %v3432_v9 = vld [vmem:[%s9416_s29 + $0x8] sm:$0xff] }
0x2835   :  { %3468 = vmatpush.msra.mxu2 %v3433_v8  ;;  %3491 = vmatpush.msra.mxu3 %v3433_v8 }
0x2836   :  { %3083 = vrot.lane.b32.xlu2 %v3081_v12, %s7076_s27 }
0x2837   :  { %3469 = vmatpush.msra.mxu2 %v3432_v9  ;;  %3492 = vmatpush.msra.mxu3 %v3432_v9 }
0x2839   :  { %3470 = vmatpush.msra.mxu2 %v3431_v24  ;;  %3493 = vmatpush.msra.mxu3 %v3431_v24 }
0x2890   :  { %v3084_v15 = vpop.permute.xlu2 %3083 }
0x2891   :  { %v8201_v0 = vadd.f32 %v3084_v15, %v3076_v14 }
0x2893   :  { %6356 = vtanh.f32 %v8201_v0  ;;  %v3186_v20 = vrot.slane %v8201_v0, 6 }
0x2894   :  { %6358 = vpow2.f32 %v5944_v19 }
0x2899   :  { %v6357_v17 = vpop.eup %6356 }
0x289a   :  { %3089 = vrot.lane.b32.xlu0 %v6357_v17, %s7076_s27  ;;  %v6359_v28 = vpop.eup %6358 }
0x289b   :  { %v3041_v29 = vadd.f32 1.0, %v6359_v28 }
0x289d   :  { %6360 = vrcp.f32 %v3041_v29  ;;  %v3068_v31 = vand.u32 2147483648, %v3041_v29  ;;  %vm3062_vm7 = vweird.f32 %v3041_v29  ;;  %v3066_v32 = vand.u32 2147483647, %v3041_v29 }
0x289f   :  { %v3069_v34 = vor.u32 1.1754944e-38, %v3068_v31  ;;  %vm3067_vm1 = vcmp.eq.f32.partialorder %v3066_v32, 8.507059e+37  ;;  %v3452_v31 = vrot.slane %v7670_v6, 6  ;;  %v3475_v32 = vrot.slane %v7986_v37, 6 }
0x28a3   :  { %v6361_v23 = vpop.eup %6360 }
0x28a4   :  { %v3058_v53 = vmul.f32 %v6361_v23, %v3041_v29  ;;  %vm3063_vm6 = vweird.f32 %v6361_v23 }
0x28a5   :  { %vm3064_vm11 = vmor %vm3062_vm7, %vm3063_vm6 }
0x28a6   :  { %v3059_v58 = vsub.f32 1.0, %v3058_v53 }
0x28a8   :  { %v3060_v60 = vmul.f32 %v6361_v23, %v3059_v58 }
0x28aa   :  { %v3061_v16 = vadd.f32 %v6361_v23, %v3060_v60 }
0x28ac   :  { %v3065_v33 = vsel %vm3064_vm11, %v6361_v23, %v3061_v16 }
0x28ad   :  { %v3070_v35 = vsel %vm3067_vm1, %v3069_v34, %v3065_v33 }
0x290c   :  { %v3090_v36 = vpop.permute.xlu0 %3089 }
0x290d   :  { %v3092_v38 = vmul.f32 %v3090_v36, %v3070_v35  ;;  %v3206_v35 = vld [vmem:[#allocation2 + $0x8] sm:$0x30] }
0x290f   :  { %5945 = vmatmul.msk.f32.vlgmr.msrb.gmra.mxu0 %vm438_vm9, %v3092_v38  ;;  %5946 = vmatmul.msk.f32.vlgmr.msrb.gmra.mxu1 %vm438_vm9, %v3092_v38 }
0x2910   :  { %3510 = vmatpush.msrb.mxu0 %v3438_v48 }
0x2912   :  { %3511 = vmatpush.msrb.mxu0 %v3437_v55 }
0x2914   :  { %3512 = vmatpush.msrb.mxu0 %v3436_v1 }
0x2916   :  { %3513 = vmatpush.msrb.mxu0 %v3435_v3 }
0x2918   :  { %3514 = vmatpush.msrb.mxu0 %v3434_v7 }
0x291a   :  { %3515 = vmatpush.msrb.mxu0 %v3433_v8 }
0x291c   :  { %3516 = vmatpush.msrb.mxu0 %v3432_v9  ;;  %v3446_v9 = vld [vmem:[#allocation15 + $0x38] sm:$0xff] }
0x291d   :  { %3539 = vmatpush.msrb.mxu1 %v3446_v9 }
0x291e   :  { %3517 = vmatpush.msrb.mxu0 %v3431_v24  ;;  %v3444_v24 = vld [vmem:[#allocation15 + $0x28] sm:$0xff] }
0x298c   :  { %v3135_v25 = vpop.f32.mrf.mxu1  ;;  %v3115_v44 = vpop.f32.mrf.mxu0 }
0x298d   :  { %v3141_v40 = vrot.slane %v3135_v25, 6  ;;  %v3140_v61 = vrot.slane %v3115_v44, 6 }
0x298f   :  { %v3145_v42 = vadd.f32 %v3141_v40, %v3094_v41  ;;  %v3144_v63 = vadd.f32 %v3140_v61, %v3093_v62  ;;  %v3205_v41 = vld [vmem:[#allocation2 + $0x18] sm:$0x30] }
0x2991   :  { %6362 = vtanh.f32 %v3145_v42  ;;  %v5947_v2 = vmul.f32 -1.442695, %v3144_v63  ;;  %v5948_v51 = vmul.f32 -1.442695, %v3145_v42 }
0x2993   :  { %6364 = vpow2.f32 %v5947_v2 }
0x2997   :  { %v6363_v43 = vpop.eup %6362 }
0x2998   :  { %3190 = vrot.lane.b32.xlu1 %v6363_v43, %s7076_s27 }
0x2999   :  { %v6365_v4 = vpop.eup %6364 }
0x299a   :  { %v3152_v56 = vadd.f32 1.0, %v6365_v4 }
0x299c   :  { %6366 = vrcp.f32 %v3152_v56  ;;  %v3165_v27 = vand.u32 2147483648, %v3152_v56  ;;  %vm3159_vm3 = vweird.f32 %v3152_v56  ;;  %v3163_v26 = vand.u32 2147483647, %v3152_v56 }
0x299e   :  { %v3166_v30 = vor.u32 1.1754944e-38, %v3165_v27  ;;  %vm3164_vm8 = vcmp.eq.f32.partialorder %v3163_v26, 8.507059e+37 }
0x29a2   :  { %v6367_v54 = vpop.eup %6366 }
0x29a3   :  { %v3155_v57 = vmul.f32 %v6367_v54, %v3152_v56  ;;  %vm3160_vm0 = vweird.f32 %v6367_v54 }
0x29a4   :  { %vm3161_vm4 = vmor %vm3159_vm3, %vm3160_vm0 }
0x29a5   :  { %v3156_v10 = vsub.f32 1.0, %v3155_v57 }
0x29a7   :  { %v3157_v11 = vmul.f32 %v6367_v54, %v3156_v10 }
0x29a9   :  { %v3158_v22 = vadd.f32 %v6367_v54, %v3157_v11 }
0x29ab   :  { %v3162_v21 = vsel %vm3161_vm4, %v6367_v54, %v3158_v22 }
0x29ac   :  { %v3167_v47 = vsel %vm3164_vm8, %v3166_v30, %v3162_v21 }
0x29ad   :  { %v3188_v49 = vmul.f32 %v3186_v20, %v3167_v47 }
0x2a0a   :  { %v3191_v46 = vpop.permute.xlu1 %3190 }
0x2a0b   :  { %v3193_v5 = vmul.f32 %v3191_v46, %v3167_v47 }
0x2a0d   :  { %3195 = vrot.lane.b32.xlu2 %v3193_v5, %s7076_s27 }
0x2a67   :  { %v3196_v59 = vpop.permute.xlu2 %3195 }
0x2a68   :  { %v8212_v18 = vadd.f32 %v3196_v59, %v3188_v49 }
0x2a6a   :  { %6368 = vtanh.f32 %v8212_v18  ;;  %v3299_v27 = vrot.slane %v8212_v18, 6 }
0x2a6b   :  { %6370 = vpow2.f32 %v5948_v51 }
0x2a70   :  { %v6369_v50 = vpop.eup %6368 }
0x2a71   :  { %3201 = vrot.lane.b32.xlu0 %v6369_v50, %s7076_s27  ;;  %v6371_v52 = vpop.eup %6370 }
0x2a72   :  { %v3153_v45 = vadd.f32 1.0, %v6371_v52 }
0x2a74   :  { %6372 = vrcp.f32 %v3153_v45  ;;  %v3180_v19 = vand.u32 2147483648, %v3153_v45  ;;  %vm3174_vm13 = vweird.f32 %v3153_v45  ;;  %v3178_v28 = vand.u32 2147483647, %v3153_v45 }
0x2a76   :  { %v3181_v23 = vor.u32 1.1754944e-38, %v3180_v19  ;;  %vm3179_vm15 = vcmp.eq.f32.partialorder %v3178_v28, 8.507059e+37  ;;  %v3439_v28 = vld [vmem:[#allocation15] sm:$0xff] }
0x2a7a   :  { %v6373_v12 = vpop.eup %6372 }
0x2a7b   :  { %v3170_v14 = vmul.f32 %v6373_v12, %v3153_v45  ;;  %vm3175_vm12 = vweird.f32 %v6373_v12 }
0x2a7c   :  { %vm3176_vm14 = vmor %vm3174_vm13, %vm3175_vm12 }
0x2a7d   :  { %v3171_v15 = vsub.f32 1.0, %v3170_v14  ;;  %v3443_v14 = vld [vmem:[#allocation15 + $0x20] sm:$0xff] }
0x2a7f   :  { %v3172_v0 = vmul.f32 %v6373_v12, %v3171_v15  ;;  %v3442_v15 = vld [vmem:[#allocation15 + $0x18] sm:$0xff] }
0x2a81   :  { %v3173_v17 = vadd.f32 %v6373_v12, %v3172_v0  ;;  %v3441_v0 = vld [vmem:[#allocation15 + $0x10] sm:$0xff] }
0x2a83   :  { %v3177_v29 = vsel %vm3176_vm14, %v6373_v12, %v3173_v17  ;;  %v3445_v12 = vld [vmem:[#allocation15 + $0x30] sm:$0xff]  ;;  %v3440_v17 = vld [vmem:[#allocation15 + $0x8] sm:$0xff] }
0x2a84   :  { %v3182_v53 = vsel %vm3179_vm15, %v3181_v23, %v3177_v29  ;;  %3540 = vmatpush.msrb.mxu1 %v3445_v12  ;;  %v3620_v23 = vld [vmem:[#allocation20 + $0x78] sm:$0xff] }
0x2a86   :  { %3541 = vmatpush.msrb.mxu1 %v3444_v24 }
0x2a88   :  { %3542 = vmatpush.msrb.mxu1 %v3443_v14 }
0x2a8a   :  { %3543 = vmatpush.msrb.mxu1 %v3442_v15 }
0x2a8c   :  { %3544 = vmatpush.msrb.mxu1 %v3441_v0 }
0x2a8e   :  { %3545 = vmatpush.msrb.mxu1 %v3440_v17 }
0x2a90   :  { %3546 = vmatpush.msrb.mxu1 %v3439_v28 }
0x2ae3   :  { %v3202_v58 = vpop.permute.xlu0 %3201 }
0x2ae4   :  { %v3204_v60 = vmul.f32 %v3202_v58, %v3182_v53  ;;  %v3319_v53 = vld [vmem:[#allocation2 + $0x8] sm:$0xc0] }
0x2ae6   :  { %v3208_v16 = vrot.slane %v3204_v60, 2  ;;  %v3618_v60 = vld [vmem:[#allocation20 + $0x68] sm:$0xff] }
0x2ae8   :  { %5949 = vmatmul.msk.f32.vlgmr.msrb.gmra.mxu2 %vm438_vm9, %v3208_v16  ;;  %5950 = vmatmul.msk.f32.vlgmr.msrb.gmra.mxu3 %vm438_vm9, %v3208_v16  ;;  %v3616_v16 = vld [vmem:[#allocation20 + $0x58] sm:$0xff] }
0x2ae9   :  { %3591 = vmatpush.msrb.mxu3 %v3446_v9  ;;  %3565 = vmatpush.msrb.mxu2 %v3446_v9  ;;  %v8286_v9 = vld [vmem:[#allocation20 + $0x60] sm:$0xff] }
0x2aeb   :  { %3592 = vmatpush.msrb.mxu3 %v3445_v12  ;;  %3566 = vmatpush.msrb.mxu2 %v3445_v12  ;;  %v8290_v12 = vld [vmem:[#allocation17] ss:$0 sm:$0xff] }
0x2aed   :  { %3593 = vmatpush.msrb.mxu3 %v3444_v24  ;;  %3567 = vmatpush.msrb.mxu2 %v3444_v24 }
0x2aef   :  { %3594 = vmatpush.msrb.mxu3 %v3443_v14  ;;  %3568 = vmatpush.msrb.mxu2 %v3443_v14  ;;  %v3552_v14 = vrot.slane %v7968_v13, 6  ;;  %v8308_v13 = vld [vmem:[#allocation20 + $0x10] sm:$0xff] }
0x2af0   :  { %5957 = vmatmul.msk.f32.vlgmr.msra.gmra.mxu2 %vm438_vm9, %v3452_v31  ;;  %5958 = vmatmul.msk.f32.vlgmr.msra.gmra.mxu3 %vm438_vm9, %v3475_v32  ;;  %v3526_v32 = vrot.slane %v7651_v39, 6  ;;  %v3606_v39 = vld [vmem:[#allocation20 + $0x8] sm:$0xff] }
0x2af1   :  { %3595 = vmatpush.msrb.mxu3 %v3442_v15  ;;  %3569 = vmatpush.msrb.mxu2 %v3442_v15 }
0x2af3   :  { %3596 = vmatpush.msrb.mxu3 %v3441_v0  ;;  %3570 = vmatpush.msrb.mxu2 %v3441_v0 }
0x2af5   :  { %3597 = vmatpush.msrb.mxu3 %v3440_v17  ;;  %3571 = vmatpush.msrb.mxu2 %v3440_v17 }
0x2af7   :  { %3598 = vmatpush.msrb.mxu3 %v3439_v28  ;;  %3572 = vmatpush.msrb.mxu2 %v3439_v28  ;;  %v8299_v28 = vld [vmem:[#allocation20 + $0x40] sm:$0xff] }
0x2b6b   :  { %v3248_v33 = vpop.f32.mrf.mxu3  ;;  %v3228_v25 = vpop.f32.mrf.mxu2 }
0x2b6c   :  { %v3254_v34 = vrot.slane %v3248_v33, 4  ;;  %v3253_v40 = vrot.slane %v3228_v25, 4 }
0x2b6e   :  { %v3258_v36 = vadd.f32 %v3254_v34, %v3206_v35  ;;  %v3257_v42 = vadd.f32 %v3253_v40, %v3205_v41  ;;  %v3318_v35 = vld [vmem:[#allocation2 + $0x18] sm:$0xc0]  ;;  %v3614_v41 = vld [vmem:[#allocation20 + $0x48] sm:$0xff] }
0x2b70   :  { %6374 = vtanh.f32 %v3258_v36  ;;  %v5951_v43 = vmul.f32 -1.442695, %v3257_v42  ;;  %v5952_v47 = vmul.f32 -1.442695, %v3258_v36  ;;  %v3612_v42 = vld [vmem:[#allocation20 + $0x38] sm:$0xff] }
0x2b72   :  { %6376 = vpow2.f32 %v5951_v43  ;;  %v3610_v43 = vld [vmem:[#allocation20 + $0x28] sm:$0xff] }
0x2b76   :  { %v6375_v38 = vpop.eup %6374 }
0x2b77   :  { %3303 = vrot.lane.b32.xlu1 %v6375_v38, %s7076_s27 }
0x2b78   :  { %v6377_v6 = vpop.eup %6376 }
0x2b79   :  { %v3265_v37 = vadd.f32 1.0, %v6377_v6  ;;  %v3608_v6 = vld [vmem:[#allocation20 + $0x18] sm:$0xff] }
0x2b7b   :  { %6378 = vrcp.f32 %v3265_v37  ;;  %v3278_v4 = vand.u32 2147483648, %v3265_v37  ;;  %vm3272_vm2 = vweird.f32 %v3265_v37  ;;  %v3276_v56 = vand.u32 2147483647, %v3265_v37 }
0x2b7d   :  { %v3279_v57 = vor.u32 1.1754944e-38, %v3278_v4  ;;  %vm3277_vm7 = vcmp.eq.f32.partialorder %v3276_v56, 8.507059e+37 }
0x2b81   :  { %v6379_v44 = vpop.eup %6378 }
0x2b82   :  { %v3268_v61 = vmul.f32 %v6379_v44, %v3265_v37  ;;  %vm3273_vm5 = vweird.f32 %v6379_v44 }
0x2b83   :  { %vm3274_vm6 = vmor %vm3272_vm2, %vm3273_vm5 }
0x2b84   :  { %v3269_v62 = vsub.f32 1.0, %v3268_v61 }
0x2b86   :  { %v3270_v63 = vmul.f32 %v6379_v44, %v3269_v62 }
0x2b88   :  { %v3271_v2 = vadd.f32 %v6379_v44, %v3270_v63 }
0x2b8a   :  { %v3275_v54 = vsel %vm3274_vm6, %v6379_v44, %v3271_v2  ;;  %vm3776_vm6 = vcmask 64512  }
0x2b8b   :  { %v3280_v11 = vsel %vm3277_vm7, %v3279_v57, %v3275_v54 }
0x2b8c   :  { %v3301_v26 = vmul.f32 %v3299_v27, %v3280_v11 }
0x2be9   :  { %v3304_v10 = vpop.permute.xlu1 %3303 }
0x2bea   :  { %v3306_v22 = vmul.f32 %v3304_v10, %v3280_v11 }
0x2bec   :  { %3308 = vrot.lane.b32.xlu2 %v3306_v22, %s7076_s27  ;;  %v8244_v22 = vld [vmem:[#allocation23 + $0x78] sm:$0xff] }
0x2c46   :  { %v3309_v21 = vpop.permute.xlu2 %3308 }
0x2c47   :  { %v8231_v30 = vadd.f32 %v3309_v21, %v3301_v26  ;;  %v8247_v26 = vld [vmem:[#allocation23 + $0x68] sm:$0xff] }
0x2c48   :  { %v8250_v21 = vld [vmem:[#allocation14] ss:$0 sm:$0xff] }
0x2c49   :  { %6380 = vtanh.f32 %v8231_v30 }
0x2c4a   :  { %6382 = vpow2.f32 %v5952_v47  ;;  %v3472_v47 = vpop.f32.mrf.mxu2 }
0x2c4f   :  { %v6381_v46 = vpop.eup %6380 }
0x2c50   :  { %3314 = vrot.lane.b32.xlu0 %v6381_v46, %s7076_s27  ;;  %v6383_v5 = vpop.eup %6382  ;;  %v8252_v46 = vld [vmem:[#allocation23 + $0x58] sm:$0xff] }
0x2c51   :  { %v3266_v48 = vadd.f32 1.0, %v6383_v5  ;;  %v8255_v5 = vld [vmem:[#allocation23 + $0x48] sm:$0xff] }
0x2c53   :  { %6384 = vrcp.f32 %v3266_v48  ;;  %v3293_v18 = vand.u32 2147483648, %v3266_v48  ;;  %vm3287_vm1 = vweird.f32 %v3266_v48  ;;  %v3291_v51 = vand.u32 2147483647, %v3266_v48 }
0x2c55   :  { %v3294_v45 = vor.u32 1.1754944e-38, %v3293_v18  ;;  %vm3292_vm3 = vcmp.eq.f32.partialorder %v3291_v51, 8.507059e+37  ;;  %v3412_v51 = vrot.slane %v8231_v30, 6 }
0x2c59   :  { %v6385_v55 = vpop.eup %6384 }
0x2c5a   :  { %v3283_v20 = vmul.f32 %v6385_v55, %v3266_v48  ;;  %vm3288_vm11 = vweird.f32 %v6385_v55  ;;  %v8259_v48 = vadd.f32 %v8250_v21, %v3472_v47  ;;  %v8366_v47 = vld [vmem:[#allocation26 + $0x58] sm:$0xff] }
0x2c5b   :  { %vm3289_vm0 = vmor %vm3287_vm1, %vm3288_vm11 }
0x2c5c   :  { %v3284_v49 = vsub.f32 1.0, %v3283_v20  ;;  %v8266_v20 = vld [vmem:[#allocation23 + $0x28] sm:$0xff] }
0x2c5e   :  { %v3285_v59 = vmul.f32 %v6385_v55, %v3284_v49  ;;  %v8269_v49 = vld [vmem:[#allocation23 + $0x18] sm:$0xff] }
0x2c60   :  { %v3286_v50 = vadd.f32 %v6385_v55, %v3285_v59  ;;  %v3495_v59 = vpop.f32.mrf.mxu3 }
0x2c61   :  { %v8276_v18 = vadd.f32 %v8250_v21, %v3495_v59  ;;  %v8372_v59 = vld [vmem:[#allocation26 + $0x48] sm:$0xff] }
0x2c62   :  { %v3290_v52 = vsel %vm3289_vm0, %v6385_v55, %v3286_v50  ;;  %v8261_v55 = vld [vmem:[#allocation23 + $0x38] sm:$0xff]  ;;  %v8272_v50 = vld [vmem:[#allocation23 + $0x8] sm:$0xff] }
0x2c63   :  { %v3295_v1 = vsel %vm3292_vm3, %v3294_v45, %v3290_v52 }
0x2cc2   :  { %v3315_v3 = vpop.permute.xlu0 %3314 }
0x2cc3   :  { %v3317_v7 = vmul.f32 %v3315_v3, %v3295_v1 }
0x2cc5   :  { %v3321_v8 = vrot.slane %v3317_v7, 4 }
0x2cc7   :  { %5953 = vmatmul.msk.f32.vlgmr.msra.gmra.mxu0 %vm438_vm9, %v3321_v8  ;;  %5954 = vmatmul.msk.f32.vlgmr.msra.gmra.mxu1 %vm438_vm9, %v3321_v8  ;;  %v8284_v8 = vld [vmem:[#allocation20 + $0x70] sm:$0xff] }
0x2cc8   :  { %3764 = vmatpush.msra.mxu1 %v3620_v23  ;;  %3744 = vmatpush.msra.mxu0 %v8284_v8  ;;  %v8305_v23 = vld [vmem:[#allocation20 + $0x20] sm:$0xff] }
0x2cca   :  { %3765 = vmatpush.msra.mxu1 %v3618_v60  ;;  %3745 = vmatpush.msra.mxu0 %v8286_v9 }
0x2ccc   :  { %3766 = vmatpush.msra.mxu1 %v3616_v16 }
0x2cce   :  { %3767 = vmatpush.msra.mxu1 %v3614_v41 }
0x2cd0   :  { %3768 = vmatpush.msra.mxu1 %v3612_v42 }
0x2cd2   :  { %3769 = vmatpush.msra.mxu1 %v3610_v43  ;;  %v8318_v43 = vld [vmem:[#allocation18] sm:$0xff] }
0x2cd4   :  { %3770 = vmatpush.msra.mxu1 %v3608_v6  ;;  %v8322_v6 = vld [vmem:[#allocation23 + $0x70] sm:$0xff] }
0x2cd6   :  { %3771 = vmatpush.msra.mxu1 %v3606_v39  ;;  %v8326_v39 = vld [vmem:[#allocation23 + $0x60] sm:$0xff] }
0x2cd7   :  { %9417 = vst [vmem:[#allocation48_spill] sm:$0xff] %v8326_v39 }
0x2d44   :  { %v3361_v19 = vpop.f32.mrf.mxu1  ;;  %v3341_v33 = vpop.f32.mrf.mxu0 }
0x2d45   :  { %v3367_v29 = vrot.slane %v3361_v19, 2  ;;  %v3366_v34 = vrot.slane %v3341_v33, 2  ;;  %v8297_v19 = vld [vmem:[#allocation20 + $0x50] sm:$0xff] }
0x2d46   :  { %3746 = vmatpush.msra.mxu0 %v8297_v19 }
0x2d47   :  { %v8237_v58 = vadd.f32 %v3367_v29, %v3319_v53  ;;  %v3370_v36 = vadd.f32 %v3366_v34, %v3318_v35  ;;  %v8302_v29 = vld [vmem:[#allocation20 + $0x30] sm:$0xff] }
0x2d48   :  { %3747 = vmatpush.msra.mxu0 %v8299_v28 }
0x2d49   :  { %6386 = vtanh.f32 %v8237_v58  ;;  %v5955_v38 = vmul.f32 -1.442695, %v3370_v36  ;;  %v5956_v15 = vmul.f32 -1.442695, %v8237_v58  ;;  %v8311_v58 = vld [vmem:[#allocation20] sm:$0xff] }
0x2d4a   :  { %3748 = vmatpush.msra.mxu0 %v8302_v29 }
0x2d4b   :  { %6388 = vpow2.f32 %v5955_v38 }
0x2d4c   :  { %3749 = vmatpush.msra.mxu0 %v8305_v23 }
0x2d4e   :  { %3750 = vmatpush.msra.mxu0 %v8308_v13 }
0x2d4f   :  { %v6387_v31 = vpop.eup %6386 }
0x2d50   :  { %3416 = vrot.lane.b32.xlu1 %v6387_v31, %s7076_s27  ;;  %3751 = vmatpush.msra.mxu0 %v8311_v58  ;;  %v8315_v31 = vld [vmem:[#allocation18 + $0x8] sm:$0xff] }
0x2d51   :  { %v6389_v25 = vpop.eup %6388  ;;  %3815 = vmatpush.msra.mxu3 %v8315_v31 }
0x2d52   :  { %v3378_v40 = vadd.f32 1.0, %v6389_v25 }
0x2d54   :  { %6390 = vrcp.f32 %v3378_v40  ;;  %v3391_v2 = vand.u32 2147483648, %v3378_v40  ;;  %vm3385_vm8 = vweird.f32 %v3378_v40  ;;  %v3389_v4 = vand.u32 2147483647, %v3378_v40 }
0x2d56   :  { %v3392_v54 = vor.u32 1.1754944e-38, %v3391_v2  ;;  %vm3390_vm13 = vcmp.eq.f32.partialorder %v3389_v4, 8.507059e+37  ;;  %v8341_v2 = vld [vmem:[#allocation23 + $0x20] sm:$0xff]  ;;  %v8344_v4 = vld [vmem:[#allocation23 + $0x10] sm:$0xff] }
0x2d57   :  { %9421 = vst [vmem:[#allocation52_spill] sm:$0xff] %v8341_v2 }
0x2d58   :  { %3527 = vrot.lane.b32.xlu1 %v3526_v32, %s7076_s27  ;;  %9422 = vst [vmem:[#allocation53_spill] sm:$0xff] %v8344_v4 }
0x2d5a   :  { %v6391_v37 = vpop.eup %6390 }
0x2d5b   :  { %v3381_v44 = vmul.f32 %v6391_v37, %v3378_v40  ;;  %vm3386_vm4 = vweird.f32 %v6391_v37 }
0x2d5c   :  { %vm3387_vm12 = vmor %vm3385_vm8, %vm3386_vm4 }
0x2d5d   :  { %v3382_v61 = vsub.f32 1.0, %v3381_v44  ;;  %v8332_v44 = vld [vmem:[#allocation23 + $0x40] sm:$0xff] }
0x2d5e   :  { %9419 = vst [vmem:[#allocation50_spill] sm:$0xff] %v8332_v44 }
0x2d5f   :  { %v3383_v62 = vmul.f32 %v6391_v37, %v3382_v61  ;;  %v3732_v61 = vld [vmem:[%s9402_s28 + $0xe] sm:$0x3] }
0x2d61   :  { %v3384_v63 = vadd.f32 %v6391_v37, %v3383_v62 }
0x2d63   :  { %v3388_v56 = vsel %vm3387_vm12, %v6391_v37, %v3384_v63  ;;  %v8329_v37 = vld [vmem:[#allocation23 + $0x50] sm:$0xff] }
0x2d64   :  { %v3393_v10 = vsel %vm3390_vm13, %v3392_v54, %v3388_v56  ;;  %9418 = vst [vmem:[#allocation49_spill] sm:$0xff] %v8329_v37  ;;  %v8336_v63 = vld [vmem:[#allocation23 + $0x30] sm:$0xff]  ;;  %v8347_v56 = vld [vmem:[#allocation23] sm:$0xff] }
0x2d65   :  { %v3414_v52 = vmul.f32 %v3412_v51, %v3393_v10  ;;  %9420 = vst [vmem:[#allocation51_spill] sm:$0xff] %v8336_v63  ;;  %v8354_v54 = vld [vmem:[#allocation26 + $0x70] sm:$0xff]  ;;  %v8378_v51 = vld [vmem:[#allocation26 + $0x38] sm:$0xff] }
0x2d66   :  { %9423 = vst [vmem:[#allocation54_spill] sm:$0xff] %v8347_v56 }
0x2d67   :  { %9424 = vst [vmem:[#allocation55_spill] sm:$0xff] %v8354_v54 }
0x2dc2   :  { %v3417_v57 = vpop.permute.xlu1 %3416 }
0x2dc3   :  { %v3419_v11 = vmul.f32 %v3417_v57, %v3393_v10  ;;  %v8356_v57 = vld [vmem:[#allocation26 + $0x78] sm:$0xff]  ;;  %v8358_v10 = vld [vmem:[#allocation26 + $0x60] sm:$0xff] }
0x2dc4   :  { %9425 = vst [vmem:[#allocation56_spill] sm:$0xff] %v8358_v10 }
0x2dc5   :  { %3421 = vrot.lane.b32.xlu2 %v3419_v11, %s7076_s27  ;;  %v8362_v11 = vld [vmem:[#allocation26 + $0x68] sm:$0xff] }
0x2dca   :  { %v3528_v27 = vpop.permute.xlu1 %3527 }
0x2dcb   :  { %5960 = vmatmul.msk.f32.vlgmr.msrb.gmra.mxu1 %vm438_vm9, %v3528_v27  ;;  %v8364_v27 = vld [vmem:[#allocation26 + $0x50] sm:$0xff] }
0x2dcc   :  { %3913 = vmatpush.msrb.mxu1 %v8244_v22  ;;  %9426 = vst [vmem:[#allocation57_spill] sm:$0xff] %v8364_v27 }
0x2dce   :  { %3914 = vmatpush.msrb.mxu1 %v8247_v26 }
0x2dd0   :  { %3915 = vmatpush.msrb.mxu1 %v8252_v46 }
0x2dd2   :  { %3916 = vmatpush.msrb.mxu1 %v8255_v5 }
0x2dd3   :  { %5964 = vmatmul.msk.f32.vlgmr.msra.gmra.mxu1 %vm438_vm9, %v8259_v48 }
0x2dd4   :  { %3917 = vmatpush.msrb.mxu1 %v8261_v55 }
0x2dd6   :  { %3918 = vmatpush.msrb.mxu1 %v8266_v20 }
0x2dd8   :  { %3919 = vmatpush.msrb.mxu1 %v8269_v49 }
0x2dda   :  { %3920 = vmatpush.msrb.mxu1 %v8272_v50 }
0x2ddb   :  { %5970 = vmatmul.msk.f32.vlgmr.msrb.gmra.mxu1 %vm438_vm9, %v8276_v18 }
0x2ddc   :  { %4061 = vmatpush.msra.mxu1 %v8356_v57 }
0x2dde   :  { %4062 = vmatpush.msra.mxu1 %v8362_v11 }
0x2de0   :  { %4063 = vmatpush.msra.mxu1 %v8366_v47 }
0x2de2   :  { %4064 = vmatpush.msra.mxu1 %v8372_v59 }
0x2de4   :  { %4065 = vmatpush.msra.mxu1 %v8378_v51 }
0x2e1f   :  { %v3422_v45 = vpop.permute.xlu2 %3421 }
0x2e20   :  { %v3424_v1 = vadd.f32 %v3422_v45, %v3414_v52  ;;  %v8382_v52 = vld [vmem:[#allocation26 + $0x20] sm:$0xff]  ;;  %v8384_v45 = vld [vmem:[#allocation26 + $0x28] sm:$0xff] }
0x2e21   :  { %9429 = vst [vmem:[#allocation60_spill] sm:$0xff] %v8382_v52  ;;  %4066 = vmatpush.msra.mxu1 %v8384_v45 }
0x2e22   :  { %6392 = vtanh.f32 %v3424_v1  ;;  %v3578_v3 = vrot.slane %v3424_v1, 6 }
0x2e23   :  { %6394 = vpow2.f32 %v5956_v15 }
0x2e24   :  { %3579 = vrot.lane.b32.xlu0 %v3578_v3, %s7076_s27 }
0x2e28   :  { %v6393_v7 = vpop.eup %6392 }
0x2e29   :  { %3427 = vrot.lane.b32.xlu2 %v6393_v7, %s7076_s27  ;;  %v6395_v0 = vpop.eup %6394  ;;  %v8393_v7 = vld [vmem:[#allocation26 + $0x10] sm:$0xff] }
0x2e2a   :  { %v3379_v17 = vadd.f32 1.0, %v6395_v0  ;;  %9431 = vst [vmem:[#allocation61_spill] sm:$0xff] %v8393_v7 }
0x2e2c   :  { %6396 = vrcp.f32 %v3379_v17  ;;  %v3406_v34 = vand.u32 2147483648, %v3379_v17  ;;  %vm3400_vm15 = vweird.f32 %v3379_v17  ;;  %v3404_v35 = vand.u32 2147483647, %v3379_v17 }
0x2e2e   :  { %v3407_v38 = vor.u32 1.1754944e-38, %v3406_v34  ;;  %vm3405_vm2 = vcmp.eq.f32.partialorder %v3404_v35, 8.507059e+37 }
0x2e32   :  { %v6397_v53 = vpop.eup %6396 }
0x2e33   :  { %v3396_v60 = vmul.f32 %v6397_v53, %v3379_v17  ;;  %vm3401_vm14 = vweird.f32 %v6397_v53 }
0x2e34   :  { %vm3402_vm5 = vmor %vm3400_vm15, %vm3401_vm14 }
0x2e35   :  { %v3397_v16 = vsub.f32 1.0, %v3396_v60 }
0x2e37   :  { %v3398_v32 = vmul.f32 %v6397_v53, %v3397_v16 }
0x2e39   :  { %v3399_v33 = vadd.f32 %v6397_v53, %v3398_v32 }
0x2e3b   :  { %v3403_v36 = vsel %vm3402_vm5, %v6397_v53, %v3399_v33  ;;  %v3685_v53 = vld [vmem:[%s9430_s15] sm:$0x3] }
0x2e3c   :  { %v3408_v25 = vsel %vm3405_vm2, %v3407_v38, %v3403_v36  ;;  %v8411_v60 = vperm.slane %v3685_v53, 1  ;;  %v8418_v38 = vperm.slane %v3685_v53, 0 }
0x2e3e   :  { %9433 = vst [vmem:[#allocation63_spill] sm:$0xff] %v8411_v60 }
0x2e3f   :  { %9434 = vst [vmem:[#allocation64_spill] sm:$0xff] %v8418_v38 }
0x2e48   :  { %v3548_v30 = vpop.f32.mrf.mxu1 }
0x2e49   :  { %v3549_v24 = vadd.f32 %v8290_v12, %v3548_v30  ;;  %v8395_v30 = vld [vmem:[#allocation26 + $0x18] sm:$0xff] }
0x2e4a   :  { %4067 = vmatpush.msra.mxu1 %v8395_v30 }
0x2e4b   :  { %3862 = vrot.lane.b32.xlu1 %v3549_v24, %s7076_s27  ;;  %v8397_v24 = vld [vmem:[#allocation26] sm:$0xff] }
0x2e4c   :  { %9432 = vst [vmem:[#allocation62_spill] sm:$0xff] %v8397_v24 }
0x2e50   :  { %v3773_v16 = vpop.f32.mrf.mxu1 }
0x2e53   :  { %3553 = vrot.lane.b32.xlu1 %v3552_v14, %s7076_s27  ;;  %v8401_v14 = vld [vmem:[#allocation26 + $0x8] sm:$0xff] }
0x2e54   :  { %4068 = vmatpush.msra.mxu1 %v8401_v14 }
0x2e83   :  { %v3428_v40 = vpop.permute.xlu2 %3427 }
0x2e84   :  { %v3430_v41 = vmul.f32 %v3428_v40, %v3408_v25 }
0x2e86   :  { %v3499_v42 = vrot.slane %v3430_v41, 6 }
0x2e88   :  { %5959 = vmatmul.msk.f32.vlgmr.msrb.gmra.mxu0 %vm438_vm9, %v3499_v42 }
0x2e89   :  { %3795 = vmatpush.msrb.mxu0 %v8318_v43 }
0x2e90   :  { %5963 = vmatmul.msk.f32.vlgmr.msra.gmra.mxu0 %vm438_vm9, %v8259_v48  ;;  %v8370_v48 = vld [vmem:[#allocation26 + $0x40] sm:$0xff] }
0x2e91   :  { %3893 = vmatpush.msra.mxu0 %v8322_v6  ;;  %9427 = vst [vmem:[#allocation58_spill] sm:$0xff] %v8370_v48 }
0x2e93   :  { %3894 = vmatpush.msra.mxu0 %v8326_v39 }
0x2e95   :  { %3895 = vmatpush.msra.mxu0 %v8329_v37 }
0x2e96   :  { %v3580_v62 = vpop.permute.xlu0 %3579 }
0x2e97   :  { %5962 = vmatmul.msk.f32.vlgmr.msrb.gmra.mxu3 %vm438_vm9, %v3580_v62  ;;  %3896 = vmatpush.msra.mxu0 %v8332_v44 }
0x2e98   :  { %5965 = vmatmul.msk.f32.vlgmr.msrb.gmra.mxu0 %vm3776_vm6, %v3732_v61 }
0x2e99   :  { %3897 = vmatpush.msra.mxu0 %v8336_v63 }
0x2e9b   :  { %3898 = vmatpush.msra.mxu0 %v8341_v2 }
0x2e9d   :  { %3899 = vmatpush.msra.mxu0 %v8344_v4 }
0x2e9f   :  { %5966 = vmatmul.msk.f32.vlgmr.msra.gmra.mxu3 %vm3776_vm6, %v3732_v61  ;;  %3900 = vmatpush.msra.mxu0 %v8347_v56 }
0x2ea0   :  { %5969 = vmatmul.msk.f32.vlgmr.msra.gmra.mxu0 %vm438_vm9, %v8276_v18  ;;  %v8376_v18 = vld [vmem:[#allocation26 + $0x30] sm:$0xff] }
0x2ea1   :  { %4041 = vmatpush.msrb.mxu0 %v8354_v54  ;;  %9428 = vst [vmem:[#allocation59_spill] sm:$0xff] %v8376_v18 }
0x2ea3   :  { %4042 = vmatpush.msrb.mxu0 %v8358_v10 }
0x2ea5   :  { %4043 = vmatpush.msrb.mxu0 %v8364_v27  ;;  %v8474_v27 = vld [vmem:[#allocation21 + $0x8] sm:$0xff] }
0x2ea7   :  { %4044 = vmatpush.msrb.mxu0 %v8370_v48  ;;  %v8472_v48 = vld [vmem:[#allocation21] sm:$0xff] }
0x2ea9   :  { %4045 = vmatpush.msrb.mxu0 %v8376_v18 }
0x2eab   :  { %4046 = vmatpush.msrb.mxu0 %v8382_v52 }
0x2ead   :  { %4047 = vmatpush.msrb.mxu0 %v8393_v7 }
0x2eaf   :  { %4048 = vmatpush.msrb.mxu0 %v8397_v24 }
0x2ebd   :  { %v8390_v1 = vpop.permute.xlu1 %3862 }
0x2ec5   :  { %v3554_v3 = vpop.permute.xlu1 %3553 }
0x2ec6   :  { %5961 = vmatmul.msk.f32.vlgmr.msrb.gmra.mxu2 %vm438_vm9, %v3554_v3 }
0x2f05   :  { %v3519_v15 = vpop.f32.mrf.mxu0 }
0x2f06   :  { %v3520_v0 = vadd.f32 %v8250_v21, %v3519_v15 }
0x2f08   :  { %5975 = vmatmul.msk.f32.vlgmr.msrb.gmra.mxu0 %vm438_vm9, %v3520_v0  ;;  %5976 = vmatmul.msk.f32.vlgmr.msra.gmra.mxu1 %vm438_vm9, %v3520_v0 }
0x2f0d   :  { %v3753_v21 = vpop.f32.mrf.mxu0 }
0x2f15   :  { %v3797_v36 = vpop.f32.mrf.mxu0 }
0x2f16   :  { %v3798_v25 = vadd.f32 %v3797_v36, %v3753_v21 }
0x2f18   :  { %v3820_v40 = vadd.f32 %v3798_v25, %v8418_v38 }
0x2f1a   :  { %v8408_v17 = vpop.f32.mrf.mxu3  ;;  %v5967_v41 = vmul.f32 -1.442695, %v3820_v40  ;;  %v8422_v40 = vld [vmem:[#allocation21 + $0x70] sm:$0xff] }
0x2f1b   :  { %3936 = vmatpush.msra.mxu2 %v8422_v40 }
0x2f22   :  { %v3817_v32 = vpop.f32.mrf.mxu3 }
0x2f23   :  { %v3818_v33 = vadd.f32 %v3817_v32, %v3773_v16 }
0x2f25   :  { %v8414_v34 = vadd.f32 %v3818_v33, %v8411_v60 }
0x2f27   :  { %6398 = vtanh.f32 %v8414_v34  ;;  %v5968_v18 = vmul.f32 -1.442695, %v8414_v34 }
0x2f28   :  { %6400 = vpow2.f32 %v5967_v41  ;;  %v8424_v41 = vld [vmem:[#allocation21 + $0x78] sm:$0xff] }
0x2f29   :  { %3956 = vmatpush.msrb.mxu3 %v8424_v41 }
0x2f2d   :  { %v6399_v35 = vpop.eup %6398 }
0x2f2e   :  { %3867 = vrot.lane.b32.xlu0 %v6399_v35, %s7076_s27  ;;  %v6401_v42 = vpop.eup %6400 }
0x2f2f   :  { %v3828_v61 = vadd.f32 1.0, %v6401_v42  ;;  %v8426_v42 = vld [vmem:[#allocation21 + $0x60] sm:$0xff] }
0x2f30   :  { %3937 = vmatpush.msra.mxu2 %v8426_v42 }
0x2f31   :  { %6402 = vrcp.f32 %v3828_v61  ;;  %v3841_v32 = vand.u32 2147483648, %v3828_v61  ;;  %vm3835_vm11 = vweird.f32 %v3828_v61  ;;  %v3839_v33 = vand.u32 2147483647, %v3828_v61 }
0x2f33   :  { %v3842_v35 = vor.u32 1.1754944e-38, %v3841_v32  ;;  %vm3840_vm0 = vcmp.eq.f32.partialorder %v3839_v33, 8.507059e+37  ;;  %v8446_v32 = vld [vmem:[#allocation21 + $0x38] sm:$0xff]  ;;  %v8450_v33 = vld [vmem:[#allocation21 + $0x20] sm:$0xff] }
0x2f37   :  { %v6403_v62 = vpop.eup %6402 }
0x2f38   :  { %v3831_v3 = vmul.f32 %v6403_v62, %v3828_v61  ;;  %vm3836_vm7 = vweird.f32 %v6403_v62  ;;  %v8430_v61 = vld [vmem:[#allocation21 + $0x68] sm:$0xff] }
0x2f39   :  { %vm3837_vm1 = vmor %vm3835_vm11, %vm3836_vm7  ;;  %3957 = vmatpush.msrb.mxu3 %v8430_v61 }
0x2f3a   :  { %v3832_v15 = vsub.f32 1.0, %v3831_v3  ;;  %v8434_v3 = vld [vmem:[#allocation21 + $0x58] sm:$0xff] }
0x2f3b   :  { %3958 = vmatpush.msrb.mxu3 %v8434_v3 }
0x2f3c   :  { %v3833_v0 = vmul.f32 %v6403_v62, %v3832_v15  ;;  %v8438_v15 = vld [vmem:[#allocation21 + $0x40] sm:$0xff] }
0x2f3e   :  { %v3834_v16 = vadd.f32 %v6403_v62, %v3833_v0  ;;  %v8440_v0 = vld [vmem:[#allocation21 + $0x48] sm:$0xff] }
0x2f3f   :  { %3959 = vmatpush.msrb.mxu3 %v8440_v0 }
0x2f40   :  { %v3838_v53 = vsel %vm3837_vm1, %v6403_v62, %v3834_v16  ;;  %v8432_v62 = vld [vmem:[#allocation21 + $0x50] sm:$0xff] }
0x2f41   :  { %v3843_v36 = vsel %vm3840_vm0, %v3842_v35, %v3838_v53  ;;  %3938 = vmatpush.msra.mxu2 %v8432_v62  ;;  %v8444_v16 = vld [vmem:[#allocation21 + $0x30] sm:$0xff]  ;;  %v8452_v53 = vld [vmem:[#allocation21 + $0x28] sm:$0xff]  ;;  %3960 = vmatpush.msrb.mxu3 %v8446_v32 }
0x2f42   :  { %v8456_v35 = vld [vmem:[#allocation21 + $0x10] sm:$0xff] }
0x2f43   :  { %3939 = vmatpush.msra.mxu2 %v8438_v15  ;;  %3961 = vmatpush.msrb.mxu3 %v8452_v53 }
0x2f45   :  { %3940 = vmatpush.msra.mxu2 %v8444_v16 }
0x2f47   :  { %3941 = vmatpush.msra.mxu2 %v8450_v33 }
0x2f49   :  { %3942 = vmatpush.msra.mxu2 %v8456_v35  ;;  %v3574_v7 = vpop.f32.mrf.mxu2 }
0x2f4a   :  { %v3575_v52 = vadd.f32 %v8290_v12, %v3574_v7 }
0x2f4b   :  { %3943 = vmatpush.msra.mxu2 %v8472_v48 }
0x2fa0   :  { %v3868_v21 = vpop.permute.xlu0 %3867 }
0x2fa1   :  { %v3870_v25 = vmul.f32 %v3868_v21, %v3843_v36  ;;  %v8458_v21 = vld [vmem:[#allocation21 + $0x18] sm:$0xff] }
0x2fa2   :  { %3962 = vmatpush.msrb.mxu3 %v8458_v21 }
0x2fa3   :  { %3872 = vrot.lane.b32.xlu2 %v3870_v25, %s7076_s27  ;;  %v3865_v25 = vmul.f32 %v8390_v1, %v3843_v36 }
0x2fa4   :  { %3963 = vmatpush.msrb.mxu3 %v8474_v27 }
0x2ffd   :  { %v3873_v38 = vpop.permute.xlu2 %3872 }
0x2ffe   :  { %v8465_v60 = vadd.f32 %v3873_v38, %v3865_v25 }
0x3000   :  { %9435 = vst [vmem:[#allocation65_spill] sm:$0xff] %v8465_v60  ;;  %6404 = vtanh.f32 %v8465_v60 }
0x3001   :  { %6406 = vpow2.f32 %v5968_v18 }
0x3006   :  { %v6405_v24 = vpop.eup %6404 }
0x3007   :  { %3878 = vrot.lane.b32.xlu0 %v6405_v24, %s7076_s27  ;;  %v6407_v1 = vpop.eup %6406 }
0x3008   :  { %v3829_v36 = vadd.f32 1.0, %v6407_v1 }
0x300a   :  { %6408 = vrcp.f32 %v3829_v36  ;;  %v3856_v34 = vand.u32 2147483648, %v3829_v36  ;;  %vm3850_vm4 = vweird.f32 %v3829_v36  ;;  %v3854_v18 = vand.u32 2147483647, %v3829_v36 }
0x300c   :  { %v3857_v60 = vor.u32 1.1754944e-38, %v3856_v34  ;;  %vm3855_vm12 = vcmp.eq.f32.partialorder %v3854_v18, 8.507059e+37 }
0x300f   :  { %4010 = vrot.lane.b32.xlu0 %v3575_v52, %s7076_s27 }
0x3010   :  { %v6409_v24 = vpop.eup %6408 }
0x3011   :  { %v3846_v38 = vmul.f32 %v6409_v24, %v3829_v36  ;;  %vm3851_vm3 = vweird.f32 %v6409_v24 }
0x3012   :  { %vm3852_vm8 = vmor %vm3850_vm4, %vm3851_vm3 }
0x3013   :  { %v3847_v25 = vsub.f32 1.0, %v3846_v38  ;;  %v3691_v38 = vld [vmem:[%s9436_s22] sm:$0x3] }
0x3015   :  { %v3848_v7 = vmul.f32 %v6409_v24, %v3847_v25  ;;  %v8485_v25 = vperm.slane %v3691_v38, 1 }
0x3017   :  { %v3849_v52 = vadd.f32 %v6409_v24, %v3848_v7  ;;  %9437 = vst [vmem:[#allocation66_spill] sm:$0xff] %v8485_v25  ;;  %v3922_v7 = vpop.f32.mrf.mxu1 }
0x3019   :  { %v3853_v1 = vsel %vm3852_vm8, %v6409_v24, %v3849_v52  ;;  %v8492_v52 = vperm.slane %v3691_v38, 0 }
0x301a   :  { %v3858_v10 = vsel %vm3855_vm12, %v3857_v60, %v3853_v1 }
0x301b   :  { %9438 = vst [vmem:[#allocation67_spill] sm:$0xff] %v8492_v52 }
0x3079   :  { %v3879_v54 = vpop.permute.xlu0 %3878 }
0x307a   :  { %v8478_v56 = vmul.f32 %v3879_v54, %v3858_v10  ;;  %v3902_v10 = vpop.f32.mrf.mxu0 }
0x307c   :  { %5971 = vmatmul.msk.f32.vlgmr.msra.gmra.mxu2 %vm438_vm9, %v8478_v56  ;;  %5972 = vmatmul.msk.f32.vlgmr.msrb.gmra.mxu3 %vm438_vm9, %v8478_v56 }
0x30ff   :  { %v3965_v4 = vpop.f32.mrf.mxu3  ;;  %v3945_v54 = vpop.f32.mrf.mxu2 }
0x3100   :  { %v3966_v36 = vadd.f32 %v3965_v4, %v3922_v7  ;;  %v3946_v34 = vadd.f32 %v3945_v54, %v3902_v10 }
0x3102   :  { %v8488_v24 = vadd.f32 %v3966_v36, %v8485_v25  ;;  %v3968_v18 = vadd.f32 %v3946_v34, %v8492_v52 }
0x3104   :  { %6410 = vtanh.f32 %v8488_v24  ;;  %v5973_v1 = vmul.f32 -1.442695, %v3968_v18  ;;  %v8499_v18 = vld [vmem:[#allocation24 + $0x78] sm:$0xff] }
0x3105   :  { %4104 = vmatpush.msra.mxu3 %v8499_v18 }
0x3106   :  { %6412 = vpow2.f32 %v5973_v1  ;;  %v8520_v1 = vld [vmem:[#allocation24 + $0x40] sm:$0xff] }
0x310a   :  { %v6411_v60 = vpop.eup %6410 }
0x310b   :  { %4015 = vrot.lane.b32.xlu2 %v6411_v60, %s7076_s27 }
0x310c   :  { %v6413_v2 = vpop.eup %6412 }
0x310d   :  { %v3976_v63 = vadd.f32 1.0, %v6413_v2  ;;  %v3601_v2 = vadd.f32 %v8290_v12, %v8408_v17  ;;  %v8514_v12 = vld [vmem:[#allocation24 + $0x50] sm:$0xff]  ;;  %v8518_v17 = vld [vmem:[#allocation24 + $0x38] sm:$0xff] }
0x310f   :  { %6414 = vrcp.f32 %v3976_v63  ;;  %v3989_v37 = vand.u32 2147483648, %v3976_v63  ;;  %vm3983_vm14 = vweird.f32 %v3976_v63  ;;  %v3987_v60 = vand.u32 2147483647, %v3976_v63 }
0x3111   :  { %v3990_v39 = vor.u32 1.1754944e-38, %v3989_v37  ;;  %vm3988_vm5 = vcmp.eq.f32.partialorder %v3987_v60, 8.507059e+37  ;;  %v8506_v37 = vld [vmem:[#allocation24 + $0x70] sm:$0xff]  ;;  %v8532_v60 = vld [vmem:[#allocation24 + $0x20] sm:$0xff] }
0x3112   :  { %4084 = vmatpush.msrb.mxu2 %v8506_v37 }
0x3115   :  { %v6415_v4 = vpop.eup %6414 }
0x3116   :  { %v3979_v7 = vmul.f32 %v6415_v4, %v3976_v63  ;;  %vm3984_vm13 = vweird.f32 %v6415_v4  ;;  %v8504_v63 = vld [vmem:[#allocation24 + $0x58] sm:$0xff] }
0x3117   :  { %vm3985_vm15 = vmor %vm3983_vm14, %vm3984_vm13 }
0x3118   :  { %v3980_v36 = vsub.f32 1.0, %v3979_v7  ;;  %v8526_v7 = vld [vmem:[#allocation24 + $0x30] sm:$0xff] }
0x3119   :  { %9439 = vst [vmem:[#allocation68_spill] sm:$0xff] %v8526_v7 }
0x311a   :  { %v3981_v25 = vmul.f32 %v6415_v4, %v3980_v36  ;;  %v8530_v36 = vld [vmem:[#allocation24 + $0x18] sm:$0xff] }
0x311c   :  { %v3982_v44 = vadd.f32 %v6415_v4, %v3981_v25  ;;  %v8501_v25 = vld [vmem:[#allocation24 + $0x68] sm:$0xff] }
0x311d   :  { %4105 = vmatpush.msra.mxu3 %v8501_v25 }
0x311e   :  { %v3986_v38 = vsel %vm3985_vm15, %v6415_v4, %v3982_v44  ;;  %v8512_v44 = vld [vmem:[#allocation24 + $0x48] sm:$0xff] }
0x311f   :  { %v3991_v10 = vsel %vm3988_vm5, %v3990_v39, %v3986_v38  ;;  %v8510_v39 = vld [vmem:[#allocation24 + $0x60] sm:$0xff]  ;;  %4106 = vmatpush.msra.mxu3 %v8504_v63  ;;  %v8524_v4 = vld [vmem:[#allocation24 + $0x28] sm:$0xff] }
0x3120   :  { %4085 = vmatpush.msrb.mxu2 %v8510_v39  ;;  %v8536_v38 = vld [vmem:[#allocation24 + $0x8] sm:$0xff] }
0x3121   :  { %4107 = vmatpush.msra.mxu3 %v8512_v44 }
0x3122   :  { %4086 = vmatpush.msrb.mxu2 %v8514_v12 }
0x3123   :  { %4108 = vmatpush.msra.mxu3 %v8518_v17 }
0x3124   :  { %4087 = vmatpush.msrb.mxu2 %v8520_v1 }
0x3125   :  { %4109 = vmatpush.msra.mxu3 %v8524_v4 }
0x3126   :  { %4088 = vmatpush.msrb.mxu2 %v8526_v7 }
0x3127   :  { %4110 = vmatpush.msra.mxu3 %v8530_v36 }
0x3128   :  { %4089 = vmatpush.msrb.mxu2 %v8532_v60 }
0x3129   :  { %4111 = vmatpush.msra.mxu3 %v8536_v38 }
0x312b   :  { %4295 = vmatpush.msrb.mxu3 %v8284_v8 }
0x312d   :  { %4296 = vmatpush.msrb.mxu3 %v8286_v9  ;;  %v5974_v9 = vmul.f32 -1.442695, %v8488_v24 }
0x312f   :  { %4297 = vmatpush.msrb.mxu3 %v8297_v19 }
0x3131   :  { %4298 = vmatpush.msrb.mxu3 %v8299_v28 }
0x3133   :  { %4299 = vmatpush.msrb.mxu3 %v8302_v29 }
0x3135   :  { %4300 = vmatpush.msrb.mxu3 %v8305_v23 }
0x3137   :  { %4301 = vmatpush.msrb.mxu3 %v8308_v13 }
0x3139   :  { %4302 = vmatpush.msrb.mxu3 %v8311_v58 }
0x3165   :  { %v4016_v54 = vpop.permute.xlu2 %4015 }
0x3166   :  { %v4018_v34 = vmul.f32 %v4016_v54, %v3991_v10  ;;  %v8538_v54 = vld [vmem:[#allocation24 + $0x10] sm:$0xff] }
0x3167   :  { %4090 = vmatpush.msrb.mxu2 %v8538_v54 }
0x3168   :  { %4020 = vrot.lane.b32.xlu1 %v4018_v34, %s7076_s27  ;;  %v4011_v34 = vpop.permute.xlu0 %4010 }
0x3170   :  { %4158 = vrot.lane.b32.xlu1 %v3601_v2, %s7076_s27  ;;  %v4013_v2 = vmul.f32 %v4011_v34, %v3991_v10 }
0x31da   :  { %v4021_v52 = vpop.permute.xlu1 %4020 }
0x31db   :  { %v8548_v7 = vadd.f32 %v4021_v52, %v4013_v2  ;;  %v8557_v52 = vld [vmem:[#allocation24] sm:$0xff] }
0x31dc   :  { %4091 = vmatpush.msrb.mxu2 %v8557_v52 }
0x31dd   :  { %9440 = vst [vmem:[#allocation69_spill] sm:$0xff] %v8548_v7  ;;  %6416 = vtanh.f32 %v8548_v7 }
0x31de   :  { %6418 = vpow2.f32 %v5974_v9 }
0x31e3   :  { %v6417_v8 = vpop.eup %6416 }
0x31e4   :  { %4026 = vrot.lane.b32.xlu2 %v6417_v8, %s7076_s27  ;;  %v6419_v19 = vpop.eup %6418 }
0x31e5   :  { %v3977_v28 = vadd.f32 1.0, %v6419_v19 }
0x31e7   :  { %6420 = vrcp.f32 %v3977_v28  ;;  %v4004_v58 = vand.u32 2147483648, %v3977_v28  ;;  %vm3998_vm7 = vweird.f32 %v3977_v28  ;;  %v4002_v2 = vand.u32 2147483647, %v3977_v28 }
0x31e9   :  { %v4005_v24 = vor.u32 1.1754944e-38, %v4004_v58  ;;  %vm4003_vm1 = vcmp.eq.f32.partialorder %v4002_v2, 8.507059e+37 }
0x31ed   :  { %v6421_v29 = vpop.eup %6420 }
0x31ee   :  { %v3994_v10 = vmul.f32 %v6421_v29, %v3977_v28  ;;  %vm3999_vm2 = vweird.f32 %v6421_v29 }
0x31ef   :  { %vm4000_vm11 = vmor %vm3998_vm7, %vm3999_vm2  ;;  %vm4263_vm2 = vcmask 1043456  }
0x31f0   :  { %v3995_v23 = vsub.f32 1.0, %v3994_v10 }
0x31f2   :  { %v3996_v34 = vmul.f32 %v6421_v29, %v3995_v23 }
0x31f4   :  { %v3997_v13 = vadd.f32 %v6421_v29, %v3996_v34 }
0x31f6   :  { %v4001_v8 = vsel %vm4000_vm11, %v6421_v29, %v3997_v13 }
0x31f7   :  { %v4006_v9 = vsel %vm4003_vm1, %v4005_v24, %v4001_v8 }
0x323e   :  { %v4027_v19 = vpop.permute.xlu2 %4026 }
0x323f   :  { %v8560_v7 = vmul.f32 %v4027_v19, %v4006_v9  ;;  %v8596_v19 = vld [vmem:[%s9443_s24 + $0x38] sm:$0xff] }
0x3240   :  { %4189 = vmatpush.msra.mxu0 %v8596_v19 }
0x3241   :  { %5977 = vmatmul.msk.f32.vlgmr.msrb.gmra.mxu2 %vm438_vm9, %v8560_v7  ;;  %5978 = vmatmul.msk.f32.vlgmr.msra.gmra.mxu3 %vm438_vm9, %v8560_v7 }
0x3242   :  { %4456 = vmatpush.msra.mxu3 %v8244_v22  ;;  %v3697_v22 = vld [vmem:[%s9441_s2] sm:$0x3] }
0x3244   :  { %4457 = vmatpush.msra.mxu3 %v8247_v26  ;;  %v8587_v26 = vperm.slane %v3697_v22, 1 }
0x3246   :  { %4458 = vmatpush.msra.mxu3 %v8252_v46  ;;  %9442 = vst [vmem:[#allocation70_spill] sm:$0xff] %v8587_v26  ;;  %v4070_v46 = vpop.f32.mrf.mxu1 }
0x3248   :  { %4459 = vmatpush.msra.mxu3 %v8255_v5 }
0x3249   :  { %5985 = vmatmul.msk.f32.vlgmr.msrb.gmra.mxu3 %vm438_vm9, %v8478_v56 }
0x324a   :  { %4460 = vmatpush.msra.mxu3 %v8261_v55 }
0x324c   :  { %4461 = vmatpush.msra.mxu3 %v8266_v20 }
0x324e   :  { %4462 = vmatpush.msra.mxu3 %v8269_v49 }
0x3250   :  { %4463 = vmatpush.msra.mxu3 %v8272_v50 }
0x3251   :  { %5992 = vmatmul.msk.f32.vlgmr.msra.gmra.mxu3 %vm438_vm9, %v8560_v7 }
0x3252   :  { %4597 = vmatpush.msrb.mxu3 %v8356_v57  ;;  %v4050_v57 = vpop.f32.mrf.mxu0 }
0x3254   :  { %4598 = vmatpush.msrb.mxu3 %v8362_v11  ;;  %v8591_v11 = vperm.slane %v3697_v22, 0  ;;  %v8599_v22 = vld [vmem:[%s9443_s24 + $0x30] sm:$0xff] }
0x3255   :  { %4190 = vmatpush.msra.mxu0 %v8599_v22 }
0x3256   :  { %4599 = vmatpush.msrb.mxu3 %v8366_v47 }
0x3258   :  { %4600 = vmatpush.msrb.mxu3 %v8372_v59 }
0x325a   :  { %4601 = vmatpush.msrb.mxu3 %v8378_v51 }
0x325c   :  { %4602 = vmatpush.msrb.mxu3 %v8384_v45 }
0x325e   :  { %4603 = vmatpush.msrb.mxu3 %v8395_v30 }
0x3260   :  { %4604 = vmatpush.msrb.mxu3 %v8401_v14 }
0x32c4   :  { %v4113_v5 = vpop.f32.mrf.mxu3  ;;  %v4093_v50 = vpop.f32.mrf.mxu2 }
0x32c5   :  { %v4114_v55 = vadd.f32 %v4113_v5, %v4070_v46  ;;  %v4094_v47 = vadd.f32 %v4093_v50, %v4050_v57  ;;  %v8603_v46 = vld [vmem:[%s9443_s24 + $0x28] sm:$0xff]  ;;  %v8607_v5 = vld [vmem:[%s9443_s24 + $0x20] sm:$0xff]  ;;  %v4159_v57 = vpop.permute.xlu1 %4158 }
0x32c6   :  { %4191 = vmatpush.msra.mxu0 %v8603_v46  ;;  %v8619_v50 = vld [vmem:[%s9443_s24 + $0x8] sm:$0xff] }
0x32c7   :  { %v4117_v20 = vadd.f32 %v4114_v55, %v8587_v26  ;;  %v4116_v59 = vadd.f32 %v4094_v47, %v8591_v11  ;;  %v8611_v55 = vld [vmem:[%s9443_s24 + $0x18] sm:$0xff] }
0x32c8   :  { %4192 = vmatpush.msra.mxu0 %v8607_v5 }
0x32c9   :  { %6422 = vtanh.f32 %v4117_v20  ;;  %v5979_v51 = vmul.f32 -1.442695, %v4116_v59 }
0x32ca   :  { %4193 = vmatpush.msra.mxu0 %v8611_v55 }
0x32cb   :  { %6424 = vpow2.f32 %v5979_v51 }
0x32cf   :  { %v6423_v49 = vpop.eup %6422 }
0x32d0   :  { %4163 = vrot.lane.b32.xlu0 %v6423_v49, %s7076_s27  ;;  %v8615_v49 = vld [vmem:[%s9443_s24 + $0x10] sm:$0xff] }
0x32d1   :  { %v6425_v45 = vpop.eup %6424  ;;  %4194 = vmatpush.msra.mxu0 %v8615_v49 }
0x32d2   :  { %v4124_v30 = vadd.f32 1.0, %v6425_v45 }
0x32d3   :  { %4195 = vmatpush.msra.mxu0 %v8619_v50 }
0x32d4   :  { %6426 = vrcp.f32 %v4124_v30  ;;  %v4137_v34 = vand.u32 2147483648, %v4124_v30  ;;  %vm4131_vm3 = vweird.f32 %v4124_v30  ;;  %v4135_v13 = vand.u32 2147483647, %v4124_v30 }
0x32d6   :  { %v4138_v2 = vor.u32 1.1754944e-38, %v4137_v34  ;;  %vm4136_vm8 = vcmp.eq.f32.partialorder %v4135_v13, 8.507059e+37 }
0x32da   :  { %v6427_v14 = vpop.eup %6426 }
0x32db   :  { %v4127_v28 = vmul.f32 %v6427_v14, %v4124_v30  ;;  %vm4132_vm0 = vweird.f32 %v6427_v14  ;;  %v5980_v30 = vmul.f32 -1.442695, %v4117_v20 }
0x32dc   :  { %vm4133_vm4 = vmor %vm4131_vm3, %vm4132_vm0  ;;  %vm4233_vm0 = vcmask 261120   ;;  %vm4257_vm3 = vcmask 25600  }
0x32dd   :  { %v4128_v29 = vsub.f32 1.0, %v4127_v28 }
0x32df   :  { %v4129_v10 = vmul.f32 %v6427_v14, %v4128_v29  ;;  %v8628_v29 = vld [vmem:[%s9443_s24] sm:$0xff] }
0x32e0   :  { %4196 = vmatpush.msra.mxu0 %v8628_v29 }
0x32e1   :  { %v4130_v23 = vadd.f32 %v6427_v14, %v4129_v10 }
0x32e2   :  { %4365 = vmatpush.msrb.mxu0 %v8315_v31  ;;  %v8647_v31 = vld [vmem:[%s9444_s9] ss:$0 sm:$0xff] }
0x32e3   :  { %v4134_v58 = vsel %vm4133_vm4, %v6427_v14, %v4130_v23  ;;  %9445 = vst [vmem:[#allocation71_spill] sm:$0xff] %v8647_v31  ;;  %vm4259_vm4 = vcmask 31744  }
0x32e4   :  { %v4139_v24 = vsel %vm4136_vm8, %v4138_v2, %v4134_v58 }
0x32e5   :  { %v4161_v47 = vmul.f32 %v4159_v57, %v4139_v24 }
0x3342   :  { %v4164_v8 = vpop.permute.xlu0 %4163 }
0x3343   :  { %v4166_v9 = vmul.f32 %v4164_v8, %v4139_v24 }
0x3345   :  { %4168 = vrot.lane.b32.xlu2 %v4166_v9, %s7076_s27 }
0x339f   :  { %v4169_v59 = vpop.permute.xlu2 %4168 }
0x33a0   :  { %v8623_v51 = vadd.f32 %v4169_v59, %v4161_v47 }
0x33a2   :  { %6428 = vtanh.f32 %v8623_v51 }
0x33a3   :  { %6430 = vpow2.f32 %v5980_v30 }
0x33a8   :  { %v6429_v45 = vpop.eup %6428 }
0x33a9   :  { %4174 = vrot.lane.b32.xlu0 %v6429_v45, %s7076_s27  ;;  %v6431_v14 = vpop.eup %6430 }
0x33aa   :  { %v4125_v28 = vadd.f32 1.0, %v6431_v14 }
0x33ac   :  { %6432 = vrcp.f32 %v4125_v28  ;;  %v4152_v2 = vand.u32 2147483648, %v4125_v28  ;;  %vm4146_vm13 = vweird.f32 %v4125_v28  ;;  %v4150_v8 = vand.u32 2147483647, %v4125_v28 }
0x33ae   :  { %v4153_v24 = vor.u32 1.1754944e-38, %v4152_v2  ;;  %vm4151_vm15 = vcmp.eq.f32.partialorder %v4150_v8, 8.507059e+37  ;;  %v8671_v2 = vld [vmem:[%s7221_s14] sm:$0xff] }
0x33af   :  { %v8675_v8 = vld [vmem:[#allocation20 + $0x78] sm:$0xff] }
0x33b2   :  { %v6433_v10 = vpop.eup %6432 }
0x33b3   :  { %v4142_v23 = vmul.f32 %v6433_v10, %v4125_v28  ;;  %vm4147_vm12 = vweird.f32 %v6433_v10 }
0x33b4   :  { %vm4148_vm14 = vmor %vm4146_vm13, %vm4147_vm12 }
0x33b5   :  { %v4143_v34 = vsub.f32 1.0, %v4142_v23 }
0x33b7   :  { %v4144_v13 = vmul.f32 %v6433_v10, %v4143_v34  ;;  %v8656_v34 = vld [vmem:[%s7221_s14 + $0x18] sm:$0xff] }
0x33b8   :  { %4249 = vmatpush.msrb.mxu1 %v8656_v34  ;;  %4773 = vmatpush.msra.mxu3 %v8656_v34 }
0x33b9   :  { %v4145_v58 = vadd.f32 %v6433_v10, %v4144_v13  ;;  %v8661_v13 = vld [vmem:[%s7221_s14 + $0x10] sm:$0xff] }
0x33ba   :  { %4250 = vmatpush.msrb.mxu1 %v8661_v13  ;;  %4774 = vmatpush.msra.mxu3 %v8661_v13 }
0x33bb   :  { %v4149_v20 = vsel %vm4148_vm14, %v6433_v10, %v4145_v58  ;;  %v8666_v58 = vld [vmem:[%s7221_s14 + $0x8] sm:$0xff] }
0x33bc   :  { %v4154_v9 = vsel %vm4151_vm15, %v4153_v24, %v4149_v20  ;;  %4251 = vmatpush.msrb.mxu1 %v8666_v58  ;;  %4775 = vmatpush.msra.mxu3 %v8666_v58  ;;  %v8679_v20 = vld [vmem:[#allocation20 + $0x68] sm:$0xff]  ;;  %v8683_v24 = vld [vmem:[#allocation20 + $0x58] sm:$0xff] }
0x33be   :  { %4252 = vmatpush.msrb.mxu1 %v8671_v2  ;;  %4776 = vmatpush.msra.mxu3 %v8671_v2 }
0x33c0   :  { %4315 = vmatpush.msra.mxu1 %v8675_v8 }
0x33c2   :  { %4316 = vmatpush.msra.mxu1 %v8679_v20 }
0x33c4   :  { %4317 = vmatpush.msra.mxu1 %v8683_v24 }
0x341b   :  { %v4175_v57 = vpop.permute.xlu0 %4174 }
0x341c   :  { %v8632_v47 = vmul.f32 %v4175_v57, %v4154_v9  ;;  %v8687_v57 = vld [vmem:[#allocation20 + $0x48] sm:$0xff] }
0x341d   :  { %4318 = vmatpush.msra.mxu1 %v8687_v57 }
0x341e   :  { %5981 = vmatmul.msk.f32.vlgmr.msra.gmra.mxu0 %vm438_vm9, %v8632_v47  ;;  %5998 = vmatmul.msk.f32.vlgmr.msrb.gmra.mxu3 %vm438_vm9, %v8632_v47 }
0x341f   :  { %4479 = vmatpush.msra.mxu0 %v8422_v40  ;;  %4834 = vmatpush.msrb.mxu3 %v8675_v8 }
0x3421   :  { %4480 = vmatpush.msra.mxu0 %v8426_v42  ;;  %v7077_v42 = vmov 32.0   ;;  %4835 = vmatpush.msrb.mxu3 %v8679_v20 }
0x3422   :  { %6434 = vrcp.f32 %v7077_v42  ;;  %v8696_v42 = vld [vmem:[#allocation20 + $0x28] sm:$0xff] }
0x3423   :  { %4481 = vmatpush.msra.mxu0 %v8432_v62  ;;  %4836 = vmatpush.msrb.mxu3 %v8683_v24 }
0x3425   :  { %4482 = vmatpush.msra.mxu0 %v8438_v15  ;;  %4837 = vmatpush.msrb.mxu3 %v8687_v57 }
0x3427   :  { %4483 = vmatpush.msra.mxu0 %v8444_v16 }
0x3428   :  { %v6435_v62 = vpop.eup %6434 }
0x3429   :  { %4484 = vmatpush.msra.mxu0 %v8450_v33  ;;  %v4205_v15 = vmul.f32 32.0, %v6435_v62  ;;  %vm4209_vm5 = vweird.f32 %v6435_v62 }
0x342b   :  { %4485 = vmatpush.msra.mxu0 %v8456_v35  ;;  %v4206_v16 = vsub.f32 1.0, %v4205_v15  ;;  %v8705_v15 = vld [vmem:[%s7231_s17] sm:$0xf] }
0x342c   :  { %5983 = vmatpush.msk.msra.mxu2 %vm4263_vm2, %v8705_v15 }
0x342d   :  { %4486 = vmatpush.msra.mxu0 %v8472_v48  ;;  %v4207_v33 = vmul.f32 %v6435_v62, %v4206_v16  ;;  %v8707_v16 = vld [vmem:[#allocation20 + $0x8] sm:$0xff] }
0x342e   :  { %9449 = vst [vmem:[#allocation74_spill] sm:$0xff] %v8707_v16  ;;  %4345 = vmatpush.msrb.mxu2 %v8318_v43 }
0x342f   :  { %v4208_v35 = vadd.f32 %v6435_v62, %v4207_v33 }
0x3431   :  { %v8651_v48 = vsel %vm4209_vm5, %v6435_v62, %v4208_v35  ;;  %v8700_v62 = vld [vmem:[#allocation20 + $0x18] sm:$0xff] }
0x3432   :  { %9446 = vst [vmem:[#allocation72_spill] sm:$0xff] %v8651_v48 }
0x3433   :  { %9447 = vst [vmem:[#allocation73_spill] sm:$0xff] %v8700_v62 }
0x349b   :  { %v4198_v59 = vpop.f32.mrf.mxu0 }
0x349c   :  { %v4199_v45 = vadd.f32 %v8647_v31, %v4198_v59  ;;  %v8718_v31 = vld [vmem:[%s9450_s21] ss:$0 sm:$0xff] }
0x349e   :  { %v4201_v40 = vsel %vm540_vm10, %v4199_v45, 0.0 }
0x349f   :  { %4202 = vadd.xlane.f32.xlu1 %v4201_v40 }
0x3512   :  { %v4203_v30 = vpop.xlane.xlu1 %4202 }
0x3513   :  { %v4211_v14 = vmul.f32 %v8651_v48, %v4203_v30 }
0x3515   :  { %v4212_v28 = vsub.f32 %v4199_v45, %v4211_v14  ;;  %v8692_v45 = vld [vmem:[#allocation20 + $0x38] sm:$0xff] }
0x3516   :  { %4319 = vmatpush.msra.mxu1 %v8692_v45  ;;  %4838 = vmatpush.msrb.mxu3 %v8692_v45 }
0x3517   :  { %v4213_v10 = vmul.f32 %v4212_v28, %v4212_v28 }
0x3518   :  { %4320 = vmatpush.msra.mxu1 %v8696_v42  ;;  %4839 = vmatpush.msrb.mxu3 %v8696_v42 }
0x3519   :  { %v4214_v23 = vsel %vm540_vm10, %v4213_v10, 0.0 }
0x351a   :  { %4215 = vadd.xlane.f32.xlu2 %v4214_v23  ;;  %4321 = vmatpush.msra.mxu1 %v8700_v62 }
0x351b   :  { %4840 = vmatpush.msrb.mxu3 %v8700_v62 }
0x351c   :  { %4322 = vmatpush.msra.mxu1 %v8707_v16 }
0x351d   :  { %4841 = vmatpush.msrb.mxu3 %v8707_v16 }
0x358d   :  { %v4216_v9 = vpop.xlane.xlu2 %4215 }
0x358e   :  { %v4217_v59 = vmul.f32 %v4216_v9, %v8651_v48  ;;  %v8715_v9 = vld [vmem:[%s9448_s7] ss:$0 sm:$0xff] }
0x3590   :  { %v4218_v40 = vadd.f32 1e-05, %v4217_v59 }
0x3592   :  { %6436 = vrsqrt.f32 %v4218_v40  ;;  %vm4225_vm11 = vweird.f32 %v4218_v40 }
0x3598   :  { %v6437_v33 = vpop.eup %6436 }
0x3599   :  { %v4220_v35 = vmul.f32 %v6437_v33, %v4218_v40  ;;  %vm4226_vm7 = vweird.f32 %v6437_v33 }
0x359a   :  { %vm4227_vm1 = vmor %vm4225_vm11, %vm4226_vm7 }
0x359b   :  { %v4221_v30 = vmul.f32 %v6437_v33, %v4220_v35 }
0x359d   :  { %v4222_v14 = vmul.f32 0.5, %v4221_v30 }
0x359f   :  { %v4223_v10 = vsub.f32 1.5, %v4222_v14 }
0x35a1   :  { %v4224_v23 = vmul.f32 %v6437_v33, %v4223_v10 }
0x35a3   :  { %v4228_v59 = vsel %vm4227_vm1, %v6437_v33, %v4224_v23 }
0x35a4   :  { %v4229_v48 = vmul.f32 %v4228_v59, %v4212_v28  ;;  %v4304_v28 = vpop.f32.mrf.mxu3 }
0x35a6   :  { %v4230_v62 = vmul.f32 %v8715_v9, %v4229_v48 }
0x35a8   :  { %v4231_v43 = vadd.f32 %v8718_v31, %v4230_v62  ;;  %v9468_v62 = vld [vmem:[#allocation64_spill] sm:$0xff] }
0x35aa   :  { %v4232_v16 = vmax.f32 %v4231_v43, 0.0 }
0x35ac   :  { %5982 = vmatmul.msk.f32.vlgmr.msrb.gmra.mxu1 %vm4233_vm0, %v4232_v16 }
0x35ad   :  { %4499 = vmatpush.msrb.mxu1 %v8424_v41 }
0x35af   :  { %4500 = vmatpush.msrb.mxu1 %v8430_v61  ;;  %v9451_v61 = vld [vmem:[#allocation48_spill] sm:$0xff] }
0x35b1   :  { %4501 = vmatpush.msrb.mxu1 %v8434_v3  ;;  %v9452_v3 = vld [vmem:[#allocation49_spill] sm:$0xff] }
0x35b3   :  { %4502 = vmatpush.msrb.mxu1 %v8440_v0  ;;  %v9453_v0 = vld [vmem:[#allocation50_spill] sm:$0xff] }
0x35b4   :  { %5986 = vmatmul.msk.f32.vlgmr.msra.gmra.mxu1 %vm438_vm9, %v8478_v56  ;;  %v8742_v56 = vld [vmem:[%s7226_s13] ss:$0 sm:$0xff] }
0x35b5   :  { %4503 = vmatpush.msrb.mxu1 %v8446_v32  ;;  %v9454_v32 = vld [vmem:[#allocation51_spill] sm:$0xff] }
0x35b7   :  { %4504 = vmatpush.msrb.mxu1 %v8452_v53  ;;  %v9455_v53 = vld [vmem:[#allocation52_spill] sm:$0xff] }
0x35b9   :  { %4505 = vmatpush.msrb.mxu1 %v8458_v21  ;;  %v9456_v21 = vld [vmem:[#allocation53_spill] sm:$0xff] }
0x35bb   :  { %4506 = vmatpush.msrb.mxu1 %v8474_v27 }
0x35bd   :  { %4640 = vmatpush.msra.mxu1 %v8499_v18  ;;  %v9457_v18 = vld [vmem:[#allocation54_spill] sm:$0xff] }
0x35bf   :  { %4641 = vmatpush.msra.mxu1 %v8501_v25 }
0x35c1   :  { %4642 = vmatpush.msra.mxu1 %v8504_v63  ;;  %v9459_v63 = vld [vmem:[#allocation56_spill] sm:$0xff] }
0x35c3   :  { %4643 = vmatpush.msra.mxu1 %v8512_v44  ;;  %v9460_v44 = vld [vmem:[#allocation57_spill] sm:$0xff] }
0x35c5   :  { %4644 = vmatpush.msra.mxu1 %v8518_v17  ;;  %v9461_v17 = vld [vmem:[#allocation58_spill] sm:$0xff] }
0x35c7   :  { %4645 = vmatpush.msra.mxu1 %v8524_v4  ;;  %v9462_v4 = vld [vmem:[#allocation59_spill] sm:$0xff] }
0x35c9   :  { %4646 = vmatpush.msra.mxu1 %v8530_v36  ;;  %v9463_v36 = vld [vmem:[#allocation68_spill] sm:$0xff] }
0x35cb   :  { %4647 = vmatpush.msra.mxu1 %v8536_v38 }
0x3629   :  { %v4254_v41 = vpop.f32.mrf.mxu1 }
0x362a   :  { %v4255_v27 = vadd.f32 %v8742_v56, %v4254_v41 }
0x362c   :  { %4258 = vst.msk [vmem:[%s7236_s5] sm:$0x3] %vm4257_vm3, %v4255_v27  ;;  %5984 = vmatmul.msk.f32.vlgmr.msra.gmra.mxu2 %vm4259_vm4, %v4255_v27 }
0x362d   :  { %4436 = vmatpush.msra.mxu2 %v8322_v6  ;;  %v9458_v6 = vld [vmem:[#allocation55_spill] sm:$0xff] }
0x362f   :  { %4437 = vmatpush.msra.mxu2 %v9451_v61 }
0x3631   :  { %4438 = vmatpush.msra.mxu2 %v9452_v3 }
0x3633   :  { %4439 = vmatpush.msra.mxu2 %v9453_v0 }
0x3635   :  { %4440 = vmatpush.msra.mxu2 %v9454_v32 }
0x3637   :  { %4441 = vmatpush.msra.mxu2 %v9455_v53 }
0x3639   :  { %4442 = vmatpush.msra.mxu2 %v9456_v21  ;;  %v9469_v21 = vld [vmem:[#allocation65_spill] sm:$0xff] }
0x363b   :  { %4443 = vmatpush.msra.mxu2 %v9457_v18 }
0x36af   :  { %v4284_v25 = vpop.f32.mrf.mxu2 }
0x36b0   :  { %5987 = vmatmul.msk.f32.vlgmr.msrb.gmra.mxu2 %vm3776_vm6, %v4284_v25  ;;  %5988 = vmatmul.msk.f32.vlgmr.msrb.gmra.mxu0 %vm3776_vm6, %v4284_v25 }
0x36b1   :  { %4577 = vmatpush.msrb.mxu2 %v9458_v6  ;;  %4620 = vmatpush.msrb.mxu0 %v8506_v37  ;;  %v9464_v37 = vld [vmem:[#allocation60_spill] sm:$0xff] }
0x36b3   :  { %4578 = vmatpush.msrb.mxu2 %v9459_v63  ;;  %4621 = vmatpush.msrb.mxu0 %v8510_v39  ;;  %v9465_v39 = vld [vmem:[#allocation61_spill] sm:$0xff] }
0x36b5   :  { %4579 = vmatpush.msrb.mxu2 %v9460_v44  ;;  %4622 = vmatpush.msrb.mxu0 %v8514_v12  ;;  %v9466_v12 = vld [vmem:[#allocation62_spill] sm:$0xff] }
0x36b7   :  { %4580 = vmatpush.msrb.mxu2 %v9461_v17  ;;  %4623 = vmatpush.msrb.mxu0 %v8520_v1  ;;  %v8786_v1 = vld [vmem:[#allocation18 + $0x8] sm:$0xff] }
0x36b8   :  { %5991 = vmatmul.msk.f32.vlgmr.msra.gmra.mxu2 %vm438_vm9, %v8560_v7  ;;  %v4324_v7 = vpop.f32.mrf.mxu1 }
0x36b9   :  { %4581 = vmatpush.msrb.mxu2 %v9462_v4  ;;  %4624 = vmatpush.msrb.mxu0 %v9463_v36 }
0x36bb   :  { %4582 = vmatpush.msrb.mxu2 %v9464_v37  ;;  %4625 = vmatpush.msrb.mxu0 %v8532_v60 }
0x36bd   :  { %4583 = vmatpush.msrb.mxu2 %v9465_v39  ;;  %4626 = vmatpush.msrb.mxu0 %v8538_v54  ;;  %v9467_v54 = vld [vmem:[#allocation63_spill] sm:$0xff] }
0x36bf   :  { %4584 = vmatpush.msrb.mxu2 %v9466_v12  ;;  %4627 = vmatpush.msrb.mxu0 %v8557_v52 }
0x36c0   :  { %5997 = vmatmul.msk.f32.vlgmr.msrb.gmra.mxu2 %vm438_vm9, %v8632_v47 }
0x36c1   :  { %4721 = vmatpush.msra.mxu2 %v8596_v19 }
0x36c3   :  { %4722 = vmatpush.msra.mxu2 %v8599_v22 }
0x36c5   :  { %4723 = vmatpush.msra.mxu2 %v8603_v46 }
0x36c7   :  { %4724 = vmatpush.msra.mxu2 %v8607_v5 }
0x36c9   :  { %4725 = vmatpush.msra.mxu2 %v8611_v55 }
0x36cb   :  { %4726 = vmatpush.msra.mxu2 %v8615_v49 }
0x36cd   :  { %4727 = vmatpush.msra.mxu2 %v8619_v50 }
0x36cf   :  { %4728 = vmatpush.msra.mxu2 %v8628_v29 }
0x36d1   :  { %4884 = vmatpush.msrb.mxu2 %v8786_v1 }
0x372d   :  { %v4367_v60 = vpop.f32.mrf.mxu0 }
0x372e   :  { %v4368_v38 = vadd.f32 %v4367_v60, %v4324_v7 }
0x3730   :  { %v4371_v52 = vadd.f32 %v4368_v38, %v9467_v54 }
0x3732   :  { %6438 = vtanh.f32 %v4371_v52  ;;  %v5990_v44 = vmul.f32 -1.442695, %v4371_v52 }
0x3733   :  { %v4347_v48 = vpop.f32.mrf.mxu2 }
0x3734   :  { %v4348_v40 = vadd.f32 %v4347_v48, %v4304_v28 }
0x3736   :  { %v4370_v16 = vadd.f32 %v4348_v40, %v9468_v62 }
0x3738   :  { %v6439_v47 = vpop.eup %6438  ;;  %v5989_v33 = vmul.f32 -1.442695, %v4370_v16  ;;  %v8804_v16 = vld [vmem:[#allocation20 + $0x70] sm:$0xff] }
0x3739   :  { %4413 = vrot.lane.b32.xlu0 %v6439_v47, %s7076_s27 }
0x373a   :  { %6440 = vpow2.f32 %v5989_v33  ;;  %v8809_v33 = vld [vmem:[#allocation20 + $0x60] sm:$0xff] }
0x3740   :  { %v6441_v35 = vpop.eup %6440 }
0x3741   :  { %v4378_v30 = vadd.f32 1.0, %v6441_v35  ;;  %v8812_v35 = vld [vmem:[#allocation20 + $0x50] sm:$0xff] }
0x3743   :  { %6442 = vrcp.f32 %v4378_v30  ;;  %v4391_v41 = vand.u32 2147483648, %v4378_v30  ;;  %vm4385_vm12 = vweird.f32 %v4378_v30  ;;  %v4389_v27 = vand.u32 2147483647, %v4378_v30 }
0x3745   :  { %v4392_v3 = vor.u32 1.1754944e-38, %v4391_v41  ;;  %vm4390_vm14 = vcmp.eq.f32.partialorder %v4389_v27, 8.507059e+37 }
0x3749   :  { %v6443_v14 = vpop.eup %6442 }
0x374a   :  { %v4381_v10 = vmul.f32 %v6443_v14, %v4378_v30  ;;  %vm4386_vm8 = vweird.f32 %v6443_v14  ;;  %v8815_v30 = vld [vmem:[#allocation20 + $0x40] sm:$0xff] }
0x374b   :  { %vm4387_vm13 = vmor %vm4385_vm12, %vm4386_vm8 }
0x374c   :  { %v4382_v23 = vsub.f32 1.0, %v4381_v10  ;;  %v8821_v10 = vld [vmem:[#allocation20 + $0x20] sm:$0xff] }
0x374e   :  { %v4383_v59 = vmul.f32 %v6443_v14, %v4382_v23  ;;  %v8824_v23 = vld [vmem:[#allocation20 + $0x10] sm:$0xff] }
0x3750   :  { %v4384_v43 = vadd.f32 %v6443_v14, %v4383_v59  ;;  %v8827_v59 = vld [vmem:[#allocation20] sm:$0xff] }
0x3752   :  { %v4388_v61 = vsel %vm4387_vm13, %v6443_v14, %v4384_v43  ;;  %v8818_v14 = vld [vmem:[#allocation20 + $0x30] sm:$0xff]  ;;  %v4465_v43 = vpop.f32.mrf.mxu3 }
0x3753   :  { %v4393_v32 = vsel %vm4390_vm14, %v4392_v3, %v4388_v61  ;;  %v9470_v61 = vld [vmem:[#allocation66_spill] sm:$0xff] }
0x3754   :  { %v4411_v18 = vmul.f32 %v4393_v32, %v9469_v21 }
0x37ab   :  { %v4414_v0 = vpop.permute.xlu0 %4413 }
0x37ac   :  { %v4416_v53 = vmul.f32 %v4414_v0, %v4393_v32 }
0x37ae   :  { %4418 = vrot.lane.b32.xlu0 %v4416_v53, %s7076_s27  ;;  %v4445_v53 = vpop.f32.mrf.mxu2 }
0x3820   :  { %v4419_v25 = vpop.permute.xlu0 %4418 }
0x3821   :  { %v8794_v6 = vadd.f32 %v4419_v25, %v4411_v18  ;;  %v9471_v18 = vld [vmem:[#allocation67_spill] sm:$0xff] }
0x3823   :  { %6444 = vtanh.f32 %v8794_v6 }
0x3824   :  { %6446 = vpow2.f32 %v5990_v44 }
0x3829   :  { %v6445_v63 = vpop.eup %6444 }
0x382a   :  { %4424 = vrot.lane.b32.xlu0 %v6445_v63, %s7076_s27  ;;  %v6447_v17 = vpop.eup %6446 }
0x382b   :  { %v4379_v4 = vadd.f32 1.0, %v6447_v17 }
0x382d   :  { %6448 = vrcp.f32 %v4379_v4  ;;  %v4406_v60 = vand.u32 2147483648, %v4379_v4  ;;  %vm4400_vm5 = vweird.f32 %v4379_v4  ;;  %v4404_v38 = vand.u32 2147483647, %v4379_v4 }
0x382f   :  { %v4407_v48 = vor.u32 1.1754944e-38, %v4406_v60  ;;  %vm4405_vm11 = vcmp.eq.f32.partialorder %v4404_v38, 8.507059e+37 }
0x3833   :  { %v6449_v36 = vpop.eup %6448 }
0x3834   :  { %v4396_v37 = vmul.f32 %v6449_v36, %v4379_v4  ;;  %vm4401_vm15 = vweird.f32 %v6449_v36 }
0x3835   :  { %vm4402_vm7 = vmor %vm4400_vm5, %vm4401_vm15 }
0x3836   :  { %v4397_v39 = vsub.f32 1.0, %v4396_v37 }
0x3838   :  { %v4398_v12 = vmul.f32 %v6449_v36, %v4397_v39 }
0x383a   :  { %v4399_v7 = vadd.f32 %v6449_v36, %v4398_v12 }
0x383c   :  { %v4403_v47 = vsel %vm4402_vm7, %v6449_v36, %v4399_v7 }
0x383d   :  { %v4408_v28 = vsel %vm4405_vm11, %v4407_v48, %v4403_v47 }
0x389c   :  { %v4425_v40 = vpop.permute.xlu0 %4424 }
0x389d   :  { %v8798_v52 = vmul.f32 %v4425_v40, %v4408_v28 }
0x389f   :  { %5993 = vmatmul.msk.f32.vlgmr.msra.gmra.mxu0 %vm438_vm9, %v8798_v52  ;;  %5994 = vmatmul.msk.f32.vlgmr.msrb.gmra.mxu1 %vm438_vm9, %v8798_v52 }
0x38a0   :  { %4814 = vmatpush.msrb.mxu1 %v8804_v16  ;;  %6006 = vmatpush.msk.msra.mxu0 %vm4263_vm2, %v8705_v15 }
0x38a2   :  { %4815 = vmatpush.msrb.mxu1 %v8809_v33 }
0x38a4   :  { %4816 = vmatpush.msrb.mxu1 %v8812_v35 }
0x38a6   :  { %4817 = vmatpush.msrb.mxu1 %v8815_v30 }
0x38a8   :  { %4818 = vmatpush.msrb.mxu1 %v8818_v14 }
0x38aa   :  { %4819 = vmatpush.msrb.mxu1 %v8821_v10 }
0x38ac   :  { %4820 = vmatpush.msrb.mxu1 %v8824_v23 }
0x38ae   :  { %4821 = vmatpush.msrb.mxu1 %v8827_v59 }
0x391c   :  { %v4508_v41 = vpop.f32.mrf.mxu1  ;;  %v4488_v32 = vpop.f32.mrf.mxu0 }
0x391d   :  { %v4509_v27 = vadd.f32 %v4508_v41, %v4465_v43  ;;  %v4489_v21 = vadd.f32 %v4488_v32, %v4445_v53  ;;  %v9472_v43 = vld [vmem:[#allocation69_spill] sm:$0xff] }
0x391f   :  { %v4512_v3 = vadd.f32 %v4509_v27, %v9470_v61  ;;  %v4511_v25 = vadd.f32 %v4489_v21, %v9471_v18 }
0x3921   :  { %6450 = vtanh.f32 %v4512_v3  ;;  %v5995_v63 = vmul.f32 -1.442695, %v4511_v25  ;;  %v5996_v53 = vmul.f32 -1.442695, %v4512_v3 }
0x3923   :  { %6452 = vpow2.f32 %v5995_v63 }
0x3927   :  { %v6451_v0 = vpop.eup %6450 }
0x3928   :  { %4554 = vrot.lane.b32.xlu0 %v6451_v0, %s7076_s27 }
0x3929   :  { %v6453_v44 = vpop.eup %6452 }
0x392a   :  { %v4519_v17 = vadd.f32 1.0, %v6453_v44 }
0x392c   :  { %6454 = vrcp.f32 %v4519_v17  ;;  %v4532_v7 = vand.u32 2147483648, %v4519_v17  ;;  %vm4526_vm8 = vweird.f32 %v4519_v17  ;;  %v4530_v60 = vand.u32 2147483647, %v4519_v17 }
0x392e   :  { %v4533_v47 = vor.u32 1.1754944e-38, %v4532_v7  ;;  %vm4531_vm13 = vcmp.eq.f32.partialorder %v4530_v60, 8.507059e+37 }
0x3932   :  { %v6455_v4 = vpop.eup %6454 }
0x3933   :  { %v4522_v36 = vmul.f32 %v6455_v4, %v4519_v17  ;;  %vm4527_vm1 = vweird.f32 %v6455_v4 }
0x3934   :  { %vm4528_vm12 = vmor %vm4526_vm8, %vm4527_vm1 }
0x3935   :  { %v4523_v37 = vsub.f32 1.0, %v4522_v36 }
0x3937   :  { %v4524_v39 = vmul.f32 %v6455_v4, %v4523_v37 }
0x3939   :  { %v4525_v12 = vadd.f32 %v6455_v4, %v4524_v39 }
0x393b   :  { %v4529_v38 = vsel %vm4528_vm12, %v6455_v4, %v4525_v12 }
0x393c   :  { %v4534_v28 = vsel %vm4531_vm13, %v4533_v47, %v4529_v38  ;;  %v8845_v47 = vld [vmem:[#allocation23 + $0x78] sm:$0xff] }
0x393d   :  { %v4552_v41 = vmul.f32 %v4534_v28, %v9472_v43  ;;  %v8857_v43 = vld [vmem:[#allocation23 + $0x48] sm:$0xff] }
0x399a   :  { %v4555_v48 = vpop.permute.xlu0 %4554 }
0x399b   :  { %v4557_v40 = vmul.f32 %v4555_v48, %v4534_v28  ;;  %v8848_v48 = vld [vmem:[#allocation18] sm:$0xff]  ;;  %v8851_v28 = vld [vmem:[#allocation23 + $0x68] sm:$0xff] }
0x399d   :  { %4559 = vrot.lane.b32.xlu0 %v4557_v40, %s7076_s27  ;;  %v8854_v40 = vld [vmem:[#allocation23 + $0x58] sm:$0xff] }
0x3a0f   :  { %v4560_v27 = vpop.permute.xlu0 %4559 }
0x3a10   :  { %v8835_v0 = vadd.f32 %v4560_v27, %v4552_v41  ;;  %v8862_v41 = vld [vmem:[#allocation23 + $0x38] sm:$0xff]  ;;  %v8865_v27 = vld [vmem:[#allocation23 + $0x28] sm:$0xff] }
0x3a12   :  { %6456 = vtanh.f32 %v8835_v0 }
0x3a13   :  { %6458 = vpow2.f32 %v5996_v53  ;;  %v8871_v53 = vld [vmem:[#allocation23 + $0x8] sm:$0xff] }
0x3a18   :  { %v6457_v32 = vpop.eup %6456 }
0x3a19   :  { %4565 = vrot.lane.b32.xlu2 %v6457_v32, %s7076_s27  ;;  %v6459_v21 = vpop.eup %6458  ;;  %v8868_v32 = vld [vmem:[#allocation23 + $0x18] sm:$0xff] }
0x3a1a   :  { %v4520_v25 = vadd.f32 1.0, %v6459_v21  ;;  %v8876_v21 = vld [vmem:[#allocation26 + $0x78] sm:$0xff] }
0x3a1c   :  { %6460 = vrcp.f32 %v4520_v25  ;;  %v4547_v37 = vand.u32 2147483648, %v4520_v25  ;;  %vm4541_vm15 = vweird.f32 %v4520_v25  ;;  %v4545_v39 = vand.u32 2147483647, %v4520_v25 }
0x3a1e   :  { %v4548_v7 = vor.u32 1.1754944e-38, %v4547_v37  ;;  %vm4546_vm7 = vcmp.eq.f32.partialorder %v4545_v39, 8.507059e+37  ;;  %v8897_v37 = vld [vmem:[#allocation26 + $0x8] sm:$0xff]  ;;  %v4606_v39 = vpop.f32.mrf.mxu3 }
0x3a1f   :  { %9479 = vst [vmem:[#allocation54_spill] sm:$0xff] %v8897_v37 }
0x3a22   :  { %v6461_v63 = vpop.eup %6460 }
0x3a23   :  { %v4537_v44 = vmul.f32 %v6461_v63, %v4520_v25  ;;  %vm4542_vm14 = vweird.f32 %v6461_v63  ;;  %v8879_v25 = vld [vmem:[#allocation26 + $0x68] sm:$0xff] }
0x3a24   :  { %vm4543_vm5 = vmor %vm4541_vm15, %vm4542_vm14  ;;  %9473 = vst [vmem:[#allocation48_spill] sm:$0xff] %v8879_v25 }
0x3a25   :  { %v4538_v17 = vsub.f32 1.0, %v4537_v44  ;;  %v8885_v44 = vld [vmem:[#allocation26 + $0x48] sm:$0xff] }
0x3a26   :  { %9475 = vst [vmem:[#allocation50_spill] sm:$0xff] %v8885_v44 }
0x3a27   :  { %v4539_v4 = vmul.f32 %v6461_v63, %v4538_v17  ;;  %v8888_v17 = vld [vmem:[#allocation26 + $0x38] sm:$0xff] }
0x3a28   :  { %9476 = vst [vmem:[#allocation51_spill] sm:$0xff] %v8888_v17 }
0x3a29   :  { %v4540_v36 = vadd.f32 %v6461_v63, %v4539_v4  ;;  %v8891_v4 = vld [vmem:[#allocation26 + $0x28] sm:$0xff] }
0x3a2a   :  { %9477 = vst [vmem:[#allocation52_spill] sm:$0xff] %v8891_v4 }
0x3a2b   :  { %v4544_v12 = vsel %vm4543_vm5, %v6461_v63, %v4540_v36  ;;  %v8882_v63 = vld [vmem:[#allocation26 + $0x58] sm:$0xff] }
0x3a2c   :  { %v4549_v60 = vsel %vm4546_vm7, %v4548_v7, %v4544_v12  ;;  %9474 = vst [vmem:[#allocation49_spill] sm:$0xff] %v8882_v63  ;;  %v8894_v36 = vld [vmem:[#allocation26 + $0x18] sm:$0xff] }
0x3a2d   :  { %9478 = vst [vmem:[#allocation53_spill] sm:$0xff] %v8894_v36 }
0x3a73   :  { %v4566_v38 = vpop.permute.xlu2 %4565 }
0x3a74   :  { %v8839_v3 = vmul.f32 %v4566_v38, %v4549_v60 }
0x3a76   :  { %5999 = vmatmul.msk.f32.vlgmr.msrb.gmra.mxu0 %vm438_vm9, %v8839_v3  ;;  %6000 = vmatmul.msk.f32.vlgmr.msra.gmra.mxu1 %vm438_vm9, %v8839_v3 }
0x3a77   :  { %4975 = vmatpush.msra.mxu1 %v8845_v47  ;;  %4864 = vmatpush.msrb.mxu0 %v8848_v48 }
0x3a79   :  { %4976 = vmatpush.msra.mxu1 %v8851_v28 }
0x3a7b   :  { %4977 = vmatpush.msra.mxu1 %v8854_v40 }
0x3a7d   :  { %4978 = vmatpush.msra.mxu1 %v8857_v43 }
0x3a7e   :  { %6008 = vmatmul.msk.f32.vlgmr.msrb.gmra.mxu1 %vm438_vm9, %v8798_v52 }
0x3a7f   :  { %4979 = vmatpush.msra.mxu1 %v8862_v41 }
0x3a81   :  { %4980 = vmatpush.msra.mxu1 %v8865_v27 }
0x3a83   :  { %4981 = vmatpush.msra.mxu1 %v8868_v32 }
0x3a85   :  { %4982 = vmatpush.msra.mxu1 %v8871_v53 }
0x3a86   :  { %6015 = vmatmul.msk.f32.vlgmr.msra.gmra.mxu1 %vm438_vm9, %v8839_v3 }
0x3a87   :  { %5116 = vmatpush.msrb.mxu1 %v8876_v21 }
0x3a89   :  { %5117 = vmatpush.msrb.mxu1 %v8879_v25 }
0x3a8b   :  { %5118 = vmatpush.msrb.mxu1 %v8882_v63 }
0x3a8d   :  { %5119 = vmatpush.msrb.mxu1 %v8885_v44 }
0x3a8f   :  { %5120 = vmatpush.msrb.mxu1 %v8888_v17 }
0x3a91   :  { %5121 = vmatpush.msrb.mxu1 %v8891_v4  ;;  %v4586_v4 = vpop.f32.mrf.mxu2 }
0x3a93   :  { %5122 = vmatpush.msrb.mxu1 %v8894_v36 }
0x3a95   :  { %5123 = vmatpush.msrb.mxu1 %v8897_v37 }
0x3a97   :  { %5292 = vmatpush.msra.mxu1 %v8656_v34 }
0x3a99   :  { %5293 = vmatpush.msra.mxu1 %v8661_v13 }
0x3a9b   :  { %5294 = vmatpush.msra.mxu1 %v8666_v58 }
0x3a9d   :  { %5295 = vmatpush.msra.mxu1 %v8671_v2 }
0x3af3   :  { %v4649_v12 = vpop.f32.mrf.mxu1  ;;  %v4629_v36 = vpop.f32.mrf.mxu0 }
0x3af4   :  { %v4650_v7 = vadd.f32 %v4649_v12, %v4606_v39  ;;  %v4630_v37 = vadd.f32 %v4629_v36, %v4586_v4 }
0x3af6   :  { %v4653_v60 = vadd.f32 %v4650_v7, %v8587_v26  ;;  %v4652_v34 = vadd.f32 %v4630_v37, %v8591_v11 }
0x3af8   :  { %6462 = vtanh.f32 %v4653_v60  ;;  %v6001_v17 = vmul.f32 -1.442695, %v4652_v34 }
0x3afa   :  { %6464 = vpow2.f32 %v6001_v17 }
0x3afe   :  { %v6463_v38 = vpop.eup %6462 }
0x3aff   :  { %4695 = vrot.lane.b32.xlu1 %v6463_v38, %s7076_s27 }
0x3b00   :  { %v6465_v13 = vpop.eup %6464 }
0x3b01   :  { %v4660_v58 = vadd.f32 1.0, %v6465_v13 }
0x3b03   :  { %6466 = vrcp.f32 %v4660_v58  ;;  %v4673_v7 = vand.u32 2147483648, %v4660_v58  ;;  %vm4667_vm1 = vweird.f32 %v4660_v58  ;;  %v4671_v26 = vand.u32 2147483647, %v4660_v58 }
0x3b05   :  { %v4674_v25 = vor.u32 1.1754944e-38, %v4673_v7  ;;  %vm4672_vm12 = vcmp.eq.f32.partialorder %v4671_v26, 8.507059e+37 }
0x3b09   :  { %v6467_v2 = vpop.eup %6466 }
0x3b0a   :  { %v4663_v44 = vmul.f32 %v6467_v2, %v4660_v58  ;;  %vm4668_vm11 = vweird.f32 %v6467_v2 }
0x3b0b   :  { %vm4669_vm8 = vmor %vm4667_vm1, %vm4668_vm11 }
0x3b0c   :  { %v4664_v63 = vsub.f32 1.0, %v4663_v44  ;;  %v6002_v44 = vmul.f32 -1.442695, %v4653_v60 }
0x3b0e   :  { %v4665_v39 = vmul.f32 %v6467_v2, %v4664_v63 }
0x3b10   :  { %v4666_v12 = vadd.f32 %v6467_v2, %v4665_v39 }
0x3b12   :  { %v4670_v38 = vsel %vm4669_vm8, %v6467_v2, %v4666_v12 }
0x3b13   :  { %v4675_v36 = vsel %vm4672_vm12, %v4674_v25, %v4670_v38 }
0x3b14   :  { %v4693_v17 = vmul.f32 %v4675_v36, %v8623_v51 }
0x3b71   :  { %v4696_v4 = vpop.permute.xlu1 %4695 }
0x3b72   :  { %v4698_v37 = vmul.f32 %v4696_v4, %v4675_v36 }
0x3b74   :  { %4700 = vrot.lane.b32.xlu0 %v4698_v37, %s7076_s27 }
0x3be6   :  { %v4701_v34 = vpop.permute.xlu0 %4700 }
0x3be7   :  { %v8909_v13 = vadd.f32 %v4701_v34, %v4693_v17  ;;  %v8919_v34 = vld [vmem:[#allocation21 + $0x70] sm:$0xff] }
0x3be9   :  { %6468 = vtanh.f32 %v8909_v13 }
0x3bea   :  { %6470 = vpow2.f32 %v6002_v44  ;;  %v8927_v44 = vld [vmem:[#allocation21 + $0x50] sm:$0xff] }
0x3bef   :  { %v6469_v63 = vpop.eup %6468 }
0x3bf0   :  { %4706 = vrot.lane.b32.xlu0 %v6469_v63, %s7076_s27  ;;  %v6471_v58 = vpop.eup %6470  ;;  %v8923_v63 = vld [vmem:[#allocation21 + $0x60] sm:$0xff] }
0x3bf1   :  { %v4661_v2 = vadd.f32 1.0, %v6471_v58  ;;  %v8931_v58 = vld [vmem:[#allocation21 + $0x40] sm:$0xff] }
0x3bf3   :  { %6472 = vrcp.f32 %v4661_v2  ;;  %v4688_v51 = vand.u32 2147483648, %v4661_v2  ;;  %vm4682_vm14 = vweird.f32 %v4661_v2  ;;  %v4686_v38 = vand.u32 2147483647, %v4661_v2 }
0x3bf5   :  { %v4689_v36 = vor.u32 1.1754944e-38, %v4688_v51  ;;  %vm4687_vm5 = vcmp.eq.f32.partialorder %v4686_v38, 8.507059e+37 }
0x3bf9   :  { %v6473_v26 = vpop.eup %6472 }
0x3bfa   :  { %v4678_v25 = vmul.f32 %v6473_v26, %v4661_v2  ;;  %vm4683_vm13 = vweird.f32 %v6473_v26  ;;  %v8935_v2 = vld [vmem:[#allocation21 + $0x30] sm:$0xff] }
0x3bfb   :  { %vm4684_vm15 = vmor %vm4682_vm14, %vm4683_vm13 }
0x3bfc   :  { %v4679_v39 = vsub.f32 1.0, %v4678_v25 }
0x3bfe   :  { %v4680_v12 = vmul.f32 %v6473_v26, %v4679_v39 }
0x3c00   :  { %v4681_v7 = vadd.f32 %v6473_v26, %v4680_v12 }
0x3c02   :  { %v4685_v4 = vsel %vm4684_vm15, %v6473_v26, %v4681_v7  ;;  %v8947_v26 = vld [vmem:[#allocation21] sm:$0xff] }
0x3c03   :  { %v4690_v37 = vsel %vm4687_vm5, %v4689_v36, %v4685_v4  ;;  %9482 = vst [vmem:[#allocation56_spill] sm:$0xff] %v8947_v26 }
0x3c62   :  { %v4707_v17 = vpop.permute.xlu0 %4706 }
0x3c63   :  { %v8913_v60 = vmul.f32 %v4707_v17, %v4690_v37 }
0x3c65   :  { %6003 = vmatmul.msk.f32.vlgmr.msra.gmra.mxu2 %vm438_vm9, %v8913_v60  ;;  %6021 = vmatmul.msk.f32.vlgmr.msrb.gmra.mxu1 %vm438_vm9, %v8913_v60 }
0x3c66   :  { %4998 = vmatpush.msra.mxu2 %v8919_v34  ;;  %5353 = vmatpush.msrb.mxu1 %v8675_v8  ;;  %v8939_v8 = vld [vmem:[#allocation21 + $0x20] sm:$0xff] }
0x3c68   :  { %4999 = vmatpush.msra.mxu2 %v8923_v63  ;;  %5354 = vmatpush.msrb.mxu1 %v8679_v20  ;;  %v8943_v20 = vld [vmem:[#allocation21 + $0x10] sm:$0xff] }
0x3c69   :  { %9480 = vst [vmem:[#allocation55_spill] sm:$0xff] %v8943_v20 }
0x3c6a   :  { %5000 = vmatpush.msra.mxu2 %v8927_v44  ;;  %5355 = vmatpush.msrb.mxu1 %v8683_v24  ;;  %v9481_v24 = vld [vmem:[#allocation73_spill] sm:$0xff] }
0x3c6c   :  { %5001 = vmatpush.msra.mxu2 %v8931_v58  ;;  %5356 = vmatpush.msrb.mxu1 %v8687_v57  ;;  %v9483_v57 = vld [vmem:[#allocation74_spill] sm:$0xff] }
0x3c6e   :  { %5002 = vmatpush.msra.mxu2 %v8935_v2  ;;  %5357 = vmatpush.msrb.mxu1 %v8692_v45  ;;  %v9484_v45 = vld [vmem:[#allocation71_spill] sm:$0xff] }
0x3c70   :  { %5003 = vmatpush.msra.mxu2 %v8939_v8  ;;  %5358 = vmatpush.msrb.mxu1 %v8696_v42  ;;  %v9485_v42 = vld [vmem:[#allocation72_spill] sm:$0xff] }
0x3c72   :  { %5004 = vmatpush.msra.mxu2 %v8943_v20  ;;  %5359 = vmatpush.msrb.mxu1 %v9481_v24 }
0x3c74   :  { %5005 = vmatpush.msra.mxu2 %v8947_v26  ;;  %5360 = vmatpush.msrb.mxu1 %v9483_v57 }
0x3ce8   :  { %v4730_v25 = vpop.f32.mrf.mxu2 }
0x3ce9   :  { %v4731_v39 = vadd.f32 %v9484_v45, %v4730_v25 }
0x3ceb   :  { %v4733_v12 = vsel %vm540_vm10, %v4731_v39, 0.0 }
0x3cec   :  { %4734 = vadd.xlane.f32.xlu0 %v4733_v12 }
0x3d5f   :  { %v4735_v7 = vpop.xlane.xlu0 %4734 }
0x3d60   :  { %v4736_v51 = vmul.f32 %v4735_v7, %v9485_v42 }
0x3d62   :  { %v4737_v38 = vsub.f32 %v4731_v39, %v4736_v51 }
0x3d64   :  { %v4738_v4 = vmul.f32 %v4737_v38, %v4737_v38 }
0x3d66   :  { %v4739_v36 = vsel %vm540_vm10, %v4738_v4, 0.0 }
0x3d67   :  { %4740 = vadd.xlane.f32.xlu2 %v4739_v36 }
0x3dda   :  { %v4741_v37 = vpop.xlane.xlu2 %4740 }
0x3ddb   :  { %v4742_v17 = vmul.f32 %v4741_v37, %v9485_v42  ;;  %v8959_v37 = vld [vmem:[#allocation21 + $0x78] sm:$0xff] }
0x3ddd   :  { %v4743_v24 = vadd.f32 1e-05, %v4742_v17  ;;  %v8979_v17 = vld [vmem:[#allocation21 + $0x18] sm:$0xff] }
0x3ddf   :  { %6474 = vrsqrt.f32 %v4743_v24  ;;  %vm4750_vm11 = vweird.f32 %v4743_v24 }
0x3de5   :  { %v6475_v57 = vpop.eup %6474 }
0x3de6   :  { %v4745_v26 = vmul.f32 %v6475_v57, %v4743_v24  ;;  %vm4751_vm7 = vweird.f32 %v6475_v57  ;;  %v8982_v24 = vld [vmem:[#allocation21 + $0x8] sm:$0xff] }
0x3de7   :  { %vm4752_vm1 = vmor %vm4750_vm11, %vm4751_vm7 }
0x3de8   :  { %v4746_v20 = vmul.f32 %v6475_v57, %v4745_v26  ;;  %v8962_v26 = vld [vmem:[#allocation21 + $0x68] sm:$0xff] }
0x3dea   :  { %v4747_v25 = vmul.f32 0.5, %v4746_v20  ;;  %v8965_v20 = vld [vmem:[#allocation21 + $0x58] sm:$0xff] }
0x3dec   :  { %v4748_v45 = vsub.f32 1.5, %v4747_v25  ;;  %v8991_v25 = vld [vmem:[#allocation24 + $0x58] sm:$0xff] }
0x3dee   :  { %v4749_v12 = vmul.f32 %v6475_v57, %v4748_v45  ;;  %v8994_v45 = vld [vmem:[#allocation24 + $0x48] sm:$0xff] }
0x3df0   :  { %v4753_v7 = vsel %vm4752_vm1, %v6475_v57, %v4749_v12  ;;  %v8985_v57 = vld [vmem:[#allocation24 + $0x78] sm:$0xff] }
0x3df1   :  { %v4754_v39 = vmul.f32 %v4753_v7, %v4737_v38  ;;  %v8968_v38 = vld [vmem:[#allocation21 + $0x48] sm:$0xff]  ;;  %v8997_v12 = vld [vmem:[#allocation24 + $0x38] sm:$0xff] }
0x3df2   :  { %9486 = vst [vmem:[#allocation57_spill] sm:$0xff] %v8997_v12  ;;  %v9000_v7 = vld [vmem:[#allocation24 + $0x28] sm:$0xff] }
0x3df3   :  { %v4755_v51 = vmul.f32 %v8715_v9, %v4754_v39  ;;  %v8976_v9 = vld [vmem:[#allocation21 + $0x28] sm:$0xff]  ;;  %9487 = vst [vmem:[#allocation58_spill] sm:$0xff] %v9000_v7  ;;  %v9003_v39 = vld [vmem:[#allocation24 + $0x18] sm:$0xff] }
0x3df4   :  { %9488 = vst [vmem:[#allocation59_spill] sm:$0xff] %v9003_v39 }
0x3df5   :  { %v4756_v4 = vadd.f32 %v8718_v31, %v4755_v51  ;;  %v8973_v31 = vld [vmem:[#allocation21 + $0x38] sm:$0xff]  ;;  %v9006_v51 = vld [vmem:[#allocation24 + $0x8] sm:$0xff] }
0x3df6   :  { %9489 = vst [vmem:[#allocation68_spill] sm:$0xff] %v9006_v51 }
0x3df7   :  { %v4757_v36 = vmax.f32 %v4756_v4, 0.0 }
0x3df9   :  { %6004 = vmatmul.msk.f32.vlgmr.msra.gmra.mxu3 %vm4233_vm0, %v4757_v36 }
0x3dfa   :  { %5018 = vmatpush.msra.mxu3 %v8959_v37 }
0x3dfc   :  { %5019 = vmatpush.msra.mxu3 %v8962_v26 }
0x3dfe   :  { %5020 = vmatpush.msra.mxu3 %v8965_v20 }
0x3e00   :  { %5021 = vmatpush.msra.mxu3 %v8968_v38 }
0x3e01   :  { %6009 = vmatmul.msk.f32.vlgmr.msrb.gmra.mxu3 %vm438_vm9, %v8798_v52  ;;  %v8988_v52 = vld [vmem:[#allocation24 + $0x68] sm:$0xff] }
0x3e02   :  { %5022 = vmatpush.msra.mxu3 %v8973_v31 }
0x3e04   :  { %5023 = vmatpush.msra.mxu3 %v8976_v9 }
0x3e06   :  { %5024 = vmatpush.msra.mxu3 %v8979_v17 }
0x3e08   :  { %5025 = vmatpush.msra.mxu3 %v8982_v24 }
0x3e0a   :  { %5159 = vmatpush.msrb.mxu3 %v8985_v57 }
0x3e0c   :  { %5160 = vmatpush.msrb.mxu3 %v8988_v52 }
0x3e0e   :  { %5161 = vmatpush.msrb.mxu3 %v8991_v25 }
0x3e10   :  { %5162 = vmatpush.msrb.mxu3 %v8994_v45 }
0x3e12   :  { %5163 = vmatpush.msrb.mxu3 %v8997_v12  ;;  %v9013_v12 = vld [vmem:[#allocation23 + $0x70] sm:$0xff] }
0x3e14   :  { %5164 = vmatpush.msrb.mxu3 %v9000_v7  ;;  %v9016_v7 = vld [vmem:[#allocation23 + $0x60] sm:$0xff] }
0x3e15   :  { %9490 = vst [vmem:[#allocation60_spill] sm:$0xff] %v9016_v7 }
0x3e16   :  { %5165 = vmatpush.msrb.mxu3 %v9003_v39  ;;  %v9019_v39 = vld [vmem:[#allocation23 + $0x50] sm:$0xff] }
0x3e17   :  { %9491 = vst [vmem:[#allocation61_spill] sm:$0xff] %v9019_v39 }
0x3e18   :  { %5166 = vmatpush.msrb.mxu3 %v9006_v51  ;;  %v9022_v51 = vld [vmem:[#allocation23 + $0x40] sm:$0xff] }
0x3e19   :  { %9492 = vst [vmem:[#allocation62_spill] sm:$0xff] %v9022_v51 }
0x3e7c   :  { %v4778_v4 = vpop.f32.mrf.mxu3 }
0x3e7d   :  { %v4779_v36 = vadd.f32 %v8742_v56, %v4778_v4  ;;  %v9025_v56 = vld [vmem:[#allocation23 + $0x30] sm:$0xff]  ;;  %v9028_v4 = vld [vmem:[#allocation23 + $0x20] sm:$0xff] }
0x3e7e   :  { %9493 = vst [vmem:[#allocation64_spill] sm:$0xff] %v9025_v56 }
0x3e7f   :  { %6005 = vst.msk [vmem:[%s7236_s5 + $0x2] sm:$0x3] %vm4257_vm3, %v4779_v36  ;;  %6007 = vmatmul.msk.f32.vlgmr.msra.gmra.mxu0 %vm4259_vm4, %v4779_v36  ;;  %v9031_v36 = vld [vmem:[#allocation23 + $0x10] sm:$0xff] }
0x3e80   :  { %4955 = vmatpush.msra.mxu0 %v9013_v12  ;;  %9494 = vst [vmem:[#allocation65_spill] sm:$0xff] %v9028_v4 }
0x3e81   :  { %9495 = vst [vmem:[#allocation66_spill] sm:$0xff] %v9031_v36 }
0x3e82   :  { %4956 = vmatpush.msra.mxu0 %v9016_v7  ;;  %v9034_v7 = vld [vmem:[#allocation23] sm:$0xff] }
0x3e83   :  { %9496 = vst [vmem:[#allocation67_spill] sm:$0xff] %v9034_v7 }
0x3e84   :  { %4957 = vmatpush.msra.mxu0 %v9019_v39 }
0x3e86   :  { %4958 = vmatpush.msra.mxu0 %v9022_v51  ;;  %v9039_v51 = vld [vmem:[#allocation26 + $0x70] sm:$0xff] }
0x3e87   :  { %9497 = vst [vmem:[#allocation69_spill] sm:$0xff] %v9039_v51 }
0x3e88   :  { %4959 = vmatpush.msra.mxu0 %v9025_v56  ;;  %v9042_v56 = vld [vmem:[#allocation24 + $0x70] sm:$0xff] }
0x3e89   :  { %9498 = vst [vmem:[#allocation73_spill] sm:$0xff] %v9042_v56 }
0x3e8a   :  { %4960 = vmatpush.msra.mxu0 %v9028_v4  ;;  %v9045_v4 = vld [vmem:[#allocation26 + $0x60] sm:$0xff] }
0x3e8c   :  { %4961 = vmatpush.msra.mxu0 %v9031_v36  ;;  %v9048_v36 = vld [vmem:[#allocation24 + $0x60] sm:$0xff] }
0x3e8d   :  { %9499 = vst [vmem:[#allocation74_spill] sm:$0xff] %v9048_v36 }
0x3e8e   :  { %4962 = vmatpush.msra.mxu0 %v9034_v7  ;;  %v9051_v7 = vld [vmem:[#allocation26 + $0x50] sm:$0xff] }
0x3e8f   :  { %9500 = vst [vmem:[#allocation71_spill] sm:$0xff] %v9051_v7 }
0x3efc   :  { %v4803_v39 = vpop.f32.mrf.mxu0 }
0x3efd   :  { %6010 = vmatmul.msk.f32.vlgmr.msrb.gmra.mxu0 %vm3776_vm6, %v4803_v39  ;;  %6011 = vmatmul.msk.f32.vlgmr.msrb.gmra.mxu2 %vm3776_vm6, %v4803_v39  ;;  %v9054_v39 = vld [vmem:[#allocation24 + $0x50] sm:$0xff] }
0x3efe   :  { %5096 = vmatpush.msrb.mxu0 %v9039_v51  ;;  %5139 = vmatpush.msrb.mxu2 %v9042_v56  ;;  %9501 = vst [vmem:[#allocation72_spill] sm:$0xff] %v9054_v39  ;;  %v9057_v51 = vld [vmem:[#allocation26 + $0x40] sm:$0xff] }
0x3eff   :  { %9502 = vst [vmem:[#allocation75_spill] sm:$0xff] %v9057_v51  ;;  %v9060_v56 = vld [vmem:[#allocation24 + $0x40] sm:$0xff] }
0x3f00   :  { %5097 = vmatpush.msrb.mxu0 %v9045_v4  ;;  %5140 = vmatpush.msrb.mxu2 %v9048_v36  ;;  %9503 = vst [vmem:[#allocation76_spill] sm:$0xff] %v9060_v56  ;;  %v9065_v36 = vld [vmem:[#allocation26 + $0x30] sm:$0xff] }
0x3f01   :  { %9504 = vst [vmem:[#allocation77_spill] sm:$0xff] %v9065_v36 }
0x3f02   :  { %5098 = vmatpush.msrb.mxu0 %v9051_v7  ;;  %5141 = vmatpush.msrb.mxu2 %v9054_v39  ;;  %v9068_v7 = vld [vmem:[#allocation24 + $0x30] sm:$0xff]  ;;  %v9071_v39 = vld [vmem:[#allocation26 + $0x20] sm:$0xff] }
0x3f03   :  { %9505 = vst [vmem:[#allocation78_spill] sm:$0xff] %v9068_v7 }
0x3f04   :  { %5099 = vmatpush.msrb.mxu0 %v9057_v51  ;;  %5142 = vmatpush.msrb.mxu2 %v9060_v56  ;;  %9506 = vst [vmem:[#allocation79_spill] sm:$0xff] %v9071_v39  ;;  %v9074_v51 = vld [vmem:[#allocation24 + $0x20] sm:$0xff]  ;;  %v9077_v56 = vld [vmem:[#allocation26 + $0x10] sm:$0xff] }
0x3f05   :  { %6014 = vmatmul.msk.f32.vlgmr.msra.gmra.mxu0 %vm438_vm9, %v8839_v3  ;;  %9507 = vst [vmem:[#allocation80_spill] sm:$0xff] %v9074_v51  ;;  %v9080_v3 = vld [vmem:[#allocation24 + $0x10] sm:$0xff] }
0x3f06   :  { %5100 = vmatpush.msrb.mxu0 %v9065_v36  ;;  %5143 = vmatpush.msrb.mxu2 %v9068_v7  ;;  %9508 = vst [vmem:[#allocation81_spill] sm:$0xff] %v9077_v56  ;;  %v9083_v36 = vld [vmem:[#allocation26] sm:$0xff] }
0x3f07   :  { %9509 = vst [vmem:[#allocation82_spill] sm:$0xff] %v9080_v3  ;;  %v9086_v7 = vld [vmem:[#allocation24] sm:$0xff] }
0x3f08   :  { %5101 = vmatpush.msrb.mxu0 %v9071_v39  ;;  %5144 = vmatpush.msrb.mxu2 %v9074_v51  ;;  %9510 = vst [vmem:[#allocation83_spill] sm:$0xff] %v9083_v36 }
0x3f09   :  { %9511 = vst [vmem:[#allocation84_spill] sm:$0xff] %v9086_v7 }
0x3f0a   :  { %5102 = vmatpush.msrb.mxu0 %v9077_v56  ;;  %5145 = vmatpush.msrb.mxu2 %v9080_v3 }
0x3f0c   :  { %5103 = vmatpush.msrb.mxu0 %v9083_v36  ;;  %5146 = vmatpush.msrb.mxu2 %v9086_v7  ;;  %v4843_v7 = vpop.f32.mrf.mxu3 }
0x3f0d   :  { %6020 = vmatmul.msk.f32.vlgmr.msrb.gmra.mxu0 %vm438_vm9, %v8913_v60 }
0x3f0e   :  { %5240 = vmatpush.msra.mxu0 %v8596_v19 }
0x3f10   :  { %5241 = vmatpush.msra.mxu0 %v8599_v22 }
0x3f12   :  { %5242 = vmatpush.msra.mxu0 %v8603_v46 }
0x3f14   :  { %5243 = vmatpush.msra.mxu0 %v8607_v5  ;;  %v4823_v5 = vpop.f32.mrf.mxu1 }
0x3f16   :  { %5244 = vmatpush.msra.mxu0 %v8611_v55 }
0x3f18   :  { %5245 = vmatpush.msra.mxu0 %v8615_v49 }
0x3f1a   :  { %5246 = vmatpush.msra.mxu0 %v8619_v50 }
0x3f1c   :  { %5247 = vmatpush.msra.mxu0 %v8628_v29 }
0x3f1e   :  { %5403 = vmatpush.msrb.mxu0 %v8786_v1 }
0x3f7a   :  { %v4866_v46 = vpop.f32.mrf.mxu0 }
0x3f7b   :  { %v4867_v55 = vadd.f32 %v4866_v46, %v4823_v5 }
0x3f7d   :  { %v4889_v49 = vadd.f32 %v4867_v55, %v9468_v62 }
0x3f7f   :  { %v6012_v3 = vmul.f32 -1.442695, %v4889_v49 }
0x3f80   :  { %v4886_v60 = vpop.f32.mrf.mxu2 }
0x3f81   :  { %v4887_v36 = vadd.f32 %v4886_v60, %v4843_v7 }
0x3f83   :  { %v4890_v19 = vadd.f32 %v4887_v36, %v9467_v54 }
0x3f85   :  { %6476 = vtanh.f32 %v4890_v19 }
0x3f86   :  { %6478 = vpow2.f32 %v6012_v3 }
0x3f8b   :  { %v6477_v22 = vpop.eup %6476 }
0x3f8c   :  { %4932 = vrot.lane.b32.xlu1 %v6477_v22, %s7076_s27  ;;  %v6479_v50 = vpop.eup %6478 }
0x3f8d   :  { %v4897_v29 = vadd.f32 1.0, %v6479_v50 }
0x3f8f   :  { %6480 = vrcp.f32 %v4897_v29  ;;  %v4910_v36 = vand.u32 2147483648, %v4897_v29  ;;  %vm4904_vm12 = vweird.f32 %v4897_v29  ;;  %v4908_v54 = vand.u32 2147483647, %v4897_v29 }
0x3f91   :  { %v4911_v39 = vor.u32 1.1754944e-38, %v4910_v36  ;;  %vm4909_vm14 = vcmp.eq.f32.partialorder %v4908_v54, 8.507059e+37 }
0x3f95   :  { %v6481_v1 = vpop.eup %6480 }
0x3f96   :  { %v4900_v56 = vmul.f32 %v6481_v1, %v4897_v29  ;;  %vm4905_vm8 = vweird.f32 %v6481_v1 }
0x3f97   :  { %vm4906_vm13 = vmor %vm4904_vm12, %vm4905_vm8 }
0x3f98   :  { %v4901_v51 = vsub.f32 1.0, %v4900_v56  ;;  %v6013_v56 = vmul.f32 -1.442695, %v4890_v19 }
0x3f9a   :  { %v4902_v7 = vmul.f32 %v6481_v1, %v4901_v51 }
0x3f9c   :  { %v4903_v60 = vadd.f32 %v6481_v1, %v4902_v7 }
0x3f9e   :  { %v4907_v22 = vsel %vm4906_vm13, %v6481_v1, %v4903_v60 }
0x3f9f   :  { %v4912_v5 = vsel %vm4909_vm14, %v4911_v39, %v4907_v22 }
0x3fa0   :  { %v4930_v3 = vmul.f32 %v4912_v5, %v8794_v6 }
0x3ffe   :  { %v4933_v46 = vpop.permute.xlu1 %4932 }
0x3fff   :  { %v4935_v55 = vmul.f32 %v4933_v46, %v4912_v5 }
0x4001   :  { %4937 = vrot.lane.b32.xlu1 %v4935_v55, %s7076_s27 }
0x4073   :  { %v4938_v49 = vpop.permute.xlu1 %4937 }
0x4074   :  { %v9105_v50 = vadd.f32 %v4938_v49, %v4930_v3  ;;  %v4984_v49 = vpop.f32.mrf.mxu1 }
0x4076   :  { %6482 = vtanh.f32 %v9105_v50 }
0x4077   :  { %6484 = vpow2.f32 %v6013_v56 }
0x407c   :  { %v6483_v51 = vpop.eup %6482 }
0x407d   :  { %4943 = vrot.lane.b32.xlu1 %v6483_v51, %s7076_s27  ;;  %v6485_v29 = vpop.eup %6484 }
0x407e   :  { %v4898_v1 = vadd.f32 1.0, %v6485_v29 }
0x4080   :  { %6486 = vrcp.f32 %v4898_v1  ;;  %v4925_v6 = vand.u32 2147483648, %v4898_v1  ;;  %vm4919_vm5 = vweird.f32 %v4898_v1  ;;  %v4923_v22 = vand.u32 2147483647, %v4898_v1 }
0x4082   :  { %v4926_v5 = vor.u32 1.1754944e-38, %v4925_v6  ;;  %vm4924_vm11 = vcmp.eq.f32.partialorder %v4923_v22, 8.507059e+37 }
0x4086   :  { %v6487_v54 = vpop.eup %6486 }
0x4087   :  { %v4915_v39 = vmul.f32 %v6487_v54, %v4898_v1  ;;  %vm4920_vm15 = vweird.f32 %v6487_v54 }
0x4088   :  { %vm4921_vm7 = vmor %vm4919_vm5, %vm4920_vm15 }
0x4089   :  { %v4916_v7 = vsub.f32 1.0, %v4915_v39 }
0x408b   :  { %v4917_v60 = vmul.f32 %v6487_v54, %v4916_v7 }
0x408d   :  { %v4918_v36 = vadd.f32 %v6487_v54, %v4917_v60 }
0x408f   :  { %v4922_v46 = vsel %vm4921_vm7, %v6487_v54, %v4918_v36 }
0x4090   :  { %v4927_v55 = vsel %vm4924_vm11, %v4926_v5, %v4922_v46 }
0x40ef   :  { %v4944_v3 = vpop.permute.xlu1 %4943 }
0x40f0   :  { %v9109_v19 = vmul.f32 %v4944_v3, %v4927_v55 }
0x40f2   :  { %6016 = vmatmul.msk.f32.vlgmr.msra.gmra.mxu2 %vm438_vm9, %v9109_v19  ;;  %6017 = vmatmul.msk.f32.vlgmr.msra.gmra.mxu3 %vm438_vm9, %v9109_v19 }
0x40f3   :  { %5333 = vmatpush.msra.mxu3 %v8804_v16  ;;  %6029 = vmatpush.msk.msra.mxu2 %vm4263_vm2, %v8705_v15 }
0x40f5   :  { %5334 = vmatpush.msra.mxu3 %v8809_v33 }
0x40f7   :  { %5335 = vmatpush.msra.mxu3 %v8812_v35  ;;  %v4964_v35 = vpop.f32.mrf.mxu0 }
0x40f9   :  { %5336 = vmatpush.msra.mxu3 %v8815_v30 }
0x40fb   :  { %5337 = vmatpush.msra.mxu3 %v8818_v14 }
0x40fd   :  { %5338 = vmatpush.msra.mxu3 %v8821_v10 }
0x40ff   :  { %5339 = vmatpush.msra.mxu3 %v8824_v23 }
0x4101   :  { %5340 = vmatpush.msra.mxu3 %v8827_v59 }
0x4175   :  { %v5027_v51 = vpop.f32.mrf.mxu3  ;;  %v5007_v33 = vpop.f32.mrf.mxu2 }
0x4176   :  { %v5028_v16 = vadd.f32 %v5027_v51, %v4984_v49  ;;  %v5008_v30 = vadd.f32 %v5007_v33, %v4964_v35 }
0x4178   :  { %v5031_v56 = vadd.f32 %v5028_v16, %v9470_v61  ;;  %v5030_v14 = vadd.f32 %v5008_v30, %v9471_v18 }
0x417a   :  { %6488 = vtanh.f32 %v5031_v56  ;;  %v6018_v29 = vmul.f32 -1.442695, %v5030_v14 }
0x417c   :  { %6490 = vpow2.f32 %v6018_v29 }
0x4180   :  { %v6489_v15 = vpop.eup %6488 }
0x4181   :  { %5073 = vrot.lane.b32.xlu1 %v6489_v15, %s7076_s27  ;;  %v6019_v15 = vmul.f32 -1.442695, %v5031_v56 }
0x4182   :  { %v6491_v10 = vpop.eup %6490 }
0x4183   :  { %v5038_v23 = vadd.f32 1.0, %v6491_v10 }
0x4185   :  { %6492 = vrcp.f32 %v5038_v23  ;;  %v5051_v60 = vand.u32 2147483648, %v5038_v23  ;;  %vm5045_vm1 = vweird.f32 %v5038_v23  ;;  %v5049_v36 = vand.u32 2147483647, %v5038_v23 }
0x4187   :  { %v5052_v22 = vor.u32 1.1754944e-38, %v5051_v60  ;;  %vm5050_vm12 = vcmp.eq.f32.partialorder %v5049_v36, 8.507059e+37  ;;  %v6636_v60 = vld [vmem:[%s7221_s14 + $0x8] sm:$0xff]  ;;  %v5125_v36 = vpop.f32.mrf.mxu1 }
0x418b   :  { %v6493_v59 = vpop.eup %6492 }
0x418c   :  { %v5041_v1 = vmul.f32 %v6493_v59, %v5038_v23  ;;  %vm5046_vm2 = vweird.f32 %v6493_v59 }
0x418d   :  { %vm5047_vm8 = vmor %vm5045_vm1, %vm5046_vm2 }
0x418e   :  { %v5042_v54 = vsub.f32 1.0, %v5041_v1 }
0x4190   :  { %v5043_v39 = vmul.f32 %v6493_v59, %v5042_v54 }
0x4192   :  { %v5044_v7 = vadd.f32 %v6493_v59, %v5043_v39 }
0x4194   :  { %v5048_v6 = vsel %vm5047_vm8, %v6493_v59, %v5044_v7 }
0x4195   :  { %v5053_v5 = vsel %vm5050_vm12, %v5052_v22, %v5048_v6 }
0x4196   :  { %v5071_v3 = vmul.f32 %v5053_v5, %v8835_v0 }
0x41f3   :  { %v5074_v46 = vpop.permute.xlu1 %5073 }
0x41f4   :  { %v5076_v55 = vmul.f32 %v5074_v46, %v5053_v5  ;;  %v9519_v46 = vld [vmem:[#allocation70_spill] sm:$0xff] }
0x41f6   :  { %5078 = vrot.lane.b32.xlu1 %v5076_v55, %s7076_s27 }
0x4268   :  { %v5079_v49 = vpop.permute.xlu1 %5078 }
0x4269   :  { %v9130_v51 = vadd.f32 %v5079_v49, %v5071_v3  ;;  %v5105_v49 = vpop.f32.mrf.mxu0 }
0x426b   :  { %6494 = vtanh.f32 %v9130_v51 }
0x426c   :  { %6496 = vpow2.f32 %v6019_v15 }
0x4271   :  { %v6495_v16 = vpop.eup %6494 }
0x4272   :  { %5084 = vrot.lane.b32.xlu0 %v6495_v16, %s7076_s27  ;;  %v6497_v33 = vpop.eup %6496 }
0x4273   :  { %v5039_v35 = vadd.f32 1.0, %v6497_v33 }
0x4275   :  { %6498 = vrcp.f32 %v5039_v35  ;;  %v5066_v0 = vand.u32 2147483648, %v5039_v35  ;;  %vm5060_vm14 = vweird.f32 %v5039_v35  ;;  %v5064_v59 = vand.u32 2147483647, %v5039_v35 }
0x4277   :  { %v5067_v54 = vor.u32 1.1754944e-38, %v5066_v0  ;;  %vm5065_vm5 = vcmp.eq.f32.partialorder %v5064_v59, 8.507059e+37 }
0x427b   :  { %v6499_v30 = vpop.eup %6498 }
0x427c   :  { %v5056_v14 = vmul.f32 %v6499_v30, %v5039_v35  ;;  %vm5061_vm13 = vweird.f32 %v6499_v30 }
0x427d   :  { %vm5062_vm15 = vmor %vm5060_vm14, %vm5061_vm13 }
0x427e   :  { %v5057_v29 = vsub.f32 1.0, %v5056_v14 }
0x4280   :  { %v5058_v10 = vmul.f32 %v6499_v30, %v5057_v29 }
0x4282   :  { %v5059_v23 = vadd.f32 %v6499_v30, %v5058_v10 }
0x4284   :  { %v5063_v1 = vsel %vm5062_vm15, %v6499_v30, %v5059_v23 }
0x4285   :  { %v5068_v39 = vsel %vm5065_vm5, %v5067_v54, %v5063_v1 }
0x42e4   :  { %v5085_v7 = vpop.permute.xlu0 %5084 }
0x42e5   :  { %v9134_v56 = vmul.f32 %v5085_v7, %v5068_v39 }
0x42e7   :  { %6022 = vmatmul.msk.f32.vlgmr.msrb.gmra.mxu2 %vm438_vm9, %v9134_v56  ;;  %6023 = vmatmul.msk.f32.vlgmr.msrb.gmra.mxu3 %vm438_vm9, %v9134_v56 }
0x42e8   :  { %5494 = vmatpush.msrb.mxu3 %v8845_v47  ;;  %5383 = vmatpush.msrb.mxu2 %v8848_v48  ;;  %v9512_v47 = vld [vmem:[#allocation48_spill] sm:$0xff]  ;;  %v9513_v48 = vld [vmem:[#allocation49_spill] sm:$0xff] }
0x42ea   :  { %5495 = vmatpush.msrb.mxu3 %v8851_v28  ;;  %v9514_v28 = vld [vmem:[#allocation50_spill] sm:$0xff] }
0x42ec   :  { %5496 = vmatpush.msrb.mxu3 %v8854_v40  ;;  %v9515_v40 = vld [vmem:[#allocation51_spill] sm:$0xff] }
0x42ee   :  { %5497 = vmatpush.msrb.mxu3 %v8857_v43  ;;  %v9516_v43 = vld [vmem:[#allocation52_spill] sm:$0xff] }
0x42ef   :  { %6031 = vmatmul.msk.f32.vlgmr.msra.gmra.mxu3 %vm438_vm9, %v9109_v19 }
0x42f0   :  { %5498 = vmatpush.msrb.mxu3 %v8862_v41  ;;  %v9517_v41 = vld [vmem:[#allocation53_spill] sm:$0xff] }
0x42f2   :  { %5499 = vmatpush.msrb.mxu3 %v8865_v27  ;;  %v9518_v27 = vld [vmem:[#allocation54_spill] sm:$0xff] }
0x42f4   :  { %5500 = vmatpush.msrb.mxu3 %v8868_v32  ;;  %v6634_v32 = vld [vmem:[%s7221_s14 + $0x18] sm:$0xff] }
0x42f6   :  { %5501 = vmatpush.msrb.mxu3 %v8871_v53  ;;  %v6635_v53 = vld [vmem:[%s7221_s14 + $0x10] sm:$0xff] }
0x42f7   :  { %6038 = vmatmul.msk.f32.vlgmr.msrb.gmra.mxu3 %vm438_vm9, %v9134_v56 }
0x42f8   :  { %5635 = vmatpush.msra.mxu3 %v8876_v21  ;;  %v6637_v21 = vld [vmem:[%s7221_s14] sm:$0xff] }
0x42fa   :  { %5636 = vmatpush.msra.mxu3 %v9512_v47 }
0x42fc   :  { %5637 = vmatpush.msra.mxu3 %v9513_v48 }
0x42fe   :  { %5638 = vmatpush.msra.mxu3 %v9514_v28 }
0x4300   :  { %5639 = vmatpush.msra.mxu3 %v9515_v40 }
0x4302   :  { %5640 = vmatpush.msra.mxu3 %v9516_v43 }
0x4304   :  { %5641 = vmatpush.msra.mxu3 %v9517_v41 }
0x4306   :  { %5642 = vmatpush.msra.mxu3 %v9518_v27 }
0x4308   :  { %5811 = vmatpush.msrb.mxu3 %v6634_v32 }
0x430a   :  { %5812 = vmatpush.msrb.mxu3 %v6635_v53 }
0x430c   :  { %5813 = vmatpush.msrb.mxu3 %v6636_v60 }
0x430e   :  { %5814 = vmatpush.msrb.mxu3 %v6637_v21 }
0x436a   :  { %v5168_v6 = vpop.f32.mrf.mxu3  ;;  %v5148_v3 = vpop.f32.mrf.mxu2 }
0x436b   :  { %v5169_v22 = vadd.f32 %v5168_v6, %v5125_v36  ;;  %v5149_v16 = vadd.f32 %v5148_v3, %v5105_v49 }
0x436d   :  { %v5172_v5 = vadd.f32 %v5169_v22, %v9519_v46  ;;  %v5171_v15 = vadd.f32 %v5149_v16, %v8591_v11 }
0x436f   :  { %6500 = vtanh.f32 %v5172_v5  ;;  %v6024_v33 = vmul.f32 -1.442695, %v5171_v15  ;;  %v6025_v27 = vmul.f32 -1.442695, %v5172_v5 }
0x4371   :  { %6502 = vpow2.f32 %v6024_v33  ;;  %v9520_v33 = vld [vmem:[#allocation55_spill] sm:$0xff] }
0x4375   :  { %v6501_v55 = vpop.eup %6500 }
0x4376   :  { %5214 = vrot.lane.b32.xlu2 %v6501_v55, %s7076_s27 }
0x4377   :  { %v6503_v35 = vpop.eup %6502 }
0x4378   :  { %v5179_v30 = vadd.f32 1.0, %v6503_v35  ;;  %v9521_v35 = vld [vmem:[#allocation56_spill] sm:$0xff] }
0x437a   :  { %6504 = vrcp.f32 %v5179_v30  ;;  %v5192_v59 = vand.u32 2147483648, %v5179_v30  ;;  %vm5186_vm11 = vweird.f32 %v5179_v30  ;;  %v5190_v1 = vand.u32 2147483647, %v5179_v30 }
0x437c   :  { %v5193_v39 = vor.u32 1.1754944e-38, %v5192_v59  ;;  %vm5191_vm1 = vcmp.eq.f32.partialorder %v5190_v1, 8.507059e+37 }
0x4380   :  { %v6505_v14 = vpop.eup %6504 }
0x4381   :  { %v5182_v29 = vmul.f32 %v6505_v14, %v5179_v30  ;;  %vm5187_vm7 = vweird.f32 %v6505_v14 }
0x4382   :  { %vm5188_vm2 = vmor %vm5186_vm11, %vm5187_vm7 }
0x4383   :  { %v5183_v10 = vsub.f32 1.0, %v5182_v29 }
0x4385   :  { %v5184_v23 = vmul.f32 %v6505_v14, %v5183_v10 }
0x4387   :  { %v5185_v0 = vadd.f32 %v6505_v14, %v5184_v23 }
0x4389   :  { %v5189_v54 = vsel %vm5188_vm2, %v6505_v14, %v5185_v0  ;;  %v9189_v14 = vld [vmem:[%s9444_s9] ss:$0 sm:$0xff] }
0x438a   :  { %v5194_v47 = vsel %vm5191_vm1, %v5193_v39, %v5189_v54 }
0x438b   :  { %v5212_v28 = vmul.f32 %v5194_v47, %v8909_v13 }
0x43d0   :  { %v5215_v7 = vpop.permute.xlu2 %5214 }
0x43d1   :  { %v5217_v48 = vmul.f32 %v5215_v7, %v5194_v47 }
0x43d3   :  { %5219 = vrot.lane.b32.xlu1 %v5217_v48, %s7076_s27 }
0x4445   :  { %v5220_v40 = vpop.permute.xlu1 %5219 }
0x4446   :  { %v9170_v43 = vadd.f32 %v5220_v40, %v5212_v28  ;;  %v9197_v40 = vld [vmem:[%s9448_s7] ss:$0 sm:$0xff] }
0x4448   :  { %6506 = vtanh.f32 %v9170_v43 }
0x4449   :  { %6508 = vpow2.f32 %v6025_v27  ;;  %v9201_v27 = vld [vmem:[%s9450_s21] ss:$0 sm:$0xff] }
0x444e   :  { %v6507_v41 = vpop.eup %6506 }
0x444f   :  { %5225 = vrot.lane.b32.xlu1 %v6507_v41, %s7076_s27  ;;  %v6509_v32 = vpop.eup %6508 }
0x4450   :  { %v5180_v53 = vadd.f32 1.0, %v6509_v32 }
0x4452   :  { %6510 = vrcp.f32 %v5180_v53  ;;  %v5207_v13 = vand.u32 2147483648, %v5180_v53  ;;  %vm5201_vm12 = vweird.f32 %v5180_v53  ;;  %v5205_v55 = vand.u32 2147483647, %v5180_v53 }
0x4454   :  { %v5208_v49 = vor.u32 1.1754944e-38, %v5207_v13  ;;  %vm5206_vm14 = vcmp.eq.f32.partialorder %v5205_v55, 8.507059e+37  ;;  %v9537_v13 = vld [vmem:[#allocation72_spill] sm:$0xff]  ;;  %v9538_v55 = vld [vmem:[#allocation75_spill] sm:$0xff] }
0x4458   :  { %v6511_v60 = vpop.eup %6510 }
0x4459   :  { %v5197_v21 = vmul.f32 %v6511_v60, %v5180_v53  ;;  %vm5202_vm8 = vweird.f32 %v6511_v60 }
0x445a   :  { %vm5203_vm13 = vmor %vm5201_vm12, %vm5202_vm8 }
0x445b   :  { %v5198_v36 = vsub.f32 1.0, %v5197_v21 }
0x445d   :  { %v5199_v6 = vmul.f32 %v6511_v60, %v5198_v36  ;;  %v9534_v36 = vld [vmem:[#allocation73_spill] sm:$0xff] }
0x445f   :  { %v5200_v22 = vadd.f32 %v6511_v60, %v5199_v6  ;;  %v9535_v6 = vld [vmem:[#allocation74_spill] sm:$0xff] }
0x4461   :  { %v5204_v3 = vsel %vm5203_vm13, %v6511_v60, %v5200_v22  ;;  %v9532_v60 = vld [vmem:[#allocation67_spill] sm:$0xff] }
0x4462   :  { %v5209_v16 = vsel %vm5206_vm14, %v5208_v49, %v5204_v3  ;;  %v9536_v22 = vld [vmem:[#allocation71_spill] sm:$0xff]  ;;  %v9539_v3 = vld [vmem:[#allocation76_spill] sm:$0xff]  ;;  %v9540_v49 = vld [vmem:[#allocation77_spill] sm:$0xff] }
0x44c1   :  { %v5226_v5 = vpop.permute.xlu1 %5225 }
0x44c2   :  { %v9174_v15 = vmul.f32 %v5226_v5, %v5209_v16  ;;  %v9542_v16 = vld [vmem:[#allocation79_spill] sm:$0xff]  ;;  %v9543_v5 = vld [vmem:[#allocation80_spill] sm:$0xff] }
0x44c4   :  { %6026 = vmatmul.msk.f32.vlgmr.msra.gmra.mxu0 %vm438_vm9, %v9174_v15  ;;  %6044 = vmatmul.msk.f32.vlgmr.msra.gmra.mxu3 %vm438_vm9, %v9174_v15 }
0x44c5   :  { %5517 = vmatpush.msra.mxu0 %v8919_v34 }
0x44c7   :  { %5518 = vmatpush.msra.mxu0 %v8923_v63 }
0x44c9   :  { %5519 = vmatpush.msra.mxu0 %v8927_v44 }
0x44cb   :  { %5520 = vmatpush.msra.mxu0 %v8931_v58 }
0x44cd   :  { %5521 = vmatpush.msra.mxu0 %v8935_v2 }
0x44cf   :  { %5522 = vmatpush.msra.mxu0 %v8939_v8 }
0x44d1   :  { %5523 = vmatpush.msra.mxu0 %v9520_v33  ;;  %v9544_v33 = vld [vmem:[#allocation81_spill] sm:$0xff] }
0x44d3   :  { %5524 = vmatpush.msra.mxu0 %v9521_v35  ;;  %v9545_v35 = vld [vmem:[#allocation82_spill] sm:$0xff] }
0x4541   :  { %v5249_v30 = vpop.f32.mrf.mxu0 }
0x4542   :  { %v5250_v29 = vadd.f32 %v9189_v14, %v5249_v30  ;;  %v9546_v30 = vld [vmem:[#allocation83_spill] sm:$0xff] }
0x4544   :  { %v5252_v34 = vsel %vm540_vm10, %v5250_v29, 0.0 }
0x4545   :  { %5253 = vadd.xlane.f32.xlu1 %v5252_v34  ;;  %v6643_v34 = vld [vmem:[%s9443_s24 + $0x30] sm:$0xff] }
0x45b8   :  { %v5254_v63 = vpop.xlane.xlu1 %5253 }
0x45b9   :  { %v5255_v44 = vmul.f32 %v5254_v63, %v9485_v42  ;;  %v6644_v63 = vld [vmem:[%s9443_s24 + $0x28] sm:$0xff] }
0x45bb   :  { %v5256_v58 = vsub.f32 %v5250_v29, %v5255_v44  ;;  %v9547_v29 = vld [vmem:[#allocation84_spill] sm:$0xff] }
0x45bc   :  { %v6645_v44 = vld [vmem:[%s9443_s24 + $0x20] sm:$0xff] }
0x45bd   :  { %v5257_v10 = vmul.f32 %v5256_v58, %v5256_v58 }
0x45bf   :  { %v5258_v2 = vsel %vm540_vm10, %v5257_v10, 0.0  ;;  %v6647_v10 = vld [vmem:[%s9443_s24 + $0x10] sm:$0xff] }
0x45c0   :  { %5259 = vadd.xlane.f32.xlu0 %v5258_v2  ;;  %v6648_v2 = vld [vmem:[%s9443_s24 + $0x8] sm:$0xff] }
0x4633   :  { %v5260_v8 = vpop.xlane.xlu0 %5259 }
0x4634   :  { %v5261_v23 = vmul.f32 %v5260_v8, %v9485_v42  ;;  %v6649_v8 = vld [vmem:[%s9443_s24] sm:$0xff] }
0x4636   :  { %v5262_v0 = vadd.f32 1e-05, %v5261_v23 }
0x4638   :  { %6512 = vrsqrt.f32 %v5262_v0  ;;  %vm5269_vm5 = vweird.f32 %v5262_v0 }
0x463e   :  { %v6513_v59 = vpop.eup %6512 }
0x463f   :  { %v5264_v1 = vmul.f32 %v6513_v59, %v5262_v0  ;;  %vm5270_vm15 = vweird.f32 %v6513_v59 }
0x4640   :  { %vm5271_vm7 = vmor %vm5269_vm5, %vm5270_vm15 }
0x4641   :  { %v5265_v54 = vmul.f32 %v6513_v59, %v5264_v1 }
0x4643   :  { %v5266_v39 = vmul.f32 0.5, %v5265_v54 }
0x4645   :  { %v5267_v7 = vsub.f32 1.5, %v5266_v39 }
0x4647   :  { %v5268_v47 = vmul.f32 %v6513_v59, %v5267_v7  ;;  %v5342_v7 = vpop.f32.mrf.mxu3 }
0x4649   :  { %v5272_v48 = vsel %vm5271_vm7, %v6513_v59, %v5268_v47 }
0x464a   :  { %v5273_v28 = vmul.f32 %v5272_v48, %v5256_v58  ;;  %v6646_v58 = vld [vmem:[%s9443_s24 + $0x18] sm:$0xff] }
0x464c   :  { %v5274_v41 = vmul.f32 %v9197_v40, %v5273_v28 }
0x464e   :  { %v5275_v32 = vadd.f32 %v9201_v27, %v5274_v41 }
0x4650   :  { %v5276_v53 = vmax.f32 %v5275_v32, 0.0 }
0x4652   :  { %6027 = vmatmul.msk.f32.vlgmr.msra.gmra.mxu1 %vm4233_vm0, %v5276_v53 }
0x4653   :  { %5537 = vmatpush.msra.mxu1 %v8959_v37  ;;  %v9522_v37 = vld [vmem:[#allocation57_spill] sm:$0xff] }
0x4655   :  { %5538 = vmatpush.msra.mxu1 %v8962_v26  ;;  %v9523_v26 = vld [vmem:[#allocation58_spill] sm:$0xff] }
0x4657   :  { %5539 = vmatpush.msra.mxu1 %v8965_v20  ;;  %v9524_v20 = vld [vmem:[#allocation59_spill] sm:$0xff] }
0x4659   :  { %5540 = vmatpush.msra.mxu1 %v8968_v38  ;;  %v9525_v38 = vld [vmem:[#allocation68_spill] sm:$0xff] }
0x465a   :  { %6032 = vmatmul.msk.f32.vlgmr.msrb.gmra.mxu1 %vm438_vm9, %v9109_v19  ;;  %v9531_v19 = vld [vmem:[#allocation66_spill] sm:$0xff] }
0x465b   :  { %5541 = vmatpush.msra.mxu1 %v8973_v31 }
0x465d   :  { %5542 = vmatpush.msra.mxu1 %v8976_v9  ;;  %v9224_v9 = vld [vmem:[%s7226_s13] ss:$0 sm:$0xff] }
0x465f   :  { %5543 = vmatpush.msra.mxu1 %v8979_v17 }
0x4661   :  { %5544 = vmatpush.msra.mxu1 %v8982_v24  ;;  %v9526_v24 = vld [vmem:[#allocation60_spill] sm:$0xff] }
0x4663   :  { %5678 = vmatpush.msrb.mxu1 %v8985_v57  ;;  %v9527_v57 = vld [vmem:[#allocation61_spill] sm:$0xff] }
0x4665   :  { %5679 = vmatpush.msrb.mxu1 %v8988_v52  ;;  %v9528_v52 = vld [vmem:[#allocation62_spill] sm:$0xff] }
0x4667   :  { %5680 = vmatpush.msrb.mxu1 %v8991_v25  ;;  %v9529_v25 = vld [vmem:[#allocation64_spill] sm:$0xff] }
0x4669   :  { %5681 = vmatpush.msrb.mxu1 %v8994_v45  ;;  %v9530_v45 = vld [vmem:[#allocation65_spill] sm:$0xff] }
0x466b   :  { %5682 = vmatpush.msrb.mxu1 %v9522_v37 }
0x466d   :  { %5683 = vmatpush.msrb.mxu1 %v9523_v26 }
0x466f   :  { %5684 = vmatpush.msrb.mxu1 %v9524_v20 }
0x4671   :  { %5685 = vmatpush.msrb.mxu1 %v9525_v38 }
0x46cf   :  { %v5297_v31 = vpop.f32.mrf.mxu1 }
0x46d0   :  { %v5298_v17 = vadd.f32 %v9224_v9, %v5297_v31 }
0x46d2   :  { %6028 = vst.msk [vmem:[%s7236_s5 + $0x4] sm:$0x3] %vm4257_vm3, %v5298_v17  ;;  %6030 = vmatmul.msk.f32.vlgmr.msra.gmra.mxu2 %vm4259_vm4, %v5298_v17 }
0x46d3   :  { %5474 = vmatpush.msra.mxu2 %v9013_v12  ;;  %v9533_v12 = vld [vmem:[#allocation69_spill] sm:$0xff] }
0x46d5   :  { %5475 = vmatpush.msra.mxu2 %v9526_v24 }
0x46d7   :  { %5476 = vmatpush.msra.mxu2 %v9527_v57  ;;  %v5362_v23 = vpop.f32.mrf.mxu1 }
0x46d9   :  { %5477 = vmatpush.msra.mxu2 %v9528_v52 }
0x46db   :  { %5478 = vmatpush.msra.mxu2 %v9529_v25 }
0x46dd   :  { %5479 = vmatpush.msra.mxu2 %v9530_v45 }
0x46df   :  { %5480 = vmatpush.msra.mxu2 %v9531_v19 }
0x46e1   :  { %5481 = vmatpush.msra.mxu2 %v9532_v60 }
0x4755   :  { %v5322_v21 = vpop.f32.mrf.mxu2 }
0x4756   :  { %6033 = vmatmul.msk.f32.vlgmr.msrb.gmra.mxu2 %vm3776_vm6, %v5322_v21  ;;  %6034 = vmatmul.msk.f32.vlgmr.msrb.gmra.mxu0 %vm3776_vm6, %v5322_v21 }
0x4757   :  { %5615 = vmatpush.msrb.mxu2 %v9533_v12  ;;  %5658 = vmatpush.msrb.mxu0 %v9534_v36 }
0x4759   :  { %5616 = vmatpush.msrb.mxu2 %v9045_v4  ;;  %5659 = vmatpush.msrb.mxu0 %v9535_v6  ;;  %v9541_v4 = vld [vmem:[#allocation78_spill] sm:$0xff] }
0x475b   :  { %5617 = vmatpush.msrb.mxu2 %v9536_v22  ;;  %5660 = vmatpush.msrb.mxu0 %v9537_v13 }
0x475d   :  { %5618 = vmatpush.msrb.mxu2 %v9538_v55  ;;  %5661 = vmatpush.msrb.mxu0 %v9539_v3 }
0x475e   :  { %6037 = vmatmul.msk.f32.vlgmr.msra.gmra.mxu2 %vm438_vm9, %v9134_v56  ;;  %v6642_v56 = vld [vmem:[%s9443_s24 + $0x38] sm:$0xff] }
0x475f   :  { %5619 = vmatpush.msrb.mxu2 %v9540_v49  ;;  %5662 = vmatpush.msrb.mxu0 %v9541_v4 }
0x4761   :  { %5620 = vmatpush.msrb.mxu2 %v9542_v16  ;;  %5663 = vmatpush.msrb.mxu0 %v9543_v5 }
0x4763   :  { %5621 = vmatpush.msrb.mxu2 %v9544_v33  ;;  %5664 = vmatpush.msrb.mxu0 %v9545_v35 }
0x4765   :  { %5622 = vmatpush.msrb.mxu2 %v9546_v30  ;;  %5665 = vmatpush.msrb.mxu0 %v9547_v29  ;;  %v5503_v29 = vpop.f32.mrf.mxu3 }
0x4766   :  { %6043 = vmatmul.msk.f32.vlgmr.msrb.gmra.mxu2 %vm438_vm9, %v9174_v15  ;;  %v9548_v15 = vld [vmem:[#allocation63_spill] sm:$0xff] }
0x4767   :  { %5759 = vmatpush.msra.mxu2 %v6642_v56 }
0x4769   :  { %5760 = vmatpush.msra.mxu2 %v6643_v34 }
0x476b   :  { %5761 = vmatpush.msra.mxu2 %v6644_v63 }
0x476d   :  { %5762 = vmatpush.msra.mxu2 %v6645_v44 }
0x476f   :  { %5763 = vmatpush.msra.mxu2 %v6646_v58 }
0x4771   :  { %5764 = vmatpush.msra.mxu2 %v6647_v10 }
0x4773   :  { %5765 = vmatpush.msra.mxu2 %v6648_v2 }
0x4775   :  { %5766 = vmatpush.msra.mxu2 %v6649_v8 }
0x47d3   :  { %v5405_v0 = vpop.f32.mrf.mxu0 }
0x47d4   :  { %v5406_v59 = vadd.f32 %v5405_v0, %v5362_v23 }
0x47d6   :  { %v5409_v1 = vadd.f32 %v5406_v59, %v9548_v15 }
0x47d8   :  { %6514 = vtanh.f32 %v5409_v1  ;;  %v6036_v12 = vmul.f32 -1.442695, %v5409_v1 }
0x47d9   :  { %v5385_v39 = vpop.f32.mrf.mxu2 }
0x47da   :  { %v5386_v47 = vadd.f32 %v5385_v39, %v5342_v7 }
0x47dc   :  { %v5408_v48 = vadd.f32 %v5386_v47, %v9468_v62 }
0x47de   :  { %v6515_v54 = vpop.eup %6514  ;;  %v6035_v28 = vmul.f32 -1.442695, %v5408_v48 }
0x47df   :  { %5451 = vrot.lane.b32.xlu2 %v6515_v54, %s7076_s27 }
0x47e0   :  { %6516 = vpow2.f32 %v6035_v28 }
0x47e1   :  { %v5483_v10 = vpop.f32.mrf.mxu2 }
0x47e6   :  { %v6517_v41 = vpop.eup %6516 }
0x47e7   :  { %v5416_v32 = vadd.f32 1.0, %v6517_v41 }
0x47e9   :  { %6518 = vrcp.f32 %v5416_v32  ;;  %v5429_v31 = vand.u32 2147483648, %v5416_v32  ;;  %vm5423_vm4 = vweird.f32 %v5416_v32  ;;  %v5427_v17 = vand.u32 2147483647, %v5416_v32 }
0x47eb   :  { %v5430_v57 = vor.u32 1.1754944e-38, %v5429_v31  ;;  %vm5428_vm2 = vcmp.eq.f32.partialorder %v5427_v17, 8.507059e+37 }
0x47ef   :  { %v6519_v53 = vpop.eup %6518 }
0x47f0   :  { %v5419_v37 = vmul.f32 %v6519_v53, %v5416_v32  ;;  %vm5424_vm6 = vweird.f32 %v6519_v53 }
0x47f1   :  { %vm5425_vm11 = vmor %vm5423_vm4, %vm5424_vm6 }
0x47f2   :  { %v5420_v26 = vsub.f32 1.0, %v5419_v37 }
0x47f4   :  { %v5421_v20 = vmul.f32 %v6519_v53, %v5420_v26 }
0x47f6   :  { %v5422_v38 = vadd.f32 %v6519_v53, %v5421_v20 }
0x47f8   :  { %v5426_v24 = vsel %vm5425_vm11, %v6519_v53, %v5422_v38 }
0x47f9   :  { %v5431_v62 = vsel %vm5428_vm2, %v5430_v57, %v5426_v24 }
0x47fa   :  { %v5449_v45 = vmul.f32 %v5431_v62, %v9105_v50 }
0x4839   :  { %v5452_v52 = vpop.permute.xlu2 %5451 }
0x483a   :  { %v5454_v25 = vmul.f32 %v5452_v52, %v5431_v62 }
0x483c   :  { %5456 = vrot.lane.b32.xlu2 %v5454_v25, %s7076_s27 }
0x4896   :  { %v5457_v19 = vpop.permute.xlu2 %5456 }
0x4897   :  { %v5459_v60 = vadd.f32 %v5457_v19, %v5449_v45 }
0x4899   :  { %6520 = vtanh.f32 %v5459_v60 }
0x489a   :  { %6522 = vpow2.f32 %v6036_v12 }
0x489f   :  { %v6521_v21 = vpop.eup %6520 }
0x48a0   :  { %5462 = vrot.lane.b32.xlu2 %v6521_v21, %s7076_s27  ;;  %v6523_v36 = vpop.eup %6522 }
0x48a1   :  { %v5417_v6 = vadd.f32 1.0, %v6523_v36 }
0x48a3   :  { %6524 = vrcp.f32 %v5417_v6  ;;  %v5444_v4 = vand.u32 2147483648, %v5417_v6  ;;  %vm5438_vm8 = vweird.f32 %v5417_v6  ;;  %v5442_v50 = vand.u32 2147483647, %v5417_v6 }
0x48a5   :  { %v5445_v5 = vor.u32 1.1754944e-38, %v5444_v4  ;;  %vm5443_vm13 = vcmp.eq.f32.partialorder %v5442_v50, 8.507059e+37  ;;  %v5624_v4 = vpop.f32.mrf.mxu2 }
0x48a9   :  { %v6525_v22 = vpop.eup %6524 }
0x48aa   :  { %v5434_v13 = vmul.f32 %v6525_v22, %v5417_v6  ;;  %vm5439_vm1 = vweird.f32 %v6525_v22  ;;  %v5644_v6 = vpop.f32.mrf.mxu3 }
0x48ab   :  { %vm5440_vm12 = vmor %vm5438_vm8, %vm5439_vm1 }
0x48ac   :  { %v5435_v55 = vsub.f32 1.0, %v5434_v13 }
0x48ae   :  { %v5436_v3 = vmul.f32 %v6525_v22, %v5435_v55 }
0x48b0   :  { %v5437_v49 = vadd.f32 %v6525_v22, %v5436_v3 }
0x48b2   :  { %v5441_v16 = vsel %vm5440_vm12, %v6525_v22, %v5437_v49 }
0x48b3   :  { %v5446_v33 = vsel %vm5443_vm13, %v5445_v5, %v5441_v16 }
0x48fa   :  { %v5463_v35 = vpop.permute.xlu2 %5462 }
0x48fb   :  { %v5465_v30 = vmul.f32 %v5463_v35, %v5446_v33 }
0x48fd   :  { %6039 = vmatmul.msk.f32.vlgmr.msra.gmra.mxu0 %vm438_vm9, %v5465_v30  ;;  %6040 = vmatmul.msk.f32.vlgmr.msra.gmra.mxu1 %vm438_vm9, %v5465_v30 }
0x497a   :  { %v5546_v56 = vpop.f32.mrf.mxu1  ;;  %v5526_v58 = vpop.f32.mrf.mxu0 }
0x497b   :  { %v5547_v34 = vadd.f32 %v5546_v56, %v5503_v29  ;;  %v5527_v2 = vadd.f32 %v5526_v58, %v5483_v10 }
0x497d   :  { %v5550_v63 = vadd.f32 %v5547_v34, %v9470_v61  ;;  %v5549_v8 = vadd.f32 %v5527_v2, %v9471_v18 }
0x497f   :  { %6526 = vtanh.f32 %v5550_v63  ;;  %v6041_v23 = vmul.f32 -1.442695, %v5549_v8  ;;  %v6042_v38 = vmul.f32 -1.442695, %v5550_v63 }
0x4981   :  { %6528 = vpow2.f32 %v6041_v23 }
0x4985   :  { %v6527_v44 = vpop.eup %6526 }
0x4986   :  { %5592 = vrot.lane.b32.xlu2 %v6527_v44, %s7076_s27 }
0x4987   :  { %v6529_v0 = vpop.eup %6528 }
0x4988   :  { %v5557_v59 = vadd.f32 1.0, %v6529_v0 }
0x498a   :  { %6530 = vrcp.f32 %v5557_v59  ;;  %v5570_v61 = vand.u32 2147483648, %v5557_v59  ;;  %vm5564_vm15 = vweird.f32 %v5557_v59  ;;  %v5568_v47 = vand.u32 2147483647, %v5557_v59 }
0x498c   :  { %v5571_v28 = vor.u32 1.1754944e-38, %v5570_v61  ;;  %vm5569_vm7 = vcmp.eq.f32.partialorder %v5568_v47, 8.507059e+37 }
0x4990   :  { %v6531_v15 = vpop.eup %6530 }
0x4991   :  { %v5560_v1 = vmul.f32 %v6531_v15, %v5557_v59  ;;  %vm5565_vm14 = vweird.f32 %v6531_v15 }
0x4992   :  { %vm5566_vm5 = vmor %vm5564_vm15, %vm5565_vm14 }
0x4993   :  { %v5561_v54 = vsub.f32 1.0, %v5560_v1 }
0x4995   :  { %v5562_v39 = vmul.f32 %v6531_v15, %v5561_v54 }
0x4997   :  { %v5563_v7 = vadd.f32 %v6531_v15, %v5562_v39 }
0x4999   :  { %v5567_v48 = vsel %vm5566_vm5, %v6531_v15, %v5563_v7 }
0x499a   :  { %v5572_v18 = vsel %vm5569_vm7, %v5571_v28, %v5567_v48 }
0x499b   :  { %v5590_v53 = vmul.f32 %v5572_v18, %v9130_v51 }
0x49e0   :  { %v5593_v41 = vpop.permute.xlu2 %5592 }
0x49e1   :  { %v5595_v32 = vmul.f32 %v5593_v41, %v5572_v18 }
0x49e3   :  { %5597 = vrot.lane.b32.xlu2 %v5595_v32, %s7076_s27 }
0x4a3d   :  { %v5598_v37 = vpop.permute.xlu2 %5597 }
0x4a3e   :  { %v5600_v26 = vadd.f32 %v5598_v37, %v5590_v53 }
0x4a40   :  { %6532 = vtanh.f32 %v5600_v26 }
0x4a41   :  { %6534 = vpow2.f32 %v6042_v38 }
0x4a46   :  { %v6533_v20 = vpop.eup %6532 }
0x4a47   :  { %5603 = vrot.lane.b32.xlu1 %v6533_v20, %s7076_s27  ;;  %v6535_v31 = vpop.eup %6534 }
0x4a48   :  { %v5558_v17 = vadd.f32 1.0, %v6535_v31 }
0x4a4a   :  { %6536 = vrcp.f32 %v5558_v17  ;;  %v5585_v45 = vand.u32 2147483648, %v5558_v17  ;;  %vm5579_vm4 = vweird.f32 %v5558_v17  ;;  %v5583_v51 = vand.u32 2147483647, %v5558_v17 }
0x4a4c   :  { %v5586_v60 = vor.u32 1.1754944e-38, %v5585_v45  ;;  %vm5584_vm2 = vcmp.eq.f32.partialorder %v5583_v51, 8.507059e+37 }
0x4a50   :  { %v6537_v24 = vpop.eup %6536 }
0x4a51   :  { %v5575_v57 = vmul.f32 %v6537_v24, %v5558_v17  ;;  %vm5580_vm6 = vweird.f32 %v6537_v24 }
0x4a52   :  { %vm5581_vm11 = vmor %vm5579_vm4, %vm5580_vm6 }
0x4a53   :  { %v5576_v52 = vsub.f32 1.0, %v5575_v57 }
0x4a55   :  { %v5577_v62 = vmul.f32 %v6537_v24, %v5576_v52 }
0x4a57   :  { %v5578_v25 = vadd.f32 %v6537_v24, %v5577_v62 }
0x4a59   :  { %v5582_v19 = vsel %vm5581_vm11, %v6537_v24, %v5578_v25 }
0x4a5a   :  { %v5587_v21 = vsel %vm5584_vm2, %v5586_v60, %v5582_v19 }
0x4ab9   :  { %v5604_v12 = vpop.permute.xlu1 %5603 }
0x4aba   :  { %v5606_v36 = vmul.f32 %v5604_v12, %v5587_v21 }
0x4abc   :  { %6045 = vmatmul.msk.f32.vlgmr.msrb.gmra.mxu0 %vm438_vm9, %v5606_v36  ;;  %6046 = vmatmul.msk.f32.vlgmr.msrb.gmra.mxu1 %vm438_vm9, %v5606_v36 }
0x4b39   :  { %v5687_v22 = vpop.f32.mrf.mxu1  ;;  %v5667_v49 = vpop.f32.mrf.mxu0 }
0x4b3a   :  { %v5688_v13 = vadd.f32 %v5687_v22, %v5644_v6  ;;  %v5668_v50 = vadd.f32 %v5667_v49, %v5624_v4 }
0x4b3c   :  { %v5691_v55 = vadd.f32 %v5688_v13, %v9519_v46  ;;  %v5690_v16 = vadd.f32 %v5668_v50, %v8591_v11 }
0x4b3e   :  { %6538 = vtanh.f32 %v5691_v55  ;;  %v6047_v5 = vmul.f32 -1.442695, %v5690_v16  ;;  %v6048_v1 = vmul.f32 -1.442695, %v5691_v55 }
0x4b40   :  { %6540 = vpow2.f32 %v6047_v5 }
0x4b44   :  { %v6539_v3 = vpop.eup %6538 }
0x4b45   :  { %5733 = vrot.lane.b32.xlu0 %v6539_v3, %s7076_s27 }
0x4b46   :  { %v6541_v33 = vpop.eup %6540 }
0x4b47   :  { %v5698_v35 = vadd.f32 1.0, %v6541_v33 }
0x4b49   :  { %6542 = vrcp.f32 %v5698_v35  ;;  %v5711_v46 = vand.u32 2147483648, %v5698_v35  ;;  %vm5705_vm8 = vweird.f32 %v5698_v35  ;;  %v5709_v44 = vand.u32 2147483647, %v5698_v35 }
0x4b4b   :  { %v5712_v10 = vor.u32 1.1754944e-38, %v5711_v46  ;;  %vm5710_vm13 = vcmp.eq.f32.partialorder %v5709_v44, 8.507059e+37 }
0x4b4f   :  { %v6543_v30 = vpop.eup %6542 }
0x4b50   :  { %v5701_v29 = vmul.f32 %v6543_v30, %v5698_v35  ;;  %vm5706_vm1 = vweird.f32 %v6543_v30 }
0x4b51   :  { %vm5707_vm12 = vmor %vm5705_vm8, %vm5706_vm1 }
0x4b52   :  { %v5702_v56 = vsub.f32 1.0, %v5701_v29 }
0x4b54   :  { %v5703_v34 = vmul.f32 %v6543_v30, %v5702_v56 }
0x4b56   :  { %v5704_v63 = vadd.f32 %v6543_v30, %v5703_v34 }
0x4b58   :  { %v5708_v58 = vsel %vm5707_vm12, %v6543_v30, %v5704_v63 }
0x4b59   :  { %v5713_v11 = vsel %vm5710_vm13, %v5712_v10, %v5708_v58 }
0x4b5a   :  { %v5731_v23 = vmul.f32 %v5713_v11, %v9170_v43 }
0x4bb7   :  { %v5734_v2 = vpop.permute.xlu0 %5733 }
0x4bb8   :  { %v5736_v8 = vmul.f32 %v5734_v2, %v5713_v11 }
0x4bba   :  { %5738 = vrot.lane.b32.xlu2 %v5736_v8, %s7076_s27 }
0x4c14   :  { %v5739_v0 = vpop.permute.xlu2 %5738 }
0x4c15   :  { %v5741_v59 = vadd.f32 %v5739_v0, %v5731_v23 }
0x4c17   :  { %6544 = vtanh.f32 %v5741_v59 }
0x4c18   :  { %6546 = vpow2.f32 %v6048_v1 }
0x4c1d   :  { %v6545_v15 = vpop.eup %6544 }
0x4c1e   :  { %5744 = vrot.lane.b32.xlu2 %v6545_v15, %s7076_s27  ;;  %v6547_v54 = vpop.eup %6546 }
0x4c1f   :  { %v5699_v39 = vadd.f32 1.0, %v6547_v54 }
0x4c21   :  { %6548 = vrcp.f32 %v5699_v39  ;;  %v5726_v41 = vand.u32 2147483648, %v5699_v39  ;;  %vm5720_vm15 = vweird.f32 %v5699_v39  ;;  %v5724_v43 = vand.u32 2147483647, %v5699_v39 }
0x4c23   :  { %v5727_v32 = vor.u32 1.1754944e-38, %v5726_v41  ;;  %vm5725_vm7 = vcmp.eq.f32.partialorder %v5724_v43, 8.507059e+37 }
0x4c27   :  { %v6549_v7 = vpop.eup %6548 }
0x4c28   :  { %v5716_v61 = vmul.f32 %v6549_v7, %v5699_v39  ;;  %vm5721_vm14 = vweird.f32 %v6549_v7 }
0x4c29   :  { %vm5722_vm5 = vmor %vm5720_vm15, %vm5721_vm14 }
0x4c2a   :  { %v5717_v47 = vsub.f32 1.0, %v5716_v61 }
0x4c2c   :  { %v5718_v48 = vmul.f32 %v6549_v7, %v5717_v47 }
0x4c2e   :  { %v5719_v28 = vadd.f32 %v6549_v7, %v5718_v48 }
0x4c30   :  { %v5723_v18 = vsel %vm5722_vm5, %v6549_v7, %v5719_v28 }
0x4c31   :  { %v5728_v53 = vsel %vm5725_vm7, %v5727_v32, %v5723_v18 }
0x4c78   :  { %v5745_v37 = vpop.permute.xlu2 %5744 }
0x4c79   :  { %v5747_v26 = vmul.f32 %v5745_v37, %v5728_v53 }
0x4c7b   :  { %6049 = vmatmul.msk.f32.vlgmr.msra.gmra.mxu2 %vm438_vm9, %v5747_v26 }
0x4cfe   :  { %v5768_v20 = vpop.f32.mrf.mxu2 }
0x4cff   :  { %v5769_v38 = vadd.f32 %v9189_v14, %v5768_v20 }
0x4d01   :  { %v5771_v31 = vsel %vm540_vm10, %v5769_v38, 0.0 }
0x4d02   :  { %5772 = vadd.xlane.f32.xlu2 %v5771_v31 }
0x4d75   :  { %v5773_v17 = vpop.xlane.xlu2 %5772 }
0x4d76   :  { %v5774_v24 = vmul.f32 %v5773_v17, %v9485_v42 }
0x4d78   :  { %v5775_v57 = vsub.f32 %v5769_v38, %v5774_v24 }
0x4d7a   :  { %v5776_v52 = vmul.f32 %v5775_v57, %v5775_v57 }
0x4d7c   :  { %v5777_v62 = vsel %vm540_vm10, %v5776_v52, 0.0 }
0x4d7d   :  { %5778 = vadd.xlane.f32.xlu0 %v5777_v62 }
0x4df0   :  { %v5779_v25 = vpop.xlane.xlu0 %5778 }
0x4df1   :  { %v5780_v45 = vmul.f32 %v5779_v25, %v9485_v42 }
0x4df3   :  { %v5781_v51 = vadd.f32 1e-05, %v5780_v45 }
0x4df5   :  { %6550 = vrsqrt.f32 %v5781_v51  ;;  %vm5788_vm6 = vweird.f32 %v5781_v51 }
0x4dfb   :  { %v6551_v19 = vpop.eup %6550 }
0x4dfc   :  { %v5783_v60 = vmul.f32 %v6551_v19, %v5781_v51  ;;  %vm5789_vm9 = vweird.f32 %v6551_v19 }
0x4dfd   :  { %vm5790_vm4 = vmor %vm5788_vm6, %vm5789_vm9 }
0x4dfe   :  { %v5784_v14 = vmul.f32 %v6551_v19, %v5783_v60 }
0x4e00   :  { %v5785_v21 = vmul.f32 0.5, %v5784_v14 }
0x4e02   :  { %v5786_v12 = vsub.f32 1.5, %v5785_v21 }
0x4e04   :  { %v5787_v36 = vmul.f32 %v6551_v19, %v5786_v12 }
0x4e06   :  { %v5791_v6 = vsel %vm5790_vm4, %v6551_v19, %v5787_v36 }
0x4e07   :  { %v5792_v22 = vmul.f32 %v5791_v6, %v5775_v57 }
0x4e09   :  { %v5793_v13 = vmul.f32 %v9197_v40, %v5792_v22 }
0x4e0b   :  { %v5794_v55 = vadd.f32 %v9201_v27, %v5793_v13 }
0x4e0d   :  { %v5795_v3 = vmax.f32 %v5794_v55, 0.0 }
0x4e0f   :  { %6050 = vmatmul.msk.f32.vlgmr.msrb.gmra.mxu3 %vm4233_vm0, %v5795_v3 }
0x4e92   :  { %v5816_v42 = vpop.f32.mrf.mxu3 }
0x4e93   :  { %v5817_v49 = vadd.f32 %v9224_v9, %v5816_v42 }
0x4e95   :  { %6051 = vst.msk [vmem:[%s7236_s5 + $0x6] sm:$0x3] %vm4257_vm3, %v5817_v49 }
0x4e96   :  { %5825 = vsyncpa [#allocation5], 1 }
0x4e97   :  { %5826 = vsyncpa [#allocation7], 1 }
0x4e98   :  { %5827 = vsyncpa [#allocation10], 1 }
0x4e99   :  { %5828 = vsyncpa [#allocation13], 1 }
0x4e9a   :  { %5829 = vsyncpa [#allocation16], 1 }
0x4e9b   :  { %5830 = vsyncpa [#allocation19], 1 }
0x4e9c   :  { %5831 = vsyncpa [#allocation22], 1 }
0x4e9d   :  { %5832 = vsyncpa [#allocation25], 1 }

</bundles_post_ra>
